<compile_context>
chip_gen: v7x
topology: tpu7x:2x2x1
jax: 0.10.0
libtpu: 0.0.40
codegen_flags: <defaults>
</compile_context>

<pallas_src>
import functools

import jax
import jax.numpy as jnp
import numpy as np
from jax import lax
from jax.experimental import pallas as pl
from jax.experimental.pallas import tpu as pltpu


# ------------------------- in-kernel building blocks -------------------------

def _depthwise_taps(xc, w_ref, w_base, k, stride, ho, wo):
    """Depthwise kxk conv of one channel, stride `stride`, output (n, ho, wo).

    xc:     (n, Hin, Win) f32 value (already ReLU'd / padded as needed)
    w_ref:  flat SMEM ref; tap (a, b) weight at w_ref[w_base + a*k + b]

    stride > 1: the input is decimated once into stride*stride phases (one
    strided slice per phase); every tap is then an *unstrided* slice of its
    phase at output extent -> no wasted stride-1 MACs, no per-tap strided
    slices, no final decimation relayout.
    """
    n = xc.shape[0]
    if stride == 1:
        phases = {(0, 0): xc}
    else:
        phases = {}
        for pa in range(min(stride, k)):
            for pb in range(min(stride, k)):
                nr = ho + (k - 1 - pa) // stride      # rows needed in phase
                nc = wo + (k - 1 - pb) // stride
                phases[(pa, pb)] = lax.slice(
                    xc, (0, pa, pb),
                    (n, pa + (nr - 1) * stride + 1, pb + (nc - 1) * stride + 1),
                    (1, stride, stride))
    acc = None
    for a in range(k):
        for b in range(k):
            ph = phases[(a % stride, b % stride)]
            oa, ob = a // stride, b // stride
            tap = lax.slice(ph, (0, oa, ob), (n, oa + ho, ob + wo))
            contrib = tap * w_ref[w_base + a * k + b]     # SMEM scalar splat
            acc = contrib if acc is None else acc + contrib
    return acc


# --------------------------------- kernel ------------------------------------

def _sepconv_kernel(k, stride, padding, cin, cout, h1, w1, eps,
                    x_ref, wdw1_ref, wpw1_ref, g1_ref, b1_ref,
                    wdw2_ref, wpw2_ref, g2_ref, b2_ref, out_ref):
    p = padding
    hq, wq = h1 + 2 * p, w1 + 2 * p       # stage-1 buffer == conv3's padded input
    h2, w2 = hq - k + 1, wq - k + 1       # final spatial size
    n = x_ref.shape[0]
    f32 = jnp.float32

    # 0/1 mask of the valid (h1, w1) interior of the enlarged stage-1 window;
    # the p-wide zero border doubles as conv3's implicit zero padding.
    if p > 0:
        row = lax.broadcasted_iota(jnp.int32, (hq, wq), 0)
        col = lax.broadcasted_iota(jnp.int32, (hq, wq), 1)
        mask1 = ((row >= p) & (row < p + h1) &
                 (col >= p) & (col < p + w1)).astype(f32)
    else:
        mask1 = None

    inv1 = 1.0 / float(n * h1 * w1)
    inv2 = 1.0 / float(n * h2 * w2)

    # ---- stage 1: relu -> depthwise kxk (stride s) -> 1x1, streamed ---------
    # Each input channel is relu'd, depthwise-convolved and immediately
    # scattered into the cin pointwise accumulators; nothing else stays live.
    u_acc = [None] * cin
    for c in range(cin):
        xc = jnp.maximum(x_ref[:, c].astype(f32), 0.0)           # relu1
        d = _depthwise_taps(xc, wdw1_ref, c * k * k, k, stride, hq, wq)
        if mask1 is not None:
            d = d * mask1                                        # zero border
        for j in range(cin):
            contrib = d * wpw1_ref[j * cin + c]                  # 1x1 splat MAC
            u_acc[j] = contrib if u_acc[j] is None else u_acc[j] + contrib

    # ---- BN1 -> relu -> depthwise kxk (stride 1) -> 1x1, streamed -----------
    z_acc = [None] * cout
    for j in range(cin):
        u = u_acc[j]
        u_acc[j] = None                                          # end live range
        # two-pass training-mode BN stats over the valid (h1, w1) region
        mean = jnp.sum(u, axis=(0, 1, 2), keepdims=True) * inv1
        cen = u - mean
        if mask1 is not None:
            cen = cen * mask1
        var = jnp.sum(cen * cen, axis=(0, 1, 2), keepdims=True) * inv1
        scale = g1_ref[j] * lax.rsqrt(var + eps)
        shift = b1_ref[j] - mean * scale
        st1 = jnp.maximum(u * scale + shift, 0.0)                # relu2
        if mask1 is not None:
            st1 = st1 * mask1                                    # border stays 0
        d2 = _depthwise_taps(st1, wdw2_ref, j * k * k, k, 1, h2, w2)
        d2 = d2.reshape(n, h2 * w2)                              # lane-dense repack
        for o in range(cout):
            contrib = d2 * wpw2_ref[o * cin + j]                 # 1x1 splat MAC
            z_acc[o] = contrib if z_acc[o] is None else z_acc[o] + contrib

    # ---- BN2 + direct lane-dense per-channel store ---------------------------
    for o in range(cout):
        z = z_acc[o]
        z_acc[o] = None
        mean = jnp.sum(z, axis=(0, 1), keepdims=True) * inv2
        cen = z - mean
        var = jnp.sum(cen * cen, axis=(0, 1), keepdims=True) * inv2
        scale = g2_ref[o] * lax.rsqrt(var + eps)
        shift = b2_ref[o] - mean * scale
        out_ref[:, o, :] = (z * scale + shift).astype(out_ref.dtype)


# --------------------------------- wrapper -----------------------------------

def separated_conv(x, params, *, kernel_size, stride, padding):
    """Pallas-TPU forward of SeparatedConv (training-mode BatchNorm)."""
    wdw1, wpw1 = params["wdw1"], params["wpw1"]    # (Cin,1,k,k), (Cin,Cin,1,1)
    wdw2, wpw2 = params["wdw2"], params["wpw2"]    # (Cin,1,k,k), (Cout,Cin,1,1)
    g1, b1, g2, b2 = params["g1"], params["b1"], params["g2"], params["b2"]

    n, cin, h, w = x.shape
    cout = wpw2.shape[0]
    k, s, p = kernel_size, stride, padding

    h1 = (h + 2 * p - k) // s + 1                  # conv1 output size
    w1 = (w + 2 * p - k) // s + 1
    h2 = h1 + 2 * p - k + 1                        # conv3 output size
    w2 = w1 + 2 * p - k + 1

    # pad by p (conv1 padding) + p*s margin so the kernel can evaluate conv1
    # directly on the enlarged (h1+2p, w1+2p) window that conv3 consumes.
    m = p * (1 + s)
    xp = jnp.pad(x, ((0, 0), (0, 0), (m, m), (m, m)))

    # flat f32 parameter vectors -> SMEM scalars inside the kernel
    f32 = jnp.float32
    wdw1_f = wdw1.reshape(-1).astype(f32)          # index: c*k*k + a*k + b
    wdw2_f = wdw2.reshape(-1).astype(f32)
    wpw1_f = wpw1.reshape(-1).astype(f32)          # index: out*cin + in
    wpw2_f = wpw2.reshape(-1).astype(f32)

    smem = pl.BlockSpec(memory_space=pltpu.MemorySpace.SMEM)
    vmem = pl.BlockSpec(memory_space=pltpu.MemorySpace.VMEM)

    kernel = functools.partial(_sepconv_kernel, k, s, p, cin, cout, h1, w1, 1e-5)
    out = pl.pallas_call(
        kernel,
        out_shape=jax.ShapeDtypeStruct((n, cout, h2 * w2), x.dtype),
        in_specs=[vmem] + [smem] * 8,
        out_specs=vmem,
    )(xp, wdw1_f, wpw1_f, g1.astype(f32), b1.astype(f32),
      wdw2_f, wpw2_f, g2.astype(f32), b2.astype(f32))
    return out.reshape(n, cout, h2, w2)            # wrapper-side layout plumbing


# ------------------------------ pure-JAX reference ---------------------------

def _reference(x, params, *, kernel_size, stride, padding):
    cin = x.shape[1]
    dn = ("NCHW", "OIHW", "NCHW")
    eps = 1e-5

    def bn(v, g, b):
        mean = jnp.mean(v, axis=(0, 2, 3), keepdims=True)
        var = jnp.var(v, axis=(0, 2, 3), keepdims=True)
        return (v - mean) / jnp.sqrt(var + eps) * g.reshape(1, -1, 1, 1) \
            + b.reshape(1, -1, 1, 1)

    y = jax.nn.relu(x)
    y = lax.conv_general_dilated(y, params["wdw1"], (stride, stride),
                                 [(padding, padding)] * 2, dimension_numbers=dn,
                                 feature_group_count=cin)
    y = lax.conv_general_dilated(y, params["wpw1"], (1, 1), [(0, 0)] * 2,
                                 dimension_numbers=dn)
    y = bn(y, params["g1"], params["b1"])
    y = jax.nn.relu(y)
    y = lax.conv_general_dilated(y, params["wdw2"], (1, 1),
                                 [(padding, padding)] * 2, dimension_numbers=dn,
                                 feature_group_count=cin)
    y = lax.conv_general_dilated(y, params["wpw2"], (1, 1), [(0, 0)] * 2,
                                 dimension_numbers=dn)
    y = bn(y, params["g2"], params["b2"])
    return y


if __name__ == "__main__":
    N, CIN, COUT, H, W = 2, 4, 8, 16, 16
    K, S, P = 3, 1, 1   # desc.kernel_size, desc.stride, desc.padding

    key = jax.random.PRNGKey(0)
    kx, k1, k2, k3, k4 = jax.random.split(key, 5)
    x = jax.random.normal(kx, (N, CIN, H, W), jnp.float32)
    params = dict(
        wdw1=0.1 * jax.random.normal(k1, (CIN, 1, K, K), jnp.float32),
        wpw1=0.1 * jax.random.normal(k2, (CIN, CIN, 1, 1), jnp.float32),
        g1=jnp.ones((CIN,), jnp.float32), b1=jnp.zeros((CIN,), jnp.float32),
        wdw2=0.1 * jax.random.normal(k3, (CIN, 1, K, K), jnp.float32),
        wpw2=0.1 * jax.random.normal(k4, (COUT, CIN, 1, 1), jnp.float32),
        g2=jnp.ones((COUT,), jnp.float32), b2=jnp.zeros((COUT,), jnp.float32),
    )

    out = separated_conv(x, params, kernel_size=K, stride=S, padding=P)
    out = jax.block_until_ready(out)

    ref = _reference(x, params, kernel_size=K, stride=S, padding=P)
    assert out.shape == ref.shape, (out.shape, ref.shape)
    np.testing.assert_allclose(np.asarray(out), np.asarray(ref),
                               rtol=2e-4, atol=2e-4)
    print("KERNEL_OK")
</pallas_src>

<mosaic_0001>
module attributes {stable_mosaic.version = 11 : i64} {
  func.func @_sepconv_kernel(%arg0: memref<2x4x20x20xf32, #tpu.memory_space<vmem>>, %arg1: memref<36xf32, #tpu.memory_space<smem>>, %arg2: memref<16xf32, #tpu.memory_space<smem>>, %arg3: memref<4xf32, #tpu.memory_space<smem>>, %arg4: memref<4xf32, #tpu.memory_space<smem>>, %arg5: memref<36xf32, #tpu.memory_space<smem>>, %arg6: memref<32xf32, #tpu.memory_space<smem>>, %arg7: memref<8xf32, #tpu.memory_space<smem>>, %arg8: memref<8xf32, #tpu.memory_space<smem>>, %arg9: memref<2x8x256xf32, #tpu.memory_space<vmem>>) attributes {dimension_semantics = [], scalar_prefetch = 0 : i64, scratch_operands = 0 : i64, tpu.core_type = #tpu.core_type<tc>} {
    %0 = tpu.iota {dimensions = array<i32: 0>} : vector<18x18xi32>
    %1 = tpu.iota {dimensions = array<i32: 1>} : vector<18x18xi32>
    %c1_i32 = arith.constant 1 : i32
    %2 = vector.broadcast %c1_i32 : i32 to vector<18x18xi32>
    %3 = arith.cmpi sge, %0, %2 : vector<18x18xi32>
    %c17_i32 = arith.constant 17 : i32
    %4 = vector.broadcast %c17_i32 : i32 to vector<18x18xi32>
    %5 = arith.cmpi slt, %0, %4 : vector<18x18xi32>
    %6 = arith.andi %3, %5 : vector<18x18xi1>
    %c1_i32_0 = arith.constant 1 : i32
    %7 = vector.broadcast %c1_i32_0 : i32 to vector<18x18xi32>
    %8 = arith.cmpi sge, %1, %7 : vector<18x18xi32>
    %9 = arith.andi %6, %8 : vector<18x18xi1>
    %c17_i32_1 = arith.constant 17 : i32
    %10 = vector.broadcast %c17_i32_1 : i32 to vector<18x18xi32>
    %11 = arith.cmpi slt, %1, %10 : vector<18x18xi32>
    %12 = arith.andi %9, %11 : vector<18x18xi1>
    %13 = arith.extui %12 : vector<18x18xi1> to vector<18x18xi32>
    %14 = arith.sitofp %13 : vector<18x18xi32> to vector<18x18xf32>
    %c0 = arith.constant 0 : index
    %c0_2 = arith.constant 0 : index
    %c0_3 = arith.constant 0 : index
    %c0_4 = arith.constant 0 : index
    %15 = vector.load %arg0[%c0, %c0_2, %c0_3, %c0_4] : memref<2x4x20x20xf32, #tpu.memory_space<vmem>>, vector<2x1x20x20xf32>
    %16 = vector.shape_cast %15 : vector<2x1x20x20xf32> to vector<2x20x20xf32>
    %cst = arith.constant 0.000000e+00 : f32
    %17 = vector.broadcast %cst : f32 to vector<2x20x20xf32>
    %18 = arith.maximumf %16, %17 : vector<2x20x20xf32>
    %19 = vector.extract_strided_slice %18 {offsets = [0, 0, 0], sizes = [2, 18, 18], strides = [1, 1, 1]} : vector<2x20x20xf32> to vector<2x18x18xf32>
    %c0_5 = arith.constant 0 : index
    %20 = memref.load %arg1[%c0_5] : memref<36xf32, #tpu.memory_space<smem>>
    %21 = vector.broadcast %20 : f32 to vector<2x18x18xf32>
    %22 = arith.mulf %19, %21 : vector<2x18x18xf32>
    %23 = vector.extract_strided_slice %18 {offsets = [0, 0, 1], sizes = [2, 18, 18], strides = [1, 1, 1]} : vector<2x20x20xf32> to vector<2x18x18xf32>
    %c1 = arith.constant 1 : index
    %24 = memref.load %arg1[%c1] : memref<36xf32, #tpu.memory_space<smem>>
    %25 = vector.broadcast %24 : f32 to vector<2x18x18xf32>
    %26 = arith.mulf %23, %25 : vector<2x18x18xf32>
    %27 = arith.addf %22, %26 : vector<2x18x18xf32>
    %28 = vector.extract_strided_slice %18 {offsets = [0, 0, 2], sizes = [2, 18, 18], strides = [1, 1, 1]} : vector<2x20x20xf32> to vector<2x18x18xf32>
    %c2 = arith.constant 2 : index
    %29 = memref.load %arg1[%c2] : memref<36xf32, #tpu.memory_space<smem>>
    %30 = vector.broadcast %29 : f32 to vector<2x18x18xf32>
    %31 = arith.mulf %28, %30 : vector<2x18x18xf32>
    %32 = arith.addf %27, %31 : vector<2x18x18xf32>
    %33 = vector.extract_strided_slice %18 {offsets = [0, 1, 0], sizes = [2, 18, 18], strides = [1, 1, 1]} : vector<2x20x20xf32> to vector<2x18x18xf32>
    %c3 = arith.constant 3 : index
    %34 = memref.load %arg1[%c3] : memref<36xf32, #tpu.memory_space<smem>>
    %35 = vector.broadcast %34 : f32 to vector<2x18x18xf32>
    %36 = arith.mulf %33, %35 : vector<2x18x18xf32>
    %37 = arith.addf %32, %36 : vector<2x18x18xf32>
    %38 = vector.extract_strided_slice %18 {offsets = [0, 1, 1], sizes = [2, 18, 18], strides = [1, 1, 1]} : vector<2x20x20xf32> to vector<2x18x18xf32>
    %c4 = arith.constant 4 : index
    %39 = memref.load %arg1[%c4] : memref<36xf32, #tpu.memory_space<smem>>
    %40 = vector.broadcast %39 : f32 to vector<2x18x18xf32>
    %41 = arith.mulf %38, %40 : vector<2x18x18xf32>
    %42 = arith.addf %37, %41 : vector<2x18x18xf32>
    %43 = vector.extract_strided_slice %18 {offsets = [0, 1, 2], sizes = [2, 18, 18], strides = [1, 1, 1]} : vector<2x20x20xf32> to vector<2x18x18xf32>
    %c5 = arith.constant 5 : index
    %44 = memref.load %arg1[%c5] : memref<36xf32, #tpu.memory_space<smem>>
    %45 = vector.broadcast %44 : f32 to vector<2x18x18xf32>
    %46 = arith.mulf %43, %45 : vector<2x18x18xf32>
    %47 = arith.addf %42, %46 : vector<2x18x18xf32>
    %48 = vector.extract_strided_slice %18 {offsets = [0, 2, 0], sizes = [2, 18, 18], strides = [1, 1, 1]} : vector<2x20x20xf32> to vector<2x18x18xf32>
    %c6 = arith.constant 6 : index
    %49 = memref.load %arg1[%c6] : memref<36xf32, #tpu.memory_space<smem>>
    %50 = vector.broadcast %49 : f32 to vector<2x18x18xf32>
    %51 = arith.mulf %48, %50 : vector<2x18x18xf32>
    %52 = arith.addf %47, %51 : vector<2x18x18xf32>
    %53 = vector.extract_strided_slice %18 {offsets = [0, 2, 1], sizes = [2, 18, 18], strides = [1, 1, 1]} : vector<2x20x20xf32> to vector<2x18x18xf32>
    %c7 = arith.constant 7 : index
    %54 = memref.load %arg1[%c7] : memref<36xf32, #tpu.memory_space<smem>>
    %55 = vector.broadcast %54 : f32 to vector<2x18x18xf32>
    %56 = arith.mulf %53, %55 : vector<2x18x18xf32>
    %57 = arith.addf %52, %56 : vector<2x18x18xf32>
    %58 = vector.extract_strided_slice %18 {offsets = [0, 2, 2], sizes = [2, 18, 18], strides = [1, 1, 1]} : vector<2x20x20xf32> to vector<2x18x18xf32>
    %c8 = arith.constant 8 : index
    %59 = memref.load %arg1[%c8] : memref<36xf32, #tpu.memory_space<smem>>
    %60 = vector.broadcast %59 : f32 to vector<2x18x18xf32>
    %61 = arith.mulf %58, %60 : vector<2x18x18xf32>
    %62 = arith.addf %57, %61 : vector<2x18x18xf32>
    %63 = vector.shape_cast %14 : vector<18x18xf32> to vector<1x18x18xf32>
    %64 = vector.broadcast %63 : vector<1x18x18xf32> to vector<2x18x18xf32>
    %65 = arith.mulf %62, %64 : vector<2x18x18xf32>
    %c0_6 = arith.constant 0 : index
    %66 = memref.load %arg2[%c0_6] : memref<16xf32, #tpu.memory_space<smem>>
    %67 = vector.broadcast %66 : f32 to vector<2x18x18xf32>
    %68 = arith.mulf %65, %67 : vector<2x18x18xf32>
    %c4_7 = arith.constant 4 : index
    %69 = memref.load %arg2[%c4_7] : memref<16xf32, #tpu.memory_space<smem>>
    %70 = vector.broadcast %69 : f32 to vector<2x18x18xf32>
    %71 = arith.mulf %65, %70 : vector<2x18x18xf32>
    %c8_8 = arith.constant 8 : index
    %72 = memref.load %arg2[%c8_8] : memref<16xf32, #tpu.memory_space<smem>>
    %73 = vector.broadcast %72 : f32 to vector<2x18x18xf32>
    %74 = arith.mulf %65, %73 : vector<2x18x18xf32>
    %c12 = arith.constant 12 : index
    %75 = memref.load %arg2[%c12] : memref<16xf32, #tpu.memory_space<smem>>
    %76 = vector.broadcast %75 : f32 to vector<2x18x18xf32>
    %77 = arith.mulf %65, %76 : vector<2x18x18xf32>
    %c0_9 = arith.constant 0 : index
    %c1_10 = arith.constant 1 : index
    %c0_11 = arith.constant 0 : index
    %c0_12 = arith.constant 0 : index
    %78 = vector.load %arg0[%c0_9, %c1_10, %c0_11, %c0_12] : memref<2x4x20x20xf32, #tpu.memory_space<vmem>>, vector<2x1x20x20xf32>
    %79 = vector.shape_cast %78 : vector<2x1x20x20xf32> to vector<2x20x20xf32>
    %cst_13 = arith.constant 0.000000e+00 : f32
    %80 = vector.broadcast %cst_13 : f32 to vector<2x20x20xf32>
    %81 = arith.maximumf %79, %80 : vector<2x20x20xf32>
    %82 = vector.extract_strided_slice %81 {offsets = [0, 0, 0], sizes = [2, 18, 18], strides = [1, 1, 1]} : vector<2x20x20xf32> to vector<2x18x18xf32>
    %c9 = arith.constant 9 : index
    %83 = memref.load %arg1[%c9] : memref<36xf32, #tpu.memory_space<smem>>
    %84 = vector.broadcast %83 : f32 to vector<2x18x18xf32>
    %85 = arith.mulf %82, %84 : vector<2x18x18xf32>
    %86 = vector.extract_strided_slice %81 {offsets = [0, 0, 1], sizes = [2, 18, 18], strides = [1, 1, 1]} : vector<2x20x20xf32> to vector<2x18x18xf32>
    %c10 = arith.constant 10 : index
    %87 = memref.load %arg1[%c10] : memref<36xf32, #tpu.memory_space<smem>>
    %88 = vector.broadcast %87 : f32 to vector<2x18x18xf32>
    %89 = arith.mulf %86, %88 : vector<2x18x18xf32>
    %90 = arith.addf %85, %89 : vector<2x18x18xf32>
    %91 = vector.extract_strided_slice %81 {offsets = [0, 0, 2], sizes = [2, 18, 18], strides = [1, 1, 1]} : vector<2x20x20xf32> to vector<2x18x18xf32>
    %c11 = arith.constant 11 : index
    %92 = memref.load %arg1[%c11] : memref<36xf32, #tpu.memory_space<smem>>
    %93 = vector.broadcast %92 : f32 to vector<2x18x18xf32>
    %94 = arith.mulf %91, %93 : vector<2x18x18xf32>
    %95 = arith.addf %90, %94 : vector<2x18x18xf32>
    %96 = vector.extract_strided_slice %81 {offsets = [0, 1, 0], sizes = [2, 18, 18], strides = [1, 1, 1]} : vector<2x20x20xf32> to vector<2x18x18xf32>
    %c12_14 = arith.constant 12 : index
    %97 = memref.load %arg1[%c12_14] : memref<36xf32, #tpu.memory_space<smem>>
    %98 = vector.broadcast %97 : f32 to vector<2x18x18xf32>
    %99 = arith.mulf %96, %98 : vector<2x18x18xf32>
    %100 = arith.addf %95, %99 : vector<2x18x18xf32>
    %101 = vector.extract_strided_slice %81 {offsets = [0, 1, 1], sizes = [2, 18, 18], strides = [1, 1, 1]} : vector<2x20x20xf32> to vector<2x18x18xf32>
    %c13 = arith.constant 13 : index
    %102 = memref.load %arg1[%c13] : memref<36xf32, #tpu.memory_space<smem>>
    %103 = vector.broadcast %102 : f32 to vector<2x18x18xf32>
    %104 = arith.mulf %101, %103 : vector<2x18x18xf32>
    %105 = arith.addf %100, %104 : vector<2x18x18xf32>
    %106 = vector.extract_strided_slice %81 {offsets = [0, 1, 2], sizes = [2, 18, 18], strides = [1, 1, 1]} : vector<2x20x20xf32> to vector<2x18x18xf32>
    %c14 = arith.constant 14 : index
    %107 = memref.load %arg1[%c14] : memref<36xf32, #tpu.memory_space<smem>>
    %108 = vector.broadcast %107 : f32 to vector<2x18x18xf32>
    %109 = arith.mulf %106, %108 : vector<2x18x18xf32>
    %110 = arith.addf %105, %109 : vector<2x18x18xf32>
    %111 = vector.extract_strided_slice %81 {offsets = [0, 2, 0], sizes = [2, 18, 18], strides = [1, 1, 1]} : vector<2x20x20xf32> to vector<2x18x18xf32>
    %c15 = arith.constant 15 : index
    %112 = memref.load %arg1[%c15] : memref<36xf32, #tpu.memory_space<smem>>
    %113 = vector.broadcast %112 : f32 to vector<2x18x18xf32>
    %114 = arith.mulf %111, %113 : vector<2x18x18xf32>
    %115 = arith.addf %110, %114 : vector<2x18x18xf32>
    %116 = vector.extract_strided_slice %81 {offsets = [0, 2, 1], sizes = [2, 18, 18], strides = [1, 1, 1]} : vector<2x20x20xf32> to vector<2x18x18xf32>
    %c16 = arith.constant 16 : index
    %117 = memref.load %arg1[%c16] : memref<36xf32, #tpu.memory_space<smem>>
    %118 = vector.broadcast %117 : f32 to vector<2x18x18xf32>
    %119 = arith.mulf %116, %118 : vector<2x18x18xf32>
    %120 = arith.addf %115, %119 : vector<2x18x18xf32>
    %121 = vector.extract_strided_slice %81 {offsets = [0, 2, 2], sizes = [2, 18, 18], strides = [1, 1, 1]} : vector<2x20x20xf32> to vector<2x18x18xf32>
    %c17 = arith.constant 17 : index
    %122 = memref.load %arg1[%c17] : memref<36xf32, #tpu.memory_space<smem>>
    %123 = vector.broadcast %122 : f32 to vector<2x18x18xf32>
    %124 = arith.mulf %121, %123 : vector<2x18x18xf32>
    %125 = arith.addf %120, %124 : vector<2x18x18xf32>
    %126 = vector.shape_cast %14 : vector<18x18xf32> to vector<1x18x18xf32>
    %127 = vector.broadcast %126 : vector<1x18x18xf32> to vector<2x18x18xf32>
    %128 = arith.mulf %125, %127 : vector<2x18x18xf32>
    %c1_15 = arith.constant 1 : index
    %129 = memref.load %arg2[%c1_15] : memref<16xf32, #tpu.memory_space<smem>>
    %130 = vector.broadcast %129 : f32 to vector<2x18x18xf32>
    %131 = arith.mulf %128, %130 : vector<2x18x18xf32>
    %132 = arith.addf %68, %131 : vector<2x18x18xf32>
    %c5_16 = arith.constant 5 : index
    %133 = memref.load %arg2[%c5_16] : memref<16xf32, #tpu.memory_space<smem>>
    %134 = vector.broadcast %133 : f32 to vector<2x18x18xf32>
    %135 = arith.mulf %128, %134 : vector<2x18x18xf32>
    %136 = arith.addf %71, %135 : vector<2x18x18xf32>
    %c9_17 = arith.constant 9 : index
    %137 = memref.load %arg2[%c9_17] : memref<16xf32, #tpu.memory_space<smem>>
    %138 = vector.broadcast %137 : f32 to vector<2x18x18xf32>
    %139 = arith.mulf %128, %138 : vector<2x18x18xf32>
    %140 = arith.addf %74, %139 : vector<2x18x18xf32>
    %c13_18 = arith.constant 13 : index
    %141 = memref.load %arg2[%c13_18] : memref<16xf32, #tpu.memory_space<smem>>
    %142 = vector.broadcast %141 : f32 to vector<2x18x18xf32>
    %143 = arith.mulf %128, %142 : vector<2x18x18xf32>
    %144 = arith.addf %77, %143 : vector<2x18x18xf32>
    %c0_19 = arith.constant 0 : index
    %c2_20 = arith.constant 2 : index
    %c0_21 = arith.constant 0 : index
    %c0_22 = arith.constant 0 : index
    %145 = vector.load %arg0[%c0_19, %c2_20, %c0_21, %c0_22] : memref<2x4x20x20xf32, #tpu.memory_space<vmem>>, vector<2x1x20x20xf32>
    %146 = vector.shape_cast %145 : vector<2x1x20x20xf32> to vector<2x20x20xf32>
    %cst_23 = arith.constant 0.000000e+00 : f32
    %147 = vector.broadcast %cst_23 : f32 to vector<2x20x20xf32>
    %148 = arith.maximumf %146, %147 : vector<2x20x20xf32>
    %149 = vector.extract_strided_slice %148 {offsets = [0, 0, 0], sizes = [2, 18, 18], strides = [1, 1, 1]} : vector<2x20x20xf32> to vector<2x18x18xf32>
    %c18 = arith.constant 18 : index
    %150 = memref.load %arg1[%c18] : memref<36xf32, #tpu.memory_space<smem>>
    %151 = vector.broadcast %150 : f32 to vector<2x18x18xf32>
    %152 = arith.mulf %149, %151 : vector<2x18x18xf32>
    %153 = vector.extract_strided_slice %148 {offsets = [0, 0, 1], sizes = [2, 18, 18], strides = [1, 1, 1]} : vector<2x20x20xf32> to vector<2x18x18xf32>
    %c19 = arith.constant 19 : index
    %154 = memref.load %arg1[%c19] : memref<36xf32, #tpu.memory_space<smem>>
    %155 = vector.broadcast %154 : f32 to vector<2x18x18xf32>
    %156 = arith.mulf %153, %155 : vector<2x18x18xf32>
    %157 = arith.addf %152, %156 : vector<2x18x18xf32>
    %158 = vector.extract_strided_slice %148 {offsets = [0, 0, 2], sizes = [2, 18, 18], strides = [1, 1, 1]} : vector<2x20x20xf32> to vector<2x18x18xf32>
    %c20 = arith.constant 20 : index
    %159 = memref.load %arg1[%c20] : memref<36xf32, #tpu.memory_space<smem>>
    %160 = vector.broadcast %159 : f32 to vector<2x18x18xf32>
    %161 = arith.mulf %158, %160 : vector<2x18x18xf32>
    %162 = arith.addf %157, %161 : vector<2x18x18xf32>
    %163 = vector.extract_strided_slice %148 {offsets = [0, 1, 0], sizes = [2, 18, 18], strides = [1, 1, 1]} : vector<2x20x20xf32> to vector<2x18x18xf32>
    %c21 = arith.constant 21 : index
    %164 = memref.load %arg1[%c21] : memref<36xf32, #tpu.memory_space<smem>>
    %165 = vector.broadcast %164 : f32 to vector<2x18x18xf32>
    %166 = arith.mulf %163, %165 : vector<2x18x18xf32>
    %167 = arith.addf %162, %166 : vector<2x18x18xf32>
    %168 = vector.extract_strided_slice %148 {offsets = [0, 1, 1], sizes = [2, 18, 18], strides = [1, 1, 1]} : vector<2x20x20xf32> to vector<2x18x18xf32>
    %c22 = arith.constant 22 : index
    %169 = memref.load %arg1[%c22] : memref<36xf32, #tpu.memory_space<smem>>
    %170 = vector.broadcast %169 : f32 to vector<2x18x18xf32>
    %171 = arith.mulf %168, %170 : vector<2x18x18xf32>
    %172 = arith.addf %167, %171 : vector<2x18x18xf32>
    %173 = vector.extract_strided_slice %148 {offsets = [0, 1, 2], sizes = [2, 18, 18], strides = [1, 1, 1]} : vector<2x20x20xf32> to vector<2x18x18xf32>
    %c23 = arith.constant 23 : index
    %174 = memref.load %arg1[%c23] : memref<36xf32, #tpu.memory_space<smem>>
    %175 = vector.broadcast %174 : f32 to vector<2x18x18xf32>
    %176 = arith.mulf %173, %175 : vector<2x18x18xf32>
    %177 = arith.addf %172, %176 : vector<2x18x18xf32>
    %178 = vector.extract_strided_slice %148 {offsets = [0, 2, 0], sizes = [2, 18, 18], strides = [1, 1, 1]} : vector<2x20x20xf32> to vector<2x18x18xf32>
    %c24 = arith.constant 24 : index
    %179 = memref.load %arg1[%c24] : memref<36xf32, #tpu.memory_space<smem>>
    %180 = vector.broadcast %179 : f32 to vector<2x18x18xf32>
    %181 = arith.mulf %178, %180 : vector<2x18x18xf32>
    %182 = arith.addf %177, %181 : vector<2x18x18xf32>
    %183 = vector.extract_strided_slice %148 {offsets = [0, 2, 1], sizes = [2, 18, 18], strides = [1, 1, 1]} : vector<2x20x20xf32> to vector<2x18x18xf32>
    %c25 = arith.constant 25 : index
    %184 = memref.load %arg1[%c25] : memref<36xf32, #tpu.memory_space<smem>>
    %185 = vector.broadcast %184 : f32 to vector<2x18x18xf32>
    %186 = arith.mulf %183, %185 : vector<2x18x18xf32>
    %187 = arith.addf %182, %186 : vector<2x18x18xf32>
    %188 = vector.extract_strided_slice %148 {offsets = [0, 2, 2], sizes = [2, 18, 18], strides = [1, 1, 1]} : vector<2x20x20xf32> to vector<2x18x18xf32>
    %c26 = arith.constant 26 : index
    %189 = memref.load %arg1[%c26] : memref<36xf32, #tpu.memory_space<smem>>
    %190 = vector.broadcast %189 : f32 to vector<2x18x18xf32>
    %191 = arith.mulf %188, %190 : vector<2x18x18xf32>
    %192 = arith.addf %187, %191 : vector<2x18x18xf32>
    %193 = vector.shape_cast %14 : vector<18x18xf32> to vector<1x18x18xf32>
    %194 = vector.broadcast %193 : vector<1x18x18xf32> to vector<2x18x18xf32>
    %195 = arith.mulf %192, %194 : vector<2x18x18xf32>
    %c2_24 = arith.constant 2 : index
    %196 = memref.load %arg2[%c2_24] : memref<16xf32, #tpu.memory_space<smem>>
    %197 = vector.broadcast %196 : f32 to vector<2x18x18xf32>
    %198 = arith.mulf %195, %197 : vector<2x18x18xf32>
    %199 = arith.addf %132, %198 : vector<2x18x18xf32>
    %c6_25 = arith.constant 6 : index
    %200 = memref.load %arg2[%c6_25] : memref<16xf32, #tpu.memory_space<smem>>
    %201 = vector.broadcast %200 : f32 to vector<2x18x18xf32>
    %202 = arith.mulf %195, %201 : vector<2x18x18xf32>
    %203 = arith.addf %136, %202 : vector<2x18x18xf32>
    %c10_26 = arith.constant 10 : index
    %204 = memref.load %arg2[%c10_26] : memref<16xf32, #tpu.memory_space<smem>>
    %205 = vector.broadcast %204 : f32 to vector<2x18x18xf32>
    %206 = arith.mulf %195, %205 : vector<2x18x18xf32>
    %207 = arith.addf %140, %206 : vector<2x18x18xf32>
    %c14_27 = arith.constant 14 : index
    %208 = memref.load %arg2[%c14_27] : memref<16xf32, #tpu.memory_space<smem>>
    %209 = vector.broadcast %208 : f32 to vector<2x18x18xf32>
    %210 = arith.mulf %195, %209 : vector<2x18x18xf32>
    %211 = arith.addf %144, %210 : vector<2x18x18xf32>
    %c0_28 = arith.constant 0 : index
    %c3_29 = arith.constant 3 : index
    %c0_30 = arith.constant 0 : index
    %c0_31 = arith.constant 0 : index
    %212 = vector.load %arg0[%c0_28, %c3_29, %c0_30, %c0_31] : memref<2x4x20x20xf32, #tpu.memory_space<vmem>>, vector<2x1x20x20xf32>
    %213 = vector.shape_cast %212 : vector<2x1x20x20xf32> to vector<2x20x20xf32>
    %cst_32 = arith.constant 0.000000e+00 : f32
    %214 = vector.broadcast %cst_32 : f32 to vector<2x20x20xf32>
    %215 = arith.maximumf %213, %214 : vector<2x20x20xf32>
    %216 = vector.extract_strided_slice %215 {offsets = [0, 0, 0], sizes = [2, 18, 18], strides = [1, 1, 1]} : vector<2x20x20xf32> to vector<2x18x18xf32>
    %c27 = arith.constant 27 : index
    %217 = memref.load %arg1[%c27] : memref<36xf32, #tpu.memory_space<smem>>
    %218 = vector.broadcast %217 : f32 to vector<2x18x18xf32>
    %219 = arith.mulf %216, %218 : vector<2x18x18xf32>
    %220 = vector.extract_strided_slice %215 {offsets = [0, 0, 1], sizes = [2, 18, 18], strides = [1, 1, 1]} : vector<2x20x20xf32> to vector<2x18x18xf32>
    %c28 = arith.constant 28 : index
    %221 = memref.load %arg1[%c28] : memref<36xf32, #tpu.memory_space<smem>>
    %222 = vector.broadcast %221 : f32 to vector<2x18x18xf32>
    %223 = arith.mulf %220, %222 : vector<2x18x18xf32>
    %224 = arith.addf %219, %223 : vector<2x18x18xf32>
    %225 = vector.extract_strided_slice %215 {offsets = [0, 0, 2], sizes = [2, 18, 18], strides = [1, 1, 1]} : vector<2x20x20xf32> to vector<2x18x18xf32>
    %c29 = arith.constant 29 : index
    %226 = memref.load %arg1[%c29] : memref<36xf32, #tpu.memory_space<smem>>
    %227 = vector.broadcast %226 : f32 to vector<2x18x18xf32>
    %228 = arith.mulf %225, %227 : vector<2x18x18xf32>
    %229 = arith.addf %224, %228 : vector<2x18x18xf32>
    %230 = vector.extract_strided_slice %215 {offsets = [0, 1, 0], sizes = [2, 18, 18], strides = [1, 1, 1]} : vector<2x20x20xf32> to vector<2x18x18xf32>
    %c30 = arith.constant 30 : index
    %231 = memref.load %arg1[%c30] : memref<36xf32, #tpu.memory_space<smem>>
    %232 = vector.broadcast %231 : f32 to vector<2x18x18xf32>
    %233 = arith.mulf %230, %232 : vector<2x18x18xf32>
    %234 = arith.addf %229, %233 : vector<2x18x18xf32>
    %235 = vector.extract_strided_slice %215 {offsets = [0, 1, 1], sizes = [2, 18, 18], strides = [1, 1, 1]} : vector<2x20x20xf32> to vector<2x18x18xf32>
    %c31 = arith.constant 31 : index
    %236 = memref.load %arg1[%c31] : memref<36xf32, #tpu.memory_space<smem>>
    %237 = vector.broadcast %236 : f32 to vector<2x18x18xf32>
    %238 = arith.mulf %235, %237 : vector<2x18x18xf32>
    %239 = arith.addf %234, %238 : vector<2x18x18xf32>
    %240 = vector.extract_strided_slice %215 {offsets = [0, 1, 2], sizes = [2, 18, 18], strides = [1, 1, 1]} : vector<2x20x20xf32> to vector<2x18x18xf32>
    %c32 = arith.constant 32 : index
    %241 = memref.load %arg1[%c32] : memref<36xf32, #tpu.memory_space<smem>>
    %242 = vector.broadcast %241 : f32 to vector<2x18x18xf32>
    %243 = arith.mulf %240, %242 : vector<2x18x18xf32>
    %244 = arith.addf %239, %243 : vector<2x18x18xf32>
    %245 = vector.extract_strided_slice %215 {offsets = [0, 2, 0], sizes = [2, 18, 18], strides = [1, 1, 1]} : vector<2x20x20xf32> to vector<2x18x18xf32>
    %c33 = arith.constant 33 : index
    %246 = memref.load %arg1[%c33] : memref<36xf32, #tpu.memory_space<smem>>
    %247 = vector.broadcast %246 : f32 to vector<2x18x18xf32>
    %248 = arith.mulf %245, %247 : vector<2x18x18xf32>
    %249 = arith.addf %244, %248 : vector<2x18x18xf32>
    %250 = vector.extract_strided_slice %215 {offsets = [0, 2, 1], sizes = [2, 18, 18], strides = [1, 1, 1]} : vector<2x20x20xf32> to vector<2x18x18xf32>
    %c34 = arith.constant 34 : index
    %251 = memref.load %arg1[%c34] : memref<36xf32, #tpu.memory_space<smem>>
    %252 = vector.broadcast %251 : f32 to vector<2x18x18xf32>
    %253 = arith.mulf %250, %252 : vector<2x18x18xf32>
    %254 = arith.addf %249, %253 : vector<2x18x18xf32>
    %255 = vector.extract_strided_slice %215 {offsets = [0, 2, 2], sizes = [2, 18, 18], strides = [1, 1, 1]} : vector<2x20x20xf32> to vector<2x18x18xf32>
    %c35 = arith.constant 35 : index
    %256 = memref.load %arg1[%c35] : memref<36xf32, #tpu.memory_space<smem>>
    %257 = vector.broadcast %256 : f32 to vector<2x18x18xf32>
    %258 = arith.mulf %255, %257 : vector<2x18x18xf32>
    %259 = arith.addf %254, %258 : vector<2x18x18xf32>
    %260 = vector.shape_cast %14 : vector<18x18xf32> to vector<1x18x18xf32>
    %261 = vector.broadcast %260 : vector<1x18x18xf32> to vector<2x18x18xf32>
    %262 = arith.mulf %259, %261 : vector<2x18x18xf32>
    %c3_33 = arith.constant 3 : index
    %263 = memref.load %arg2[%c3_33] : memref<16xf32, #tpu.memory_space<smem>>
    %264 = vector.broadcast %263 : f32 to vector<2x18x18xf32>
    %265 = arith.mulf %262, %264 : vector<2x18x18xf32>
    %266 = arith.addf %199, %265 : vector<2x18x18xf32>
    %c7_34 = arith.constant 7 : index
    %267 = memref.load %arg2[%c7_34] : memref<16xf32, #tpu.memory_space<smem>>
    %268 = vector.broadcast %267 : f32 to vector<2x18x18xf32>
    %269 = arith.mulf %262, %268 : vector<2x18x18xf32>
    %270 = arith.addf %203, %269 : vector<2x18x18xf32>
    %c11_35 = arith.constant 11 : index
    %271 = memref.load %arg2[%c11_35] : memref<16xf32, #tpu.memory_space<smem>>
    %272 = vector.broadcast %271 : f32 to vector<2x18x18xf32>
    %273 = arith.mulf %262, %272 : vector<2x18x18xf32>
    %274 = arith.addf %207, %273 : vector<2x18x18xf32>
    %c15_36 = arith.constant 15 : index
    %275 = memref.load %arg2[%c15_36] : memref<16xf32, #tpu.memory_space<smem>>
    %276 = vector.broadcast %275 : f32 to vector<2x18x18xf32>
    %277 = arith.mulf %262, %276 : vector<2x18x18xf32>
    %278 = arith.addf %211, %277 : vector<2x18x18xf32>
    %279 = vector.shape_cast %266 : vector<2x18x18xf32> to vector<1x2x18x18xf32>
    %cst_37 = arith.constant dense<0.000000e+00> : vector<1xf32>
    %280 = vector.multi_reduction <add>, %279, %cst_37 [1, 2, 3] : vector<1x2x18x18xf32> to vector<1xf32>
    %281 = vector.shape_cast %280 : vector<1xf32> to vector<1x1x1x1xf32>
    %282 = vector.extract %281[0, 0, 0, 0] : f32 from vector<1x1x1x1xf32>
    %283 = vector.broadcast %282 : f32 to vector<1x1x1xf32>
    %cst_38 = arith.constant 0.001953125 : f32
    %284 = vector.broadcast %cst_38 : f32 to vector<1x1x1xf32>
    %285 = arith.mulf %283, %284 : vector<1x1x1xf32>
    %286 = vector.broadcast %285 : vector<1x1x1xf32> to vector<2x18x18xf32>
    %287 = arith.subf %266, %286 : vector<2x18x18xf32>
    %288 = vector.shape_cast %14 : vector<18x18xf32> to vector<1x18x18xf32>
    %289 = vector.broadcast %288 : vector<1x18x18xf32> to vector<2x18x18xf32>
    %290 = arith.mulf %287, %289 : vector<2x18x18xf32>
    %291 = arith.mulf %290, %290 : vector<2x18x18xf32>
    %292 = vector.shape_cast %291 : vector<2x18x18xf32> to vector<1x2x18x18xf32>
    %cst_39 = arith.constant dense<0.000000e+00> : vector<1xf32>
    %293 = vector.multi_reduction <add>, %292, %cst_39 [1, 2, 3] : vector<1x2x18x18xf32> to vector<1xf32>
    %294 = vector.shape_cast %293 : vector<1xf32> to vector<1x1x1x1xf32>
    %295 = vector.extract %294[0, 0, 0, 0] : f32 from vector<1x1x1x1xf32>
    %296 = vector.broadcast %295 : f32 to vector<1x1x1xf32>
    %cst_40 = arith.constant 0.001953125 : f32
    %297 = vector.broadcast %cst_40 : f32 to vector<1x1x1xf32>
    %298 = arith.mulf %296, %297 : vector<1x1x1xf32>
    %c0_41 = arith.constant 0 : index
    %299 = memref.load %arg3[%c0_41] : memref<4xf32, #tpu.memory_space<smem>>
    %cst_42 = arith.constant 9.99999974E-6 : f32
    %300 = vector.broadcast %cst_42 : f32 to vector<1x1x1xf32>
    %301 = arith.addf %298, %300 : vector<1x1x1xf32>
    %302 = math.rsqrt %301 : vector<1x1x1xf32>
    %303 = vector.broadcast %299 : f32 to vector<1x1x1xf32>
    %304 = arith.mulf %303, %302 : vector<1x1x1xf32>
    %c0_43 = arith.constant 0 : index
    %305 = memref.load %arg4[%c0_43] : memref<4xf32, #tpu.memory_space<smem>>
    %306 = arith.mulf %285, %304 : vector<1x1x1xf32>
    %307 = vector.broadcast %305 : f32 to vector<1x1x1xf32>
    %308 = arith.subf %307, %306 : vector<1x1x1xf32>
    %309 = vector.broadcast %304 : vector<1x1x1xf32> to vector<2x18x18xf32>
    %310 = arith.mulf %266, %309 : vector<2x18x18xf32>
    %311 = vector.broadcast %308 : vector<1x1x1xf32> to vector<2x18x18xf32>
    %312 = arith.addf %310, %311 : vector<2x18x18xf32>
    %cst_44 = arith.constant 0.000000e+00 : f32
    %313 = vector.broadcast %cst_44 : f32 to vector<2x18x18xf32>
    %314 = arith.maximumf %312, %313 : vector<2x18x18xf32>
    %315 = vector.shape_cast %14 : vector<18x18xf32> to vector<1x18x18xf32>
    %316 = vector.broadcast %315 : vector<1x18x18xf32> to vector<2x18x18xf32>
    %317 = arith.mulf %314, %316 : vector<2x18x18xf32>
    %318 = vector.extract_strided_slice %317 {offsets = [0, 0, 0], sizes = [2, 16, 16], strides = [1, 1, 1]} : vector<2x18x18xf32> to vector<2x16x16xf32>
    %c0_45 = arith.constant 0 : index
    %319 = memref.load %arg5[%c0_45] : memref<36xf32, #tpu.memory_space<smem>>
    %320 = vector.broadcast %319 : f32 to vector<2x16x16xf32>
    %321 = arith.mulf %318, %320 : vector<2x16x16xf32>
    %322 = vector.extract_strided_slice %317 {offsets = [0, 0, 1], sizes = [2, 16, 16], strides = [1, 1, 1]} : vector<2x18x18xf32> to vector<2x16x16xf32>
    %c1_46 = arith.constant 1 : index
    %323 = memref.load %arg5[%c1_46] : memref<36xf32, #tpu.memory_space<smem>>
    %324 = vector.broadcast %323 : f32 to vector<2x16x16xf32>
    %325 = arith.mulf %322, %324 : vector<2x16x16xf32>
    %326 = arith.addf %321, %325 : vector<2x16x16xf32>
    %327 = vector.extract_strided_slice %317 {offsets = [0, 0, 2], sizes = [2, 16, 16], strides = [1, 1, 1]} : vector<2x18x18xf32> to vector<2x16x16xf32>
    %c2_47 = arith.constant 2 : index
    %328 = memref.load %arg5[%c2_47] : memref<36xf32, #tpu.memory_space<smem>>
    %329 = vector.broadcast %328 : f32 to vector<2x16x16xf32>
    %330 = arith.mulf %327, %329 : vector<2x16x16xf32>
    %331 = arith.addf %326, %330 : vector<2x16x16xf32>
    %332 = vector.extract_strided_slice %317 {offsets = [0, 1, 0], sizes = [2, 16, 16], strides = [1, 1, 1]} : vector<2x18x18xf32> to vector<2x16x16xf32>
    %c3_48 = arith.constant 3 : index
    %333 = memref.load %arg5[%c3_48] : memref<36xf32, #tpu.memory_space<smem>>
    %334 = vector.broadcast %333 : f32 to vector<2x16x16xf32>
    %335 = arith.mulf %332, %334 : vector<2x16x16xf32>
    %336 = arith.addf %331, %335 : vector<2x16x16xf32>
    %337 = vector.extract_strided_slice %317 {offsets = [0, 1, 1], sizes = [2, 16, 16], strides = [1, 1, 1]} : vector<2x18x18xf32> to vector<2x16x16xf32>
    %c4_49 = arith.constant 4 : index
    %338 = memref.load %arg5[%c4_49] : memref<36xf32, #tpu.memory_space<smem>>
    %339 = vector.broadcast %338 : f32 to vector<2x16x16xf32>
    %340 = arith.mulf %337, %339 : vector<2x16x16xf32>
    %341 = arith.addf %336, %340 : vector<2x16x16xf32>
    %342 = vector.extract_strided_slice %317 {offsets = [0, 1, 2], sizes = [2, 16, 16], strides = [1, 1, 1]} : vector<2x18x18xf32> to vector<2x16x16xf32>
    %c5_50 = arith.constant 5 : index
    %343 = memref.load %arg5[%c5_50] : memref<36xf32, #tpu.memory_space<smem>>
    %344 = vector.broadcast %343 : f32 to vector<2x16x16xf32>
    %345 = arith.mulf %342, %344 : vector<2x16x16xf32>
    %346 = arith.addf %341, %345 : vector<2x16x16xf32>
    %347 = vector.extract_strided_slice %317 {offsets = [0, 2, 0], sizes = [2, 16, 16], strides = [1, 1, 1]} : vector<2x18x18xf32> to vector<2x16x16xf32>
    %c6_51 = arith.constant 6 : index
    %348 = memref.load %arg5[%c6_51] : memref<36xf32, #tpu.memory_space<smem>>
    %349 = vector.broadcast %348 : f32 to vector<2x16x16xf32>
    %350 = arith.mulf %347, %349 : vector<2x16x16xf32>
    %351 = arith.addf %346, %350 : vector<2x16x16xf32>
    %352 = vector.extract_strided_slice %317 {offsets = [0, 2, 1], sizes = [2, 16, 16], strides = [1, 1, 1]} : vector<2x18x18xf32> to vector<2x16x16xf32>
    %c7_52 = arith.constant 7 : index
    %353 = memref.load %arg5[%c7_52] : memref<36xf32, #tpu.memory_space<smem>>
    %354 = vector.broadcast %353 : f32 to vector<2x16x16xf32>
    %355 = arith.mulf %352, %354 : vector<2x16x16xf32>
    %356 = arith.addf %351, %355 : vector<2x16x16xf32>
    %357 = vector.extract_strided_slice %317 {offsets = [0, 2, 2], sizes = [2, 16, 16], strides = [1, 1, 1]} : vector<2x18x18xf32> to vector<2x16x16xf32>
    %c8_53 = arith.constant 8 : index
    %358 = memref.load %arg5[%c8_53] : memref<36xf32, #tpu.memory_space<smem>>
    %359 = vector.broadcast %358 : f32 to vector<2x16x16xf32>
    %360 = arith.mulf %357, %359 : vector<2x16x16xf32>
    %361 = arith.addf %356, %360 : vector<2x16x16xf32>
    %362 = vector.shape_cast %361 : vector<2x16x16xf32> to vector<2x256xf32>
    %c0_54 = arith.constant 0 : index
    %363 = memref.load %arg6[%c0_54] : memref<32xf32, #tpu.memory_space<smem>>
    %364 = vector.broadcast %363 : f32 to vector<2x256xf32>
    %365 = arith.mulf %362, %364 : vector<2x256xf32>
    %c4_55 = arith.constant 4 : index
    %366 = memref.load %arg6[%c4_55] : memref<32xf32, #tpu.memory_space<smem>>
    %367 = vector.broadcast %366 : f32 to vector<2x256xf32>
    %368 = arith.mulf %362, %367 : vector<2x256xf32>
    %c8_56 = arith.constant 8 : index
    %369 = memref.load %arg6[%c8_56] : memref<32xf32, #tpu.memory_space<smem>>
    %370 = vector.broadcast %369 : f32 to vector<2x256xf32>
    %371 = arith.mulf %362, %370 : vector<2x256xf32>
    %c12_57 = arith.constant 12 : index
    %372 = memref.load %arg6[%c12_57] : memref<32xf32, #tpu.memory_space<smem>>
    %373 = vector.broadcast %372 : f32 to vector<2x256xf32>
    %374 = arith.mulf %362, %373 : vector<2x256xf32>
    %c16_58 = arith.constant 16 : index
    %375 = memref.load %arg6[%c16_58] : memref<32xf32, #tpu.memory_space<smem>>
    %376 = vector.broadcast %375 : f32 to vector<2x256xf32>
    %377 = arith.mulf %362, %376 : vector<2x256xf32>
    %c20_59 = arith.constant 20 : index
    %378 = memref.load %arg6[%c20_59] : memref<32xf32, #tpu.memory_space<smem>>
    %379 = vector.broadcast %378 : f32 to vector<2x256xf32>
    %380 = arith.mulf %362, %379 : vector<2x256xf32>
    %c24_60 = arith.constant 24 : index
    %381 = memref.load %arg6[%c24_60] : memref<32xf32, #tpu.memory_space<smem>>
    %382 = vector.broadcast %381 : f32 to vector<2x256xf32>
    %383 = arith.mulf %362, %382 : vector<2x256xf32>
    %c28_61 = arith.constant 28 : index
    %384 = memref.load %arg6[%c28_61] : memref<32xf32, #tpu.memory_space<smem>>
    %385 = vector.broadcast %384 : f32 to vector<2x256xf32>
    %386 = arith.mulf %362, %385 : vector<2x256xf32>
    %387 = vector.shape_cast %270 : vector<2x18x18xf32> to vector<1x2x18x18xf32>
    %cst_62 = arith.constant dense<0.000000e+00> : vector<1xf32>
    %388 = vector.multi_reduction <add>, %387, %cst_62 [1, 2, 3] : vector<1x2x18x18xf32> to vector<1xf32>
    %389 = vector.shape_cast %388 : vector<1xf32> to vector<1x1x1x1xf32>
    %390 = vector.extract %389[0, 0, 0, 0] : f32 from vector<1x1x1x1xf32>
    %391 = vector.broadcast %390 : f32 to vector<1x1x1xf32>
    %cst_63 = arith.constant 0.001953125 : f32
    %392 = vector.broadcast %cst_63 : f32 to vector<1x1x1xf32>
    %393 = arith.mulf %391, %392 : vector<1x1x1xf32>
    %394 = vector.broadcast %393 : vector<1x1x1xf32> to vector<2x18x18xf32>
    %395 = arith.subf %270, %394 : vector<2x18x18xf32>
    %396 = vector.shape_cast %14 : vector<18x18xf32> to vector<1x18x18xf32>
    %397 = vector.broadcast %396 : vector<1x18x18xf32> to vector<2x18x18xf32>
    %398 = arith.mulf %395, %397 : vector<2x18x18xf32>
    %399 = arith.mulf %398, %398 : vector<2x18x18xf32>
    %400 = vector.shape_cast %399 : vector<2x18x18xf32> to vector<1x2x18x18xf32>
    %cst_64 = arith.constant dense<0.000000e+00> : vector<1xf32>
    %401 = vector.multi_reduction <add>, %400, %cst_64 [1, 2, 3] : vector<1x2x18x18xf32> to vector<1xf32>
    %402 = vector.shape_cast %401 : vector<1xf32> to vector<1x1x1x1xf32>
    %403 = vector.extract %402[0, 0, 0, 0] : f32 from vector<1x1x1x1xf32>
    %404 = vector.broadcast %403 : f32 to vector<1x1x1xf32>
    %cst_65 = arith.constant 0.001953125 : f32
    %405 = vector.broadcast %cst_65 : f32 to vector<1x1x1xf32>
    %406 = arith.mulf %404, %405 : vector<1x1x1xf32>
    %c1_66 = arith.constant 1 : index
    %407 = memref.load %arg3[%c1_66] : memref<4xf32, #tpu.memory_space<smem>>
    %cst_67 = arith.constant 9.99999974E-6 : f32
    %408 = vector.broadcast %cst_67 : f32 to vector<1x1x1xf32>
    %409 = arith.addf %406, %408 : vector<1x1x1xf32>
    %410 = math.rsqrt %409 : vector<1x1x1xf32>
    %411 = vector.broadcast %407 : f32 to vector<1x1x1xf32>
    %412 = arith.mulf %411, %410 : vector<1x1x1xf32>
    %c1_68 = arith.constant 1 : index
    %413 = memref.load %arg4[%c1_68] : memref<4xf32, #tpu.memory_space<smem>>
    %414 = arith.mulf %393, %412 : vector<1x1x1xf32>
    %415 = vector.broadcast %413 : f32 to vector<1x1x1xf32>
    %416 = arith.subf %415, %414 : vector<1x1x1xf32>
    %417 = vector.broadcast %412 : vector<1x1x1xf32> to vector<2x18x18xf32>
    %418 = arith.mulf %270, %417 : vector<2x18x18xf32>
    %419 = vector.broadcast %416 : vector<1x1x1xf32> to vector<2x18x18xf32>
    %420 = arith.addf %418, %419 : vector<2x18x18xf32>
    %cst_69 = arith.constant 0.000000e+00 : f32
    %421 = vector.broadcast %cst_69 : f32 to vector<2x18x18xf32>
    %422 = arith.maximumf %420, %421 : vector<2x18x18xf32>
    %423 = vector.shape_cast %14 : vector<18x18xf32> to vector<1x18x18xf32>
    %424 = vector.broadcast %423 : vector<1x18x18xf32> to vector<2x18x18xf32>
    %425 = arith.mulf %422, %424 : vector<2x18x18xf32>
    %426 = vector.extract_strided_slice %425 {offsets = [0, 0, 0], sizes = [2, 16, 16], strides = [1, 1, 1]} : vector<2x18x18xf32> to vector<2x16x16xf32>
    %c9_70 = arith.constant 9 : index
    %427 = memref.load %arg5[%c9_70] : memref<36xf32, #tpu.memory_space<smem>>
    %428 = vector.broadcast %427 : f32 to vector<2x16x16xf32>
    %429 = arith.mulf %426, %428 : vector<2x16x16xf32>
    %430 = vector.extract_strided_slice %425 {offsets = [0, 0, 1], sizes = [2, 16, 16], strides = [1, 1, 1]} : vector<2x18x18xf32> to vector<2x16x16xf32>
    %c10_71 = arith.constant 10 : index
    %431 = memref.load %arg5[%c10_71] : memref<36xf32, #tpu.memory_space<smem>>
    %432 = vector.broadcast %431 : f32 to vector<2x16x16xf32>
    %433 = arith.mulf %430, %432 : vector<2x16x16xf32>
    %434 = arith.addf %429, %433 : vector<2x16x16xf32>
    %435 = vector.extract_strided_slice %425 {offsets = [0, 0, 2], sizes = [2, 16, 16], strides = [1, 1, 1]} : vector<2x18x18xf32> to vector<2x16x16xf32>
    %c11_72 = arith.constant 11 : index
    %436 = memref.load %arg5[%c11_72] : memref<36xf32, #tpu.memory_space<smem>>
    %437 = vector.broadcast %436 : f32 to vector<2x16x16xf32>
    %438 = arith.mulf %435, %437 : vector<2x16x16xf32>
    %439 = arith.addf %434, %438 : vector<2x16x16xf32>
    %440 = vector.extract_strided_slice %425 {offsets = [0, 1, 0], sizes = [2, 16, 16], strides = [1, 1, 1]} : vector<2x18x18xf32> to vector<2x16x16xf32>
    %c12_73 = arith.constant 12 : index
    %441 = memref.load %arg5[%c12_73] : memref<36xf32, #tpu.memory_space<smem>>
    %442 = vector.broadcast %441 : f32 to vector<2x16x16xf32>
    %443 = arith.mulf %440, %442 : vector<2x16x16xf32>
    %444 = arith.addf %439, %443 : vector<2x16x16xf32>
    %445 = vector.extract_strided_slice %425 {offsets = [0, 1, 1], sizes = [2, 16, 16], strides = [1, 1, 1]} : vector<2x18x18xf32> to vector<2x16x16xf32>
    %c13_74 = arith.constant 13 : index
    %446 = memref.load %arg5[%c13_74] : memref<36xf32, #tpu.memory_space<smem>>
    %447 = vector.broadcast %446 : f32 to vector<2x16x16xf32>
    %448 = arith.mulf %445, %447 : vector<2x16x16xf32>
    %449 = arith.addf %444, %448 : vector<2x16x16xf32>
    %450 = vector.extract_strided_slice %425 {offsets = [0, 1, 2], sizes = [2, 16, 16], strides = [1, 1, 1]} : vector<2x18x18xf32> to vector<2x16x16xf32>
    %c14_75 = arith.constant 14 : index
    %451 = memref.load %arg5[%c14_75] : memref<36xf32, #tpu.memory_space<smem>>
    %452 = vector.broadcast %451 : f32 to vector<2x16x16xf32>
    %453 = arith.mulf %450, %452 : vector<2x16x16xf32>
    %454 = arith.addf %449, %453 : vector<2x16x16xf32>
    %455 = vector.extract_strided_slice %425 {offsets = [0, 2, 0], sizes = [2, 16, 16], strides = [1, 1, 1]} : vector<2x18x18xf32> to vector<2x16x16xf32>
    %c15_76 = arith.constant 15 : index
    %456 = memref.load %arg5[%c15_76] : memref<36xf32, #tpu.memory_space<smem>>
    %457 = vector.broadcast %456 : f32 to vector<2x16x16xf32>
    %458 = arith.mulf %455, %457 : vector<2x16x16xf32>
    %459 = arith.addf %454, %458 : vector<2x16x16xf32>
    %460 = vector.extract_strided_slice %425 {offsets = [0, 2, 1], sizes = [2, 16, 16], strides = [1, 1, 1]} : vector<2x18x18xf32> to vector<2x16x16xf32>
    %c16_77 = arith.constant 16 : index
    %461 = memref.load %arg5[%c16_77] : memref<36xf32, #tpu.memory_space<smem>>
    %462 = vector.broadcast %461 : f32 to vector<2x16x16xf32>
    %463 = arith.mulf %460, %462 : vector<2x16x16xf32>
    %464 = arith.addf %459, %463 : vector<2x16x16xf32>
    %465 = vector.extract_strided_slice %425 {offsets = [0, 2, 2], sizes = [2, 16, 16], strides = [1, 1, 1]} : vector<2x18x18xf32> to vector<2x16x16xf32>
    %c17_78 = arith.constant 17 : index
    %466 = memref.load %arg5[%c17_78] : memref<36xf32, #tpu.memory_space<smem>>
    %467 = vector.broadcast %466 : f32 to vector<2x16x16xf32>
    %468 = arith.mulf %465, %467 : vector<2x16x16xf32>
    %469 = arith.addf %464, %468 : vector<2x16x16xf32>
    %470 = vector.shape_cast %469 : vector<2x16x16xf32> to vector<2x256xf32>
    %c1_79 = arith.constant 1 : index
    %471 = memref.load %arg6[%c1_79] : memref<32xf32, #tpu.memory_space<smem>>
    %472 = vector.broadcast %471 : f32 to vector<2x256xf32>
    %473 = arith.mulf %470, %472 : vector<2x256xf32>
    %474 = arith.addf %365, %473 : vector<2x256xf32>
    %c5_80 = arith.constant 5 : index
    %475 = memref.load %arg6[%c5_80] : memref<32xf32, #tpu.memory_space<smem>>
    %476 = vector.broadcast %475 : f32 to vector<2x256xf32>
    %477 = arith.mulf %470, %476 : vector<2x256xf32>
    %478 = arith.addf %368, %477 : vector<2x256xf32>
    %c9_81 = arith.constant 9 : index
    %479 = memref.load %arg6[%c9_81] : memref<32xf32, #tpu.memory_space<smem>>
    %480 = vector.broadcast %479 : f32 to vector<2x256xf32>
    %481 = arith.mulf %470, %480 : vector<2x256xf32>
    %482 = arith.addf %371, %481 : vector<2x256xf32>
    %c13_82 = arith.constant 13 : index
    %483 = memref.load %arg6[%c13_82] : memref<32xf32, #tpu.memory_space<smem>>
    %484 = vector.broadcast %483 : f32 to vector<2x256xf32>
    %485 = arith.mulf %470, %484 : vector<2x256xf32>
    %486 = arith.addf %374, %485 : vector<2x256xf32>
    %c17_83 = arith.constant 17 : index
    %487 = memref.load %arg6[%c17_83] : memref<32xf32, #tpu.memory_space<smem>>
    %488 = vector.broadcast %487 : f32 to vector<2x256xf32>
    %489 = arith.mulf %470, %488 : vector<2x256xf32>
    %490 = arith.addf %377, %489 : vector<2x256xf32>
    %c21_84 = arith.constant 21 : index
    %491 = memref.load %arg6[%c21_84] : memref<32xf32, #tpu.memory_space<smem>>
    %492 = vector.broadcast %491 : f32 to vector<2x256xf32>
    %493 = arith.mulf %470, %492 : vector<2x256xf32>
    %494 = arith.addf %380, %493 : vector<2x256xf32>
    %c25_85 = arith.constant 25 : index
    %495 = memref.load %arg6[%c25_85] : memref<32xf32, #tpu.memory_space<smem>>
    %496 = vector.broadcast %495 : f32 to vector<2x256xf32>
    %497 = arith.mulf %470, %496 : vector<2x256xf32>
    %498 = arith.addf %383, %497 : vector<2x256xf32>
    %c29_86 = arith.constant 29 : index
    %499 = memref.load %arg6[%c29_86] : memref<32xf32, #tpu.memory_space<smem>>
    %500 = vector.broadcast %499 : f32 to vector<2x256xf32>
    %501 = arith.mulf %470, %500 : vector<2x256xf32>
    %502 = arith.addf %386, %501 : vector<2x256xf32>
    %503 = vector.shape_cast %274 : vector<2x18x18xf32> to vector<1x2x18x18xf32>
    %cst_87 = arith.constant dense<0.000000e+00> : vector<1xf32>
    %504 = vector.multi_reduction <add>, %503, %cst_87 [1, 2, 3] : vector<1x2x18x18xf32> to vector<1xf32>
    %505 = vector.shape_cast %504 : vector<1xf32> to vector<1x1x1x1xf32>
    %506 = vector.extract %505[0, 0, 0, 0] : f32 from vector<1x1x1x1xf32>
    %507 = vector.broadcast %506 : f32 to vector<1x1x1xf32>
    %cst_88 = arith.constant 0.001953125 : f32
    %508 = vector.broadcast %cst_88 : f32 to vector<1x1x1xf32>
    %509 = arith.mulf %507, %508 : vector<1x1x1xf32>
    %510 = vector.broadcast %509 : vector<1x1x1xf32> to vector<2x18x18xf32>
    %511 = arith.subf %274, %510 : vector<2x18x18xf32>
    %512 = vector.shape_cast %14 : vector<18x18xf32> to vector<1x18x18xf32>
    %513 = vector.broadcast %512 : vector<1x18x18xf32> to vector<2x18x18xf32>
    %514 = arith.mulf %511, %513 : vector<2x18x18xf32>
    %515 = arith.mulf %514, %514 : vector<2x18x18xf32>
    %516 = vector.shape_cast %515 : vector<2x18x18xf32> to vector<1x2x18x18xf32>
    %cst_89 = arith.constant dense<0.000000e+00> : vector<1xf32>
    %517 = vector.multi_reduction <add>, %516, %cst_89 [1, 2, 3] : vector<1x2x18x18xf32> to vector<1xf32>
    %518 = vector.shape_cast %517 : vector<1xf32> to vector<1x1x1x1xf32>
    %519 = vector.extract %518[0, 0, 0, 0] : f32 from vector<1x1x1x1xf32>
    %520 = vector.broadcast %519 : f32 to vector<1x1x1xf32>
    %cst_90 = arith.constant 0.001953125 : f32
    %521 = vector.broadcast %cst_90 : f32 to vector<1x1x1xf32>
    %522 = arith.mulf %520, %521 : vector<1x1x1xf32>
    %c2_91 = arith.constant 2 : index
    %523 = memref.load %arg3[%c2_91] : memref<4xf32, #tpu.memory_space<smem>>
    %cst_92 = arith.constant 9.99999974E-6 : f32
    %524 = vector.broadcast %cst_92 : f32 to vector<1x1x1xf32>
    %525 = arith.addf %522, %524 : vector<1x1x1xf32>
    %526 = math.rsqrt %525 : vector<1x1x1xf32>
    %527 = vector.broadcast %523 : f32 to vector<1x1x1xf32>
    %528 = arith.mulf %527, %526 : vector<1x1x1xf32>
    %c2_93 = arith.constant 2 : index
    %529 = memref.load %arg4[%c2_93] : memref<4xf32, #tpu.memory_space<smem>>
    %530 = arith.mulf %509, %528 : vector<1x1x1xf32>
    %531 = vector.broadcast %529 : f32 to vector<1x1x1xf32>
    %532 = arith.subf %531, %530 : vector<1x1x1xf32>
    %533 = vector.broadcast %528 : vector<1x1x1xf32> to vector<2x18x18xf32>
    %534 = arith.mulf %274, %533 : vector<2x18x18xf32>
    %535 = vector.broadcast %532 : vector<1x1x1xf32> to vector<2x18x18xf32>
    %536 = arith.addf %534, %535 : vector<2x18x18xf32>
    %cst_94 = arith.constant 0.000000e+00 : f32
    %537 = vector.broadcast %cst_94 : f32 to vector<2x18x18xf32>
    %538 = arith.maximumf %536, %537 : vector<2x18x18xf32>
    %539 = vector.shape_cast %14 : vector<18x18xf32> to vector<1x18x18xf32>
    %540 = vector.broadcast %539 : vector<1x18x18xf32> to vector<2x18x18xf32>
    %541 = arith.mulf %538, %540 : vector<2x18x18xf32>
    %542 = vector.extract_strided_slice %541 {offsets = [0, 0, 0], sizes = [2, 16, 16], strides = [1, 1, 1]} : vector<2x18x18xf32> to vector<2x16x16xf32>
    %c18_95 = arith.constant 18 : index
    %543 = memref.load %arg5[%c18_95] : memref<36xf32, #tpu.memory_space<smem>>
    %544 = vector.broadcast %543 : f32 to vector<2x16x16xf32>
    %545 = arith.mulf %542, %544 : vector<2x16x16xf32>
    %546 = vector.extract_strided_slice %541 {offsets = [0, 0, 1], sizes = [2, 16, 16], strides = [1, 1, 1]} : vector<2x18x18xf32> to vector<2x16x16xf32>
    %c19_96 = arith.constant 19 : index
    %547 = memref.load %arg5[%c19_96] : memref<36xf32, #tpu.memory_space<smem>>
    %548 = vector.broadcast %547 : f32 to vector<2x16x16xf32>
    %549 = arith.mulf %546, %548 : vector<2x16x16xf32>
    %550 = arith.addf %545, %549 : vector<2x16x16xf32>
    %551 = vector.extract_strided_slice %541 {offsets = [0, 0, 2], sizes = [2, 16, 16], strides = [1, 1, 1]} : vector<2x18x18xf32> to vector<2x16x16xf32>
    %c20_97 = arith.constant 20 : index
    %552 = memref.load %arg5[%c20_97] : memref<36xf32, #tpu.memory_space<smem>>
    %553 = vector.broadcast %552 : f32 to vector<2x16x16xf32>
    %554 = arith.mulf %551, %553 : vector<2x16x16xf32>
    %555 = arith.addf %550, %554 : vector<2x16x16xf32>
    %556 = vector.extract_strided_slice %541 {offsets = [0, 1, 0], sizes = [2, 16, 16], strides = [1, 1, 1]} : vector<2x18x18xf32> to vector<2x16x16xf32>
    %c21_98 = arith.constant 21 : index
    %557 = memref.load %arg5[%c21_98] : memref<36xf32, #tpu.memory_space<smem>>
    %558 = vector.broadcast %557 : f32 to vector<2x16x16xf32>
    %559 = arith.mulf %556, %558 : vector<2x16x16xf32>
    %560 = arith.addf %555, %559 : vector<2x16x16xf32>
    %561 = vector.extract_strided_slice %541 {offsets = [0, 1, 1], sizes = [2, 16, 16], strides = [1, 1, 1]} : vector<2x18x18xf32> to vector<2x16x16xf32>
    %c22_99 = arith.constant 22 : index
    %562 = memref.load %arg5[%c22_99] : memref<36xf32, #tpu.memory_space<smem>>
    %563 = vector.broadcast %562 : f32 to vector<2x16x16xf32>
    %564 = arith.mulf %561, %563 : vector<2x16x16xf32>
    %565 = arith.addf %560, %564 : vector<2x16x16xf32>
    %566 = vector.extract_strided_slice %541 {offsets = [0, 1, 2], sizes = [2, 16, 16], strides = [1, 1, 1]} : vector<2x18x18xf32> to vector<2x16x16xf32>
    %c23_100 = arith.constant 23 : index
    %567 = memref.load %arg5[%c23_100] : memref<36xf32, #tpu.memory_space<smem>>
    %568 = vector.broadcast %567 : f32 to vector<2x16x16xf32>
    %569 = arith.mulf %566, %568 : vector<2x16x16xf32>
    %570 = arith.addf %565, %569 : vector<2x16x16xf32>
    %571 = vector.extract_strided_slice %541 {offsets = [0, 2, 0], sizes = [2, 16, 16], strides = [1, 1, 1]} : vector<2x18x18xf32> to vector<2x16x16xf32>
    %c24_101 = arith.constant 24 : index
    %572 = memref.load %arg5[%c24_101] : memref<36xf32, #tpu.memory_space<smem>>
    %573 = vector.broadcast %572 : f32 to vector<2x16x16xf32>
    %574 = arith.mulf %571, %573 : vector<2x16x16xf32>
    %575 = arith.addf %570, %574 : vector<2x16x16xf32>
    %576 = vector.extract_strided_slice %541 {offsets = [0, 2, 1], sizes = [2, 16, 16], strides = [1, 1, 1]} : vector<2x18x18xf32> to vector<2x16x16xf32>
    %c25_102 = arith.constant 25 : index
    %577 = memref.load %arg5[%c25_102] : memref<36xf32, #tpu.memory_space<smem>>
    %578 = vector.broadcast %577 : f32 to vector<2x16x16xf32>
    %579 = arith.mulf %576, %578 : vector<2x16x16xf32>
    %580 = arith.addf %575, %579 : vector<2x16x16xf32>
    %581 = vector.extract_strided_slice %541 {offsets = [0, 2, 2], sizes = [2, 16, 16], strides = [1, 1, 1]} : vector<2x18x18xf32> to vector<2x16x16xf32>
    %c26_103 = arith.constant 26 : index
    %582 = memref.load %arg5[%c26_103] : memref<36xf32, #tpu.memory_space<smem>>
    %583 = vector.broadcast %582 : f32 to vector<2x16x16xf32>
    %584 = arith.mulf %581, %583 : vector<2x16x16xf32>
    %585 = arith.addf %580, %584 : vector<2x16x16xf32>
    %586 = vector.shape_cast %585 : vector<2x16x16xf32> to vector<2x256xf32>
    %c2_104 = arith.constant 2 : index
    %587 = memref.load %arg6[%c2_104] : memref<32xf32, #tpu.memory_space<smem>>
    %588 = vector.broadcast %587 : f32 to vector<2x256xf32>
    %589 = arith.mulf %586, %588 : vector<2x256xf32>
    %590 = arith.addf %474, %589 : vector<2x256xf32>
    %c6_105 = arith.constant 6 : index
    %591 = memref.load %arg6[%c6_105] : memref<32xf32, #tpu.memory_space<smem>>
    %592 = vector.broadcast %591 : f32 to vector<2x256xf32>
    %593 = arith.mulf %586, %592 : vector<2x256xf32>
    %594 = arith.addf %478, %593 : vector<2x256xf32>
    %c10_106 = arith.constant 10 : index
    %595 = memref.load %arg6[%c10_106] : memref<32xf32, #tpu.memory_space<smem>>
    %596 = vector.broadcast %595 : f32 to vector<2x256xf32>
    %597 = arith.mulf %586, %596 : vector<2x256xf32>
    %598 = arith.addf %482, %597 : vector<2x256xf32>
    %c14_107 = arith.constant 14 : index
    %599 = memref.load %arg6[%c14_107] : memref<32xf32, #tpu.memory_space<smem>>
    %600 = vector.broadcast %599 : f32 to vector<2x256xf32>
    %601 = arith.mulf %586, %600 : vector<2x256xf32>
    %602 = arith.addf %486, %601 : vector<2x256xf32>
    %c18_108 = arith.constant 18 : index
    %603 = memref.load %arg6[%c18_108] : memref<32xf32, #tpu.memory_space<smem>>
    %604 = vector.broadcast %603 : f32 to vector<2x256xf32>
    %605 = arith.mulf %586, %604 : vector<2x256xf32>
    %606 = arith.addf %490, %605 : vector<2x256xf32>
    %c22_109 = arith.constant 22 : index
    %607 = memref.load %arg6[%c22_109] : memref<32xf32, #tpu.memory_space<smem>>
    %608 = vector.broadcast %607 : f32 to vector<2x256xf32>
    %609 = arith.mulf %586, %608 : vector<2x256xf32>
    %610 = arith.addf %494, %609 : vector<2x256xf32>
    %c26_110 = arith.constant 26 : index
    %611 = memref.load %arg6[%c26_110] : memref<32xf32, #tpu.memory_space<smem>>
    %612 = vector.broadcast %611 : f32 to vector<2x256xf32>
    %613 = arith.mulf %586, %612 : vector<2x256xf32>
    %614 = arith.addf %498, %613 : vector<2x256xf32>
    %c30_111 = arith.constant 30 : index
    %615 = memref.load %arg6[%c30_111] : memref<32xf32, #tpu.memory_space<smem>>
    %616 = vector.broadcast %615 : f32 to vector<2x256xf32>
    %617 = arith.mulf %586, %616 : vector<2x256xf32>
    %618 = arith.addf %502, %617 : vector<2x256xf32>
    %619 = vector.shape_cast %278 : vector<2x18x18xf32> to vector<1x2x18x18xf32>
    %cst_112 = arith.constant dense<0.000000e+00> : vector<1xf32>
    %620 = vector.multi_reduction <add>, %619, %cst_112 [1, 2, 3] : vector<1x2x18x18xf32> to vector<1xf32>
    %621 = vector.shape_cast %620 : vector<1xf32> to vector<1x1x1x1xf32>
    %622 = vector.extract %621[0, 0, 0, 0] : f32 from vector<1x1x1x1xf32>
    %623 = vector.broadcast %622 : f32 to vector<1x1x1xf32>
    %cst_113 = arith.constant 0.001953125 : f32
    %624 = vector.broadcast %cst_113 : f32 to vector<1x1x1xf32>
    %625 = arith.mulf %623, %624 : vector<1x1x1xf32>
    %626 = vector.broadcast %625 : vector<1x1x1xf32> to vector<2x18x18xf32>
    %627 = arith.subf %278, %626 : vector<2x18x18xf32>
    %628 = vector.shape_cast %14 : vector<18x18xf32> to vector<1x18x18xf32>
    %629 = vector.broadcast %628 : vector<1x18x18xf32> to vector<2x18x18xf32>
    %630 = arith.mulf %627, %629 : vector<2x18x18xf32>
    %631 = arith.mulf %630, %630 : vector<2x18x18xf32>
    %632 = vector.shape_cast %631 : vector<2x18x18xf32> to vector<1x2x18x18xf32>
    %cst_114 = arith.constant dense<0.000000e+00> : vector<1xf32>
    %633 = vector.multi_reduction <add>, %632, %cst_114 [1, 2, 3] : vector<1x2x18x18xf32> to vector<1xf32>
    %634 = vector.shape_cast %633 : vector<1xf32> to vector<1x1x1x1xf32>
    %635 = vector.extract %634[0, 0, 0, 0] : f32 from vector<1x1x1x1xf32>
    %636 = vector.broadcast %635 : f32 to vector<1x1x1xf32>
    %cst_115 = arith.constant 0.001953125 : f32
    %637 = vector.broadcast %cst_115 : f32 to vector<1x1x1xf32>
    %638 = arith.mulf %636, %637 : vector<1x1x1xf32>
    %c3_116 = arith.constant 3 : index
    %639 = memref.load %arg3[%c3_116] : memref<4xf32, #tpu.memory_space<smem>>
    %cst_117 = arith.constant 9.99999974E-6 : f32
    %640 = vector.broadcast %cst_117 : f32 to vector<1x1x1xf32>
    %641 = arith.addf %638, %640 : vector<1x1x1xf32>
    %642 = math.rsqrt %641 : vector<1x1x1xf32>
    %643 = vector.broadcast %639 : f32 to vector<1x1x1xf32>
    %644 = arith.mulf %643, %642 : vector<1x1x1xf32>
    %c3_118 = arith.constant 3 : index
    %645 = memref.load %arg4[%c3_118] : memref<4xf32, #tpu.memory_space<smem>>
    %646 = arith.mulf %625, %644 : vector<1x1x1xf32>
    %647 = vector.broadcast %645 : f32 to vector<1x1x1xf32>
    %648 = arith.subf %647, %646 : vector<1x1x1xf32>
    %649 = vector.broadcast %644 : vector<1x1x1xf32> to vector<2x18x18xf32>
    %650 = arith.mulf %278, %649 : vector<2x18x18xf32>
    %651 = vector.broadcast %648 : vector<1x1x1xf32> to vector<2x18x18xf32>
    %652 = arith.addf %650, %651 : vector<2x18x18xf32>
    %cst_119 = arith.constant 0.000000e+00 : f32
    %653 = vector.broadcast %cst_119 : f32 to vector<2x18x18xf32>
    %654 = arith.maximumf %652, %653 : vector<2x18x18xf32>
    %655 = vector.shape_cast %14 : vector<18x18xf32> to vector<1x18x18xf32>
    %656 = vector.broadcast %655 : vector<1x18x18xf32> to vector<2x18x18xf32>
    %657 = arith.mulf %654, %656 : vector<2x18x18xf32>
    %658 = vector.extract_strided_slice %657 {offsets = [0, 0, 0], sizes = [2, 16, 16], strides = [1, 1, 1]} : vector<2x18x18xf32> to vector<2x16x16xf32>
    %c27_120 = arith.constant 27 : index
    %659 = memref.load %arg5[%c27_120] : memref<36xf32, #tpu.memory_space<smem>>
    %660 = vector.broadcast %659 : f32 to vector<2x16x16xf32>
    %661 = arith.mulf %658, %660 : vector<2x16x16xf32>
    %662 = vector.extract_strided_slice %657 {offsets = [0, 0, 1], sizes = [2, 16, 16], strides = [1, 1, 1]} : vector<2x18x18xf32> to vector<2x16x16xf32>
    %c28_121 = arith.constant 28 : index
    %663 = memref.load %arg5[%c28_121] : memref<36xf32, #tpu.memory_space<smem>>
    %664 = vector.broadcast %663 : f32 to vector<2x16x16xf32>
    %665 = arith.mulf %662, %664 : vector<2x16x16xf32>
    %666 = arith.addf %661, %665 : vector<2x16x16xf32>
    %667 = vector.extract_strided_slice %657 {offsets = [0, 0, 2], sizes = [2, 16, 16], strides = [1, 1, 1]} : vector<2x18x18xf32> to vector<2x16x16xf32>
    %c29_122 = arith.constant 29 : index
    %668 = memref.load %arg5[%c29_122] : memref<36xf32, #tpu.memory_space<smem>>
    %669 = vector.broadcast %668 : f32 to vector<2x16x16xf32>
    %670 = arith.mulf %667, %669 : vector<2x16x16xf32>
    %671 = arith.addf %666, %670 : vector<2x16x16xf32>
    %672 = vector.extract_strided_slice %657 {offsets = [0, 1, 0], sizes = [2, 16, 16], strides = [1, 1, 1]} : vector<2x18x18xf32> to vector<2x16x16xf32>
    %c30_123 = arith.constant 30 : index
    %673 = memref.load %arg5[%c30_123] : memref<36xf32, #tpu.memory_space<smem>>
    %674 = vector.broadcast %673 : f32 to vector<2x16x16xf32>
    %675 = arith.mulf %672, %674 : vector<2x16x16xf32>
    %676 = arith.addf %671, %675 : vector<2x16x16xf32>
    %677 = vector.extract_strided_slice %657 {offsets = [0, 1, 1], sizes = [2, 16, 16], strides = [1, 1, 1]} : vector<2x18x18xf32> to vector<2x16x16xf32>
    %c31_124 = arith.constant 31 : index
    %678 = memref.load %arg5[%c31_124] : memref<36xf32, #tpu.memory_space<smem>>
    %679 = vector.broadcast %678 : f32 to vector<2x16x16xf32>
    %680 = arith.mulf %677, %679 : vector<2x16x16xf32>
    %681 = arith.addf %676, %680 : vector<2x16x16xf32>
    %682 = vector.extract_strided_slice %657 {offsets = [0, 1, 2], sizes = [2, 16, 16], strides = [1, 1, 1]} : vector<2x18x18xf32> to vector<2x16x16xf32>
    %c32_125 = arith.constant 32 : index
    %683 = memref.load %arg5[%c32_125] : memref<36xf32, #tpu.memory_space<smem>>
    %684 = vector.broadcast %683 : f32 to vector<2x16x16xf32>
    %685 = arith.mulf %682, %684 : vector<2x16x16xf32>
    %686 = arith.addf %681, %685 : vector<2x16x16xf32>
    %687 = vector.extract_strided_slice %657 {offsets = [0, 2, 0], sizes = [2, 16, 16], strides = [1, 1, 1]} : vector<2x18x18xf32> to vector<2x16x16xf32>
    %c33_126 = arith.constant 33 : index
    %688 = memref.load %arg5[%c33_126] : memref<36xf32, #tpu.memory_space<smem>>
    %689 = vector.broadcast %688 : f32 to vector<2x16x16xf32>
    %690 = arith.mulf %687, %689 : vector<2x16x16xf32>
    %691 = arith.addf %686, %690 : vector<2x16x16xf32>
    %692 = vector.extract_strided_slice %657 {offsets = [0, 2, 1], sizes = [2, 16, 16], strides = [1, 1, 1]} : vector<2x18x18xf32> to vector<2x16x16xf32>
    %c34_127 = arith.constant 34 : index
    %693 = memref.load %arg5[%c34_127] : memref<36xf32, #tpu.memory_space<smem>>
    %694 = vector.broadcast %693 : f32 to vector<2x16x16xf32>
    %695 = arith.mulf %692, %694 : vector<2x16x16xf32>
    %696 = arith.addf %691, %695 : vector<2x16x16xf32>
    %697 = vector.extract_strided_slice %657 {offsets = [0, 2, 2], sizes = [2, 16, 16], strides = [1, 1, 1]} : vector<2x18x18xf32> to vector<2x16x16xf32>
    %c35_128 = arith.constant 35 : index
    %698 = memref.load %arg5[%c35_128] : memref<36xf32, #tpu.memory_space<smem>>
    %699 = vector.broadcast %698 : f32 to vector<2x16x16xf32>
    %700 = arith.mulf %697, %699 : vector<2x16x16xf32>
    %701 = arith.addf %696, %700 : vector<2x16x16xf32>
    %702 = vector.shape_cast %701 : vector<2x16x16xf32> to vector<2x256xf32>
    %c3_129 = arith.constant 3 : index
    %703 = memref.load %arg6[%c3_129] : memref<32xf32, #tpu.memory_space<smem>>
    %704 = vector.broadcast %703 : f32 to vector<2x256xf32>
    %705 = arith.mulf %702, %704 : vector<2x256xf32>
    %706 = arith.addf %590, %705 : vector<2x256xf32>
    %c7_130 = arith.constant 7 : index
    %707 = memref.load %arg6[%c7_130] : memref<32xf32, #tpu.memory_space<smem>>
    %708 = vector.broadcast %707 : f32 to vector<2x256xf32>
    %709 = arith.mulf %702, %708 : vector<2x256xf32>
    %710 = arith.addf %594, %709 : vector<2x256xf32>
    %c11_131 = arith.constant 11 : index
    %711 = memref.load %arg6[%c11_131] : memref<32xf32, #tpu.memory_space<smem>>
    %712 = vector.broadcast %711 : f32 to vector<2x256xf32>
    %713 = arith.mulf %702, %712 : vector<2x256xf32>
    %714 = arith.addf %598, %713 : vector<2x256xf32>
    %c15_132 = arith.constant 15 : index
    %715 = memref.load %arg6[%c15_132] : memref<32xf32, #tpu.memory_space<smem>>
    %716 = vector.broadcast %715 : f32 to vector<2x256xf32>
    %717 = arith.mulf %702, %716 : vector<2x256xf32>
    %718 = arith.addf %602, %717 : vector<2x256xf32>
    %c19_133 = arith.constant 19 : index
    %719 = memref.load %arg6[%c19_133] : memref<32xf32, #tpu.memory_space<smem>>
    %720 = vector.broadcast %719 : f32 to vector<2x256xf32>
    %721 = arith.mulf %702, %720 : vector<2x256xf32>
    %722 = arith.addf %606, %721 : vector<2x256xf32>
    %c23_134 = arith.constant 23 : index
    %723 = memref.load %arg6[%c23_134] : memref<32xf32, #tpu.memory_space<smem>>
    %724 = vector.broadcast %723 : f32 to vector<2x256xf32>
    %725 = arith.mulf %702, %724 : vector<2x256xf32>
    %726 = arith.addf %610, %725 : vector<2x256xf32>
    %c27_135 = arith.constant 27 : index
    %727 = memref.load %arg6[%c27_135] : memref<32xf32, #tpu.memory_space<smem>>
    %728 = vector.broadcast %727 : f32 to vector<2x256xf32>
    %729 = arith.mulf %702, %728 : vector<2x256xf32>
    %730 = arith.addf %614, %729 : vector<2x256xf32>
    %c31_136 = arith.constant 31 : index
    %731 = memref.load %arg6[%c31_136] : memref<32xf32, #tpu.memory_space<smem>>
    %732 = vector.broadcast %731 : f32 to vector<2x256xf32>
    %733 = arith.mulf %702, %732 : vector<2x256xf32>
    %734 = arith.addf %618, %733 : vector<2x256xf32>
    %735 = vector.shape_cast %706 : vector<2x256xf32> to vector<1x2x256xf32>
    %cst_137 = arith.constant dense<0.000000e+00> : vector<1xf32>
    %736 = vector.multi_reduction <add>, %735, %cst_137 [1, 2] : vector<1x2x256xf32> to vector<1xf32>
    %737 = vector.shape_cast %736 : vector<1xf32> to vector<1x1x1xf32>
    %738 = vector.extract %737[0, 0, 0] : f32 from vector<1x1x1xf32>
    %739 = vector.broadcast %738 : f32 to vector<1x1xf32>
    %cst_138 = arith.constant 0.001953125 : f32
    %740 = vector.broadcast %cst_138 : f32 to vector<1x1xf32>
    %741 = arith.mulf %739, %740 : vector<1x1xf32>
    %742 = vector.broadcast %741 : vector<1x1xf32> to vector<2x256xf32>
    %743 = arith.subf %706, %742 : vector<2x256xf32>
    %744 = arith.mulf %743, %743 : vector<2x256xf32>
    %745 = vector.shape_cast %744 : vector<2x256xf32> to vector<1x2x256xf32>
    %cst_139 = arith.constant dense<0.000000e+00> : vector<1xf32>
    %746 = vector.multi_reduction <add>, %745, %cst_139 [1, 2] : vector<1x2x256xf32> to vector<1xf32>
    %747 = vector.shape_cast %746 : vector<1xf32> to vector<1x1x1xf32>
    %748 = vector.extract %747[0, 0, 0] : f32 from vector<1x1x1xf32>
    %749 = vector.broadcast %748 : f32 to vector<1x1xf32>
    %cst_140 = arith.constant 0.001953125 : f32
    %750 = vector.broadcast %cst_140 : f32 to vector<1x1xf32>
    %751 = arith.mulf %749, %750 : vector<1x1xf32>
    %c0_141 = arith.constant 0 : index
    %752 = memref.load %arg7[%c0_141] : memref<8xf32, #tpu.memory_space<smem>>
    %cst_142 = arith.constant 9.99999974E-6 : f32
    %753 = vector.broadcast %cst_142 : f32 to vector<1x1xf32>
    %754 = arith.addf %751, %753 : vector<1x1xf32>
    %755 = math.rsqrt %754 : vector<1x1xf32>
    %756 = vector.broadcast %752 : f32 to vector<1x1xf32>
    %757 = arith.mulf %756, %755 : vector<1x1xf32>
    %c0_143 = arith.constant 0 : index
    %758 = memref.load %arg8[%c0_143] : memref<8xf32, #tpu.memory_space<smem>>
    %759 = arith.mulf %741, %757 : vector<1x1xf32>
    %760 = vector.broadcast %758 : f32 to vector<1x1xf32>
    %761 = arith.subf %760, %759 : vector<1x1xf32>
    %762 = vector.broadcast %757 : vector<1x1xf32> to vector<2x256xf32>
    %763 = arith.mulf %706, %762 : vector<2x256xf32>
    %764 = vector.broadcast %761 : vector<1x1xf32> to vector<2x256xf32>
    %765 = arith.addf %763, %764 : vector<2x256xf32>
    %c0_144 = arith.constant 0 : index
    %c0_145 = arith.constant 0 : index
    %c0_146 = arith.constant 0 : index
    %766 = vector.load %arg9[%c0_144, %c0_145, %c0_146] : memref<2x8x256xf32, #tpu.memory_space<vmem>>, vector<2x1x256xf32>
    %767 = vector.shape_cast %766 : vector<2x1x256xf32> to vector<2x256xf32>
    %768 = vector.shape_cast %765 : vector<2x256xf32> to vector<2x1x256xf32>
    tpu.vector_store %arg9[%c0_144, %c0_145, %c0_146], %768 {strides = array<i32>} : memref<2x8x256xf32, #tpu.memory_space<vmem>>, vector<2x1x256xf32>,
    %769 = vector.shape_cast %710 : vector<2x256xf32> to vector<1x2x256xf32>
    %cst_147 = arith.constant dense<0.000000e+00> : vector<1xf32>
    %770 = vector.multi_reduction <add>, %769, %cst_147 [1, 2] : vector<1x2x256xf32> to vector<1xf32>
    %771 = vector.shape_cast %770 : vector<1xf32> to vector<1x1x1xf32>
    %772 = vector.extract %771[0, 0, 0] : f32 from vector<1x1x1xf32>
    %773 = vector.broadcast %772 : f32 to vector<1x1xf32>
    %cst_148 = arith.constant 0.001953125 : f32
    %774 = vector.broadcast %cst_148 : f32 to vector<1x1xf32>
    %775 = arith.mulf %773, %774 : vector<1x1xf32>
    %776 = vector.broadcast %775 : vector<1x1xf32> to vector<2x256xf32>
    %777 = arith.subf %710, %776 : vector<2x256xf32>
    %778 = arith.mulf %777, %777 : vector<2x256xf32>
    %779 = vector.shape_cast %778 : vector<2x256xf32> to vector<1x2x256xf32>
    %cst_149 = arith.constant dense<0.000000e+00> : vector<1xf32>
    %780 = vector.multi_reduction <add>, %779, %cst_149 [1, 2] : vector<1x2x256xf32> to vector<1xf32>
    %781 = vector.shape_cast %780 : vector<1xf32> to vector<1x1x1xf32>
    %782 = vector.extract %781[0, 0, 0] : f32 from vector<1x1x1xf32>
    %783 = vector.broadcast %782 : f32 to vector<1x1xf32>
    %cst_150 = arith.constant 0.001953125 : f32
    %784 = vector.broadcast %cst_150 : f32 to vector<1x1xf32>
    %785 = arith.mulf %783, %784 : vector<1x1xf32>
    %c1_151 = arith.constant 1 : index
    %786 = memref.load %arg7[%c1_151] : memref<8xf32, #tpu.memory_space<smem>>
    %cst_152 = arith.constant 9.99999974E-6 : f32
    %787 = vector.broadcast %cst_152 : f32 to vector<1x1xf32>
    %788 = arith.addf %785, %787 : vector<1x1xf32>
    %789 = math.rsqrt %788 : vector<1x1xf32>
    %790 = vector.broadcast %786 : f32 to vector<1x1xf32>
    %791 = arith.mulf %790, %789 : vector<1x1xf32>
    %c1_153 = arith.constant 1 : index
    %792 = memref.load %arg8[%c1_153] : memref<8xf32, #tpu.memory_space<smem>>
    %793 = arith.mulf %775, %791 : vector<1x1xf32>
    %794 = vector.broadcast %792 : f32 to vector<1x1xf32>
    %795 = arith.subf %794, %793 : vector<1x1xf32>
    %796 = vector.broadcast %791 : vector<1x1xf32> to vector<2x256xf32>
    %797 = arith.mulf %710, %796 : vector<2x256xf32>
    %798 = vector.broadcast %795 : vector<1x1xf32> to vector<2x256xf32>
    %799 = arith.addf %797, %798 : vector<2x256xf32>
    %c0_154 = arith.constant 0 : index
    %c1_155 = arith.constant 1 : index
    %c0_156 = arith.constant 0 : index
    %800 = vector.load %arg9[%c0_154, %c1_155, %c0_156] : memref<2x8x256xf32, #tpu.memory_space<vmem>>, vector<2x1x256xf32>
    %801 = vector.shape_cast %800 : vector<2x1x256xf32> to vector<2x256xf32>
    %802 = vector.shape_cast %799 : vector<2x256xf32> to vector<2x1x256xf32>
    tpu.vector_store %arg9[%c0_154, %c1_155, %c0_156], %802 {strides = array<i32>} : memref<2x8x256xf32, #tpu.memory_space<vmem>>, vector<2x1x256xf32>,
    %803 = vector.shape_cast %714 : vector<2x256xf32> to vector<1x2x256xf32>
    %cst_157 = arith.constant dense<0.000000e+00> : vector<1xf32>
    %804 = vector.multi_reduction <add>, %803, %cst_157 [1, 2] : vector<1x2x256xf32> to vector<1xf32>
    %805 = vector.shape_cast %804 : vector<1xf32> to vector<1x1x1xf32>
    %806 = vector.extract %805[0, 0, 0] : f32 from vector<1x1x1xf32>
    %807 = vector.broadcast %806 : f32 to vector<1x1xf32>
    %cst_158 = arith.constant 0.001953125 : f32
    %808 = vector.broadcast %cst_158 : f32 to vector<1x1xf32>
    %809 = arith.mulf %807, %808 : vector<1x1xf32>
    %810 = vector.broadcast %809 : vector<1x1xf32> to vector<2x256xf32>
    %811 = arith.subf %714, %810 : vector<2x256xf32>
    %812 = arith.mulf %811, %811 : vector<2x256xf32>
    %813 = vector.shape_cast %812 : vector<2x256xf32> to vector<1x2x256xf32>
    %cst_159 = arith.constant dense<0.000000e+00> : vector<1xf32>
    %814 = vector.multi_reduction <add>, %813, %cst_159 [1, 2] : vector<1x2x256xf32> to vector<1xf32>
    %815 = vector.shape_cast %814 : vector<1xf32> to vector<1x1x1xf32>
    %816 = vector.extract %815[0, 0, 0] : f32 from vector<1x1x1xf32>
    %817 = vector.broadcast %816 : f32 to vector<1x1xf32>
    %cst_160 = arith.constant 0.001953125 : f32
    %818 = vector.broadcast %cst_160 : f32 to vector<1x1xf32>
    %819 = arith.mulf %817, %818 : vector<1x1xf32>
    %c2_161 = arith.constant 2 : index
    %820 = memref.load %arg7[%c2_161] : memref<8xf32, #tpu.memory_space<smem>>
    %cst_162 = arith.constant 9.99999974E-6 : f32
    %821 = vector.broadcast %cst_162 : f32 to vector<1x1xf32>
    %822 = arith.addf %819, %821 : vector<1x1xf32>
    %823 = math.rsqrt %822 : vector<1x1xf32>
    %824 = vector.broadcast %820 : f32 to vector<1x1xf32>
    %825 = arith.mulf %824, %823 : vector<1x1xf32>
    %c2_163 = arith.constant 2 : index
    %826 = memref.load %arg8[%c2_163] : memref<8xf32, #tpu.memory_space<smem>>
    %827 = arith.mulf %809, %825 : vector<1x1xf32>
    %828 = vector.broadcast %826 : f32 to vector<1x1xf32>
    %829 = arith.subf %828, %827 : vector<1x1xf32>
    %830 = vector.broadcast %825 : vector<1x1xf32> to vector<2x256xf32>
    %831 = arith.mulf %714, %830 : vector<2x256xf32>
    %832 = vector.broadcast %829 : vector<1x1xf32> to vector<2x256xf32>
    %833 = arith.addf %831, %832 : vector<2x256xf32>
    %c0_164 = arith.constant 0 : index
    %c2_165 = arith.constant 2 : index
    %c0_166 = arith.constant 0 : index
    %834 = vector.load %arg9[%c0_164, %c2_165, %c0_166] : memref<2x8x256xf32, #tpu.memory_space<vmem>>, vector<2x1x256xf32>
    %835 = vector.shape_cast %834 : vector<2x1x256xf32> to vector<2x256xf32>
    %836 = vector.shape_cast %833 : vector<2x256xf32> to vector<2x1x256xf32>
    tpu.vector_store %arg9[%c0_164, %c2_165, %c0_166], %836 {strides = array<i32>} : memref<2x8x256xf32, #tpu.memory_space<vmem>>, vector<2x1x256xf32>,
    %837 = vector.shape_cast %718 : vector<2x256xf32> to vector<1x2x256xf32>
    %cst_167 = arith.constant dense<0.000000e+00> : vector<1xf32>
    %838 = vector.multi_reduction <add>, %837, %cst_167 [1, 2] : vector<1x2x256xf32> to vector<1xf32>
    %839 = vector.shape_cast %838 : vector<1xf32> to vector<1x1x1xf32>
    %840 = vector.extract %839[0, 0, 0] : f32 from vector<1x1x1xf32>
    %841 = vector.broadcast %840 : f32 to vector<1x1xf32>
    %cst_168 = arith.constant 0.001953125 : f32
    %842 = vector.broadcast %cst_168 : f32 to vector<1x1xf32>
    %843 = arith.mulf %841, %842 : vector<1x1xf32>
    %844 = vector.broadcast %843 : vector<1x1xf32> to vector<2x256xf32>
    %845 = arith.subf %718, %844 : vector<2x256xf32>
    %846 = arith.mulf %845, %845 : vector<2x256xf32>
    %847 = vector.shape_cast %846 : vector<2x256xf32> to vector<1x2x256xf32>
    %cst_169 = arith.constant dense<0.000000e+00> : vector<1xf32>
    %848 = vector.multi_reduction <add>, %847, %cst_169 [1, 2] : vector<1x2x256xf32> to vector<1xf32>
    %849 = vector.shape_cast %848 : vector<1xf32> to vector<1x1x1xf32>
    %850 = vector.extract %849[0, 0, 0] : f32 from vector<1x1x1xf32>
    %851 = vector.broadcast %850 : f32 to vector<1x1xf32>
    %cst_170 = arith.constant 0.001953125 : f32
    %852 = vector.broadcast %cst_170 : f32 to vector<1x1xf32>
    %853 = arith.mulf %851, %852 : vector<1x1xf32>
    %c3_171 = arith.constant 3 : index
    %854 = memref.load %arg7[%c3_171] : memref<8xf32, #tpu.memory_space<smem>>
    %cst_172 = arith.constant 9.99999974E-6 : f32
    %855 = vector.broadcast %cst_172 : f32 to vector<1x1xf32>
    %856 = arith.addf %853, %855 : vector<1x1xf32>
    %857 = math.rsqrt %856 : vector<1x1xf32>
    %858 = vector.broadcast %854 : f32 to vector<1x1xf32>
    %859 = arith.mulf %858, %857 : vector<1x1xf32>
    %c3_173 = arith.constant 3 : index
    %860 = memref.load %arg8[%c3_173] : memref<8xf32, #tpu.memory_space<smem>>
    %861 = arith.mulf %843, %859 : vector<1x1xf32>
    %862 = vector.broadcast %860 : f32 to vector<1x1xf32>
    %863 = arith.subf %862, %861 : vector<1x1xf32>
    %864 = vector.broadcast %859 : vector<1x1xf32> to vector<2x256xf32>
    %865 = arith.mulf %718, %864 : vector<2x256xf32>
    %866 = vector.broadcast %863 : vector<1x1xf32> to vector<2x256xf32>
    %867 = arith.addf %865, %866 : vector<2x256xf32>
    %c0_174 = arith.constant 0 : index
    %c3_175 = arith.constant 3 : index
    %c0_176 = arith.constant 0 : index
    %868 = vector.load %arg9[%c0_174, %c3_175, %c0_176] : memref<2x8x256xf32, #tpu.memory_space<vmem>>, vector<2x1x256xf32>
    %869 = vector.shape_cast %868 : vector<2x1x256xf32> to vector<2x256xf32>
    %870 = vector.shape_cast %867 : vector<2x256xf32> to vector<2x1x256xf32>
    tpu.vector_store %arg9[%c0_174, %c3_175, %c0_176], %870 {strides = array<i32>} : memref<2x8x256xf32, #tpu.memory_space<vmem>>, vector<2x1x256xf32>,
    %871 = vector.shape_cast %722 : vector<2x256xf32> to vector<1x2x256xf32>
    %cst_177 = arith.constant dense<0.000000e+00> : vector<1xf32>
    %872 = vector.multi_reduction <add>, %871, %cst_177 [1, 2] : vector<1x2x256xf32> to vector<1xf32>
    %873 = vector.shape_cast %872 : vector<1xf32> to vector<1x1x1xf32>
    %874 = vector.extract %873[0, 0, 0] : f32 from vector<1x1x1xf32>
    %875 = vector.broadcast %874 : f32 to vector<1x1xf32>
    %cst_178 = arith.constant 0.001953125 : f32
    %876 = vector.broadcast %cst_178 : f32 to vector<1x1xf32>
    %877 = arith.mulf %875, %876 : vector<1x1xf32>
    %878 = vector.broadcast %877 : vector<1x1xf32> to vector<2x256xf32>
    %879 = arith.subf %722, %878 : vector<2x256xf32>
    %880 = arith.mulf %879, %879 : vector<2x256xf32>
    %881 = vector.shape_cast %880 : vector<2x256xf32> to vector<1x2x256xf32>
    %cst_179 = arith.constant dense<0.000000e+00> : vector<1xf32>
    %882 = vector.multi_reduction <add>, %881, %cst_179 [1, 2] : vector<1x2x256xf32> to vector<1xf32>
    %883 = vector.shape_cast %882 : vector<1xf32> to vector<1x1x1xf32>
    %884 = vector.extract %883[0, 0, 0] : f32 from vector<1x1x1xf32>
    %885 = vector.broadcast %884 : f32 to vector<1x1xf32>
    %cst_180 = arith.constant 0.001953125 : f32
    %886 = vector.broadcast %cst_180 : f32 to vector<1x1xf32>
    %887 = arith.mulf %885, %886 : vector<1x1xf32>
    %c4_181 = arith.constant 4 : index
    %888 = memref.load %arg7[%c4_181] : memref<8xf32, #tpu.memory_space<smem>>
    %cst_182 = arith.constant 9.99999974E-6 : f32
    %889 = vector.broadcast %cst_182 : f32 to vector<1x1xf32>
    %890 = arith.addf %887, %889 : vector<1x1xf32>
    %891 = math.rsqrt %890 : vector<1x1xf32>
    %892 = vector.broadcast %888 : f32 to vector<1x1xf32>
    %893 = arith.mulf %892, %891 : vector<1x1xf32>
    %c4_183 = arith.constant 4 : index
    %894 = memref.load %arg8[%c4_183] : memref<8xf32, #tpu.memory_space<smem>>
    %895 = arith.mulf %877, %893 : vector<1x1xf32>
    %896 = vector.broadcast %894 : f32 to vector<1x1xf32>
    %897 = arith.subf %896, %895 : vector<1x1xf32>
    %898 = vector.broadcast %893 : vector<1x1xf32> to vector<2x256xf32>
    %899 = arith.mulf %722, %898 : vector<2x256xf32>
    %900 = vector.broadcast %897 : vector<1x1xf32> to vector<2x256xf32>
    %901 = arith.addf %899, %900 : vector<2x256xf32>
    %c0_184 = arith.constant 0 : index
    %c4_185 = arith.constant 4 : index
    %c0_186 = arith.constant 0 : index
    %902 = vector.load %arg9[%c0_184, %c4_185, %c0_186] : memref<2x8x256xf32, #tpu.memory_space<vmem>>, vector<2x1x256xf32>
    %903 = vector.shape_cast %902 : vector<2x1x256xf32> to vector<2x256xf32>
    %904 = vector.shape_cast %901 : vector<2x256xf32> to vector<2x1x256xf32>
    tpu.vector_store %arg9[%c0_184, %c4_185, %c0_186], %904 {strides = array<i32>} : memref<2x8x256xf32, #tpu.memory_space<vmem>>, vector<2x1x256xf32>,
    %905 = vector.shape_cast %726 : vector<2x256xf32> to vector<1x2x256xf32>
    %cst_187 = arith.constant dense<0.000000e+00> : vector<1xf32>
    %906 = vector.multi_reduction <add>, %905, %cst_187 [1, 2] : vector<1x2x256xf32> to vector<1xf32>
    %907 = vector.shape_cast %906 : vector<1xf32> to vector<1x1x1xf32>
    %908 = vector.extract %907[0, 0, 0] : f32 from vector<1x1x1xf32>
    %909 = vector.broadcast %908 : f32 to vector<1x1xf32>
    %cst_188 = arith.constant 0.001953125 : f32
    %910 = vector.broadcast %cst_188 : f32 to vector<1x1xf32>
    %911 = arith.mulf %909, %910 : vector<1x1xf32>
    %912 = vector.broadcast %911 : vector<1x1xf32> to vector<2x256xf32>
    %913 = arith.subf %726, %912 : vector<2x256xf32>
    %914 = arith.mulf %913, %913 : vector<2x256xf32>
    %915 = vector.shape_cast %914 : vector<2x256xf32> to vector<1x2x256xf32>
    %cst_189 = arith.constant dense<0.000000e+00> : vector<1xf32>
    %916 = vector.multi_reduction <add>, %915, %cst_189 [1, 2] : vector<1x2x256xf32> to vector<1xf32>
    %917 = vector.shape_cast %916 : vector<1xf32> to vector<1x1x1xf32>
    %918 = vector.extract %917[0, 0, 0] : f32 from vector<1x1x1xf32>
    %919 = vector.broadcast %918 : f32 to vector<1x1xf32>
    %cst_190 = arith.constant 0.001953125 : f32
    %920 = vector.broadcast %cst_190 : f32 to vector<1x1xf32>
    %921 = arith.mulf %919, %920 : vector<1x1xf32>
    %c5_191 = arith.constant 5 : index
    %922 = memref.load %arg7[%c5_191] : memref<8xf32, #tpu.memory_space<smem>>
    %cst_192 = arith.constant 9.99999974E-6 : f32
    %923 = vector.broadcast %cst_192 : f32 to vector<1x1xf32>
    %924 = arith.addf %921, %923 : vector<1x1xf32>
    %925 = math.rsqrt %924 : vector<1x1xf32>
    %926 = vector.broadcast %922 : f32 to vector<1x1xf32>
    %927 = arith.mulf %926, %925 : vector<1x1xf32>
    %c5_193 = arith.constant 5 : index
    %928 = memref.load %arg8[%c5_193] : memref<8xf32, #tpu.memory_space<smem>>
    %929 = arith.mulf %911, %927 : vector<1x1xf32>
    %930 = vector.broadcast %928 : f32 to vector<1x1xf32>
    %931 = arith.subf %930, %929 : vector<1x1xf32>
    %932 = vector.broadcast %927 : vector<1x1xf32> to vector<2x256xf32>
    %933 = arith.mulf %726, %932 : vector<2x256xf32>
    %934 = vector.broadcast %931 : vector<1x1xf32> to vector<2x256xf32>
    %935 = arith.addf %933, %934 : vector<2x256xf32>
    %c0_194 = arith.constant 0 : index
    %c5_195 = arith.constant 5 : index
    %c0_196 = arith.constant 0 : index
    %936 = vector.load %arg9[%c0_194, %c5_195, %c0_196] : memref<2x8x256xf32, #tpu.memory_space<vmem>>, vector<2x1x256xf32>
    %937 = vector.shape_cast %936 : vector<2x1x256xf32> to vector<2x256xf32>
    %938 = vector.shape_cast %935 : vector<2x256xf32> to vector<2x1x256xf32>
    tpu.vector_store %arg9[%c0_194, %c5_195, %c0_196], %938 {strides = array<i32>} : memref<2x8x256xf32, #tpu.memory_space<vmem>>, vector<2x1x256xf32>,
    %939 = vector.shape_cast %730 : vector<2x256xf32> to vector<1x2x256xf32>
    %cst_197 = arith.constant dense<0.000000e+00> : vector<1xf32>
    %940 = vector.multi_reduction <add>, %939, %cst_197 [1, 2] : vector<1x2x256xf32> to vector<1xf32>
    %941 = vector.shape_cast %940 : vector<1xf32> to vector<1x1x1xf32>
    %942 = vector.extract %941[0, 0, 0] : f32 from vector<1x1x1xf32>
    %943 = vector.broadcast %942 : f32 to vector<1x1xf32>
    %cst_198 = arith.constant 0.001953125 : f32
    %944 = vector.broadcast %cst_198 : f32 to vector<1x1xf32>
    %945 = arith.mulf %943, %944 : vector<1x1xf32>
    %946 = vector.broadcast %945 : vector<1x1xf32> to vector<2x256xf32>
    %947 = arith.subf %730, %946 : vector<2x256xf32>
    %948 = arith.mulf %947, %947 : vector<2x256xf32>
    %949 = vector.shape_cast %948 : vector<2x256xf32> to vector<1x2x256xf32>
    %cst_199 = arith.constant dense<0.000000e+00> : vector<1xf32>
    %950 = vector.multi_reduction <add>, %949, %cst_199 [1, 2] : vector<1x2x256xf32> to vector<1xf32>
    %951 = vector.shape_cast %950 : vector<1xf32> to vector<1x1x1xf32>
    %952 = vector.extract %951[0, 0, 0] : f32 from vector<1x1x1xf32>
    %953 = vector.broadcast %952 : f32 to vector<1x1xf32>
    %cst_200 = arith.constant 0.001953125 : f32
    %954 = vector.broadcast %cst_200 : f32 to vector<1x1xf32>
    %955 = arith.mulf %953, %954 : vector<1x1xf32>
    %c6_201 = arith.constant 6 : index
    %956 = memref.load %arg7[%c6_201] : memref<8xf32, #tpu.memory_space<smem>>
    %cst_202 = arith.constant 9.99999974E-6 : f32
    %957 = vector.broadcast %cst_202 : f32 to vector<1x1xf32>
    %958 = arith.addf %955, %957 : vector<1x1xf32>
    %959 = math.rsqrt %958 : vector<1x1xf32>
    %960 = vector.broadcast %956 : f32 to vector<1x1xf32>
    %961 = arith.mulf %960, %959 : vector<1x1xf32>
    %c6_203 = arith.constant 6 : index
    %962 = memref.load %arg8[%c6_203] : memref<8xf32, #tpu.memory_space<smem>>
    %963 = arith.mulf %945, %961 : vector<1x1xf32>
    %964 = vector.broadcast %962 : f32 to vector<1x1xf32>
    %965 = arith.subf %964, %963 : vector<1x1xf32>
    %966 = vector.broadcast %961 : vector<1x1xf32> to vector<2x256xf32>
    %967 = arith.mulf %730, %966 : vector<2x256xf32>
    %968 = vector.broadcast %965 : vector<1x1xf32> to vector<2x256xf32>
    %969 = arith.addf %967, %968 : vector<2x256xf32>
    %c0_204 = arith.constant 0 : index
    %c6_205 = arith.constant 6 : index
    %c0_206 = arith.constant 0 : index
    %970 = vector.load %arg9[%c0_204, %c6_205, %c0_206] : memref<2x8x256xf32, #tpu.memory_space<vmem>>, vector<2x1x256xf32>
    %971 = vector.shape_cast %970 : vector<2x1x256xf32> to vector<2x256xf32>
    %972 = vector.shape_cast %969 : vector<2x256xf32> to vector<2x1x256xf32>
    tpu.vector_store %arg9[%c0_204, %c6_205, %c0_206], %972 {strides = array<i32>} : memref<2x8x256xf32, #tpu.memory_space<vmem>>, vector<2x1x256xf32>,
    %973 = vector.shape_cast %734 : vector<2x256xf32> to vector<1x2x256xf32>
    %cst_207 = arith.constant dense<0.000000e+00> : vector<1xf32>
    %974 = vector.multi_reduction <add>, %973, %cst_207 [1, 2] : vector<1x2x256xf32> to vector<1xf32>
    %975 = vector.shape_cast %974 : vector<1xf32> to vector<1x1x1xf32>
    %976 = vector.extract %975[0, 0, 0] : f32 from vector<1x1x1xf32>
    %977 = vector.broadcast %976 : f32 to vector<1x1xf32>
    %cst_208 = arith.constant 0.001953125 : f32
    %978 = vector.broadcast %cst_208 : f32 to vector<1x1xf32>
    %979 = arith.mulf %977, %978 : vector<1x1xf32>
    %980 = vector.broadcast %979 : vector<1x1xf32> to vector<2x256xf32>
    %981 = arith.subf %734, %980 : vector<2x256xf32>
    %982 = arith.mulf %981, %981 : vector<2x256xf32>
    %983 = vector.shape_cast %982 : vector<2x256xf32> to vector<1x2x256xf32>
    %cst_209 = arith.constant dense<0.000000e+00> : vector<1xf32>
    %984 = vector.multi_reduction <add>, %983, %cst_209 [1, 2] : vector<1x2x256xf32> to vector<1xf32>
    %985 = vector.shape_cast %984 : vector<1xf32> to vector<1x1x1xf32>
    %986 = vector.extract %985[0, 0, 0] : f32 from vector<1x1x1xf32>
    %987 = vector.broadcast %986 : f32 to vector<1x1xf32>
    %cst_210 = arith.constant 0.001953125 : f32
    %988 = vector.broadcast %cst_210 : f32 to vector<1x1xf32>
    %989 = arith.mulf %987, %988 : vector<1x1xf32>
    %c7_211 = arith.constant 7 : index
    %990 = memref.load %arg7[%c7_211] : memref<8xf32, #tpu.memory_space<smem>>
    %cst_212 = arith.constant 9.99999974E-6 : f32
    %991 = vector.broadcast %cst_212 : f32 to vector<1x1xf32>
    %992 = arith.addf %989, %991 : vector<1x1xf32>
    %993 = math.rsqrt %992 : vector<1x1xf32>
    %994 = vector.broadcast %990 : f32 to vector<1x1xf32>
    %995 = arith.mulf %994, %993 : vector<1x1xf32>
    %c7_213 = arith.constant 7 : index
    %996 = memref.load %arg8[%c7_213] : memref<8xf32, #tpu.memory_space<smem>>
    %997 = arith.mulf %979, %995 : vector<1x1xf32>
    %998 = vector.broadcast %996 : f32 to vector<1x1xf32>
    %999 = arith.subf %998, %997 : vector<1x1xf32>
    %1000 = vector.broadcast %995 : vector<1x1xf32> to vector<2x256xf32>
    %1001 = arith.mulf %734, %1000 : vector<2x256xf32>
    %1002 = vector.broadcast %999 : vector<1x1xf32> to vector<2x256xf32>
    %1003 = arith.addf %1001, %1002 : vector<2x256xf32>
    %c0_214 = arith.constant 0 : index
    %c7_215 = arith.constant 7 : index
    %c0_216 = arith.constant 0 : index
    %1004 = vector.load %arg9[%c0_214, %c7_215, %c0_216] : memref<2x8x256xf32, #tpu.memory_space<vmem>>, vector<2x1x256xf32>
    %1005 = vector.shape_cast %1004 : vector<2x1x256xf32> to vector<2x256xf32>
    %1006 = vector.shape_cast %1003 : vector<2x256xf32> to vector<2x1x256xf32>
    tpu.vector_store %arg9[%c0_214, %c7_215, %c0_216], %1006 {strides = array<i32>} : memref<2x8x256xf32, #tpu.memory_space<vmem>>, vector<2x1x256xf32>,
    return
  }
}

</mosaic_0001>

<bundles_post_ra>
// kernel: tpu_custom_call.1
= control target key start
LH: loop header
LB: loop body
LE: loop exit
PB: predicated region body
PF: predicated region fallthrough
CT: control target
= control target key end

     0   :  { %14 = vsyncpa [#allocation4], 0  ;;  %s10081_s0 = inlined_call_operand.vmem [shape: f32[2,4,20,20], index: 0, kind: input, shape index: {}]   ;;  %s10082_s1 = inlined_call_operand.vmem [shape: f32[36], index: 1, kind: input, shape index: {}]   ;;  %s10083_s2 = inlined_call_operand.vmem [shape: f32[16], index: 2, kind: input, shape index: {}]   ;;  %s10084_s3 = inlined_call_operand.vmem [shape: f32[4], index: 3, kind: input, shape index: {}]   ;;  %s10085_s4 = inlined_call_operand.vmem [shape: f32[4], index: 4, kind: input, shape index: {}]   ;;  %s10086_s5 = inlined_call_operand.vmem [shape: f32[36], index: 5, kind: input, shape index: {}]   ;;  %s10087_s6 = inlined_call_operand.vmem [shape: f32[32], index: 6, kind: input, shape index: {}]   ;;  %s10088_s7 = inlined_call_operand.vmem [shape: f32[8], index: 7, kind: input, shape index: {}]   ;;  %s10089_s8 = inlined_call_operand.vmem [shape: f32[8], index: 8, kind: input, shape index: {}]   ;;  %s10090_s9 = inlined_call_operand.hbm [shape: f32[2,8,256], index: 9, kind: output, shape index: {}]  }
   0x1   :  { %15 = vsyncpa [#allocation6], 0 }
   0x2   :  { %16 = vsyncpa [#allocation9], 0 }
   0x3   :  { %17 = vsyncpa [#allocation12], 0 }
   0x4   :  { %18 = vsyncpa [#allocation15], 0  ;;  %s38_s11 = sshll.u32 %s10083_s2, 4  ;;  %s39_s11 = int_to_ptr.vmem [resolvable:$true] %s38_s11 }
   0x5   :  { %19 = vsyncpa [#allocation3], 0  ;;  %s58_s14 = sshll.u32 %s10085_s4, 4  ;;  %s5227_s15 = scalar_lea.vmem %s39_s11, 16  ;;  %s59_s14 = int_to_ptr.vmem [resolvable:$true] %s58_s14 }
   0x6   :  { %p5228_p0 = scmp.ne.s32.totalorder %s39_s11, %s5227_s15  ;;  %p5232_p1 = scmp.lt.s32.totalorder %s39_s11, %s39_s11 }
   0x7   :  { %p5233_p2 = scmp.lt.s32.totalorder %s5227_s15, %s5227_s15 }
   0x9   :  { %p5234_p3 = por %p5233_p2, %p5232_p1 }
   0xb   :  { %p5235_p4 = pnand %p5234_p3, %p5228_p0 }
   0xd   :  { %5238 = shalt.err (!%p5235_p4)
}
   0xe   :  { %s5357_s16 = smov [#allocation5]   ;;  %s5239_s17 = scalar_lea.vmem %s59_s14, 16 }
   0xf   :  { %41 = dma.vmem_to_smem %s39_s11, 16, %s5357_s16, [#allocation6]  }
  0x10   :  { %p5240_p5 = scmp.ne.s32.totalorder %s59_s14, %s5239_s17  ;;  %p5244_p6 = scmp.lt.s32.totalorder %s59_s14, %s59_s14 }
  0x11   :  { %p5245_p7 = scmp.lt.s32.totalorder %s5239_s17, %s5239_s17 }
  0x13   :  { %p5246_p8 = por %p5245_p7, %p5244_p6 }
  0x15   :  { %p5247_p9 = pnand %p5246_p8, %p5240_p5 }
  0x17   :  { %5250 = shalt.err (!%p5247_p9)
}
  0x18   :  { %s5358_s2 = smov [#allocation8]   ;;  %s78_s19 = sshll.u32 %s10087_s6, 4  ;;  %s79_s19 = int_to_ptr.vmem [resolvable:$true] %s78_s19 }
  0x19   :  { %61 = dma.vmem_to_smem %s59_s14, 16, %s5358_s2, [#allocation9]  }
  0x1a   :  { %s28_s22 = sshll.u32 %s10082_s1, 4  ;;  %s5251_s23 = scalar_lea.vmem %s79_s19, 16  ;;  %s29_s22 = int_to_ptr.vmem [resolvable:$true] %s28_s22 }
  0x1b   :  { %p5252_p10 = scmp.ne.s32.totalorder %s79_s19, %s5251_s23  ;;  %p5256_p11 = scmp.lt.s32.totalorder %s79_s19, %s79_s19 }
  0x1c   :  { %p5257_p12 = scmp.lt.s32.totalorder %s5251_s23, %s5251_s23 }
  0x1e   :  { %p5258_p13 = por %p5257_p12, %p5256_p11 }
  0x20   :  { %p5259_p0 = pnand %p5258_p13, %p5252_p10 }
  0x22   :  { %5262 = shalt.err (!%p5259_p0)
}
  0x23   :  { %s5359_s24 = smov [#allocation11]   ;;  %s5263_s25 = scalar_lea.vmem %s29_s22, 16 }
  0x24   :  { %81 = dma.vmem_to_smem %s79_s19, 16, %s5359_s24, [#allocation12]  }
  0x25   :  { %p5264_p1 = scmp.ne.s32.totalorder %s29_s22, %s5263_s25  ;;  %p5268_p2 = scmp.lt.s32.totalorder %s29_s22, %s29_s22 }
  0x26   :  { %p5269_p3 = scmp.lt.s32.totalorder %s5263_s25, %s5263_s25 }
  0x28   :  { %p5270_p4 = por %p5269_p3, %p5268_p2 }
  0x2a   :  { %p5271_p5 = pnand %p5270_p4, %p5264_p1 }
  0x2c   :  { %5274 = shalt.err (!%p5271_p5)
}
  0x2d   :  { %s5360_s6 = smov [#allocation2]   ;;  %s48_s27 = sshll.u32 %s10084_s3, 4  ;;  %s49_s27 = int_to_ptr.vmem [resolvable:$true] %s48_s27 }
  0x2e   :  { %31 = dma.vmem_to_smem %s29_s22, 16, %s5360_s6, [#allocation4]  }
  0x2f   :  { %s68_s30 = sshll.u32 %s10086_s5, 4  ;;  %s5275_s10 = scalar_lea.vmem %s49_s27, 16  ;;  %s69_s30 = int_to_ptr.vmem [resolvable:$true] %s68_s30 }
  0x30   :  { %p5276_p6 = scmp.ne.s32.totalorder %s49_s27, %s5275_s10  ;;  %p5280_p7 = scmp.lt.s32.totalorder %s49_s27, %s49_s27 }
  0x31   :  { %p5281_p8 = scmp.lt.s32.totalorder %s5275_s10, %s5275_s10 }
  0x33   :  { %p5282_p9 = por %p5281_p8, %p5280_p7 }
  0x35   :  { %p5283_p10 = pnand %p5282_p9, %p5276_p6 }
  0x37   :  { %5286 = shalt.err (!%p5283_p10)
}
  0x38   :  { %s5361_s11 = smov [#allocation7]   ;;  %s5287_s12 = scalar_lea.vmem %s69_s30, 16 }
  0x39   :  { %51 = dma.vmem_to_smem %s49_s27, 16, %s5361_s11, [#allocation6]  }
  0x3a   :  { %p5288_p11 = scmp.ne.s32.totalorder %s69_s30, %s5287_s12  ;;  %p5292_p12 = scmp.lt.s32.totalorder %s69_s30, %s69_s30 }
  0x3b   :  { %p5293_p13 = scmp.lt.s32.totalorder %s5287_s12, %s5287_s12 }
  0x3d   :  { %p5294_p0 = por %p5293_p13, %p5292_p12 }
  0x3f   :  { %p5295_p1 = pnand %p5294_p0, %p5288_p11 }
  0x41   :  { %5298 = shalt.err (!%p5295_p1)
}
  0x42   :  { %s5362_s3 = smov [#allocation10]   ;;  %s88_s14 = sshll.u32 %s10088_s7, 4  ;;  %s89_s14 = int_to_ptr.vmem [resolvable:$true] %s88_s14 }
  0x43   :  { %71 = dma.vmem_to_smem %s69_s30, 16, %s5362_s3, [#allocation9]  }
  0x44   :  { %s98_s17 = sshll.u32 %s10089_s8, 4  ;;  %s5299_s2 = scalar_lea.vmem %s89_s14, 16  ;;  %s99_s17 = int_to_ptr.vmem [resolvable:$true] %s98_s17 }
  0x45   :  { %p5300_p2 = scmp.ne.s32.totalorder %s89_s14, %s5299_s2  ;;  %p5304_p3 = scmp.lt.s32.totalorder %s89_s14, %s89_s14 }
  0x46   :  { %p5305_p4 = scmp.lt.s32.totalorder %s5299_s2, %s5299_s2 }
  0x48   :  { %p5306_p5 = por %p5305_p4, %p5304_p3 }
  0x4a   :  { %p5307_p6 = pnand %p5306_p5, %p5300_p2 }
  0x4c   :  { %5310 = shalt.err (!%p5307_p6)
}
  0x4d   :  { %s5363_s4 = smov [#allocation13]   ;;  %s5311_s18 = scalar_lea.vmem %s99_s17, 16 }
  0x4e   :  { %91 = dma.vmem_to_smem %s89_s14, 16, %s5363_s4, [#allocation12]  }
  0x4f   :  { %p5312_p7 = scmp.ne.s32.totalorder %s99_s17, %s5311_s18  ;;  %p5316_p8 = scmp.lt.s32.totalorder %s99_s17, %s99_s17 }
  0x50   :  { %p5317_p9 = scmp.lt.s32.totalorder %s5311_s18, %s5311_s18 }
  0x52   :  { %p5318_p10 = por %p5317_p9, %p5316_p8 }
  0x54   :  { %p5319_p11 = pnand %p5318_p10, %p5312_p7 }
  0x56   :  { %5322 = shalt.err (!%p5319_p11)
}
  0x57   :  { %s5364_s7 = smov [#allocation14]  }
  0x58   :  { %101 = dma.vmem_to_smem %s99_s17, 16, %s5364_s7, [#allocation15]  }
  0x59   :  { %5345 = dma.done.wait [#allocation4], 16  }
  0x5a   :  { %5346 = vsyncadd [#allocation4], 4294967280 }
  0x5b   :  { %5347 = dma.done.wait [#allocation6], 32  }
  0x5c   :  { %5348 = vsyncadd [#allocation6], 4294967264 }
  0x5d   :  { %5349 = dma.done.wait [#allocation9], 32  }
  0x5e   :  { %5350 = vsyncadd [#allocation9], 4294967264 }
  0x5f   :  { %5351 = dma.done.wait [#allocation12], 32  }
  0x60   :  { %5352 = vsyncadd [#allocation12], 4294967264 }
  0x61   :  { %5353 = dma.done.wait [#allocation15], 16  }
  0x62   :  { %5354 = vsyncadd [#allocation15], 4294967280 }
  0x63   :  { %126 = sfence }
  0x64   :  { %v4989_v0 = vld [vmem:[%s10081_s0 + $0x18] sm:$0xff]  ;;  %s4996_s20 = sld [smem:[#allocation2 + $0xa]]  ;;  %v156_v1 = vld [vmem:[%s10081_s0] sm:$0xff]  ;;  %s4978_s23 = sld [smem:[#allocation2 + $0x1]]  ;;  %v157_v4 = vld [vmem:[%s10081_s0 + $0x8] sm:$0xff]  ;;  %vm266_vm0 = vcmask 1046528  }
  0x65   :  { %v4990_v2 = vld [vmem:[%s10081_s0 + $0x20] sm:$0xff]  ;;  %s4979_s6 = sld [smem:[#allocation2 + $0x2]]  ;;  %v5463_v3 = vmax.f32 %v4989_v0, 0.0  ;;  %v5468_v5 = vmax.f32 %v156_v1, 0.0  ;;  %v5474_v8 = vmax.f32 %v157_v4, 0.0  ;;  %s5365_s29 = smov 127  }
  0x66   :  { %v5470_v6 = vmax.f32 %v4990_v2, 0.0  ;;  %v158_v11 = vld [vmem:[%s10081_s0 + $0x10] sm:$0xf]  ;;  %v4991_v17 = vld [vmem:[%s10081_s0 + $0x28] sm:$0xf]  ;;  %s4997_s11 = sld [smem:[#allocation2 + $0xb]] }
  0x67   :  { %v5493_v16 = vmax.f32 %v158_v11, 0.0  ;;  %v5501_v19 = vmax.f32 %v4991_v17, 0.0  ;;  %s5015_s12 = sld [smem:[#allocation2 + $0x13]]  ;;  %s5366_s3 = smov 126   ;;  %v5009_v24 = vld [vmem:[%s10081_s0 + $0x38] sm:$0xff]  ;;  %v5008_v25 = vld [vmem:[%s10081_s0 + $0x30] sm:$0xff] }
  0x68   :  { %v5523_v27 = vmax.f32 %v5009_v24, 0.0  ;;  %v5530_v30 = vmax.f32 %v5008_v25, 0.0  ;;  %v159_v31 = vld [vmem:[%s10081_s0 + $0x60] sm:$0xff]  ;;  %s5016_s2 = sld [smem:[#allocation2 + $0x14]]  ;;  %v4992_v35 = vld [vmem:[%s10081_s0 + $0x78] sm:$0xff]  ;;  %v5027_v44 = vld [vmem:[%s10081_s0 + $0x48] sm:$0xff] }
  0x69   :  { %v5541_v34 = vmax.f32 %v159_v31, 0.0  ;;  %v5552_v38 = vmax.f32 %v4992_v35, 0.0  ;;  %s5034_s7 = sld [smem:[#allocation2 + $0x1c]]  ;;  %v5010_v39 = vld [vmem:[%s10081_s0 + $0x40] sm:$0xf]  ;;  %v5573_v46 = vmax.f32 %v5027_v44, 0.0 }
  0x6a   :  { %v5472_v7 = vstv %s4996_s20  ;;  %v5478_v10 = vstv %s4978_s23  ;;  %s4981_s20 = sld [smem:[#allocation2 + $0x4]]  ;;  %v5565_v43 = vmax.f32 %v5010_v39, 0.0  ;;  %v160_v49 = vld [vmem:[%s10081_s0 + $0x68] sm:$0xff]  ;;  %v5028_v50 = vld [vmem:[%s10081_s0 + $0x50] sm:$0xff]  ;;  %s4999_s1 = sld [smem:[#allocation2 + $0xd]]  ;;  %vm399_vm1 = vcmask 1045504  }
  0x6b   :  { %v579_v9 = vmul.f32 %v5472_v7, %v5463_v3  ;;  %v178_v12 = vmul.f32 %v5478_v10, %v5468_v5  ;;  %v580_v13 = vmul.f32 %v5472_v7, %v5470_v6  ;;  %v179_v14 = vmul.f32 %v5478_v10, %v5474_v8  ;;  %v4993_v62 = vld [vmem:[%s10081_s0 + $0x80] sm:$0xff]  ;;  %s4982_s5 = sld [smem:[#allocation2 + $0x5]]  ;;  %v161_v39 = vld [vmem:[%s10081_s0 + $0x70] sm:$0xf]  ;;  %s5000_s15 = sld [smem:[#allocation2 + $0xe]] }
  0x6c   :  { %v5491_v15 = vstv %s4979_s6  ;;  %v180_v20 = vmul.f32 %v5478_v10, %v5493_v16  ;;  %v581_v21 = vmul.f32 %v5472_v7, %v5501_v19  ;;  %v5512_v23 = vstv %s4997_s11  ;;  %s5019_s19 = sld [smem:[#allocation2 + $0x17]]  ;;  %s5002_s6 = sld [smem:[#allocation2 + $0x10]] }
  0x6d   :  { %591 = vrot.lane.b32.xlu1 %v579_v9, %s5365_s29  ;;  %190 = vrot.lane.b32.xlu0 %v178_v12, %s5365_s29  ;;  %v216_v18 = vmul.f32 %v5491_v15, %v5468_v5  ;;  %v217_v22 = vmul.f32 %v5491_v15, %v5474_v8  ;;  %v618_v26 = vmul.f32 %v5512_v23, %v5470_v6  ;;  %v5528_v29 = vstv %s5015_s12  ;;  %s5035_s12 = sld [smem:[#allocation2 + $0x1d]]  ;;  %s5037_s22 = sld [smem:[#allocation2 + $0x1f]] }
  0x6e   :  { %v617_v28 = vmul.f32 %v5512_v23, %v5463_v3  ;;  %v1003_v32 = vmul.f32 %v5528_v29, %v5523_v27  ;;  %v1002_v33 = vmul.f32 %v5528_v29, %v5530_v30  ;;  %v218_v36 = vmul.f32 %v5491_v15, %v5493_v16  ;;  %s4984_s25 = sld [smem:[#allocation2 + $0x7]]  ;;  %s5003_s28 = sld [smem:[#allocation2 + $0x11]] }
  0x6f   :  { %v181_v37 = vmul.f32 %v5478_v10, %v5541_v34  ;;  %v619_v40 = vmul.f32 %v5512_v23, %v5501_v19  ;;  %v582_v41 = vmul.f32 %v5472_v7, %v5552_v38  ;;  %v5563_v42 = vstv %s5016_s2  ;;  %s5018_s2 = sld [smem:[#allocation2 + $0x16]]  ;;  %s5021_s30 = sld [smem:[#allocation2 + $0x19]] }
  0x70   :  { %v1040_v45 = vmul.f32 %v5563_v42, %v5530_v30  ;;  %v1004_v47 = vmul.f32 %v5528_v29, %v5565_v43  ;;  %v5578_v48 = vstv %s5034_s7  ;;  %v5586_v51 = vstv %s4981_s20  ;;  %s5022_s10 = sld [smem:[#allocation2 + $0x1a]]  ;;  %s4980_s13 = sld [smem:[#allocation2 + $0x3]] }
  0x71   :  { %593 = vrot.lane.b32.xlu1 %v580_v13, %s5365_s29  ;;  %192 = vrot.lane.b32.xlu0 %v179_v14, %s5365_s29  ;;  %v1425_v52 = vmul.f32 %v5578_v48, %v5573_v46  ;;  %v5591_v53 = vmax.f32 %v160_v49, 0.0  ;;  %v1041_v54 = vmul.f32 %v5563_v42, %v5523_v27  ;;  %v5596_v55 = vmax.f32 %v5028_v50, 0.0  ;;  %s5040_s11 = sld [smem:[#allocation2 + $0x22]]  ;;  %s168_s14 = sld [smem:[#allocation2]] }
  0x72   :  { %v291_v56 = vmul.f32 %v5586_v51, %v5468_v5  ;;  %v292_v57 = vmul.f32 %v5586_v51, %v5474_v8  ;;  %v5613_v63 = vmul.f32 %v5586_v51, %v5493_v16  ;;  %v5615_v0 = vstv %s4999_s1  ;;  %s5038_s1 = sld [smem:[#allocation2 + $0x20]]  ;;  %s4998_s16 = sld [smem:[#allocation2 + $0xc]] }
  0x73   :  { %v182_v58 = vmul.f32 %v5478_v10, %v5591_v53  ;;  %v1426_v59 = vmul.f32 %v5578_v48, %v5596_v55  ;;  %v5618_v1 = vmax.f32 %v4993_v62, 0.0  ;;  %v219_v4 = vmul.f32 %v5491_v15, %v5541_v34  ;;  %s6452_s17 = sld [smem:[#allocation2 + $0x1b]]  ;;  %s6520_s4 = sld [smem:[#allocation2 + $0x15]] }
  0x74   :  { %v303_v60 = vrot.slane %v291_v56, 1  ;;  %v304_v61 = vrot.slane %v292_v57, 1  ;;  %v691_v9 = vmul.f32 %v5615_v0, %v5463_v3  ;;  %v692_v11 = vmul.f32 %v5615_v0, %v5470_v6  ;;  %v4994_v57 = vld [vmem:[%s10081_s0 + $0x88] sm:$0xf]  ;;  %s6583_s18 = sld [smem:[#allocation2 + $0xf]]  ;;  %s6703_s7 = sld [smem:[#allocation2 + $0x1e]] }
  0x75   :  { %228 = vrot.lane.b32.xlu1 %v216_v18, %s5366_s3  ;;  %194 = vrot.lane.b32.xlu0 %v180_v20, %s5365_s29  ;;  %v306_v12 = vrot.slane %v5613_v63, 1  ;;  %v583_v13 = vmul.f32 %v5472_v7, %v5618_v1  ;;  %v5011_v18 = vld [vmem:[%s10081_s0 + $0x90] sm:$0xff]  ;;  %v620_v25 = vmul.f32 %v5512_v23, %v5552_v38  ;;  %v220_v50 = vmul.f32 %v5491_v15, %v5591_v53  ;;  %s6782_s8 = sld [smem:[#allocation5 + $0x8]]  ;;  %s6791_s20 = sld [smem:[#allocation5 + $0x9]] }
  0x76   :  { %v305_v2 = vsel %vm266_vm0, %v303_v60, %v304_v61  ;;  %v703_v14 = vrot.slane %v691_v9, 1  ;;  %v704_v17 = vrot.slane %v692_v11, 1  ;;  %s6793_s21 = sld [smem:[#allocation5 + $0xd]]  ;;  %s6951_s23 = sld [smem:[#allocation2 + $0x21]]  ;;  %vm1825_vm11 = vcmask 146432  }
  0x77   :  { %v307_v20 = vsel %vm266_vm0, %v304_v61, %v306_v12  ;;  %v5700_v61 = vstv %s5000_s15  ;;  %s5014_s15 = sld [smem:[#allocation2 + $0x12]]  ;;  %s7109_s24 = sld [smem:[#allocation5]]  ;;  %vm1829_vm12 = vcmask 140288   ;;  %vm2392_vm13 = vcmask 130048  }
  0x78   :  { %v705_v24 = vsel %vm266_vm0, %v703_v14, %v704_v17  ;;  %v740_v63 = vmul.f32 %v5700_v61, %v5470_v6  ;;  %v739_v9 = vmul.f32 %v5700_v61, %v5463_v3  ;;  %v5012_v14 = vld [vmem:[%s10081_s0 + $0x98] sm:$0xff]  ;;  %s7168_s26 = sld [smem:[#allocation5 + $0x1]]  ;;  %s7170_s27 = sld [smem:[#allocation5 + $0x5]]  ;;  %vm2394_vm14 = vcmask 261120  }
  0x79   :  { %595 = vrot.lane.b32.xlu1 %v581_v21, %s5365_s29  ;;  %230 = vrot.lane.b32.xlu0 %v217_v22, %s5366_s3  ;;  %v693_v21 = vmul.f32 %v5615_v0, %v5501_v19  ;;  %v5640_v22 = vmax.f32 %v5011_v18, 0.0  ;;  %vm2396_vm15 = vcmask 392192  }
  0x7a   :  { %v752_v11 = vrot.slane %v740_v63, 1  ;;  %v5776_v63 = vmul.f32 %v5615_v0, %v5618_v1 }
  0x7b   :  { %v1005_v31 = vmul.f32 %v5528_v29, %v5640_v22 }
  0x7d   :  { %631 = vrot.lane.b32.xlu1 %v618_v26, %s5366_s3  ;;  %629 = vrot.lane.b32.xlu0 %v617_v28, %s5366_s3  ;;  %v5029_v26 = vld [vmem:[%s10081_s0 + $0x58] sm:$0xf]  ;;  %v706_v28 = vrot.slane %v693_v21, 1 }
  0x81   :  { %1016 = vrot.lane.b32.xlu1 %v1003_v32, %s5365_s29  ;;  %1014 = vrot.lane.b32.xlu0 %v1002_v33, %s5365_s29  ;;  %v5652_v32 = vmax.f32 %v5029_v26, 0.0  ;;  %v707_v33 = vsel %vm266_vm0, %v704_v17, %v706_v28  ;;  %v5720_v17 = vstv %s5018_s2  ;;  %s6483_s2 = sld [smem:[#allocation2 + $0x6]] }
  0x82   :  { %v1115_v21 = vmul.f32 %v5720_v17, %v5523_v27  ;;  %v1114_v26 = vmul.f32 %v5720_v17, %v5530_v30 }
  0x83   :  { %v1427_v35 = vmul.f32 %v5578_v48, %v5652_v32 }
  0x85   :  { %232 = vrot.lane.b32.xlu1 %v218_v36, %s5366_s3  ;;  %196 = vrot.lane.b32.xlu0 %v181_v37, %s5365_s29  ;;  %v1042_v36 = vmul.f32 %v5563_v42, %v5565_v43  ;;  %v5662_v37 = vstv %s5035_s12  ;;  %s5041_s12 = sld [smem:[#allocation2 + $0x23]] }
  0x86   :  { %v1463_v44 = vmul.f32 %v5662_v37, %v5573_v46 }
  0x89   :  { %633 = vrot.lane.b32.xlu1 %v619_v40, %s5366_s3  ;;  %597 = vrot.lane.b32.xlu0 %v582_v41, %s5365_s29  ;;  %v5667_v40 = vstv %s4982_s5  ;;  %v1464_v41 = vmul.f32 %v5662_v37, %v5596_v55  ;;  %s4995_s5 = sld [smem:[#allocation2 + $0x9]] }
  0x8a   :  { %v340_v49 = vmul.f32 %v5667_v40, %v5474_v8 }
  0x8c   :  { %v352_v56 = vrot.slane %v340_v49, 1  ;;  %v5755_v49 = vmul.f32 %v5586_v51, %v5591_v53 }
  0x8d   :  { %1052 = vrot.lane.b32.xlu1 %v1040_v45, %s5366_s3  ;;  %1018 = vrot.lane.b32.xlu0 %v1004_v47, %s5365_s29  ;;  %v5675_v45 = vmax.f32 %v161_v39, 0.0  ;;  %v339_v47 = vmul.f32 %v5667_v40, %v5468_v5  ;;  %v5030_v39 = vld [vmem:[%s10081_s0 + $0xa8] sm:$0xff] }
  0x91   :  { %1437 = vrot.lane.b32.xlu1 %v1425_v52, %s5365_s29  ;;  %1054 = vrot.lane.b32.xlu0 %v1041_v54, %s5366_s3  ;;  %v183_v52 = vmul.f32 %v5478_v10, %v5675_v45  ;;  %v351_v54 = vrot.slane %v339_v47, 1  ;;  %v294_v47 = vmul.f32 %v5586_v51, %v5541_v34 }
  0x93   :  { %v353_v60 = vsel %vm266_vm0, %v351_v54, %v352_v56 }
  0x95   :  { %198 = vrot.lane.b32.xlu1 %v182_v58, %s5365_s29  ;;  %1439 = vrot.lane.b32.xlu0 %v1426_v59, %s5365_s29  ;;  %v5692_v58 = vmul.f32 %v5667_v40, %v5493_v16  ;;  %v5695_v59 = vmax.f32 %v4994_v57, 0.0  ;;  %v309_v57 = vrot.slane %v5755_v49, 1 }
  0x97   :  { %v354_v10 = vrot.slane %v5692_v58, 1  ;;  %v584_v62 = vmul.f32 %v5472_v7, %v5695_v59  ;;  %v621_v7 = vmul.f32 %v5512_v23, %v5618_v1 }
  0x99   :  { %313 = vrot.lane.b32.xlu1 %v305_v2, %s5365_s29  ;;  %234 = vrot.lane.b32.xlu0 %v219_v4, %s5366_s3  ;;  %v741_v2 = vmul.f32 %v5700_v61, %v5501_v19  ;;  %v355_v4 = vsel %vm266_vm0, %v352_v56, %v354_v10  ;;  %v308_v56 = vrot.slane %v294_v47, 1 }
  0x9b   :  { %v310_v58 = vsel %vm266_vm0, %v308_v56, %v309_v57 }
  0x9d   :  { %599 = vrot.lane.b32.xlu1 %v583_v13, %s5365_s29  ;;  %315 = vrot.lane.b32.xlu0 %v307_v20, %s5365_s29  ;;  %v751_v13 = vrot.slane %v739_v9, 1  ;;  %v5725_v20 = vmax.f32 %v5012_v14, 0.0  ;;  %v709_v9 = vrot.slane %v5776_v63, 1 }
  0x9f   :  { %10240 = vst [vmem:[#allocation23_spill] sm:$0xff] %v5725_v20 }
  0xa1   :  { %713 = vrot.lane.b32.xlu1 %v705_v24, %s5365_s29  ;;  %635 = vrot.lane.b32.xlu0 %v620_v25, %s5366_s3  ;;  %v5731_v24 = vmul.f32 %v5720_v17, %v5565_v43  ;;  %v753_v25 = vsel %vm266_vm0, %v751_v13, %v752_v11 }
  0xa5   :  { %1020 = vrot.lane.b32.xlu1 %v1005_v31, %s5365_s29  ;;  %715 = vrot.lane.b32.xlu0 %v707_v33, %s5365_s29  ;;  %v1006_v31 = vmul.f32 %v5528_v29, %v5725_v20  ;;  %v1127_v33 = vrot.slane %v1115_v21, 1 }
  0xa9   :  { %1441 = vrot.lane.b32.xlu1 %v1427_v35, %s5365_s29  ;;  %1056 = vrot.lane.b32.xlu0 %v1042_v36, %s5366_s3  ;;  %v1129_v35 = vrot.slane %v5731_v24, 1  ;;  %v1126_v36 = vrot.slane %v1114_v26, 1 }
  0xad   :  { %1477 = vrot.lane.b32.xlu1 %v1464_v41, %s5366_s3  ;;  %1475 = vrot.lane.b32.xlu0 %v1463_v44, %s5366_s3  ;;  %v1130_v41 = vsel %vm266_vm0, %v1127_v33, %v1129_v35  ;;  %v5749_v44 = vmax.f32 %v5030_v39, 0.0 }
  0xaf   :  { %10241 = vst [vmem:[#allocation24_spill] sm:$0xff] %v5749_v44  ;;  %v1428_v54 = vmul.f32 %v5578_v48, %v5749_v44 }
  0xb1   :  { %236 = vrot.lane.b32.xlu1 %v220_v50, %s5366_s3  ;;  %200 = vrot.lane.b32.xlu0 %v183_v52, %s5365_s29  ;;  %v1128_v50 = vsel %vm266_vm0, %v1126_v36, %v1127_v33  ;;  %v1465_v52 = vmul.f32 %v5662_v37, %v5652_v32 }
  0xb5   :  { %361 = vrot.lane.b32.xlu1 %v353_v60, %s5366_s3  ;;  %317 = vrot.lane.b32.xlu0 %v306_v12, %s5365_s29  ;;  %v754_v12 = vrot.slane %v741_v2, 1  ;;  %v221_v60 = vmul.f32 %v5491_v15, %v5675_v45  ;;  %v622_v2 = vmul.f32 %v5512_v23, %v5695_v59  ;;  %v5013_v15 = vld [vmem:[%s10081_s0 + $0xa0] sm:$0xf] }
  0xb7   :  { %v755_v18 = vsel %vm266_vm0, %v752_v11, %v754_v12  ;;  %v5790_v11 = vmax.f32 %v5013_v15, 0.0 }
  0xb9   :  { %601 = vrot.lane.b32.xlu1 %v584_v62, %s5365_s29  ;;  %363 = vrot.lane.b32.xlu0 %v355_v4, %s5366_s3  ;;  %v694_v62 = vmul.f32 %v5615_v0, %v5552_v38  ;;  %10242 = vst [vmem:[#allocation25_spill] sm:$0xff] %v5790_v11 }
  0xbb   :  { %v708_v4 = vrot.slane %v694_v62, 1  ;;  %v5845_v62 = vstv %s4984_s25  ;;  %s7135_s25 = sld [smem:[#allocation5 + $0x4]] }
  0xbd   :  { %717 = vrot.lane.b32.xlu1 %v706_v28, %s5365_s29  ;;  %637 = vrot.lane.b32.xlu0 %v621_v7, %s5366_s3  ;;  %v1043_v28 = vmul.f32 %v5563_v42, %v5640_v22  ;;  %v5786_v7 = vstv %s5019_s19  ;;  %v710_v14 = vsel %vm266_vm0, %v708_v4, %v709_v9  ;;  %s6784_s19 = sld [smem:[#allocation5 + $0xc]] }
  0xbe   :  { %v1162_v23 = vmul.f32 %v5786_v7, %v5530_v30  ;;  %v1163_v13 = vmul.f32 %v5786_v7, %v5523_v27  ;;  %v5810_v26 = vmul.f32 %v5786_v7, %v5565_v43 }
  0xc0   :  { %v1174_v21 = vrot.slane %v1162_v23, 1  ;;  %v1175_v24 = vrot.slane %v1163_v13, 1  ;;  %v10094_v39 = vrot.slane %v5810_v26, 1  ;;  %v424_v23 = vmul.f32 %v5845_v62, %v5468_v5 }
  0xc1   :  { %763 = vrot.lane.b32.xlu1 %v755_v18, %s5366_s3  ;;  %761 = vrot.lane.b32.xlu0 %v753_v25, %s5366_s3  ;;  %v1044_v18 = vmul.f32 %v5563_v42, %v5725_v20  ;;  %v5031_v25 = vld [vmem:[%s10081_s0 + $0xb0] sm:$0xff]  ;;  %v425_v13 = vmul.f32 %v5845_v62, %v5474_v8 }
  0xc5   :  { %1058 = vrot.lane.b32.xlu1 %v1043_v28, %s5366_s3  ;;  %1022 = vrot.lane.b32.xlu0 %v1006_v31, %s5365_s29  ;;  %v5812_v28 = vstv %s5037_s22  ;;  %s6860_s22 = sld [smem:[#allocation2 + $0x18]] }
  0xc6   :  { %v1537_v31 = vmul.f32 %v5812_v28, %v5573_v46  ;;  %v1538_v33 = vmul.f32 %v5812_v28, %v5596_v55  ;;  %v5838_v56 = vmul.f32 %v5812_v28, %v5652_v32 }
  0xc8   :  { %v10093_v15 = vrot.slane %v5838_v56, 1 }
  0xc9   :  { %1138 = vrot.lane.b32.xlu1 %v1130_v41, %s5365_s29  ;;  %1136 = vrot.lane.b32.xlu0 %v1128_v50, %s5365_s29  ;;  %v5833_v50 = vmul.f32 %v5586_v51, %v5675_v45  ;;  %v1466_v51 = vmul.f32 %v5662_v37, %v5749_v44 }
  0xcd   :  { %1479 = vrot.lane.b32.xlu1 %v1465_v52, %s5366_s3  ;;  %1443 = vrot.lane.b32.xlu0 %v1428_v54, %s5365_s29  ;;  %v1549_v52 = vrot.slane %v1537_v31, 1  ;;  %v1550_v54 = vrot.slane %v1538_v33, 1  ;;  %v437_v31 = vrot.slane %v425_v13, 2  ;;  %v5882_v33 = vmul.f32 %v5615_v0, %v5695_v59 }
  0xcf   :  { %v1551_v4 = vsel %vm266_vm0, %v1549_v52, %v1550_v54 }
  0xd1   :  { %319 = vrot.lane.b32.xlu1 %v310_v58, %s5365_s29  ;;  %238 = vrot.lane.b32.xlu0 %v221_v60, %s5366_s3  ;;  %v1178_v60 = vsel %vm266_vm0, %v1175_v24, %v10094_v39 }
  0xd5   :  { %639 = vrot.lane.b32.xlu1 %v622_v2, %s5366_s3  ;;  %365 = vrot.lane.b32.xlu0 %v354_v10, %s5366_s3  ;;  %v1007_v10 = vmul.f32 %v5528_v29, %v5790_v11  ;;  %v1176_v29 = vsel %vm266_vm0, %v1174_v21, %v1175_v24 }
  0xd9   :  { %765 = vrot.lane.b32.xlu1 %v754_v12, %s5366_s3  ;;  %719 = vrot.lane.b32.xlu0 %v710_v14, %s5365_s29  ;;  %v5815_v12 = vmax.f32 %v5031_v25, 0.0  ;;  %v1553_v25 = vsel %vm266_vm0, %v1550_v54, %v10093_v15  ;;  %v10095_v54 = vrot.slane %v5882_v33, 1 }
  0xdb   :  { %10243 = vst [vmem:[#allocation26_spill] sm:$0xff] %v5815_v12  ;;  %v1429_v47 = vmul.f32 %v5578_v48, %v5815_v12 }
  0xdd   :  { %1060 = vrot.lane.b32.xlu1 %v1044_v18, %s5366_s3  ;;  %1024 = vrot.lane.b32.xlu0 %v1007_v10, %s5365_s29  ;;  %v342_v18 = vmul.f32 %v5667_v40, %v5541_v34  ;;  %v5866_v10 = vmul.f32 %v5667_v40, %v5591_v53 }
  0xdf   :  { %v5823_v36 = vpop.permute.xlu1 %591  ;;  %v5826_v41 = vpop.permute.xlu0 %190  ;;  %v356_v52 = vrot.slane %v342_v18, 1  ;;  %v10092_v49 = vrot.slane %v5866_v10, 1 }
  0xe1   :  { %1184 = vrot.lane.b32.xlu1 %v1176_v29, %s5366_s3  ;;  %1140 = vrot.lane.b32.xlu0 %v1129_v35, %s5365_s29  ;;  %v10091_v35 = vrot.slane %v5833_v50, 1  ;;  %v436_v29 = vrot.slane %v424_v23, 2  ;;  %v358_v18 = vsel %vm266_vm0, %v356_v52, %v10092_v49  ;;  %v712_v52 = vsel %vm266_vm0, %v709_v9, %v10095_v54 }
  0xe3   :  { %v5840_v58 = vpop.permute.xlu1 %593  ;;  %v5847_v2 = vpop.permute.xlu0 %192  ;;  %v312_v24 = vsel %vm266_vm0, %v309_v57, %v10091_v35  ;;  %v5889_v57 = vmul.f32 %v5845_v62, %v5493_v16  ;;  %v438_v0 = vsel %vm399_vm1, %v436_v29, %v437_v31  ;;  %v5913_v29 = vmul.f32 %v5700_v61, %v5618_v1 }
  0xe4   :  { %10244 = vst [vmem:[#allocation27_spill] sm:$0xff] %v5840_v58 }
  0xe5   :  { %1445 = vrot.lane.b32.xlu1 %v1429_v47, %s5365_s29  ;;  %1186 = vrot.lane.b32.xlu0 %v1178_v60, %s5366_s3  ;;  %v5891_v60 = vstv %s5002_s6  ;;  %s7155_s6 = sld [smem:[#allocation5 + $0xa]] }
  0xe6   :  { %v824_v23 = vmul.f32 %v5891_v60, %v5470_v6 }
  0xe7   :  { %v5860_v14 = vpop.permute.xlu1 %228  ;;  %v5868_v21 = vpop.permute.xlu0 %194 }
  0xe8   :  { %10245 = vst [vmem:[#allocation28_spill] sm:$0xff] %v5868_v21  ;;  %v836_v15 = vrot.slane %v824_v23, 2  ;;  %v1117_v23 = vmul.f32 %v5720_v17, %v5640_v22 }
  0xe9   :  { %1559 = vrot.lane.b32.xlu1 %v1551_v4, %s5365_s29  ;;  %1481 = vrot.lane.b32.xlu0 %v1466_v51, %s5366_s3  ;;  %v823_v4 = vmul.f32 %v5891_v60, %v5463_v3 }
  0xea   :  { %v1131_v54 = vrot.slane %v1117_v23, 1 }
  0xeb   :  { %v5884_v47 = vpop.permute.xlu1 %595  ;;  %v5893_v51 = vpop.permute.xlu0 %230  ;;  %v835_v49 = vrot.slane %v823_v4, 2 }
  0xec   :  { %10246 = vst [vmem:[#allocation29_spill] sm:$0xff] %v5884_v47 }
  0xed   :  { %321 = vrot.lane.b32.xlu1 %v312_v24, %s5365_s29  ;;  %1561 = vrot.lane.b32.xlu0 %v1553_v25, %s5365_s29  ;;  %v10097_v24 = vrot.slane %v5889_v57, 2  ;;  %v742_v25 = vmul.f32 %v5700_v61, %v5552_v38  ;;  %v837_v63 = vsel %vm399_vm1, %v835_v49, %v836_v15 }
  0xef   :  { %v5903_v13 = vpop.permute.xlu1 %631  ;;  %v5915_v35 = vpop.permute.xlu0 %629  ;;  %v440_v47 = vsel %vm399_vm1, %v437_v31, %v10097_v24  ;;  %v756_v21 = vrot.slane %v742_v25, 1  ;;  %v5949_v25 = vmul.f32 %v5720_v17, %v5725_v20  ;;  %v5032_v24 = vld [vmem:[%s10081_s0 + $0xb8] sm:$0xf]  ;;  %s4985_s0 = sld [smem:[#allocation2 + $0x8]] }
  0xf0   :  { %10247 = vst [vmem:[#allocation30_spill] sm:$0xff] %v5903_v13  ;;  %v10096_v13 = vrot.slane %v5913_v29, 1 }
  0xf1   :  { %446 = vrot.lane.b32.xlu1 %v438_v0, %s5365_s29  ;;  %367 = vrot.lane.b32.xlu0 %v358_v18, %s5366_s3  ;;  %v5932_v0 = vmul.f32 %v5891_v60, %v5501_v19 }
  0xf2   :  { %v758_v31 = vsel %vm266_vm0, %v756_v21, %v10096_v13  ;;  %v10099_v13 = vrot.slane %v5949_v25, 1 }
  0xf3   :  { %v5924_v39 = vpop.permute.xlu1 %1016  ;;  %v5934_v18 = vpop.permute.xlu0 %1014  ;;  %v10098_v4 = vrot.slane %v5932_v0, 2 }
  0xf4   :  { %10248 = vst [vmem:[#allocation31_spill] sm:$0xff] %v5924_v39  ;;  %10249 = vst [vmem:[#allocation32_spill] sm:$0xff] %v5934_v18 }
  0xf5   :  { %721 = vrot.lane.b32.xlu1 %v712_v52, %s5365_s29  ;;  %448 = vrot.lane.b32.xlu0 %v440_v47, %s5365_s29  ;;  %v1045_v47 = vmul.f32 %v5563_v42, %v5790_v11  ;;  %v839_v21 = vsel %vm399_vm1, %v836_v15, %v10098_v4  ;;  %v5972_v42 = vmax.f32 %v5032_v24, 0.0  ;;  %v1133_v4 = vsel %vm266_vm0, %v1131_v54, %v10099_v13 }
  0xf6   :  { %v1467_v24 = vmul.f32 %v5662_v37, %v5815_v12 }
  0xf7   :  { %v5939_v9 = vpop.permute.xlu1 %232  ;;  %v5951_v52 = vpop.permute.xlu0 %196 }
  0xf8   :  { %10250 = vst [vmem:[#allocation33_spill] sm:$0xff] %v5939_v9  ;;  %10251 = vst [vmem:[#allocation34_spill] sm:$0xff] %v5951_v52  ;;  %v5966_v52 = vstv %s5038_s1  ;;  %v6081_v9 = vmul.f32 %v5720_v17, %v5790_v11  ;;  %s7157_s1 = sld [smem:[#allocation5 + $0xe]] }
  0xf9   :  { %845 = vrot.lane.b32.xlu1 %v837_v63, %s5365_s29  ;;  %767 = vrot.lane.b32.xlu0 %v758_v31, %s5366_s3  ;;  %v1585_v15 = vmul.f32 %v5966_v52, %v5573_v46  ;;  %v1586_v31 = vmul.f32 %v5966_v52, %v5596_v55  ;;  %v5997_v54 = vmul.f32 %v5966_v52, %v5652_v32 }
  0xfa   :  { %v10104_v17 = vrot.slane %v6081_v9, 1 }
  0xfb   :  { %v5957_v49 = vpop.permute.xlu1 %633  ;;  %v5968_v63 = vpop.permute.xlu0 %597  ;;  %v1597_v39 = vrot.slane %v1585_v15, 1  ;;  %v6009_v15 = vmul.f32 %v5667_v40, %v5675_v45 }
  0xfc   :  { %10252 = vst [vmem:[#allocation35_spill] sm:$0xff] %v5957_v49  ;;  %10253 = vst [vmem:[#allocation36_spill] sm:$0xff] %v5968_v63 }
  0xfd   :  { %1062 = vrot.lane.b32.xlu1 %v1045_v47, %s5366_s3  ;;  %847 = vrot.lane.b32.xlu0 %v839_v21, %s5365_s29  ;;  %v10256_v47 = vrot.slane %v5810_v26, 1  ;;  %v1430_v21 = vmul.f32 %v5578_v48, %v5972_v42  ;;  %v10100_v48 = vrot.slane %v5997_v54, 1 }
  0xff   :  { %v5978_v23 = vpop.permute.xlu1 %1052  ;;  %v5983_v63 = vpop.permute.xlu0 %1018 }
 0x100   :  { %10254 = vst [vmem:[#allocation37_spill] sm:$0xff] %v5978_v23  ;;  %10255 = vst [vmem:[#allocation38_spill] sm:$0xff] %v5983_v63  ;;  %v1598_v23 = vrot.slane %v1586_v31, 1  ;;  %v6011_v31 = vstv %s4985_s0  ;;  %s7274_s0 = sld [smem:[#allocation5 + $0x2]] }
 0x101   :  { %1188 = vrot.lane.b32.xlu1 %v10256_v47, %s5366_s3  ;;  %1142 = vrot.lane.b32.xlu0 %v1133_v4, %s5365_s29 }
 0x102   :  { %v1599_v26 = vsel %vm266_vm0, %v1597_v39, %v1598_v23  ;;  %v473_v39 = vmul.f32 %v6011_v31, %v5474_v8 }
 0x103   :  { %v5993_v18 = vpop.permute.xlu1 %1437  ;;  %v5999_v13 = vpop.permute.xlu0 %1054 }
 0x104   :  { %10257 = vst [vmem:[#allocation39_spill] sm:$0xff] %v5993_v18  ;;  %10258 = vst [vmem:[#allocation40_spill] sm:$0xff] %v5999_v13  ;;  %v485_v18 = vrot.slane %v473_v39, 2  ;;  %v6042_v13 = vmul.f32 %v5700_v61, %v5695_v59  ;;  %v10267_v39 = vrot.slane %v5889_v57, 2 }
 0x105   :  { %1483 = vrot.lane.b32.xlu1 %v1467_v24, %s5366_s3  ;;  %1447 = vrot.lane.b32.xlu0 %v1430_v21, %s5365_s29  ;;  %v10261_v24 = vrot.slane %v5838_v56, 1  ;;  %v6023_v21 = vmul.f32 %v6011_v31, %v5493_v16 }
 0x107   :  { %v6004_v4 = vpop.permute.xlu1 %198  ;;  %v6013_v47 = vpop.permute.xlu0 %1439  ;;  %v10102_v63 = vrot.slane %v6023_v21, 2 }
 0x108   :  { %10259 = vst [vmem:[#allocation41_spill] sm:$0xff] %v6004_v4  ;;  %10260 = vst [vmem:[#allocation42_spill] sm:$0xff] %v6013_v47  ;;  %v1601_v4 = vsel %vm266_vm0, %v1598_v23, %v10100_v48  ;;  %v10101_v47 = vrot.slane %v6009_v15, 1  ;;  %v10265_v48 = vrot.slane %v5866_v10, 1  ;;  %v10103_v10 = vrot.slane %v6042_v13, 1 }
 0x109   :  { %1607 = vrot.lane.b32.xlu1 %v1599_v26, %s5366_s3  ;;  %1563 = vrot.lane.b32.xlu0 %v10261_v24, %s5365_s29  ;;  %v472_v26 = vmul.f32 %v6011_v31, %v5468_v5  ;;  %v10263_v24 = vrot.slane %v5833_v50, 1  ;;  %v6051_v50 = vstv %s5003_s28  ;;  %v488_v61 = vsel %vm399_vm1, %v485_v18, %v10102_v63  ;;  %s7276_s28 = sld [smem:[#allocation5 + $0x6]] }
 0x10b   :  { %v6025_v40 = vpop.permute.xlu1 %313  ;;  %v6033_v56 = vpop.permute.xlu0 %234  ;;  %v484_v49 = vrot.slane %v472_v26, 2  ;;  %v872_v26 = vmul.f32 %v6051_v50, %v5470_v6 }
 0x10c   :  { %10262 = vst [vmem:[#allocation43_spill] sm:$0xff] %v6033_v56  ;;  %v360_v56 = vsel %vm266_vm0, %v10265_v48, %v10101_v47  ;;  %v871_v48 = vmul.f32 %v6051_v50, %v5463_v3 }
 0x10d   :  { %323 = vrot.lane.b32.xlu1 %v10263_v24, %s5365_s29  ;;  %1609 = vrot.lane.b32.xlu0 %v1601_v4, %s5366_s3  ;;  %v486_v47 = vsel %vm399_vm1, %v484_v49, %v485_v18  ;;  %v6087_v18 = vmul.f32 %v6051_v50, %v5501_v19  ;;  %v6089_v49 = vstv %s5021_s30  ;;  %s7309_s30 = sld [smem:[#allocation5 + $0x3]] }
 0x10e   :  { %v883_v63 = vrot.slane %v871_v48, 2  ;;  %v1246_v48 = vmul.f32 %v6089_v49, %v5530_v30 }
 0x10f   :  { %v6044_v23 = vpop.permute.xlu1 %599  ;;  %v6053_v4 = vpop.permute.xlu0 %315 }
 0x110   :  { %10264 = vst [vmem:[#allocation44_spill] sm:$0xff] %v6044_v23  ;;  %10266 = vst [vmem:[#allocation45_spill] sm:$0xff] %v6053_v4  ;;  %v884_v23 = vrot.slane %v872_v26, 2  ;;  %v1247_v26 = vmul.f32 %v6089_v49, %v5523_v27 }
 0x111   :  { %450 = vrot.lane.b32.xlu1 %v10267_v39, %s5365_s29  ;;  %369 = vrot.lane.b32.xlu0 %v360_v56, %s5366_s3  ;;  %v10270_v56 = vrot.slane %v5913_v29, 1  ;;  %v10273_v29 = vrot.slane %v5882_v33, 1  ;;  %v6110_v33 = vmul.f32 %v5786_v7, %v5725_v20 }
 0x113   :  { %v6067_v24 = vpop.permute.xlu1 %713  ;;  %v6070_v57 = vpop.permute.xlu0 %635  ;;  %v760_v39 = vsel %vm266_vm0, %v10270_v56, %v10103_v10 }
 0x114   :  { %10268 = vst [vmem:[#allocation46_spill] sm:$0xff] %v6067_v24  ;;  %10269 = vst [vmem:[#allocation47_spill] sm:$0xff] %v6070_v57  ;;  %v1259_v57 = vrot.slane %v1247_v26, 2  ;;  %v10279_v24 = vrot.slane %v6087_v18, 2 }
 0x115   :  { %496 = vrot.lane.b32.xlu1 %v488_v61, %s5366_s3  ;;  %494 = vrot.lane.b32.xlu0 %v486_v47, %s5366_s3  ;;  %v885_v61 = vsel %vm399_vm1, %v883_v63, %v884_v23 }
 0x117   :  { %v6083_v4 = vpop.permute.xlu1 %1020  ;;  %v6091_v47 = vpop.permute.xlu0 %715 }
 0x118   :  { %10271 = vst [vmem:[#allocation48_spill] sm:$0xff] %v6083_v4  ;;  %10272 = vst [vmem:[#allocation49_spill] sm:$0xff] %v6091_v47  ;;  %v1258_v4 = vrot.slane %v1246_v48, 2 }
 0x119   :  { %769 = vrot.lane.b32.xlu1 %v760_v39, %s5366_s3  ;;  %723 = vrot.lane.b32.xlu0 %v10273_v29, %s5365_s29  ;;  %v1165_v39 = vmul.f32 %v5786_v7, %v5640_v22  ;;  %v10276_v29 = vrot.slane %v5932_v0, 2  ;;  %v6131_v0 = vmul.f32 %v6089_v49, %v5565_v43 }
 0x11b   :  { %v6103_v56 = vpop.permute.xlu1 %1441  ;;  %v6112_v63 = vpop.permute.xlu0 %1056  ;;  %v1179_v58 = vrot.slane %v1165_v39, 1 }
 0x11c   :  { %10274 = vst [vmem:[#allocation50_spill] sm:$0xff] %v6103_v56  ;;  %10275 = vst [vmem:[#allocation51_spill] sm:$0xff] %v6112_v63  ;;  %v10277_v56 = vrot.slane %v5949_v25, 1  ;;  %v887_v63 = vsel %vm399_vm1, %v884_v23, %v10279_v24  ;;  %v1260_v25 = vsel %vm399_vm1, %v1258_v4, %v1259_v57  ;;  %v10106_v23 = vrot.slane %v6131_v0, 2 }
 0x11d   :  { %893 = vrot.lane.b32.xlu1 %v885_v61, %s5366_s3  ;;  %849 = vrot.lane.b32.xlu0 %v10276_v29, %s5365_s29  ;;  %v1180_v61 = vrot.slane %v6110_v33, 1  ;;  %v1540_v24 = vmul.f32 %v5812_v28, %v5749_v44  ;;  %v1468_v4 = vmul.f32 %v5662_v37, %v5972_v42 }
 0x11e   :  { %v1135_v10 = vsel %vm266_vm0, %v10277_v56, %v10104_v17  ;;  %v6146_v56 = vmul.f32 %v5812_v28, %v5815_v12 }
 0x11f   :  { %v6123_v47 = vpop.permute.xlu1 %1477  ;;  %v6133_v29 = vpop.permute.xlu0 %1475  ;;  %v1181_v26 = vsel %vm266_vm0, %v1179_v58, %v1180_v61  ;;  %v427_v58 = vmul.f32 %v5845_v62, %v5541_v34  ;;  %v1554_v17 = vrot.slane %v1540_v24, 1 }
 0x120   :  { %10278 = vst [vmem:[#allocation52_spill] sm:$0xff] %v6123_v47  ;;  %10280 = vst [vmem:[#allocation53_spill] sm:$0xff] %v6133_v29 }
 0x121   :  { %1144 = vrot.lane.b32.xlu1 %v1135_v10, %s5365_s29  ;;  %895 = vrot.lane.b32.xlu0 %v887_v63, %s5366_s3  ;;  %v6158_v10 = vmul.f32 %v5845_v62, %v5591_v53  ;;  %v1262_v63 = vsel %vm399_vm1, %v1259_v57, %v10106_v23  ;;  %v441_v37 = vrot.slane %v427_v58, 2  ;;  %v10286_v57 = vrot.slane %v5997_v54, 1 }
 0x122   :  { %v6196_v54 = vmul.f32 %v5786_v7, %v5790_v11 }
 0x123   :  { %v6138_v48 = vpop.permute.xlu1 %236  ;;  %v6148_v39 = vpop.permute.xlu0 %200 }
 0x124   :  { %10281 = vst [vmem:[#allocation54_spill] sm:$0xff] %v6138_v48  ;;  %10282 = vst [vmem:[#allocation55_spill] sm:$0xff] %v6148_v39  ;;  %v10107_v7 = vrot.slane %v6196_v54, 1 }
 0x125   :  { %1268 = vrot.lane.b32.xlu1 %v1260_v25, %s5365_s29  ;;  %1190 = vrot.lane.b32.xlu0 %v1181_v26, %s5366_s3  ;;  %v1555_v25 = vrot.slane %v6146_v56, 1  ;;  %v10105_v26 = vrot.slane %v6158_v10, 2 }
 0x127   :  { %v6160_v33 = vpop.permute.xlu1 %361  ;;  %v6166_v39 = vpop.permute.xlu0 %317  ;;  %v1556_v29 = vsel %vm266_vm0, %v1554_v17, %v1555_v25  ;;  %v443_v24 = vsel %vm399_vm1, %v441_v37, %v10105_v26  ;;  %v6189_v17 = vmul.f32 %v5891_v60, %v5618_v1  ;;  %v6204_v26 = vstv %s5022_s10  ;;  %s7318_s10 = sld [smem:[#allocation5 + $0x7]] }
 0x128   :  { %10283 = vst [vmem:[#allocation56_spill] sm:$0xff] %v6166_v39  ;;  %v6237_v39 = vstv %s5040_s11  ;;  %s7335_s11 = sld [smem:[#allocation5 + $0xb]] }
 0x129   :  { %1485 = vrot.lane.b32.xlu1 %v1468_v4, %s5366_s3  ;;  %1270 = vrot.lane.b32.xlu0 %v1262_v63, %s5365_s29  ;;  %v826_v4 = vmul.f32 %v5891_v60, %v5552_v38 }
 0x12b   :  { %v6171_v48 = vpop.permute.xlu1 %601  ;;  %v6174_v47 = vpop.permute.xlu0 %363  ;;  %v840_v37 = vrot.slane %v826_v4, 2  ;;  %v1295_v4 = vmul.f32 %v6204_v26, %v5523_v27 }
 0x12c   :  { %10284 = vst [vmem:[#allocation57_spill] sm:$0xff] %v6171_v48  ;;  %10285 = vst [vmem:[#allocation58_spill] sm:$0xff] %v6174_v47 }
 0x12d   :  { %1611 = vrot.lane.b32.xlu1 %v10286_v57, %s5366_s3  ;;  %1565 = vrot.lane.b32.xlu0 %v1556_v29, %s5365_s29  ;;  %v10289_v29 = vrot.slane %v6009_v15, 1  ;;  %v10293_v15 = vrot.slane %v6023_v21, 2  ;;  %v1183_v21 = vsel %vm266_vm0, %v1180_v61, %v10107_v7  ;;  %v1669_v61 = vmul.f32 %v6237_v39, %v5573_v46 }
 0x12f   :  { %v6183_v56 = vpop.permute.xlu1 %717  ;;  %v6191_v58 = vpop.permute.xlu0 %637 }
 0x130   :  { %10287 = vst [vmem:[#allocation59_spill] sm:$0xff] %v6183_v56  ;;  %10288 = vst [vmem:[#allocation60_spill] sm:$0xff] %v6191_v58  ;;  %v10295_v58 = vrot.slane %v6189_v17, 2  ;;  %v1307_v56 = vrot.slane %v1295_v4, 2 }
 0x131   :  { %452 = vrot.lane.b32.xlu1 %v443_v24, %s5365_s29  ;;  %371 = vrot.lane.b32.xlu0 %v10289_v29, %s5366_s3  ;;  %v10292_v24 = vrot.slane %v6042_v13, 1  ;;  %v1294_v29 = vmul.f32 %v6204_v26, %v5530_v30 }
 0x132   :  { %v842_v48 = vsel %vm399_vm1, %v840_v37, %v10295_v58 }
 0x133   :  { %v6201_v63 = vpop.permute.xlu1 %763  ;;  %v6206_v23 = vpop.permute.xlu0 %761 }
 0x134   :  { %10290 = vst [vmem:[#allocation61_spill] sm:$0xff] %v6201_v63  ;;  %10291 = vst [vmem:[#allocation62_spill] sm:$0xff] %v6206_v23 }
 0x135   :  { %771 = vrot.lane.b32.xlu1 %v10292_v24, %s5366_s3  ;;  %498 = vrot.lane.b32.xlu0 %v10293_v15, %s5366_s3  ;;  %v10297_v24 = vrot.slane %v6087_v18, 2  ;;  %v1306_v15 = vrot.slane %v1294_v29, 2  ;;  %v6243_v18 = vmul.f32 %v6204_v26, %v5565_v43 }
 0x137   :  { %v6219_v57 = vpop.permute.xlu1 %1058  ;;  %v6224_v13 = vpop.permute.xlu0 %1022  ;;  %v1308_v29 = vsel %vm399_vm1, %v1306_v15, %v1307_v56  ;;  %v10303_v15 = vrot.slane %v6131_v0, 2  ;;  %v6287_v0 = vmul.f32 %v6237_v39, %v5652_v32 }
 0x138   :  { %10294 = vst [vmem:[#allocation63_spill] sm:$0xff] %v6219_v57  ;;  %10296 = vst [vmem:[#allocation64_spill] sm:$0xff] %v6224_v13  ;;  %v6235_v57 = vmul.f32 %v5812_v28, %v5972_v42  ;;  %v10300_v28 = vrot.slane %v6081_v9, 1  ;;  %v6264_v13 = vmul.f32 %v5966_v52, %v5815_v12  ;;  %v1681_v9 = vrot.slane %v1669_v61, 2 }
 0x139   :  { %897 = vrot.lane.b32.xlu1 %v10297_v24, %s5366_s3  ;;  %851 = vrot.lane.b32.xlu0 %v842_v48, %s5365_s29  ;;  %v1670_v48 = vmul.f32 %v6237_v39, %v5596_v55 }
 0x13a   :  { %v10108_v4 = vrot.slane %v6235_v57, 1 }
 0x13b   :  { %v6239_v58 = vpop.permute.xlu1 %1138  ;;  %v6245_v37 = vpop.permute.xlu0 %1136 }
 0x13c   :  { %10298 = vst [vmem:[#allocation65_spill] sm:$0xff] %v6239_v58  ;;  %10299 = vst [vmem:[#allocation66_spill] sm:$0xff] %v6245_v37  ;;  %v1558_v7 = vsel %vm266_vm0, %v1555_v25, %v10108_v4 }
 0x13d   :  { %1192 = vrot.lane.b32.xlu1 %v1183_v21, %s5366_s3  ;;  %1146 = vrot.lane.b32.xlu0 %v10300_v28, %s5365_s29  ;;  %v1588_v21 = vmul.f32 %v5966_v52, %v5749_v44  ;;  %v1682_v28 = vrot.slane %v1670_v48, 2  ;;  %v1603_v48 = vrot.slane %v6264_v13, 1  ;;  %v475_v13 = vmul.f32 %v6011_v31, %v5541_v34 }
 0x13f   :  { %v6257_v24 = vpop.permute.xlu1 %1479  ;;  %v6266_v58 = vpop.permute.xlu0 %1443  ;;  %v1602_v61 = vrot.slane %v1588_v21, 1 }
 0x140   :  { %10301 = vst [vmem:[#allocation67_spill] sm:$0xff] %v6257_v24  ;;  %10302 = vst [vmem:[#allocation68_spill] sm:$0xff] %v6266_v58  ;;  %v6277_v24 = vmul.f32 %v5845_v62, %v5675_v45  ;;  %v10305_v58 = vrot.slane %v6243_v18, 2  ;;  %v1683_v62 = vsel %vm399_vm1, %v1681_v9, %v1682_v28  ;;  %v1684_v9 = vrot.slane %v6287_v0, 2 }
 0x141   :  { %1316 = vrot.lane.b32.xlu1 %v1308_v29, %s5366_s3  ;;  %1272 = vrot.lane.b32.xlu0 %v10303_v15, %s5365_s29 }
 0x142   :  { %v1310_v29 = vsel %vm399_vm1, %v1307_v56, %v10305_v58  ;;  %v10109_v25 = vrot.slane %v6277_v24, 2  ;;  %v6297_v56 = vmul.f32 %v5891_v60, %v5695_v59  ;;  %v6303_v58 = vmul.f32 %v6011_v31, %v5591_v53 }
 0x143   :  { %v6279_v37 = vpop.permute.xlu1 %319  ;;  %v6289_v15 = vpop.permute.xlu0 %238  ;;  %v10309_v60 = vrot.slane %v6158_v10, 2  ;;  %v1685_v0 = vsel %vm399_vm1, %v1682_v28, %v1684_v9 }
 0x144   :  { %10304 = vst [vmem:[#allocation69_spill] sm:$0xff] %v6279_v37  ;;  %10306 = vst [vmem:[#allocation70_spill] sm:$0xff] %v6289_v15  ;;  %v10110_v15 = vrot.slane %v6297_v56, 2  ;;  %v489_v37 = vrot.slane %v475_v13, 2  ;;  %v10312_v13 = vrot.slane %v6189_v17, 2  ;;  %v6354_v17 = vmul.f32 %v5966_v52, %v5972_v42 }
 0x145   :  { %1567 = vrot.lane.b32.xlu1 %v1558_v7, %s5365_s29  ;;  %1318 = vrot.lane.b32.xlu0 %v1310_v29, %s5366_s3  ;;  %v1604_v7 = vsel %vm266_vm0, %v1602_v61, %v1603_v48  ;;  %v445_v4 = vsel %vm399_vm1, %v10309_v60, %v10109_v25 }
 0x146   :  { %v844_v28 = vsel %vm399_vm1, %v10312_v13, %v10110_v15  ;;  %v10113_v52 = vrot.slane %v6354_v17, 1 }
 0x147   :  { %v6305_v21 = vpop.permute.xlu1 %639  ;;  %v6309_v29 = vpop.permute.xlu0 %365 }
 0x148   :  { %10307 = vst [vmem:[#allocation71_spill] sm:$0xff] %v6305_v21  ;;  %10308 = vst [vmem:[#allocation72_spill] sm:$0xff] %v6309_v29  ;;  %v10111_v21 = vrot.slane %v6303_v58, 2 }
 0x149   :  { %1691 = vrot.lane.b32.xlu1 %v1683_v62, %s5365_s29  ;;  %1613 = vrot.lane.b32.xlu0 %v1604_v7, %s5366_s3  ;;  %v874_v62 = vmul.f32 %v6051_v50, %v5552_v38  ;;  %v6327_v7 = vmul.f32 %v6051_v50, %v5618_v1 }
 0x14a   :  { %v491_v60 = vsel %vm399_vm1, %v489_v37, %v10111_v21  ;;  %v6361_v21 = vstv %s5041_s12  ;;  %s7349_s12 = sld [smem:[#allocation5 + $0xf]] }
 0x14b   :  { %v6320_v61 = vpop.permute.xlu1 %765  ;;  %v6329_v10 = vpop.permute.xlu0 %719  ;;  %v10112_v29 = vrot.slane %v6327_v7, 2 }
 0x14c   :  { %10310 = vst [vmem:[#allocation73_spill] sm:$0xff] %v6320_v61  ;;  %10311 = vst [vmem:[#allocation74_spill] sm:$0xff] %v6329_v10  ;;  %v888_v61 = vrot.slane %v874_v62, 2 }
 0x14d   :  { %454 = vrot.lane.b32.xlu1 %v445_v4, %s5365_s29  ;;  %1693 = vrot.lane.b32.xlu0 %v1685_v0, %s5365_s29  ;;  %v1249_v4 = vmul.f32 %v6089_v49, %v5640_v22  ;;  %v1250_v0 = vmul.f32 %v6089_v49, %v5725_v20 }
 0x14e   :  { %v890_v62 = vsel %vm399_vm1, %v888_v61, %v10112_v29  ;;  %v1718_v61 = vmul.f32 %v6361_v21, %v5596_v55 }
 0x14f   :  { %v6341_v25 = vpop.permute.xlu1 %1060  ;;  %v6348_v10 = vpop.permute.xlu0 %1024  ;;  %v1263_v13 = vrot.slane %v1249_v4, 2  ;;  %v1264_v15 = vrot.slane %v1250_v0, 2 }
 0x150   :  { %10313 = vst [vmem:[#allocation75_spill] sm:$0xff] %v6341_v25  ;;  %10314 = vst [vmem:[#allocation76_spill] sm:$0xff] %v6348_v10  ;;  %v1730_v10 = vrot.slane %v1718_v61, 2 }
 0x151   :  { %853 = vrot.lane.b32.xlu1 %v844_v28, %s5365_s29  ;;  %500 = vrot.lane.b32.xlu0 %v491_v60, %s5366_s3  ;;  %v10317_v28 = vrot.slane %v6196_v54, 1  ;;  %v1717_v60 = vmul.f32 %v6361_v21, %v5573_v46  ;;  %v1265_v0 = vsel %vm399_vm1, %v1263_v13, %v1264_v15  ;;  %v10320_v54 = vrot.slane %v6243_v18, 2 }
 0x152   :  { %v10323_v18 = vrot.slane %v6235_v57, 1  ;;  %v6412_v57 = vmul.f32 %v6089_v49, %v5790_v11  ;;  %v6450_v49 = vstv %s4995_s5 }
 0x153   :  { %v6356_v37 = vpop.permute.xlu1 %1184  ;;  %v6363_v25 = vpop.permute.xlu0 %1140  ;;  %v6566_v23 = vmul.f32 %v6450_v49, %v5552_v38 }
 0x154   :  { %10315 = vst [vmem:[#allocation77_spill] sm:$0xff] %v6356_v37  ;;  %10316 = vst [vmem:[#allocation78_spill] sm:$0xff] %v6363_v25  ;;  %v6502_v37 = vstv %s4998_s16  ;;  %s1894_s16 = sld [smem:[#allocation8]] }
 0x155   :  { %1194 = vrot.lane.b32.xlu1 %v10317_v28, %s5366_s3  ;;  %899 = vrot.lane.b32.xlu0 %v890_v62, %s5366_s3  ;;  %v1606_v62 = vsel %vm266_vm0, %v1603_v48, %v10113_v52  ;;  %v1729_v28 = vrot.slane %v1717_v60, 2  ;;  %v6404_v60 = vmul.f32 %v6011_v31, %v5675_v45  ;;  %10349 = vst [vmem:[#allocation101_spill] sm:$0xff] %v6566_v23 }
 0x157   :  { %v6374_v4 = vpop.permute.xlu1 %1445  ;;  %v6377_v29 = vpop.permute.xlu0 %1186 }
 0x158   :  { %10318 = vst [vmem:[#allocation79_spill] sm:$0xff] %v6374_v4  ;;  %10319 = vst [vmem:[#allocation80_spill] sm:$0xff] %v6377_v29  ;;  %v6390_v4 = vmul.f32 %v6361_v21, %v5652_v32 }
 0x159   :  { %1320 = vrot.lane.b32.xlu1 %v10320_v54, %s5366_s3  ;;  %1274 = vrot.lane.b32.xlu0 %v1265_v0, %s5365_s29  ;;  %v1731_v0 = vsel %vm399_vm1, %v1729_v28, %v1730_v10 }
 0x15a   :  { %v10114_v48 = vrot.slane %v6390_v4, 2 }
 0x15b   :  { %v6386_v25 = vpop.permute.xlu1 %1559  ;;  %v6392_v13 = vpop.permute.xlu0 %1481 }
 0x15c   :  { %10321 = vst [vmem:[#allocation81_spill] sm:$0xff] %v6386_v25  ;;  %10322 = vst [vmem:[#allocation82_spill] sm:$0xff] %v6392_v13  ;;  %v1733_v31 = vsel %vm399_vm1, %v1730_v10, %v10114_v48  ;;  %v10330_v10 = vrot.slane %v6303_v58, 2  ;;  %v1672_v25 = vmul.f32 %v6237_v39, %v5749_v44 }
 0x15d   :  { %1615 = vrot.lane.b32.xlu1 %v1606_v62, %s5366_s3  ;;  %1569 = vrot.lane.b32.xlu0 %v10323_v18, %s5365_s29  ;;  %v6416_v62 = vmul.f32 %v6051_v50, %v5695_v59  ;;  %v10115_v18 = vrot.slane %v6404_v60, 2  ;;  %v10116_v50 = vrot.slane %v6412_v57, 2 }
 0x15f   :  { %v6399_v54 = vpop.permute.xlu1 %321  ;;  %v6406_v61 = vpop.permute.xlu0 %1561  ;;  %v493_v48 = vsel %vm399_vm1, %v10330_v10, %v10115_v18  ;;  %v1267_v58 = vsel %vm399_vm1, %v1264_v15, %v10116_v50  ;;  %v10333_v10 = vrot.slane %v6416_v62, 2  ;;  %v10334_v18 = vrot.slane %v6327_v7, 2 }
 0x160   :  { %10324 = vst [vmem:[#allocation83_spill] sm:$0xff] %v6399_v54  ;;  %10325 = vst [vmem:[#allocation84_spill] sm:$0xff] %v6406_v61  ;;  %v1297_v61 = vmul.f32 %v6204_v26, %v5640_v22  ;;  %v6474_v15 = vstv %s4980_s13  ;;  %v6479_v7 = vmul.f32 %v6450_v49, %v5463_v3  ;;  %v1686_v50 = vrot.slane %v1672_v25, 2 }
 0x161   :  { %1739 = vrot.lane.b32.xlu1 %v1731_v0, %s5366_s3  ;;  %1695 = vrot.lane.b32.xlu0 %v1684_v9, %s5365_s29  ;;  %v10328_v9 = vrot.slane %v6277_v24, 2  ;;  %v6443_v24 = vmul.f32 %v6204_v26, %v5725_v20  ;;  %v254_v29 = vmul.f32 %v6474_v15, %v5468_v5 }
 0x163   :  { %v6418_v28 = vpop.permute.xlu1 %446  ;;  %v6424_v0 = vpop.permute.xlu0 %367 }
 0x164   :  { %10326 = vst [vmem:[#allocation85_spill] sm:$0xff] %v6418_v28  ;;  %10327 = vst [vmem:[#allocation86_spill] sm:$0xff] %v6424_v0  ;;  %v6496_v0 = vstv %s5014_s15  ;;  %s1889_s15 = sld [smem:[#allocation7]] }
 0x165   :  { %456 = vrot.lane.b32.xlu1 %v10328_v9, %s5365_s29  ;;  %1741 = vrot.lane.b32.xlu0 %v1733_v31, %s5366_s3  ;;  %v10332_v9 = vrot.slane %v6297_v56, 2  ;;  %v1311_v56 = vrot.slane %v1297_v61, 2  ;;  %v6481_v61 = vstv %s168_s14 }
 0x166   :  { %v6510_v25 = vmul.f32 %v6481_v61, %v5474_v8 }
 0x167   :  { %v6432_v52 = vpop.permute.xlu1 %721  ;;  %v6445_v31 = vpop.permute.xlu0 %448 }
 0x168   :  { %10329 = vst [vmem:[#allocation87_spill] sm:$0xff] %v6432_v52  ;;  %10331 = vst [vmem:[#allocation88_spill] sm:$0xff] %v6445_v31  ;;  %v892_v52 = vsel %vm399_vm1, %v10334_v18, %v10333_v10  ;;  %v6488_v18 = vmul.f32 %v6450_v49, %v5470_v6  ;;  %v6531_v31 = vmul.f32 %v6496_v0, %v5523_v27 }
 0x169   :  { %855 = vrot.lane.b32.xlu1 %v10332_v9, %s5365_s29  ;;  %502 = vrot.lane.b32.xlu0 %v493_v48, %s5366_s3  ;;  %v10119_v9 = vrot.slane %v6443_v24, 2  ;;  %v6470_v48 = vmul.f32 %v6237_v39, %v5815_v12 }
 0x16a   :  { %10343 = vst [vmem:[#allocation96_spill] sm:$0xff] %v6531_v31 }
 0x16b   :  { %v6463_v54 = vpop.permute.xlu1 %845  ;;  %v6472_v13 = vpop.permute.xlu0 %767  ;;  %v10346_v63 = vrot.slane %v6470_v48, 2 }
 0x16c   :  { %10335 = vst [vmem:[#allocation89_spill] sm:$0xff] %v6463_v54  ;;  %10336 = vst [vmem:[#allocation90_spill] sm:$0xff] %v6472_v13  ;;  %v10341_v13 = vrot.slane %v6354_v17, 1  ;;  %v6534_v54 = vstv %s6452_s17  ;;  %v6543_v17 = vmul.f32 %v6496_v0, %v5530_v30  ;;  %s5046_s17 = sld [smem:[#allocation10 + $0x1]] }
 0x16d   :  { %1276 = vrot.lane.b32.xlu1 %v1267_v58, %s5365_s29  ;;  %901 = vrot.lane.b32.xlu0 %v892_v52, %s5366_s3  ;;  %v1313_v58 = vsel %vm399_vm1, %v1311_v56, %v10119_v9  ;;  %v255_v52 = vmul.f32 %v6474_v15, %v5474_v8  ;;  %v6514_v56 = vmul.f32 %v6481_v61, %v5493_v16 }
 0x16e   :  { %v6518_v9 = vmul.f32 %v6474_v15, %v5493_v16  ;;  %10344 = vst [vmem:[#allocation97_spill] sm:$0xff] %v6543_v17  ;;  %v6560_v17 = vmul.f32 %v6502_v37, %v5501_v19 }
 0x16f   :  { %v6490_v10 = vpop.permute.xlu1 %1062  ;;  %v6504_v20 = vpop.permute.xlu0 %847  ;;  %10339 = vst [vmem:[#allocation93_spill] sm:$0xff] %v6514_v56  ;;  %v6539_v56 = vmul.f32 %v6204_v26, %v5790_v11  ;;  %v6556_v26 = vmul.f32 %v6481_v61, %v5541_v34  ;;  %v267_v11 = vrot.slane %v254_v29, 1  ;;  %v268_v28 = vrot.slane %v255_v52, 1 }
 0x170   :  { %10337 = vst [vmem:[#allocation91_spill] sm:$0xff] %v6490_v10  ;;  %10338 = vst [vmem:[#allocation92_spill] sm:$0xff] %v6504_v20  ;;  %v170_v10 = vmul.f32 %v6481_v61, %v5468_v5  ;;  %v6527_v20 = vmul.f32 %v6450_v49, %v5501_v19  ;;  %v6581_v52 = vstv %s6483_s2  ;;  %s7825_s2 = sld [smem:[#allocation10 + $0x4]] }
 0x171   :  { %10340 = vst [vmem:[#allocation94_spill] sm:$0xff] %v6518_v9  ;;  %1617 = vrot.lane.b32.xlu1 %v10341_v13, %s5366_s3  ;;  %1322 = vrot.lane.b32.xlu0 %v1313_v58, %s5366_s3  ;;  %v655_v13 = vmul.f32 %v6502_v37, %v5463_v3  ;;  %v1688_v58 = vsel %vm399_vm1, %v1686_v50, %v10346_v63  ;;  %10347 = vst [vmem:[#allocation99_spill] sm:$0xff] %v6556_v26  ;;  %v10352_v50 = vrot.slane %v6390_v4, 2 }
 0x172   :  { %10342 = vst [vmem:[#allocation95_spill] sm:$0xff] %v6527_v20  ;;  %v656_v20 = vmul.f32 %v6502_v37, %v5470_v6  ;;  %v6574_v63 = vmul.f32 %v6534_v54, %v5573_v46  ;;  %v6595_v4 = vmul.f32 %v6481_v61, %v5591_v53  ;;  %v269_v26 = vsel %vm266_vm0, %v267_v11, %v268_v28 }
 0x173   :  { %v6549_v31 = vpop.permute.xlu1 %1188  ;;  %v6562_v47 = vpop.permute.xlu0 %1142  ;;  %v387_v11 = vmul.f32 %v6581_v52, %v5468_v5 }
 0x174   :  { %10345 = vst [vmem:[#allocation98_spill] sm:$0xff] %v6549_v31  ;;  %10348 = vst [vmem:[#allocation100_spill] sm:$0xff] %v6562_v47  ;;  %v6570_v31 = vmul.f32 %v6496_v0, %v5565_v43  ;;  %v668_v29 = vrot.slane %v656_v20, 1  ;;  %v6605_v47 = vmul.f32 %v6534_v54, %v5596_v55  ;;  %v10358_v20 = vrot.slane %v6518_v9, 1 }
 0x175   :  { %10351 = vst [vmem:[#allocation103_spill] sm:$0xff] %v6574_v63  ;;  %1743 = vrot.lane.b32.xlu1 %v10352_v50, %s5366_s3  ;;  %1697 = vrot.lane.b32.xlu0 %v1688_v58, %s5365_s29  ;;  %v6591_v63 = vmul.f32 %v6361_v21, %v5815_v12  ;;  %10353 = vst [vmem:[#allocation104_spill] sm:$0xff] %v6595_v4  ;;  %v667_v50 = vrot.slane %v655_v13, 1  ;;  %v6601_v58 = vmul.f32 %v6237_v39, %v5972_v42 }
 0x176   :  { %10350 = vst [vmem:[#allocation102_spill] sm:$0xff] %v6570_v31  ;;  %v1720_v31 = vmul.f32 %v6361_v21, %v5749_v44  ;;  %10355 = vst [vmem:[#allocation106_spill] sm:$0xff] %v6605_v47  ;;  %v6610_v12 = vmul.f32 %v6450_v49, %v5618_v1  ;;  %v6620_v39 = vmul.f32 %v6496_v0, %v5640_v22  ;;  %v6623_v44 = vstv %s6520_s4  ;;  %s7830_s4 = sld [smem:[#allocation10 + $0x2]] }
 0x177   :  { %v6597_v23 = vpop.permute.xlu1 %1483  ;;  %v6613_v13 = vpop.permute.xlu0 %1447  ;;  %v208_v4 = vadd.f32 %v5826_v41, %v170_v10  ;;  %v10128_v9 = vrot.slane %v6591_v63, 2  ;;  %v669_v5 = vsel %vm266_vm0, %v667_v50, %v668_v29  ;;  %v6647_v41 = vmul.f32 %v6581_v52, %v5474_v8 }
 0x178   :  { %10354 = vst [vmem:[#allocation105_spill] sm:$0xff] %v6597_v23  ;;  %10356 = vst [vmem:[#allocation107_spill] sm:$0xff] %v6610_v12  ;;  %v271_v23 = vsel %vm266_vm0, %v268_v28, %v10358_v20  ;;  %v10360_v12 = vrot.slane %v6416_v62, 2  ;;  %v10362_v28 = vrot.slane %v6539_v56, 2  ;;  %v10363_v20 = vrot.slane %v6443_v24, 2 }
 0x179   :  { %10357 = vst [vmem:[#allocation108_spill] sm:$0xff] %v6613_v13  ;;  %10359 = vst [vmem:[#allocation109_spill] sm:$0xff] %v6620_v39  ;;  %v10361_v13 = vrot.slane %v6404_v60, 2  ;;  %v1734_v47 = vrot.slane %v1720_v31, 2  ;;  %v1689_v62 = vrot.slane %v6601_v58, 2  ;;  %v246_v24 = vadd.f32 %v5860_v14, %v208_v4 }
 0x17a   :  { %903 = vrot.lane.b32.xlu1 %v10360_v12, %s5366_s3  ;;  %v1315_v39 = vsel %vm399_vm1, %v10363_v20, %v10362_v28  ;;  %v6643_v12 = vmul.f32 %v6534_v54, %v5652_v32  ;;  %v10366_v31 = vrot.slane %v6560_v17, 1  ;;  %v6660_v50 = vmul.f32 %v6481_v61, %v5675_v45 }
 0x17b   :  { %504 = vrot.lane.b32.xlu0 %v10361_v13, %s5366_s3  ;;  %v6649_v60 = vpop.permute.xlu1 %1607  ;;  %v6662_v13 = vpop.permute.xlu0 %1563  ;;  %v6666_v8 = vmul.f32 %v6450_v49, %v5695_v59  ;;  %v6670_v58 = vmul.f32 %v6623_v44, %v5523_v27  ;;  %v6674_v14 = vmul.f32 %v6623_v44, %v5565_v43  ;;  %v609_v61 = vadd.f32 %v5823_v36, %v6479_v7 }
 0x17c   :  { %10364 = vst [vmem:[#allocation110_spill] sm:$0xff] %v6643_v12  ;;  %10365 = vst [vmem:[#allocation111_spill] sm:$0xff] %v6649_v60  ;;  %v6656_v10 = vsel %vm266_vm0, %v668_v29, %v10366_v31  ;;  %v6678_v29 = vmul.f32 %v6623_v44, %v5530_v30  ;;  %v400_v4 = vrot.slane %v387_v11, 2  ;;  %v6684_v49 = vstv %s6583_s18  ;;  %s5050_s18 = sld [smem:[#allocation10 + $0x5]] }
 0x17d   :  { %10367 = vst [vmem:[#allocation112_spill] sm:$0xff] %v6660_v50  ;;  %10368 = vst [vmem:[#allocation113_spill] sm:$0xff] %v6662_v13  ;;  %v10371_v20 = vrot.slane %v6412_v57, 2  ;;  %v1736_v31 = vsel %vm399_vm1, %v1734_v47, %v10128_v9  ;;  %v209_v28 = vadd.f32 %v5847_v2, %v6510_v25  ;;  %v401_v13 = vrot.slane %v6647_v41, 2  ;;  %v10415_v50 = vld [vmem:[#allocation28_spill] sm:$0xff] }
 0x17e   :  { %10369 = vst [vmem:[#allocation114_spill] sm:$0xff] %v6666_v8  ;;  %10370 = vst [vmem:[#allocation115_spill] sm:$0xff] %v6674_v14  ;;  %1324 = vrot.lane.b32.xlu1 %v1315_v39, %s5366_s3  ;;  %v10373_v36 = vrot.slane %v6470_v48, 2  ;;  %v1722_v11 = vmul.f32 %v6361_v21, %v5972_v42  ;;  %v647_v57 = vadd.f32 %v5915_v35, %v609_v61  ;;  %v10375_v9 = vlaneseq  ;;  %v10414_v8 = vld [vmem:[#allocation93_spill] sm:$0xff] }
 0x17f   :  { %1278 = vrot.lane.b32.xlu0 %v10371_v20, %s5365_s29  ;;  %v6695_v39 = vpop.permute.xlu1 %323  ;;  %v283_v20 = vadd.f32 %v269_v26, %v246_v24  ;;  %v6705_v47 = vpop.permute.xlu0 %1609  ;;  %v247_v48 = vadd.f32 %v5893_v51, %v209_v28  ;;  %v6716_v41 = vmul.f32 %v6474_v15, %v5541_v34  ;;  %v787_v35 = vmul.f32 %v6684_v49, %v5463_v3  ;;  %v10377_v3 = vld [vmem:[#allocation27_spill] sm:$0xff] }
 0x180   :  { %10372 = vst [vmem:[#allocation116_spill] sm:$0xff] %v6695_v39  ;;  %v1690_v7 = vsel %vm399_vm1, %v10373_v36, %v1689_v62  ;;  %10374 = vst [vmem:[#allocation117_spill] sm:$0xff] %v6705_v47  ;;  %v6708_v2 = vand.u32 127, %v10375_v9  ;;  %v6711_v25 = vshrl.u32 %v10375_v9, 7  ;;  %v6722_v21 = vmul.f32 %v6684_v49, %v5470_v6 }
 0x181   :  { %v331_v26 = vadd.f32 %v6025_v40, %v283_v20  ;;  %v1091_v24 = vrot.slane %v6670_v58, 1  ;;  %v6729_v51 = vmul.f32 %v6474_v15, %v5591_v53  ;;  %v6733_v28 = vmul.f32 %v6581_v52, %v5493_v16  ;;  %v10379_v16 = vld [vmem:[#allocation30_spill] sm:$0xff] }
 0x182   :  { %10376 = vst [vmem:[#allocation118_spill] sm:$0xff] %v6711_v25  ;;  %1745 = vrot.lane.b32.xlu1 %v1736_v31, %s5366_s3  ;;  %v610_v6 = vadd.f32 %v10377_v3, %v6488_v18  ;;  %v402_v31 = vsel %vm399_vm1, %v400_v4, %v401_v13  ;;  %v1737_v58 = vrot.slane %v1722_v11, 2  ;;  %v683_v36 = vadd.f32 %v669_v5, %v647_v57  ;;  %v10380_v4 = vld [vmem:[#allocation46_spill] sm:$0xff] }
 0x183   :  { %1699 = vrot.lane.b32.xlu0 %v1690_v7, %s5365_s29  ;;  %v6740_v40 = vpop.permute.xlu1 %450  ;;  %v379_v20 = vadd.f32 %v6160_v33, %v331_v26  ;;  %v6743_v9 = vpop.permute.xlu0 %369  ;;  %vm142_vm2 = vcmp.ge.s32.totalorder %v6708_v2, 1  ;;  %vm133_vm3 = vcmp.ge.s32.totalorder %v6711_v25, 1  ;;  %v284_v39 = vadd.f32 %v271_v23, %v247_v48  ;;  %v10382_v48 = vld [vmem:[#allocation45_spill] sm:$0xff] }
 0x184   :  { %10378 = vst [vmem:[#allocation27_spill] sm:$0xff] %v6743_v9  ;;  %v648_v7 = vadd.f32 %v10379_v16, %v610_v6  ;;  %v799_v18 = vrot.slane %v787_v35, 2  ;;  %v800_v3 = vrot.slane %v6722_v21, 2  ;;  %v731_v11 = vadd.f32 %v10380_v4, %v683_v36  ;;  %vm6770_vm5 = vmand %vm133_vm3, %vm142_vm2  ;;  %v10386_v6 = vld [vmem:[#allocation62_spill] sm:$0xff] }
 0x185   :  { %v6753_v33 = vmul.f32 %v6502_v37, %v5552_v38  ;;  %v10130_v5 = vrot.slane %v6733_v28, 2  ;;  %v6758_v57 = vmul.f32 %v6684_v49, %v5501_v19  ;;  %v10381_v23 = vrot.slane %v6539_v56, 2 }
 0x186   :  { %1701 = vrot.lane.b32.xlu1 %v1689_v62, %s5365_s29  ;;  %v332_v35 = vadd.f32 %v10382_v48, %v284_v39  ;;  %v1090_v62 = vrot.slane %v6678_v29, 1  ;;  %vm146_vm4 = vcmp.lt.s32.totalorder %v6708_v2, 17  ;;  %v10385_v19 = vrot.slane %v6591_v63, 2  ;;  %v10387_v48 = vld [vmem:[#allocation58_spill] sm:$0xff] }
 0x187   :  { %1326 = vrot.lane.b32.xlu0 %v10381_v23, %s5366_s3  ;;  %v497_v21 = vpop.permute.xlu1 %496  ;;  %v779_v36 = vadd.f32 %v10386_v6, %v731_v11  ;;  %v272_v39 = vrot.slane %v6716_v41, 1  ;;  %v6780_v29 = vstv %s6703_s7  ;;  %v416_v16 = vadd.f32 %v402_v31, %v379_v20  ;;  %v495_v4 = vpop.permute.xlu0 %494  ;;  %v10388_v41 = vld [vmem:[#allocation85_spill] sm:$0xff]  ;;  %vm6804_vm6 = vmand %vm6770_vm5, %vm146_vm4  ;;  %s5052_s7 = sld [smem:[#allocation10 + $0x7]] }
 0x188   :  { %v1738_v56 = vsel %vm399_vm1, %v10385_v19, %v1737_v58  ;;  %v684_v23 = vadd.f32 %v6656_v10, %v648_v7  ;;  %v380_v61 = vadd.f32 %v10387_v48, %v332_v35  ;;  %v10131_v63 = vrot.slane %v6729_v51, 1  ;;  %v10401_v7 = vld [vmem:[#allocation88_spill] sm:$0xff]  ;;  %vm148_vm7 = vmand %vm142_vm2, %vm146_vm4 }
 0x189   :  { %v801_v19 = vsel %vm399_vm1, %v799_v18, %v800_v3  ;;  %v464_v31 = vadd.f32 %v10388_v41, %v416_v16  ;;  %v404_v20 = vsel %vm399_vm1, %v401_v13, %v10130_v5  ;;  %v10392_v11 = vrot.slane %v6674_v14, 1 }
 0x18a   :  { %1749 = vrot.lane.b32.xlu1 %v1737_v58, %s5366_s3  ;;  %v10391_v58 = vld [vmem:[#allocation49_spill] sm:$0xff]  ;;  %v6817_v13 = vmul.f32 %v6502_v37, %v5618_v1  ;;  %v1501_v26 = vmul.f32 %v6780_v29, %v5573_v46  ;;  %v6824_v16 = vsel %vm266_vm0, %v1090_v62, %v1091_v24  ;;  %v6833_v5 = vsel %vm266_vm0, %v272_v39, %v10131_v63 }
 0x18b   :  { %1747 = vrot.lane.b32.xlu0 %v1738_v56, %s5366_s3  ;;  %v732_v18 = vadd.f32 %v10391_v58, %v684_v23  ;;  %v6813_v35 = vsel %vm266_vm0, %v1091_v24, %v10392_v11  ;;  %v6821_v6 = vpop.permute.xlu1 %769  ;;  %v672_v56 = vrot.slane %v6753_v33, 1  ;;  %v815_v23 = vadd.f32 %v801_v19, %v779_v36  ;;  %v6827_v41 = vpop.permute.xlu0 %723  ;;  %v10395_v58 = vld [vmem:[#allocation61_spill] sm:$0xff] }
 0x18c   :  { %10393 = vst [vmem:[#allocation30_spill] sm:$0xff] %v6821_v6  ;;  %v512_v48 = vadd.f32 %v495_v4, %v464_v31  ;;  %10394 = vst [vmem:[#allocation46_spill] sm:$0xff] %v6827_v41  ;;  %v417_v10 = vadd.f32 %v404_v20, %v380_v61  ;;  %v10132_v6 = vmov 0.0   ;;  %v1502_v33 = vmul.f32 %v6780_v29, %v5596_v55  ;;  %v10398_v36 = vld [vmem:[#allocation89_spill] sm:$0xff] }
 0x18d   :  { %v780_v11 = vadd.f32 %v10395_v58, %v732_v18  ;;  %v6838_v24 = vsel %vm6804_vm6, 1.0, %v10132_v6  ;;  %v6844_v62 = vmul.f32 %v6474_v15, %v5675_v45  ;;  %v863_v4 = vadd.f32 %v10398_v36, %v815_v23 }
 0x18e   :  { %10396 = vst [vmem:[#allocation45_spill] sm:$0xff] %v6838_v24  ;;  %v10399_v39 = vrot.slane %v6758_v57, 2  ;;  %v1513_v31 = vrot.slane %v1501_v26, 1  ;;  %v6853_v20 = vmul.f32 %v6780_v29, %v5652_v32  ;;  %v465_v18 = vadd.f32 %v10401_v7, %v417_v10 }
 0x18f   :  { %10397 = vst [vmem:[#allocation62_spill] sm:$0xff] %v6844_v62  ;;  %v894_v15 = vpop.permute.xlu1 %893  ;;  %v6863_v23 = vstv %s6782_s8  ;;  %v6869_v26 = vmul.f32 %v6838_v24, %v512_v48  ;;  %v6871_v36 = vpop.permute.xlu0 %849  ;;  %v6874_v7 = vstv %s6791_s20  ;;  %v6877_v63 = vstv %s6793_s21  ;;  %s1922_s8 = sld [smem:[#allocation10]]  ;;  %s5051_s20 = sld [smem:[#allocation10 + $0x6]] }
 0x190   :  { %v803_v61 = vsel %vm399_vm1, %v800_v3, %v10399_v39  ;;  %10400 = vst [vmem:[#allocation58_spill] sm:$0xff] %v6853_v20  ;;  %v6866_v3 = vstv %s6784_s19  ;;  %v911_v58 = vadd.f32 %v894_v15, %v863_v4  ;;  %v513_v10 = vadd.f32 %v497_v21, %v465_v18  ;;  %10403 = vst [vmem:[#allocation49_spill] sm:$0xff] %v6877_v63  ;;  %v10408_v21 = vld [vmem:[#allocation92_spill] sm:$0xff]  ;;  %s5048_s19 = sld [smem:[#allocation10 + $0x3]]  ;;  %s5053_s21 = sld [smem:[#allocation10 + $0x8]] }
 0x191   :  { %10402 = vst [vmem:[#allocation85_spill] sm:$0xff] %v6869_v26  ;;  %v816_v39 = vadd.f32 %v803_v61, %v780_v11  ;;  %v1514_v19 = vrot.slane %v1502_v33, 1  ;;  %v10404_v41 = vmov 0.0   ;;  %v6889_v4 = vmul.f32 %v6502_v37, %v5695_v59 }
 0x192   :  { %v6881_v9 = vsel %vm148_vm7, 1.0, %v10404_v41  ;;  %v6884_v47 = vmul.f32 %v6838_v24, %v911_v58  ;;  %v1081_v61 = vmul.f32 %v6623_v44, %v5640_v22  ;;  %v542_v18 = vmul.f32 %v6863_v23, %v6869_v26 }
 0x193   :  { %10405 = vst [vmem:[#allocation61_spill] sm:$0xff] %v6881_v9  ;;  %10407 = vst [vmem:[#allocation88_spill] sm:$0xff] %v6889_v4  ;;  %v864_v11 = vadd.f32 %v10408_v21, %v816_v39  ;;  %v6894_v33 = vpop.permute.xlu1 %1144  ;;  %v550_v15 = vmul.f32 %v6866_v3, %v6869_v26  ;;  %v896_v48 = vpop.permute.xlu0 %895  ;;  %v10410_v39 = vld [vmem:[#allocation23_spill] sm:$0xff]  ;;  %v10412_v6 = vrot.slane %v6817_v13, 1  ;;  %v6914_v60 = vmul.f32 %v6881_v9, %v513_v10 }
 0x194   :  { %10406 = vst [vmem:[#allocation89_spill] sm:$0xff] %v6884_v47  ;;  %10409 = vst [vmem:[#allocation92_spill] sm:$0xff] %v6894_v33  ;;  %v953_v58 = vmul.f32 %v6874_v7, %v6884_v47  ;;  %v967_v37 = vmul.f32 %v6877_v63, %v6884_v47  ;;  %v6906_v21 = vmul.f32 %v6496_v0, %v10410_v39  ;;  %vm2404_vm3 = vcmask 916480  }
 0x195   :  { %v6911_v33 = vsel %vm266_vm0, %v672_v56, %v10412_v6  ;;  %10413 = vst [vmem:[#allocation119_spill] sm:$0xff] %v6914_v60  ;;  %v912_v26 = vadd.f32 %v896_v48, %v864_v11  ;;  %v210_v14 = vadd.f32 %v10415_v50, %v10414_v8  ;;  %v1082_v47 = vmul.f32 %v6623_v44, %v10410_v39  ;;  %v10421_v11 = vld [vmem:[#allocation33_spill] sm:$0xff] }
 0x196   :  { %10411 = vst [vmem:[#allocation23_spill] sm:$0xff] %v6906_v21  ;;  %v6920_v12 = vadd.f32 %v953_v58, %v542_v18  ;;  %v6922_v24 = vadd.f32 %v967_v37, %v550_v15  ;;  %v6925_v21 = vsel %vm266_vm0, %v1513_v31, %v1514_v19  ;;  %v10417_v6 = vrot.slane %v6844_v62, 1  ;;  %v10426_v58 = vld [vmem:[#allocation25_spill] sm:$0xff] }
 0x197   :  { %10416 = vst [vmem:[#allocation93_spill] sm:$0xff] %v6925_v21  ;;  %v10418_v56 = vrot.slane %v6729_v51, 1  ;;  %v6935_v48 = vmul.f32 %v6881_v9, %v912_v26  ;;  %v6938_v50 = vstv %s6860_s22  ;;  %v6940_v8 = vpop.permute.xlu1 %1268  ;;  %v248_v18 = vadd.f32 %v10421_v11, %v210_v14  ;;  %v6949_v37 = vpop.permute.xlu0 %1190  ;;  %v10425_v11 = vld [vmem:[#allocation29_spill] sm:$0xff] }
 0x198   :  { %v10422_v15 = vrot.slane %v6853_v20, 1  ;;  %v1095_v51 = vrot.slane %v1081_v61, 1  ;;  %10423 = vst [vmem:[#allocation33_spill] sm:$0xff] %v6949_v37  ;;  %v543_v26 = vmul.f32 %v6863_v23, %v6914_v60  ;;  %v1096_v61 = vrot.slane %v1082_v47, 1  ;;  %v10430_v47 = vld [vmem:[#allocation35_spill] sm:$0xff] }
 0x199   :  { %v6932_v10 = vsel %vm266_vm0, %v10418_v56, %v10417_v6  ;;  %10420 = vst [vmem:[#allocation120_spill] sm:$0xff] %v6935_v48  ;;  %v551_v6 = vmul.f32 %v6866_v3, %v6914_v60  ;;  %v954_v14 = vmul.f32 %v6874_v7, %v6935_v48  ;;  %v10424_v56 = vld [vmem:[#allocation95_spill] sm:$0xff]  ;;  %v6965_v37 = vmul.f32 %v6623_v44, %v10426_v58  ;;  %v10431_v44 = vld [vmem:[#allocation24_spill] sm:$0xff] }
 0x19a   :  { %10419 = vst [vmem:[#allocation28_spill] sm:$0xff] %v6932_v10  ;;  %v6946_v31 = vsel %vm266_vm0, %v1514_v19, %v10422_v15  ;;  %v968_v19 = vmul.f32 %v6877_v63, %v6935_v48  ;;  %v611_v15 = vadd.f32 %v10425_v11, %v10424_v56  ;;  %v1210_v62 = vmul.f32 %v6938_v50, %v5530_v30 }
 0x19b   :  { %v6969_v20 = vadd.f32 %v954_v14, %v543_v26  ;;  %v1211_v9 = vmul.f32 %v6938_v50, %v5523_v27  ;;  %v6975_v10 = vpop.permute.xlu1 %1485  ;;  %v6979_v56 = vmul.f32 %v6938_v50, %v5565_v43  ;;  %v6984_v48 = vmul.f32 %v6534_v54, %v10431_v44  ;;  %v6986_v30 = vpop.permute.xlu0 %1270  ;;  %v10433_v27 = vld [vmem:[#allocation94_spill] sm:$0xff] }
 0x19c   :  { %v6971_v60 = vadd.f32 %v968_v19, %v551_v6  ;;  %10429 = vst [vmem:[#allocation25_spill] sm:$0xff] %v6975_v10  ;;  %v649_v11 = vadd.f32 %v10430_v47, %v611_v15  ;;  %v1504_v26 = vmul.f32 %v6780_v29, %v10431_v44  ;;  %v130_v6 = vadd.s32 16, %v6711_v25  ;;  %v10438_v47 = vld [vmem:[#allocation26_spill] sm:$0xff]  ;;  %v10447_v44 = vld [vmem:[#allocation72_spill] sm:$0xff] }
 0x19d   :  { %10427 = vst [vmem:[#allocation95_spill] sm:$0xff] %v6969_v20  ;;  %10432 = vst [vmem:[#allocation35_spill] sm:$0xff] %v6984_v48  ;;  %v10434_v14 = vrot.slane %v10433_v27, 1  ;;  %v10435_v10 = vrot.slane %v6889_v4, 1  ;;  %v10436_v43 = vrot.slane %v6817_v13, 1  ;;  %v7002_v48 = vmul.f32 %v6780_v29, %v10438_v47  ;;  %v10441_v27 = vld [vmem:[#allocation56_spill] sm:$0xff] }
 0x19e   :  { %10428 = vst [vmem:[#allocation29_spill] sm:$0xff] %v6971_v60  ;;  %v390_v60 = vmul.f32 %v6581_v52, %v5541_v34  ;;  %v7008_v25 = vmul.f32 %v6496_v0, %v10426_v58  ;;  %v1223_v4 = vrot.slane %v1211_v9, 2  ;;  %v10443_v0 = vrot.slane %v6560_v17, 1 }
 0x19f   :  { %v285_v19 = vadd.f32 %v10434_v14, %v248_v18  ;;  %v6998_v15 = vsel %vm266_vm0, %v10436_v43, %v10435_v10  ;;  %v7011_v18 = vsel %vm266_vm0, %v1095_v51, %v1096_v61  ;;  %v7016_v10 = vmul.f32 %v6581_v52, %v5591_v53  ;;  %v7020_v34 = vpop.permute.xlu1 %1611  ;;  %v7024_v51 = vpop.permute.xlu0 %1565  ;;  %v10446_v53 = vld [vmem:[#allocation32_spill] sm:$0xff] }
 0x1a0   :  { %10437 = vst [vmem:[#allocation94_spill] sm:$0xff] %v6998_v15  ;;  %10439 = vst [vmem:[#allocation26_spill] sm:$0xff] %v7008_v25  ;;  %v1222_v43 = vrot.slane %v1210_v62, 2  ;;  %v685_v25 = vadd.f32 %v10443_v0, %v649_v11  ;;  %v1518_v20 = vrot.slane %v1504_v26, 1  ;;  %vm138_vm8 = vcmp.lt.s32.totalorder %v130_v6, 17  ;;  %v10449_v26 = vld [vmem:[#allocation37_spill] sm:$0xff] }
 0x1a1   :  { %10440 = vst [vmem:[#allocation121_spill] sm:$0xff] %v7011_v18  ;;  %v333_v14 = vadd.f32 %v10441_v27, %v285_v19  ;;  %10442 = vst [vmem:[#allocation56_spill] sm:$0xff] %v7020_v34  ;;  %v7027_v13 = vstv %s6951_s23  ;;  %v10445_v18 = vld [vmem:[#allocation97_spill] sm:$0xff]  ;;  %v1519_v9 = vrot.slane %v7002_v48, 1  ;;  %v405_v62 = vrot.slane %v390_v60, 2  ;;  %v10448_v27 = vld [vmem:[#allocation59_spill] sm:$0xff] }
 0x1a2   :  { %10444 = vst [vmem:[#allocation122_spill] sm:$0xff] %v7024_v51  ;;  %v1032_v21 = vadd.f32 %v10446_v53, %v10445_v18  ;;  %v733_v15 = vadd.f32 %v10448_v27, %v685_v25  ;;  %v10153_v34 = vrot.slane %v7016_v10, 2  ;;  %v790_v17 = vmul.f32 %v6684_v49, %v5552_v38  ;;  %vm145_vm9 = vmand %vm138_vm8, %vm142_vm2 }
 0x1a3   :  { %v381_v19 = vadd.f32 %v10447_v44, %v333_v14  ;;  %v7039_v11 = vmul.f32 %v6684_v49, %v5618_v1  ;;  %v10450_v18 = vrot.slane %v6965_v37, 1  ;;  %v7047_v48 = vpop.permute.xlu1 %452  ;;  %v7053_v60 = vmul.f32 %v6780_v29, %v5972_v42  ;;  %v10452_v1 = vld [vmem:[#allocation73_spill] sm:$0xff]  ;;  %vm7090_vm10 = vmand %vm145_vm9, %vm146_vm4 }
 0x1a4   :  { %v1070_v6 = vadd.f32 %v10449_v26, %v1032_v21  ;;  %v1633_v38 = vmul.f32 %v7027_v13, %v5573_v46  ;;  %v781_v25 = vadd.f32 %v10452_v1, %v733_v15  ;;  %v7060_v21 = vmul.f32 %v6534_v54, %v10438_v47  ;;  %v10458_v1 = vld [vmem:[#allocation31_spill] sm:$0xff] }
 0x1a5   :  { %v7045_v44 = vsel %vm266_vm0, %v1096_v61, %v10450_v18  ;;  %10451 = vst [vmem:[#allocation97_spill] sm:$0xff] %v7053_v60  ;;  %v7062_v61 = vpop.permute.xlu0 %371  ;;  %v1634_v14 = vmul.f32 %v7027_v13, %v5596_v55  ;;  %v7068_v0 = vmul.f32 %v7027_v13, %v5652_v32  ;;  %v10455_v29 = vrot.slane %v6733_v28, 2  ;;  %v10457_v18 = vld [vmem:[#allocation96_spill] sm:$0xff]  ;;  %v10470_v28 = vld [vmem:[#allocation34_spill] sm:$0xff] }
 0x1a6   :  { %10453 = vst [vmem:[#allocation32_spill] sm:$0xff] %v7062_v61  ;;  %v1224_v46 = vsel %vm399_vm1, %v1222_v43, %v1223_v4  ;;  %v10456_v15 = vrot.slane %v6979_v56, 2  ;;  %v7079_v26 = vsel %vm266_vm0, %v1518_v20, %v1519_v9  ;;  %v1033_v55 = vadd.f32 %v10458_v1, %v10457_v18 }
 0x1a7   :  { %10454 = vst [vmem:[#allocation72_spill] sm:$0xff] %v7068_v0  ;;  %v418_v53 = vadd.f32 %v10455_v29, %v381_v19  ;;  %v7086_v32 = vsel %vm399_vm1, %v405_v62, %v10153_v34  ;;  %v804_v43 = vrot.slane %v790_v17, 2  ;;  %v1106_v20 = vadd.f32 %v6824_v16, %v1070_v6  ;;  %v7097_v29 = vpop.permute.xlu1 %771  ;;  %v10465_v6 = vld [vmem:[#allocation66_spill] sm:$0xff] }
 0x1a8   :  { %v7076_v27 = vsel %vm399_vm1, %v1223_v4, %v10456_v15  ;;  %10461 = vst [vmem:[#allocation59_spill] sm:$0xff] %v7097_v29  ;;  %v10154_v15 = vrot.slane %v7053_v60, 1  ;;  %v1645_v18 = vrot.slane %v1633_v38, 2  ;;  %v10462_v62 = vrot.slane %v6758_v57, 2  ;;  %v10464_v4 = vld [vmem:[#allocation40_spill] sm:$0xff] }
 0x1a9   :  { %v466_v19 = vadd.f32 %v6740_v40, %v418_v53  ;;  %v499_v2 = vpop.permute.xlu0 %498  ;;  %v1646_v34 = vrot.slane %v1634_v14, 2  ;;  %v7104_v51 = vmul.f32 %v6581_v52, %v5675_v45  ;;  %v10155_v17 = vrot.slane %v7068_v0, 2 }
 0x1aa   :  { %v817_v1 = vadd.f32 %v10462_v62, %v781_v25  ;;  %v1071_v16 = vadd.f32 %v10464_v4, %v1033_v55  ;;  %v1154_v40 = vadd.f32 %v10465_v6, %v1106_v20  ;;  %v7114_v38 = vsel %vm7090_vm10, 1.0, %v10404_v41  ;;  %v10469_v55 = vld [vmem:[#allocation99_spill] sm:$0xff]  ;;  %v10471_v20 = vld [vmem:[#allocation101_spill] sm:$0xff]  ;;  %v10475_v6 = vld [vmem:[#allocation38_spill] sm:$0xff] }
 0x1ab   :  { %10463 = vst [vmem:[#allocation37_spill] sm:$0xff] %v7104_v51  ;;  %10466 = vst [vmem:[#allocation73_spill] sm:$0xff] %v7114_v38  ;;  %v514_v57 = vadd.f32 %v499_v2, %v466_v19  ;;  %v7118_v25 = vmul.f32 %v6534_v54, %v5972_v42  ;;  %v10467_v52 = vrot.slane %v7039_v11, 2  ;;  %v7128_v53 = vmul.f32 %v6684_v49, %v5695_v59  ;;  %v10472_v19 = vld [vmem:[#allocation36_spill] sm:$0xff]  ;;  %v10473_v2 = vld [vmem:[#allocation77_spill] sm:$0xff] }
 0x1ac   :  { %v865_v45 = vadd.f32 %v6871_v36, %v817_v1  ;;  %v211_v4 = vadd.f32 %v10470_v28, %v10469_v55  ;;  %v612_v62 = vadd.f32 %v10472_v19, %v10471_v20  ;;  %v1202_v54 = vadd.f32 %v10473_v2, %v1154_v40  ;;  %v898_v36 = vpop.permute.xlu1 %897  ;;  %v10474_v1 = vld [vmem:[#allocation102_spill] sm:$0xff]  ;;  %v10477_v40 = vld [vmem:[#allocation103_spill] sm:$0xff] }
 0x1ad   :  { %v7124_v14 = vsel %vm399_vm1, %v804_v43, %v10467_v52  ;;  %10468 = vst [vmem:[#allocation96_spill] sm:$0xff] %v7128_v53  ;;  %v7140_v43 = vsel %vm266_vm0, %v1519_v9, %v10154_v15  ;;  %v1034_v59 = vadd.f32 %v10475_v6, %v10474_v1  ;;  %v7145_v49 = vmul.f32 %v7114_v38, %v514_v57  ;;  %v7147_v55 = vpop.permute.xlu0 %851  ;;  %v10478_v20 = vld [vmem:[#allocation39_spill] sm:$0xff] }
 0x1ae   :  { %v913_v52 = vadd.f32 %v898_v36, %v865_v45  ;;  %v7150_v28 = vsel %vm399_vm1, %v1645_v18, %v1646_v34  ;;  %v1455_v19 = vadd.f32 %v10478_v20, %v10477_v40  ;;  %v1107_v2 = vadd.f32 %v6813_v35, %v1071_v16  ;;  %v10479_v45 = vld [vmem:[#allocation104_spill] sm:$0xff]  ;;  %v10480_v36 = vld [vmem:[#allocation41_spill] sm:$0xff]  ;;  %v10481_v1 = vld [vmem:[#allocation43_spill] sm:$0xff] }
 0x1af   :  { %10476 = vst [vmem:[#allocation31_spill] sm:$0xff] %v7145_v49  ;;  %v10163_v9 = vrot.slane %v7104_v51, 2  ;;  %v7163_v57 = vsel %vm399_vm1, %v1646_v34, %v10155_v17  ;;  %v212_v18 = vadd.f32 %v10480_v36, %v10479_v45  ;;  %v249_v6 = vadd.f32 %v10481_v1, %v211_v4  ;;  %v10483_v40 = vld [vmem:[#allocation65_spill] sm:$0xff]  ;;  %v10487_v1 = vld [vmem:[#allocation42_spill] sm:$0xff] }
 0x1b0   :  { %v7173_v35 = vmul.f32 %v7114_v38, %v913_v52  ;;  %v1155_v20 = vadd.f32 %v10483_v40, %v1107_v2  ;;  %v1238_v15 = vadd.f32 %v1224_v46, %v1202_v54  ;;  %v7177_v34 = vpop.permute.xlu1 %1192  ;;  %v1213_v45 = vmul.f32 %v6938_v50, %v5640_v22  ;;  %v10486_v22 = vld [vmem:[#allocation106_spill] sm:$0xff] }
 0x1b1   :  { %10484 = vst [vmem:[#allocation66_spill] sm:$0xff] %v7177_v34  ;;  %v7183_v4 = vmul.f32 %v6938_v50, %v10410_v39  ;;  %v544_v36 = vmul.f32 %v6863_v23, %v7145_v49  ;;  %v552_v52 = vmul.f32 %v6866_v3, %v7145_v49  ;;  %v7193_v54 = vpop.permute.xlu0 %1146  ;;  %v1456_v40 = vadd.f32 %v10487_v1, %v10486_v22  ;;  %v10488_v39 = vld [vmem:[#allocation80_spill] sm:$0xff]  ;;  %v10490_v49 = vld [vmem:[#allocation47_spill] sm:$0xff] }
 0x1b2   :  { %10482 = vst [vmem:[#allocation40_spill] sm:$0xff] %v7173_v35  ;;  %v955_v2 = vmul.f32 %v6874_v7, %v7173_v35  ;;  %v969_v46 = vmul.f32 %v6877_v63, %v7173_v35  ;;  %10485 = vst [vmem:[#allocation99_spill] sm:$0xff] %v7193_v54  ;;  %v1203_v17 = vadd.f32 %v10488_v39, %v1155_v20  ;;  %v7199_v16 = vstv %s7109_s24  ;;  %v10493_v20 = vld [vmem:[#allocation107_spill] sm:$0xff]  ;;  %v10494_v1 = vld [vmem:[#allocation44_spill] sm:$0xff]  ;;  %s5061_s24 = sld [smem:[#allocation7 + $0x1]] }
 0x1b3   :  { %v10489_v41 = vrot.slane %v7016_v10, 2  ;;  %v650_v0 = vadd.f32 %v10490_v49, %v612_v62  ;;  %v1286_v35 = vadd.f32 %v6940_v8, %v1238_v15  ;;  %v613_v39 = vadd.f32 %v10494_v1, %v10493_v20  ;;  %v10498_v15 = vld [vmem:[#allocation51_spill] sm:$0xff]  ;;  %v10499_v1 = vld [vmem:[#allocation52_spill] sm:$0xff] }
 0x1b4   :  { %v7210_v54 = vadd.f32 %v955_v2, %v544_v36  ;;  %v7212_v22 = vadd.f32 %v969_v46, %v552_v52  ;;  %v286_v10 = vadd.f32 %v6833_v5, %v249_v6  ;;  %v7218_v51 = vstv %s7135_s25  ;;  %s5062_s25 = sld [smem:[#allocation8 + $0x1]] }
 0x1b5   :  { %v7206_v34 = vsel %vm399_vm1, %v10489_v41, %v10163_v9  ;;  %v1317_v41 = vpop.permute.xlu1 %1316  ;;  %v10495_v62 = vrot.slane %v7128_v53, 2  ;;  %v10496_v49 = vrot.slane %v7039_v11, 2  ;;  %v1072_v36 = vadd.f32 %v10498_v15, %v1034_v59  ;;  %v7228_v2 = vpop.permute.xlu0 %1272  ;;  %v10502_v59 = vld [vmem:[#allocation45_spill] sm:$0xff] }
 0x1b6   :  { %10491 = vst [vmem:[#allocation34_spill] sm:$0xff] %v7210_v54  ;;  %10492 = vst [vmem:[#allocation101_spill] sm:$0xff] %v7212_v22  ;;  %v1334_v52 = vadd.f32 %v1317_v41, %v1286_v35  ;;  %v1227_v46 = vrot.slane %v1213_v45, 2  ;;  %v1228_v20 = vrot.slane %v7183_v4, 2  ;;  %v1494_v5 = vadd.f32 %v10499_v1, %v1456_v40  ;;  %v10504_v45 = vld [vmem:[#allocation109_spill] sm:$0xff]  ;;  %v10505_v41 = vld [vmem:[#allocation48_spill] sm:$0xff] }
 0x1b7   :  { %v7225_v8 = vsel %vm399_vm1, %v10496_v49, %v10495_v62  ;;  %v1239_v6 = vadd.f32 %v7076_v27, %v1203_v17  ;;  %v7234_v9 = vstv %s7155_s6  ;;  %v7237_v53 = vstv %s7157_s1  ;;  %v10506_v15 = vld [vmem:[#allocation53_spill] sm:$0xff]  ;;  %v10507_v1 = vld [vmem:[#allocation54_spill] sm:$0xff]  ;;  %s5064_s6 = sld [smem:[#allocation10 + $0xa]]  ;;  %s5067_s1 = sld [smem:[#allocation10 + $0xd]] }
 0x1b8   :  { %10497 = vst [vmem:[#allocation36_spill] sm:$0xff] %v7225_v8  ;;  %10500 = vst [vmem:[#allocation77_spill] sm:$0xff] %v7234_v9  ;;  %v686_v11 = vadd.f32 %v6911_v33, %v650_v0  ;;  %v7241_v62 = vstv %s7168_s26  ;;  %v7244_v49 = vstv %s7170_s27  ;;  %v7247_v35 = vmul.f32 %v10502_v59, %v1334_v52  ;;  %v10542_v22 = vld [vmem:[#allocation94_spill] sm:$0xff]  ;;  %s5065_s26 = sld [smem:[#allocation10 + $0xb]]  ;;  %s5068_s27 = sld [smem:[#allocation10 + $0xe]] }
 0x1b9   :  { %10501 = vst [vmem:[#allocation102_spill] sm:$0xff] %v7237_v53  ;;  %v1035_v4 = vadd.f32 %v10505_v41, %v10504_v45  ;;  %v1493_v40 = vadd.f32 %v10506_v15, %v1455_v19  ;;  %v250_v27 = vadd.f32 %v10507_v1, %v212_v18  ;;  %v1287_v17 = vadd.f32 %v6986_v30, %v1239_v6  ;;  %v7254_v60 = vpop.permute.xlu1 %1567  ;;  %v1319_v8 = vpop.permute.xlu0 %1318  ;;  %v10511_v19 = vld [vmem:[#allocation110_spill] sm:$0xff]  ;;  %v10513_v30 = vld [vmem:[#allocation115_spill] sm:$0xff] }
 0x1ba   :  { %10503 = vst [vmem:[#allocation38_spill] sm:$0xff] %v7247_v35  ;;  %10508 = vst [vmem:[#allocation103_spill] sm:$0xff] %v7254_v60  ;;  %v1376_v33 = vmul.f32 %v7234_v9, %v7247_v35  ;;  %v1390_v0 = vmul.f32 %v7237_v53, %v7247_v35  ;;  %v7261_v52 = vsel %vm399_vm1, %v1227_v46, %v1228_v20  ;;  %v10512_v18 = vld [vmem:[#allocation50_spill] sm:$0xff]  ;;  %v10514_v6 = vrot.slane %v10513_v30, 1  ;;  %v10520_v30 = vld [vmem:[#allocation93_spill] sm:$0xff] }
 0x1bb   :  { %10509 = vst [vmem:[#allocation39_spill] sm:$0xff] %v7261_v52  ;;  %v7265_v45 = vmul.f32 %v6938_v50, %v10426_v58  ;;  %v1457_v41 = vadd.f32 %v10512_v18, %v10511_v19  ;;  %v7272_v1 = vadd.f32 %v6946_v31, %v1494_v5  ;;  %v1335_v60 = vadd.f32 %v1319_v8, %v1287_v17  ;;  %v10517_v58 = vld [vmem:[#allocation24_spill] sm:$0xff]  ;;  %v10519_v31 = vld [vmem:[#allocation55_spill] sm:$0xff]  ;;  %v10522_v8 = vld [vmem:[#allocation61_spill] sm:$0xff] }
 0x1bc   :  { %v1108_v15 = vadd.f32 %v10514_v6, %v1072_v36  ;;  %v7279_v46 = vadd.f32 %v1376_v33, %v6920_v12  ;;  %v7282_v50 = vadd.f32 %v1390_v0, %v6922_v24  ;;  %v1636_v19 = vmul.f32 %v7027_v13, %v10517_v58  ;;  %v10518_v18 = vld [vmem:[#allocation112_spill] sm:$0xff]  ;;  %v10524_v24 = vld [vmem:[#allocation114_spill] sm:$0xff]  ;;  %v10525_v33 = vld [vmem:[#allocation57_spill] sm:$0xff] }
 0x1bd   :  { %10510 = vst [vmem:[#allocation104_spill] sm:$0xff] %v7265_v45  ;;  %v1637_v36 = vmul.f32 %v7027_v13, %v10438_v47  ;;  %v213_v5 = vadd.f32 %v10519_v31, %v10518_v18  ;;  %v1529_v6 = vadd.f32 %v10520_v30, %v1493_v40  ;;  %v10521_v35 = vld [vmem:[#allocation28_spill] sm:$0xff]  ;;  %v7293_v17 = vmul.f32 %v10522_v8, %v1335_v60  ;;  %v7295_v12 = vpop.permute.xlu1 %1691  ;;  %v7301_v47 = vpop.permute.xlu0 %1613  ;;  %v10529_v31 = vld [vmem:[#allocation63_spill] sm:$0xff]  ;;  %v10535_v18 = vld [vmem:[#allocation70_spill] sm:$0xff] }
 0x1be   :  { %10515 = vst [vmem:[#allocation41_spill] sm:$0xff] %v7279_v46  ;;  %10516 = vst [vmem:[#allocation43_spill] sm:$0xff] %v7282_v50  ;;  %v287_v52 = vadd.f32 %v10521_v35, %v250_v27  ;;  %v614_v0 = vadd.f32 %v10525_v33, %v10524_v24  ;;  %v10526_v50 = vld [vmem:[#allocation60_spill] sm:$0xff]  ;;  %v10527_v46 = vld [vmem:[#allocation69_spill] sm:$0xff]  ;;  %v1073_v40 = vadd.f32 %v10529_v31, %v1035_v4  ;;  %v1650_v4 = vrot.slane %v1636_v19, 2 }
 0x1bf   :  { %10523 = vst [vmem:[#allocation65_spill] sm:$0xff] %v7293_v17  ;;  %v651_v58 = vadd.f32 %v10526_v50, %v613_v39  ;;  %v334_v29 = vadd.f32 %v10527_v46, %v286_v10  ;;  %10528 = vst [vmem:[#allocation106_spill] sm:$0xff] %v7301_v47  ;;  %v1377_v35 = vmul.f32 %v7234_v9, %v7293_v17  ;;  %v10531_v39 = vld [vmem:[#allocation23_spill] sm:$0xff]  ;;  %v10532_v10 = vld [vmem:[#allocation64_spill] sm:$0xff]  ;;  %v1651_v24 = vrot.slane %v1637_v36, 2 }
 0x1c0   :  { %v1391_v60 = vmul.f32 %v7237_v53, %v7293_v17  ;;  %v7313_v27 = vmul.f32 %v7027_v13, %v5972_v42  ;;  %v1036_v46 = vadd.f32 %v10532_v10, %v10531_v39  ;;  %v10533_v50 = vld [vmem:[#allocation86_spill] sm:$0xff]  ;;  %v10534_v33 = vld [vmem:[#allocation67_spill] sm:$0xff]  ;;  %v251_v47 = vadd.f32 %v10535_v18, %v213_v5  ;;  %v10538_v42 = vld [vmem:[#allocation29_spill] sm:$0xff] }
 0x1c1   :  { %v382_v30 = vadd.f32 %v10533_v50, %v334_v29  ;;  %v1495_v31 = vadd.f32 %v10534_v33, %v1457_v41  ;;  %v10536_v17 = vld [vmem:[#allocation95_spill] sm:$0xff]  ;;  %v7328_v61 = vpop.permute.xlu1 %454  ;;  %v10541_v10 = vld [vmem:[#allocation74_spill] sm:$0xff]  ;;  %v687_v54 = vadd.f32 %v10542_v22, %v651_v58  ;;  %v7333_v19 = vpop.permute.xlu0 %1693  ;;  %v10543_v41 = vrot.slane %v7265_v45, 2  ;;  %v10548_v33 = vld [vmem:[#allocation121_spill] sm:$0xff] }
 0x1c2   :  { %10530 = vst [vmem:[#allocation42_spill] sm:$0xff] %v7313_v27  ;;  %v7323_v8 = vadd.f32 %v1377_v35, %v10536_v17  ;;  %v7326_v13 = vadd.f32 %v1391_v60, %v10538_v42  ;;  %v10540_v39 = vld [vmem:[#allocation71_spill] sm:$0xff]  ;;  %v734_v50 = vadd.f32 %v10541_v10, %v686_v11  ;;  %v7344_v18 = vstv %s7274_s0  ;;  %v10546_v22 = vld [vmem:[#allocation78_spill] sm:$0xff]  ;;  %v10550_v10 = vld [vmem:[#allocation68_spill] sm:$0xff]  ;;  %s5070_s0 = sld [smem:[#allocation10 + $0x10]] }
 0x1c3   :  { %v652_v29 = vadd.f32 %v10540_v39, %v614_v0  ;;  %v7340_v36 = vsel %vm399_vm1, %v1228_v20, %v10543_v41  ;;  %v10545_v5 = vld [vmem:[#allocation75_spill] sm:$0xff]  ;;  %v7347_v35 = vstv %s7276_s28  ;;  %v1156_v0 = vadd.f32 %v10546_v22, %v1108_v15  ;;  %v10547_v58 = vld [vmem:[#allocation90_spill] sm:$0xff]  ;;  %v10556_v22 = vld [vmem:[#allocation76_spill] sm:$0xff]  ;;  %s5071_s28 = sld [smem:[#allocation10 + $0x11]] }
 0x1c4   :  { %10537 = vst [vmem:[#allocation80_spill] sm:$0xff] %v7323_v8  ;;  %10539 = vst [vmem:[#allocation47_spill] sm:$0xff] %v7326_v13  ;;  %v1074_v17 = vadd.f32 %v10545_v5, %v1036_v46  ;;  %v782_v60 = vadd.f32 %v10547_v58, %v734_v50  ;;  %v1109_v42 = vadd.f32 %v10548_v33, %v1073_v40  ;;  %v10549_v39 = vld [vmem:[#allocation35_spill] sm:$0xff]  ;;  %v10551_v41 = vld [vmem:[#allocation58_spill] sm:$0xff]  ;;  %vm2402_vm2 = vcmask 785408  }
 0x1c5   :  { %10544 = vst [vmem:[#allocation107_spill] sm:$0xff] %v7340_v36  ;;  %v419_v20 = vadd.f32 %v7086_v32, %v382_v30  ;;  %v1458_v46 = vadd.f32 %v10550_v10, %v10549_v39  ;;  %v10552_v5 = vrot.slane %v10551_v41, 1  ;;  %v10553_v13 = vld [vmem:[#allocation62_spill] sm:$0xff]  ;;  %v7362_v11 = vpop.permute.xlu1 %853  ;;  %v7365_v15 = vsel %vm399_vm1, %v1650_v4, %v1651_v24  ;;  %v10558_v30 = vld [vmem:[#allocation88_spill] sm:$0xff] }
 0x1c6   :  { %v10554_v8 = vrot.slane %v10553_v13, 1  ;;  %v10555_v50 = vld [vmem:[#allocation26_spill] sm:$0xff]  ;;  %v10559_v33 = vrot.slane %v10558_v30, 1  ;;  %v10560_v13 = vld [vmem:[#allocation79_spill] sm:$0xff]  ;;  %v10561_v4 = vrot.slane %v7313_v27, 2  ;;  %vm4326_vm4 = vcmask 1041408  }
 0x1c7   :  { %v1531_v45 = vadd.f32 %v10552_v5, %v1495_v31  ;;  %v1037_v40 = vadd.f32 %v10556_v22, %v10555_v50  ;;  %v10557_v58 = vld [vmem:[#allocation98_spill] sm:$0xff]  ;;  %v467_v10 = vadd.f32 %v7047_v48, %v419_v20  ;;  %v501_v31 = vpop.permute.xlu0 %500  ;;  %v1459_v41 = vadd.f32 %v10560_v13, %v7060_v21  ;;  %v10564_v21 = vld [vmem:[#allocation81_spill] sm:$0xff] }
 0x1c8   :  { %v288_v36 = vadd.f32 %v10554_v8, %v251_v47  ;;  %v1204_v32 = vadd.f32 %v10557_v58, %v1156_v0  ;;  %v688_v39 = vadd.f32 %v10559_v33, %v652_v29  ;;  %v7376_v8 = vadd.f32 %v7045_v44, %v1074_v17  ;;  %v10563_v0 = vld [vmem:[#allocation82_spill] sm:$0xff]  ;;  %v10565_v44 = vld [vmem:[#allocation83_spill] sm:$0xff]  ;;  %v10566_v58 = vld [vmem:[#allocation84_spill] sm:$0xff] }
 0x1c9   :  { %v7379_v47 = vstv %s7309_s30  ;;  %v7384_v5 = vsel %vm399_vm1, %v1651_v24, %v10561_v4  ;;  %v1496_v50 = vadd.f32 %v10563_v0, %v1458_v46  ;;  %v818_v29 = vadd.f32 %v7124_v14, %v782_v60  ;;  %v10567_v33 = vld [vmem:[#allocation91_spill] sm:$0xff]  ;;  %v7396_v27 = vpop.permute.xlu1 %1194  ;;  %v10568_v24 = vld [vmem:[#allocation105_spill] sm:$0xff]  ;;  %s5063_s30 = sld [smem:[#allocation10 + $0x9]] }
 0x1ca   :  { %10562 = vst [vmem:[#allocation44_spill] sm:$0xff] %v7384_v5  ;;  %v515_v48 = vadd.f32 %v501_v31, %v467_v10  ;;  %v7389_v20 = vstv %s7318_s10  ;;  %v1577_v22 = vadd.f32 %v10564_v21, %v1529_v6  ;;  %v335_v17 = vadd.f32 %v10565_v44, %v287_v52  ;;  %v10571_v6 = vld [vmem:[#allocation111_spill] sm:$0xff]  ;;  %v10572_v52 = vld [vmem:[#allocation117_spill] sm:$0xff]  ;;  %s5066_s10 = sld [smem:[#allocation10 + $0xc]] }
 0x1cb   :  { %v1578_v30 = vadd.f32 %v10566_v58, %v7272_v1  ;;  %v1075_v13 = vadd.f32 %v10567_v33, %v1037_v40  ;;  %v1497_v4 = vadd.f32 %v10568_v24, %v1459_v41  ;;  %v866_v46 = vadd.f32 %v7147_v55, %v818_v29  ;;  %v900_v10 = vpop.permute.xlu0 %899  ;;  %v10573_v44 = vld [vmem:[#allocation27_spill] sm:$0xff]  ;;  %v10576_v33 = vld [vmem:[#allocation100_spill] sm:$0xff] }
 0x1cc   :  { %v10569_v14 = vrot.slane %v6979_v56, 2  ;;  %v7403_v31 = vstv %s7335_s11  ;;  %v1625_v0 = vadd.f32 %v10571_v6, %v1577_v22  ;;  %v383_v1 = vadd.f32 %v10573_v44, %v335_v17  ;;  %v10577_v22 = vld [vmem:[#allocation108_spill] sm:$0xff]  ;;  %v10583_v44 = vld [vmem:[#allocation30_spill] sm:$0xff]  ;;  %s5069_s11 = sld [smem:[#allocation10 + $0xf]] }
 0x1cd   :  { %10570 = vst [vmem:[#allocation51_spill] sm:$0xff] %v7403_v31  ;;  %v1626_v21 = vadd.f32 %v10572_v52, %v1578_v30  ;;  %v7409_v58 = vstv %s7349_s12  ;;  %v1532_v40 = vadd.f32 %v7079_v26, %v1496_v50  ;;  %v7414_v55 = vmul.f32 %v10502_v59, %v515_v48  ;;  %v1321_v6 = vpop.permute.xlu1 %1320  ;;  %v10579_v52 = vld [vmem:[#allocation113_spill] sm:$0xff]  ;;  %s5370_s12 = smov 16  }
 0x1ce   :  { %v1240_v60 = vadd.f32 %v10569_v14, %v1204_v32  ;;  %10574 = vst [vmem:[#allocation52_spill] sm:$0xff] %v7409_v58  ;;  %v914_v56 = vadd.f32 %v900_v10, %v866_v46  ;;  %v10575_v32 = vld [vmem:[#allocation87_spill] sm:$0xff]  ;;  %v1157_v24 = vadd.f32 %v10576_v33, %v1109_v42  ;;  %v1460_v14 = vadd.f32 %v10577_v22, %v7118_v25  ;;  %v10580_v42 = vld [vmem:[#allocation116_spill] sm:$0xff]  ;;  %v10582_v10 = vld [vmem:[#allocation85_spill] sm:$0xff] }
 0x1cf   :  { %v735_v29 = vadd.f32 %v10575_v32, %v687_v54  ;;  %v10578_v30 = vrot.slane %v6965_v37, 1  ;;  %v1579_v26 = vadd.f32 %v10579_v52, %v1531_v45  ;;  %v7431_v54 = vpop.permute.xlu0 %1274  ;;  %v336_v46 = vadd.f32 %v10580_v42, %v288_v36  ;;  %v10581_v36 = vld [vmem:[#allocation119_spill] sm:$0xff]  ;;  %v10589_v42 = vld [vmem:[#allocation120_spill] sm:$0xff] }
 0x1d0   :  { %v1288_v41 = vadd.f32 %v7228_v2, %v1240_v60  ;;  %v7426_v2 = vadd.f32 %v7140_v43, %v1497_v4  ;;  %v7429_v50 = vmul.f32 %v10502_v59, %v914_v56  ;;  %v1661_v25 = vadd.f32 %v7150_v28, %v1625_v0 }
 0x1d1   :  { %v7422_v17 = vadd.f32 %v10578_v30, %v1075_v13  ;;  %v7436_v37 = vadd.f32 %v7206_v34, %v383_v1  ;;  %v1662_v13 = vadd.f32 %v7163_v57, %v1626_v21  ;;  %v545_v45 = vmul.f32 %v6863_v23, %v7414_v55  ;;  %v7456_v21 = vpop.permute.xlu1 %1615  ;;  %v10588_v30 = vld [vmem:[#allocation89_spill] sm:$0xff] }
 0x1d2   :  { %v1336_v48 = vadd.f32 %v1321_v6, %v1288_v41  ;;  %v553_v43 = vmul.f32 %v6866_v3, %v7414_v55  ;;  %v956_v4 = vmul.f32 %v6874_v7, %v7429_v50  ;;  %v970_v60 = vmul.f32 %v6877_v63, %v7429_v50  ;;  %v10584_v41 = vld [vmem:[#allocation46_spill] sm:$0xff]  ;;  %v10598_v63 = vld [vmem:[#allocation59_spill] sm:$0xff] }
 0x1d3   :  { %v527_v28 = vmul.f32 %v7199_v16, %v10581_v36  ;;  %v526_v34 = vmul.f32 %v7199_v16, %v10582_v10  ;;  %v534_v57 = vmul.f32 %v7218_v51, %v10582_v10  ;;  %v783_v1 = vadd.f32 %v10583_v44, %v735_v29  ;;  %v7464_v22 = vpop.permute.xlu0 %1569  ;;  %v10591_v10 = vld [vmem:[#allocation25_spill] sm:$0xff] }
 0x1d4   :  { %v7454_v0 = vmul.f32 %v7114_v38, %v1336_v48  ;;  %v736_v56 = vadd.f32 %v10584_v41, %v688_v39  ;;  %v7460_v32 = vadd.f32 %v956_v4, %v545_v45  ;;  %v7462_v33 = vadd.f32 %v970_v60, %v553_v43  ;;  %10587 = vst [vmem:[#allocation53_spill] sm:$0xff] %v7464_v22  ;;  %v10590_v43 = vld [vmem:[#allocation33_spill] sm:$0xff]  ;;  %v10592_v41 = vld [vmem:[#allocation56_spill] sm:$0xff] }
 0x1d5   :  { %v925_v6 = vmul.f32 %v7241_v62, %v10588_v30  ;;  %v939_v52 = vmul.f32 %v7244_v49, %v10588_v30  ;;  %v926_v39 = vmul.f32 %v7241_v62, %v10589_v42  ;;  %v940_v45 = vmul.f32 %v7244_v49, %v10589_v42  ;;  %v10595_v38 = vld [vmem:[#allocation101_spill] sm:$0xff]  ;;  %v10597_v22 = vld [vmem:[#allocation32_spill] sm:$0xff] }
 0x1d6   :  { %10585 = vst [vmem:[#allocation109_spill] sm:$0xff] %v7460_v32  ;;  %10586 = vst [vmem:[#allocation48_spill] sm:$0xff] %v7462_v33  ;;  %v1378_v48 = vmul.f32 %v7234_v9, %v7454_v0  ;;  %v1392_v29 = vmul.f32 %v7237_v53, %v7454_v0  ;;  %v1205_v4 = vadd.f32 %v10590_v43, %v1157_v24  ;;  %v10593_v33 = vld [vmem:[#allocation34_spill] sm:$0xff]  ;;  %v1740_v53 = vpop.permute.xlu1 %1739 }
 0x1d7   :  { %v1709_v60 = vadd.f32 %v7295_v12, %v1661_v25  ;;  %v1498_v44 = vadd.f32 %v10591_v10, %v1460_v14  ;;  %v1627_v30 = vadd.f32 %v10592_v41, %v1579_v26  ;;  %v535_v5 = vmul.f32 %v7218_v51, %v10581_v36  ;;  %v7492_v12 = vpop.permute.xlu0 %1695  ;;  %v10599_v26 = vld [vmem:[#allocation92_spill] sm:$0xff]  ;;  %v10601_v41 = vld [vmem:[#allocation39_spill] sm:$0xff] }
 0x1d8   :  { %v7483_v32 = vadd.f32 %v1378_v48, %v10593_v33  ;;  %v7486_v9 = vadd.f32 %v1392_v29, %v10595_v38  ;;  %v384_v42 = vadd.f32 %v10597_v22, %v336_v46  ;;  %v784_v24 = vadd.f32 %v10598_v63, %v736_v56  ;;  %v10600_v48 = vld [vmem:[#allocation36_spill] sm:$0xff] }
 0x1d9   :  { %v1757_v43 = vadd.f32 %v1740_v53, %v1709_v60  ;;  %v931_v14 = vadd.f32 %v925_v6, %v526_v34  ;;  %v945_v25 = vadd.f32 %v939_v52, %v534_v57  ;;  %v1158_v33 = vadd.f32 %v10599_v26, %v7376_v8  ;;  %v10603_v53 = vld [vmem:[#allocation97_spill] sm:$0xff]  ;;  %v10605_v34 = vld [vmem:[#allocation72_spill] sm:$0xff] }
 0x1da   :  { %10594 = vst [vmem:[#allocation54_spill] sm:$0xff] %v7483_v32  ;;  %10596 = vst [vmem:[#allocation110_spill] sm:$0xff] %v7486_v9  ;;  %v819_v10 = vadd.f32 %v10600_v48, %v783_v1  ;;  %v932_v38 = vadd.f32 %v926_v39, %v527_v28  ;;  %v946_v29 = vadd.f32 %v940_v45, %v535_v5  ;;  %v10602_v32 = vld [vmem:[#allocation122_spill] sm:$0xff]  ;;  %v10604_v56 = vrot.slane %v10603_v53, 1  ;;  %v7509_v8 = vpop.permute.xlu1 %456  ;;  %v10608_v1 = vld [vmem:[#allocation37_spill] sm:$0xff] }
 0x1db   :  { %v1241_v9 = vadd.f32 %v10601_v41, %v1205_v4  ;;  %v1763_v36 = vmul.f32 %v10502_v59, %v1757_v43  ;;  %v1580_v46 = vadd.f32 %v10602_v32, %v1532_v40  ;;  %v1710_v63 = vadd.f32 %v7333_v19, %v1662_v13  ;;  %10607 = vst [vmem:[#allocation50_spill] sm:$0xff] %v7509_v8  ;;  %v1742_v40 = vpop.permute.xlu0 %1741  ;;  %v10610_v19 = vld [vmem:[#allocation96_spill] sm:$0xff]  ;;  %v10613_v45 = vld [vmem:[#allocation31_spill] sm:$0xff]  ;;  %v10616_v41 = vld [vmem:[#allocation41_spill] sm:$0xff] }
 0x1dc   :  { %v7503_v22 = vadd.f32 %v10604_v56, %v1498_v44  ;;  %v10606_v57 = vrot.slane %v10605_v34, 2  ;;  %v10609_v52 = vrot.slane %v10608_v1, 2  ;;  %v10611_v13 = vrot.slane %v10610_v19, 2  ;;  %v10614_v60 = vld [vmem:[#allocation40_spill] sm:$0xff]  ;;  %v10620_v34 = vld [vmem:[#allocation99_spill] sm:$0xff]  ;;  %v10621_v1 = vld [vmem:[#allocation38_spill] sm:$0xff] }
 0x1dd   :  { %v1799_v5 = vmul.f32 %v7403_v31, %v1763_v36  ;;  %v1813_v28 = vmul.f32 %v7409_v58, %v1763_v36  ;;  %v528_v4 = vmul.f32 %v7199_v16, %v10613_v45  ;;  %v927_v44 = vmul.f32 %v7241_v62, %v10614_v60 }
 0x1de   :  { %v7507_v6 = vadd.f32 %v10606_v57, %v1627_v30  ;;  %v7515_v39 = vadd.f32 %v10609_v52, %v384_v42  ;;  %v7519_v32 = vadd.f32 %v10611_v13, %v784_v24  ;;  %v941_v30 = vmul.f32 %v7244_v49, %v10614_v60  ;;  %v10615_v42 = vld [vmem:[#allocation66_spill] sm:$0xff]  ;;  %v10618_v24 = vld [vmem:[#allocation43_spill] sm:$0xff]  ;;  %v7543_v13 = vpop.permute.xlu1 %855 }
 0x1df   :  { %v1758_v43 = vadd.f32 %v1742_v40, %v1710_v63  ;;  %v536_v26 = vmul.f32 %v7218_v51, %v10613_v45  ;;  %v1206_v48 = vadd.f32 %v10615_v42, %v1158_v33  ;;  %v7531_v53 = vadd.f32 %v1799_v5, %v10616_v41  ;;  %v10622_v40 = vld [vmem:[#allocation61_spill] sm:$0xff]  ;;  %10623 = vst [vmem:[#allocation55_spill] sm:$0xff] %v7543_v13  ;;  %v10625_v45 = vld [vmem:[#allocation106_spill] sm:$0xff]  ;;  %v503_v42 = vpop.permute.xlu0 %502 }
 0x1e0   :  { %10612 = vst [vmem:[#allocation115_spill] sm:$0xff] %v7519_v32  ;;  %v7534_v56 = vadd.f32 %v1813_v28, %v10618_v24  ;;  %v1159_v57 = vadd.f32 %v10620_v34, %v7422_v17  ;;  %v1348_v52 = vmul.f32 %v7344_v18, %v10621_v1  ;;  %v1362_v63 = vmul.f32 %v7347_v35, %v10621_v1  ;;  %v10624_v33 = vld [vmem:[#allocation65_spill] sm:$0xff]  ;;  %v10626_v1 = vld [vmem:[#allocation103_spill] sm:$0xff] }
 0x1e1   :  { %10617 = vst [vmem:[#allocation24_spill] sm:$0xff] %v7531_v53  ;;  %v1764_v19 = vmul.f32 %v10622_v40, %v1758_v43  ;;  %v1349_v5 = vmul.f32 %v7344_v18, %v10624_v33  ;;  %v1363_v28 = vmul.f32 %v7347_v35, %v10624_v33  ;;  %v1628_v60 = vadd.f32 %v10625_v45, %v1580_v46  ;;  %v10627_v32 = vld [vmem:[#allocation107_spill] sm:$0xff]  ;;  %v10628_v45 = vld [vmem:[#allocation80_spill] sm:$0xff] }
 0x1e2   :  { %10619 = vst [vmem:[#allocation112_spill] sm:$0xff] %v7534_v56  ;;  %v468_v17 = vadd.f32 %v7328_v61, %v7436_v37  ;;  %v933_v41 = vadd.f32 %v927_v44, %v528_v4  ;;  %v947_v24 = vadd.f32 %v941_v30, %v536_v26  ;;  %v1581_v56 = vadd.f32 %v10626_v1, %v7426_v2  ;;  %v10630_v37 = vld [vmem:[#allocation47_spill] sm:$0xff]  ;;  %v1277_v44 = vpop.permute.xlu1 %1276 }
 0x1e3   :  { %v1800_v34 = vmul.f32 %v7403_v31, %v1764_v19  ;;  %v1814_v43 = vmul.f32 %v7409_v58, %v1764_v19  ;;  %v1207_v53 = vadd.f32 %v7396_v27, %v1159_v57  ;;  %v1242_v33 = vadd.f32 %v10627_v32, %v1206_v48  ;;  %v902_v31 = vpop.permute.xlu0 %901 }
 0x1e4   :  { %v516_v13 = vadd.f32 %v503_v42, %v468_v17  ;;  %v1354_v8 = vadd.f32 %v1348_v52, %v931_v14  ;;  %v867_v46 = vadd.f32 %v7362_v11, %v819_v10  ;;  %v1368_v30 = vadd.f32 %v1362_v63, %v945_v25 }
 0x1e5   :  { %v7560_v61 = vadd.f32 %v1800_v34, %v10628_v45  ;;  %v7563_v4 = vadd.f32 %v1814_v43, %v10630_v37  ;;  %v1355_v26 = vadd.f32 %v1349_v5, %v932_v38  ;;  %v1369_v58 = vadd.f32 %v1363_v28, %v946_v29 }
 0x1e6   :  { %v7566_v2 = vadd.f32 %v7365_v15, %v1628_v60  ;;  %v529_v27 = vmul.f32 %v7199_v16, %v7414_v55  ;;  %v537_v11 = vmul.f32 %v7218_v51, %v7414_v55  ;;  %v522_v14 = vmul.f32 %v10622_v40, %v516_v13  ;;  %v10632_v15 = vld [vmem:[#allocation104_spill] sm:$0xff]  ;;  %v1618_v63 = vpop.permute.xlu1 %1617 }
 0x1e7   :  { %10629 = vst [vmem:[#allocation93_spill] sm:$0xff] %v7560_v61  ;;  %10631 = vst [vmem:[#allocation28_spill] sm:$0xff] %v7563_v4  ;;  %v915_v10 = vadd.f32 %v902_v31, %v867_v46  ;;  %v928_v32 = vmul.f32 %v7241_v62, %v7429_v50  ;;  %v942_v25 = vmul.f32 %v7244_v49, %v7429_v50  ;;  %v10633_v29 = vrot.slane %v10632_v15, 2 }
 0x1e8   :  { %v1289_v38 = vadd.f32 %v7431_v54, %v1241_v9  ;;  %v1350_v57 = vmul.f32 %v7344_v18, %v7454_v0  ;;  %v1771_v55 = vmul.f32 %v7379_v47, %v1763_v36  ;;  %v1785_v52 = vmul.f32 %v7389_v20, %v1763_v36  ;;  %v10634_v36 = vld [vmem:[#allocation49_spill] sm:$0xff] }
 0x1e9   :  { %v7580_v48 = vadd.f32 %v10633_v29, %v1207_v53  ;;  %v921_v31 = vmul.f32 %v10622_v40, %v915_v10  ;;  %v1364_v13 = vmul.f32 %v7347_v35, %v7454_v0  ;;  %v1629_v50 = vadd.f32 %v7456_v21, %v1581_v56  ;;  %v1323_v53 = vpop.permute.xlu0 %1322  ;;  %v10642_v29 = vld [vmem:[#allocation115_spill] sm:$0xff] }
 0x1ea   :  { %v1772_v9 = vmul.f32 %v7379_v47, %v1764_v19  ;;  %v1786_v54 = vmul.f32 %v7389_v20, %v1764_v19  ;;  %v546_v5 = vmul.f32 %v6863_v23, %v522_v14  ;;  %v554_v28 = vmul.f32 %v6866_v3, %v522_v14  ;;  %v1744_v46 = vpop.permute.xlu1 %1743 }
 0x1eb   :  { %v957_v60 = vmul.f32 %v6874_v7, %v921_v31  ;;  %v971_v17 = vmul.f32 %v10634_v36, %v921_v31  ;;  %v7596_v42 = vadd.f32 %v928_v32, %v529_v27  ;;  %v7598_v34 = vadd.f32 %v942_v25, %v537_v11 }
 0x1ec   :  { %v1711_v0 = vadd.f32 %v7492_v12, %v7507_v6  ;;  %v1337_v21 = vadd.f32 %v1323_v53, %v1289_v38  ;;  %v7602_v56 = vadd.f32 %v1771_v55, %v1354_v8  ;;  %v7604_v19 = vadd.f32 %v1785_v52, %v1368_v30  ;;  %v10639_v6 = vld [vmem:[#allocation53_spill] sm:$0xff]  ;;  %v10640_v30 = vld [vmem:[#allocation44_spill] sm:$0xff]  ;;  %v10641_v38 = vld [vmem:[#allocation50_spill] sm:$0xff] }
 0x1ed   :  { %v7606_v43 = vadd.f32 %v957_v60, %v546_v5  ;;  %v7608_v1 = vadd.f32 %v971_v17, %v554_v28  ;;  %v7610_v45 = vadd.f32 %v1772_v9, %v1355_v26  ;;  %v7612_v37 = vadd.f32 %v1786_v54, %v1369_v58  ;;  %v1698_v10 = vpop.permute.xlu0 %1697  ;;  %v10643_v26 = vld [vmem:[#allocation55_spill] sm:$0xff]  ;;  %v10644_v58 = vld [vmem:[#allocation77_spill] sm:$0xff]  ;;  %v10645_v9 = vld [vmem:[#allocation102_spill] sm:$0xff] }
 0x1ee   :  { %10635 = vst [vmem:[#allocation114_spill] sm:$0xff] %v7602_v56  ;;  %10636 = vst [vmem:[#allocation57_spill] sm:$0xff] %v7604_v19  ;;  %v1343_v27 = vmul.f32 %v10502_v59, %v1337_v21  ;;  %v1759_v11 = vadd.f32 %v1744_v46, %v1711_v0  ;;  %v1356_v32 = vadd.f32 %v1350_v57, %v933_v41  ;;  %v10646_v5 = vld [vmem:[#allocation73_spill] sm:$0xff]  ;;  %v2445_v57 = vsel %vm1825_vm11, %v7604_v19, 0.0  ;;  %v10649_v21 = vld [vmem:[#allocation51_spill] sm:$0xff] }
 0x1ef   :  { %10637 = vst [vmem:[#allocation60_spill] sm:$0xff] %v7610_v45  ;;  %10638 = vst [vmem:[#allocation69_spill] sm:$0xff] %v7612_v37  ;;  %v1370_v12 = vadd.f32 %v1364_v13, %v947_v24  ;;  %v1582_v8 = vadd.f32 %v10639_v6, %v7503_v22  ;;  %v7618_v25 = vadd.f32 %v10640_v30, %v1629_v50  ;;  %v904_v24 = vpop.permute.xlu1 %903  ;;  %v1826_v22 = vsel %vm1825_vm11, %v7602_v56, 0.0  ;;  %v10647_v13 = vld [vmem:[#allocation109_spill] sm:$0xff]  ;;  %v10648_v50 = vld [vmem:[#allocation48_spill] sm:$0xff] }
 0x1f0   :  { %v469_v15 = vadd.f32 %v10641_v38, %v7515_v39  ;;  %v868_v55 = vadd.f32 %v10643_v26, %v10642_v29  ;;  %v1379_v52 = vmul.f32 %v10644_v58, %v1343_v27  ;;  %v1393_v54 = vmul.f32 %v10645_v9, %v1343_v27 }
 0x1f1   :  { %v1290_v53 = vadd.f32 %v1277_v44, %v1242_v33  ;;  %v1765_v41 = vmul.f32 %v10646_v5, %v1759_v11  ;;  %v505_v60 = vpop.permute.xlu0 %504  ;;  %v1827_v33 = vsel %vm1825_vm11, %v7610_v45, 0.0  ;;  %v2446_v44 = vsel %vm1825_vm11, %v7612_v37, 0.0  ;;  %v10650_v11 = vld [vmem:[#allocation52_spill] sm:$0xff]  ;;  %v10653_v37 = vld [vmem:[#allocation110_spill] sm:$0xff] }
 0x1f2   :  { %v7632_v39 = vadd.f32 %v1379_v52, %v10647_v13  ;;  %v7635_v28 = vadd.f32 %v1393_v54, %v10648_v50  ;;  %v530_v17 = vmul.f32 %v7199_v16, %v522_v14  ;;  %v538_v0 = vmul.f32 %v7218_v51, %v522_v14  ;;  %v10651_v13 = vld [vmem:[#allocation54_spill] sm:$0xff] }
 0x1f3   :  { %v1801_v46 = vmul.f32 %v10649_v21, %v1765_v41  ;;  %v1815_v6 = vmul.f32 %v10650_v11, %v1765_v41  ;;  %v1773_v30 = vmul.f32 %v7379_v47, %v1765_v41  ;;  %v1787_v38 = vmul.f32 %v7389_v20, %v1765_v41  ;;  %v1325_v14 = vpop.permute.xlu1 %1324 }
 0x1f4   :  { %v916_v29 = vadd.f32 %v904_v24, %v868_v55  ;;  %v517_v26 = vadd.f32 %v505_v60, %v469_v15  ;;  %v929_v52 = vmul.f32 %v7241_v62, %v921_v31  ;;  %v1630_v54 = vadd.f32 %v1618_v63, %v1582_v8 }
 0x1f5   :  { %v7649_v50 = vadd.f32 %v1801_v46, %v10651_v13  ;;  %v7652_v19 = vadd.f32 %v1815_v6, %v10653_v37  ;;  %v943_v4 = vmul.f32 %v7244_v49, %v921_v31  ;;  %v1338_v56 = vadd.f32 %v1325_v14, %v1290_v53  ;;  %v1279_v41 = vpop.permute.xlu0 %1278 }
 0x1f6   :  { %v922_v61 = vmul.f32 %v10646_v5, %v916_v29  ;;  %v523_v45 = vmul.f32 %v10646_v5, %v517_v26  ;;  %v1351_v15 = vmul.f32 %v7344_v18, %v1343_v27  ;;  %v1365_v55 = vmul.f32 %v7347_v35, %v1343_v27  ;;  %v10655_v26 = vld [vmem:[#allocation42_spill] sm:$0xff] }
 0x1f7   :  { %10652 = vst [vmem:[#allocation63_spill] sm:$0xff] %v7649_v50  ;;  %10654 = vst [vmem:[#allocation23_spill] sm:$0xff] %v7652_v19  ;;  %v1828_v63 = vadd.f32 %v1827_v33, %v1826_v22  ;;  %v2447_v8 = vadd.f32 %v2446_v44, %v2445_v57  ;;  %v7659_v24 = vadd.f32 %v1773_v30, %v1356_v32  ;;  %v1746_v29 = vpop.permute.xlu1 %1745  ;;  %v10656_v13 = vrot.slane %v10655_v26, 2 }
 0x1f8   :  { %v7661_v60 = vadd.f32 %v1787_v38, %v1370_v12  ;;  %v1712_v37 = vadd.f32 %v1698_v10, %v7566_v2  ;;  %v958_v31 = vmul.f32 %v6874_v7, %v922_v61  ;;  %v972_v46 = vmul.f32 %v10634_v36, %v922_v61 }
 0x1f9   :  { %v547_v6 = vmul.f32 %v6863_v23, %v523_v45  ;;  %v555_v53 = vmul.f32 %v6866_v3, %v523_v45  ;;  %v1666_v27 = vadd.f32 %v10656_v13, %v1630_v54  ;;  %v935_v22 = vadd.f32 %v929_v52, %v530_v17  ;;  %v1700_v33 = vpop.permute.xlu0 %1699 }
 0x1fa   :  { %v949_v57 = vadd.f32 %v943_v4, %v538_v0  ;;  %v1344_v32 = vmul.f32 %v10622_v40, %v1338_v56  ;;  %v1760_v12 = vadd.f32 %v1746_v29, %v1712_v37  ;;  %v1357_v2 = vadd.f32 %v1351_v15, %v7596_v42 }
 0x1fb   :  { %v1371_v7 = vadd.f32 %v1365_v55, %v7598_v34  ;;  %v1291_v36 = vadd.f32 %v1279_v41, %v7580_v48  ;;  %v964_v10 = vadd.f32 %v958_v31, %v547_v6  ;;  %v1830_v44 = vsel %vm1829_vm12, %v7659_v24, 0.0  ;;  %v1702_v34 = vpop.permute.xlu1 %1701 }
 0x1fc   :  { %v1380_v23 = vmul.f32 %v10644_v58, %v1344_v32  ;;  %v1394_v3 = vmul.f32 %v10645_v9, %v1344_v32  ;;  %v2448_v4 = vsel %vm1829_vm12, %v7661_v60, 0.0  ;;  %v930_v56 = vmul.f32 %v7241_v62, %v922_v61 }
 0x1fd   :  { %v944_v17 = vmul.f32 %v7244_v49, %v922_v61  ;;  %v1766_v42 = vmul.f32 %v10502_v59, %v1760_v12  ;;  %v978_v0 = vadd.f32 %v972_v46, %v555_v53  ;;  %v531_v48 = vmul.f32 %v7199_v16, %v523_v45  ;;  %v1327_v52 = vpop.permute.xlu0 %1326 }
 0x1fe   :  { %v539_v30 = vmul.f32 %v7218_v51, %v523_v45  ;;  %v1713_v38 = vadd.f32 %v1700_v33, %v7618_v25  ;;  %v1386_v54 = vadd.f32 %v1380_v23, %v7606_v43  ;;  %v1352_v61 = vmul.f32 %v7344_v18, %v1344_v32 }
 0x1ff   :  { %v1774_v14 = vmul.f32 %v7379_v47, %v1766_v42  ;;  %v1788_v41 = vmul.f32 %v7389_v20, %v1766_v42  ;;  %v1802_v62 = vmul.f32 %v10649_v21, %v1766_v42  ;;  %v1816_v49 = vmul.f32 %v10650_v11, %v1766_v42  ;;  %v1750_v45 = vpop.permute.xlu1 %1749 }
 0x200   :  { %v1714_v15 = vadd.f32 %v1702_v34, %v1666_v27  ;;  %v1339_v55 = vadd.f32 %v1327_v52, %v1291_v36  ;;  %v1400_v16 = vadd.f32 %v1394_v3, %v7608_v1  ;;  %v1366_v51 = vmul.f32 %v7347_v35, %v1344_v32 }
 0x201   :  { %v7694_v25 = vadd.f32 %v1774_v14, %v1357_v2  ;;  %v7697_v43 = vadd.f32 %v1802_v62, %v7632_v39  ;;  %v7700_v37 = vadd.f32 %v1816_v49, %v7635_v28  ;;  %v1748_v6 = vpop.permute.xlu0 %1747  ;;  %v1831_v53 = vadd.f32 %v1830_v44, %v1828_v63 }
 0x202   :  { %v1345_v31 = vmul.f32 %v10646_v5, %v1339_v55  ;;  %v1762_v46 = vadd.f32 %v1750_v45, %v1714_v15  ;;  %v7703_v29 = vadd.f32 %v1788_v41, %v1371_v7  ;;  %v1761_v26 = vadd.f32 %v1748_v6, %v1713_v38 }
 0x203   :  { %10657 = vst [vmem:[#allocation64_spill] sm:$0xff] %v7697_v43  ;;  %10658 = vst [vmem:[#allocation86_spill] sm:$0xff] %v7700_v37  ;;  %v936_v1 = vadd.f32 %v930_v56, %v531_v48  ;;  %v950_v13 = vadd.f32 %v944_v17, %v539_v30  ;;  %v2449_v27 = vadd.f32 %v2448_v4, %v2447_v8  ;;  %v1832_v63 = vsel %vm1825_vm11, %v7694_v25, 0.0 }
 0x204   :  { %v1353_v32 = vmul.f32 %v7344_v18, %v1345_v31  ;;  %v1381_v12 = vmul.f32 %v10644_v58, %v1345_v31  ;;  %v1395_v39 = vmul.f32 %v10645_v9, %v1345_v31  ;;  %v1358_v33 = vadd.f32 %v1352_v61, %v935_v22 }
 0x205   :  { %v1768_v28 = vmul.f32 %v10646_v5, %v1762_v46  ;;  %v1767_v2 = vmul.f32 %v10622_v40, %v1761_v26  ;;  %v1372_v7 = vadd.f32 %v1366_v51, %v949_v57  ;;  %v1367_v36 = vmul.f32 %v7347_v35, %v1345_v31  ;;  %v10663_v26 = vld [vmem:[#allocation114_spill] sm:$0xff] }
 0x206   :  { %v1359_v23 = vadd.f32 %v1353_v32, %v936_v1  ;;  %v2450_v8 = vsel %vm1825_vm11, %v7703_v29, 0.0  ;;  %v1387_v18 = vadd.f32 %v1381_v12, %v964_v10  ;;  %v1401_v35 = vadd.f32 %v1395_v39, %v978_v0 }
 0x207   :  { %v1775_v58 = vmul.f32 %v7379_v47, %v1767_v2  ;;  %v1789_v9 = vmul.f32 %v7389_v20, %v1767_v2  ;;  %v1803_v22 = vmul.f32 %v10649_v21, %v1767_v2  ;;  %v1817_v3 = vmul.f32 %v10650_v11, %v1767_v2 }
 0x208   :  { %v1776_v44 = vmul.f32 %v7379_v47, %v1768_v28  ;;  %v1790_v4 = vmul.f32 %v7389_v20, %v1768_v28  ;;  %v1804_v57 = vmul.f32 %v10649_v21, %v1768_v28  ;;  %v1818_v42 = vmul.f32 %v10650_v11, %v1768_v28 }
 0x209   :  { %v7722_v56 = vadd.f32 %v1775_v58, %v1358_v33  ;;  %v7724_v17 = vadd.f32 %v1789_v9, %v1372_v7  ;;  %v7726_v10 = vadd.f32 %v1803_v22, %v1386_v54  ;;  %v1833_v48 = vadd.f32 %v1832_v63, %v1831_v53  ;;  %v10665_v58 = vld [vmem:[#allocation93_spill] sm:$0xff] }
 0x20a   :  { %v7729_v34 = vadd.f32 %v1776_v44, %v1359_v23  ;;  %v7731_v30 = vadd.f32 %v1804_v57, %v1387_v18  ;;  %v7733_v38 = vadd.f32 %v1817_v3, %v1400_v16  ;;  %v1373_v20 = vadd.f32 %v1367_v36, %v950_v13  ;;  %v10664_v13 = vld [vmem:[#allocation60_spill] sm:$0xff] }
 0x20b   :  { %10659 = vst [vmem:[#allocation67_spill] sm:$0xff] %v7726_v10  ;;  %v1834_v47 = vsel %vm1825_vm11, %v7722_v56, 0.0  ;;  %v2452_v21 = vsel %vm1825_vm11, %v7724_v17, 0.0  ;;  %v7739_v0 = vadd.f32 %v1818_v42, %v1401_v35  ;;  %v2451_v54 = vadd.f32 %v2450_v8, %v2449_v27 }
 0x20c   :  { %10660 = vst [vmem:[#allocation70_spill] sm:$0xff] %v7731_v30  ;;  %10661 = vst [vmem:[#allocation95_spill] sm:$0xff] %v7733_v38  ;;  %v1835_v52 = vadd.f32 %v1834_v47, %v1833_v48  ;;  %v1836_v11 = vsel %vm1829_vm12, %v7729_v34, 0.0  ;;  %v7743_v14 = vadd.f32 %v1790_v4, %v1373_v20  ;;  %v3073_v9 = vsel %vm1825_vm11, %v10665_v58, 0.0  ;;  %v10666_v48 = vld [vmem:[#allocation24_spill] sm:$0xff] }
 0x20d   :  { %10662 = vst [vmem:[#allocation29_spill] sm:$0xff] %v7739_v0  ;;  %v2453_v62 = vadd.f32 %v2452_v21, %v2451_v54  ;;  %v3072_v47 = vsel %vm1825_vm11, %v10666_v48, 0.0  ;;  %v3075_v20 = vsel %vm1829_vm12, %v7649_v50, 0.0 }
 0x20e   :  { %v1837_v41 = vadd.f32 %v1836_v11, %v1835_v52  ;;  %v2454_v49 = vsel %vm1829_vm12, %v7743_v14, 0.0  ;;  %v3074_v52 = vadd.f32 %v3073_v9, %v3072_v47 }
 0x20f   :  { %v2455_v61 = vadd.f32 %v2454_v49, %v2453_v62  ;;  %v10667_v62 = vld [vmem:[#allocation28_spill] sm:$0xff] }
 0x210   :  { %1838 = vadd.xlane.f32.xlu0 %v1837_v41  ;;  %v3077_v41 = vsel %vm1825_vm11, %v7697_v43, 0.0  ;;  %v3700_v49 = vsel %vm1825_vm11, %v10667_v62, 0.0 }
 0x214   :  { %2456 = vadd.xlane.f32.xlu0 %v2455_v61 }
 0x29d   :  { %v1839_v15 = vpop.xlane.xlu0 %1838 }
 0x29e   :  { %v1840_v55 = vrot.slane %v1839_v15, 4 }
 0x2a0   :  { %v1841_v16 = vadd.f32 %v1840_v55, %v1839_v15  ;;  %v3076_v15 = vadd.f32 %v3075_v20, %v3074_v52 }
 0x2a2   :  { %v1842_v51 = vrot.slane %v1841_v16, 2 }
 0x2a4   :  { %v1843_v45 = vadd.f32 %v1842_v51, %v1841_v16  ;;  %v3079_v16 = vsel %vm1825_vm11, %v7726_v10, 0.0  ;;  %v10668_v51 = vld [vmem:[#allocation112_spill] sm:$0xff] }
 0x2a6   :  { %v1844_v31 = vrot.slane %v1843_v45, 1 }
 0x2a8   :  { %v1845_v46 = vadd.f32 %v1844_v31, %v1843_v45  ;;  %v3699_v45 = vsel %vm1825_vm11, %v10668_v51, 0.0  ;;  %v3702_v31 = vsel %vm1829_vm12, %v7652_v19, 0.0 }
 0x2aa   :  { %5132 = vpush %v1845_v46 }
 0x2db   :  { %s5133_s5 = spop %5132 }
 0x2dc   :  { %v1847_v6 = vstv %s5133_s5  ;;  %s5371_s5 = smov 32  }
 0x2dd   :  { %v7747_v53 = vmul.f32 0.001953125, %v1847_v6  ;;  %v3078_v6 = vadd.f32 %v3077_v41, %v3076_v15 }
 0x2df   :  { %v1849_v1 = vsub.f32 %v10663_v26, %v7747_v53  ;;  %v1850_v27 = vsub.f32 %v10664_v13, %v7747_v53  ;;  %v1851_v32 = vsub.f32 %v7659_v24, %v7747_v53  ;;  %v1852_v12 = vsub.f32 %v7694_v25, %v7747_v53 }
 0x2e0   :  { %v1853_v39 = vsub.f32 %v7722_v56, %v7747_v53  ;;  %v1854_v33 = vsub.f32 %v7729_v34, %v7747_v53 }
 0x2e1   :  { %v1855_v28 = vmul.f32 %v10502_v59, %v1849_v1  ;;  %v1856_v2 = vmul.f32 %v10622_v40, %v1850_v27  ;;  %v1857_v63 = vmul.f32 %v10646_v5, %v1851_v32  ;;  %v1858_v7 = vmul.f32 %v10502_v59, %v1852_v12 }
 0x2e2   :  { %v1859_v36 = vmul.f32 %v10622_v40, %v1853_v39  ;;  %v1860_v22 = vmul.f32 %v10646_v5, %v1854_v33  ;;  %v3701_v1 = vadd.f32 %v3700_v49, %v3699_v45  ;;  %v3704_v32 = vsel %vm1825_vm11, %v7700_v37, 0.0  ;;  %v10670_v45 = vld [vmem:[#allocation69_spill] sm:$0xff] }
 0x2e3   :  { %v1861_v23 = vmul.f32 %v1855_v28, %v1855_v28  ;;  %v1862_v8 = vmul.f32 %v1856_v2, %v1856_v2  ;;  %v1863_v18 = vmul.f32 %v1857_v63, %v1857_v63  ;;  %v1864_v3 = vmul.f32 %v1858_v7, %v1858_v7 }
 0x2e4   :  { %v1865_v35 = vmul.f32 %v1859_v36, %v1859_v36  ;;  %v1866_v54 = vmul.f32 %v1860_v22, %v1860_v22  ;;  %v3080_v39 = vadd.f32 %v3079_v16, %v3078_v6  ;;  %v3703_v33 = vadd.f32 %v3702_v31, %v3701_v1 }
 0x2e5   :  { %v1867_v44 = vsel %vm1825_vm11, %v1861_v23, 0.0  ;;  %v1868_v4 = vsel %vm1825_vm11, %v1862_v8, 0.0  ;;  %v1870_v42 = vsel %vm1829_vm12, %v1863_v18, 0.0  ;;  %v1872_v11 = vsel %vm1825_vm11, %v1864_v3, 0.0  ;;  %v2457_v18 = vpop.xlane.xlu0 %2456 }
 0x2e6   :  { %v1869_v57 = vadd.f32 %v1868_v4, %v1867_v44  ;;  %v1874_v55 = vsel %vm1825_vm11, %v1865_v35, 0.0  ;;  %v1876_v27 = vsel %vm1829_vm12, %v1866_v54, 0.0  ;;  %v3706_v28 = vsel %vm1825_vm11, %v7733_v38, 0.0 }
 0x2e7   :  { %v3705_v2 = vadd.f32 %v3704_v32, %v3703_v33  ;;  %v3081_v63 = vsel %vm1829_vm12, %v7731_v30, 0.0  ;;  %v3708_v23 = vsel %vm1829_vm12, %v7739_v0, 0.0  ;;  %v2458_v9 = vrot.slane %v2457_v18, 4 }
 0x2e8   :  { %v1871_v21 = vadd.f32 %v1870_v42, %v1869_v57  ;;  %v3082_v7 = vadd.f32 %v3081_v63, %v3080_v39 }
 0x2e9   :  { %v3707_v36 = vadd.f32 %v3706_v28, %v3705_v2  ;;  %v2459_v22 = vadd.f32 %v2458_v9, %v2457_v18 }
 0x2ea   :  { %v1873_v61 = vadd.f32 %v1872_v11, %v1871_v21 }
 0x2eb   :  { %v3709_v8 = vadd.f32 %v3708_v23, %v3707_v36  ;;  %v2460_v44 = vrot.slane %v2459_v22, 2 }
 0x2ec   :  { %v1875_v46 = vadd.f32 %v1874_v55, %v1873_v61  ;;  %v10669_v55 = vld [vmem:[#allocation57_spill] sm:$0xff] }
 0x2ed   :  { %v2461_v35 = vadd.f32 %v2460_v44, %v2459_v22  ;;  %v1892_v44 = vstv %s1889_s15 }
 0x2ee   :  { %v1877_v12 = vadd.f32 %v1876_v27, %v1875_v46 }
 0x2ef   :  { %v2462_v20 = vrot.slane %v2461_v35, 1 }
 0x2f0   :  { %1878 = vadd.xlane.f32.xlu1 %v1877_v12 }
 0x2f1   :  { %v2463_v54 = vadd.f32 %v2462_v20, %v2461_v35 }
 0x2f4   :  { %3083 = vadd.xlane.f32.xlu1 %v3082_v7 }
 0x2f8   :  { %3710 = vadd.xlane.f32.xlu1 %v3709_v8 }
 0x37d   :  { %v1879_v3 = vpop.xlane.xlu1 %1878 }
 0x37e   :  { %v1880_v4 = vrot.slane %v1879_v3, 4 }
 0x380   :  { %v1881_v57 = vadd.f32 %v1880_v4, %v1879_v3 }
 0x382   :  { %v1882_v42 = vrot.slane %v1881_v57, 2 }
 0x384   :  { %v1883_v47 = vadd.f32 %v1882_v42, %v1881_v57 }
 0x386   :  { %v1884_v21 = vrot.slane %v1883_v47, 1 }
 0x388   :  { %v1885_v52 = vadd.f32 %v1884_v21, %v1883_v47 }
 0x38a   :  { %5134 = vpush %v1885_v52  ;;  %v1896_v52 = vstv %s1894_s16  ;;  %s5373_s16 = smov 64  }
 0x38b   :  { %5136 = vpush %v2463_v54 }
 0x3bb   :  { %s5135_s13 = spop %5134 }
 0x3bc   :  { %v1887_v11 = vstv %s5135_s13  ;;  %s5137_s14 = spop %5136  ;;  %s5372_s13 = smov 48  }
 0x3bd   :  { %v1888_v41 = vmul.f32 0.001953125, %v1887_v11  ;;  %v2465_v49 = vstv %s5137_s14 }
 0x3be   :  { %v7797_v61 = vmul.f32 0.001953125, %v2465_v49 }
 0x3bf   :  { %v1890_v15 = vadd.f32 1e-05, %v1888_v41 }
 0x3c0   :  { %v2467_v16 = vsub.f32 %v10669_v55, %v7797_v61  ;;  %v2468_v31 = vsub.f32 %v10670_v45, %v7797_v61  ;;  %v2469_v46 = vsub.f32 %v7661_v60, %v7797_v61  ;;  %v2470_v6 = vsub.f32 %v7703_v29, %v7797_v61 }
 0x3c1   :  { %5203 = vrsqrt.f32 %v1890_v15  ;;  %v2471_v1 = vsub.f32 %v7724_v17, %v7797_v61  ;;  %v2472_v27 = vsub.f32 %v7743_v14, %v7797_v61 }
 0x3c2   :  { %v2473_v32 = vmul.f32 %v10502_v59, %v2467_v16  ;;  %v2474_v12 = vmul.f32 %v10622_v40, %v2468_v31  ;;  %v2475_v39 = vmul.f32 %v10646_v5, %v2469_v46  ;;  %v2476_v33 = vmul.f32 %v10502_v59, %v2470_v6 }
 0x3c3   :  { %v2477_v28 = vmul.f32 %v10622_v40, %v2471_v1  ;;  %v2478_v36 = vmul.f32 %v10646_v5, %v2472_v27 }
 0x3c4   :  { %v2479_v2 = vmul.f32 %v2473_v32, %v2473_v32  ;;  %v2480_v63 = vmul.f32 %v2474_v12, %v2474_v12  ;;  %v2481_v7 = vmul.f32 %v2475_v39, %v2475_v39  ;;  %v2482_v23 = vmul.f32 %v2476_v33, %v2476_v33 }
 0x3c5   :  { %v2483_v22 = vmul.f32 %v2477_v28, %v2477_v28  ;;  %v2484_v57 = vmul.f32 %v2478_v36, %v2478_v36 }
 0x3c6   :  { %v2485_v8 = vsel %vm1825_vm11, %v2479_v2, 0.0  ;;  %v2486_v18 = vsel %vm1825_vm11, %v2480_v63, 0.0  ;;  %v2488_v3 = vsel %vm1829_vm12, %v2481_v7, 0.0  ;;  %v2490_v35 = vsel %vm1825_vm11, %v2482_v23, 0.0 }
 0x3c7   :  { %v2487_v9 = vadd.f32 %v2486_v18, %v2485_v8  ;;  %v2492_v21 = vsel %vm1825_vm11, %v2483_v22, 0.0  ;;  %v2494_v41 = vsel %vm1829_vm12, %v2484_v57, 0.0  ;;  %v2013_v8 = vstv %s7825_s2  ;;  %s5081_s2 = sld [smem:[#allocation8 + $0x2]] }
 0x3c8   :  { %v7859_v57 = vstv %s5052_s7  ;;  %s5087_s7 = sld [smem:[#allocation10 + $0x17]] }
 0x3c9   :  { %v2489_v4 = vadd.f32 %v2488_v3, %v2487_v9  ;;  %v2053_v3 = vstv %s5050_s18  ;;  %s5086_s18 = sld [smem:[#allocation10 + $0x16]] }
 0x3cb   :  { %v5204_v42 = vpop.eup %5203  ;;  %v2491_v47 = vadd.f32 %v2490_v35, %v2489_v4  ;;  %v7861_v35 = vstv %s1922_s8  ;;  %s5084_s8 = sld [smem:[#allocation10 + $0x14]] }
 0x3cc   :  { %v1893_v20 = vmul.f32 %v5204_v42, %v1892_v44  ;;  %v1955_v44 = vstv %s7830_s4  ;;  %s5083_s4 = sld [smem:[#allocation10 + $0x13]] }
 0x3cd   :  { %v2493_v54 = vadd.f32 %v2492_v21, %v2491_v47  ;;  %v7871_v21 = vstv %s5051_s20  ;;  %s5090_s20 = sld [smem:[#allocation10 + $0x1a]] }
 0x3ce   :  { %v1895_v11 = vmul.f32 %v1893_v20, %v7747_v53  ;;  %v1898_v49 = vmul.f32 %v1893_v20, %v10663_v26  ;;  %v1899_v31 = vmul.f32 %v1893_v20, %v10664_v13  ;;  %v1901_v46 = vmul.f32 %v1893_v20, %v7694_v25 }
 0x3cf   :  { %v2495_v15 = vadd.f32 %v2494_v41, %v2493_v54  ;;  %v1902_v6 = vmul.f32 %v1893_v20, %v7722_v56  ;;  %v1900_v1 = vmul.f32 %v1893_v20, %v7659_v24  ;;  %v1903_v53 = vmul.f32 %v1893_v20, %v7729_v34 }
 0x3d0   :  { %v1897_v16 = vsub.f32 %v1896_v52, %v1895_v11  ;;  %v1929_v24 = vstv %s5046_s17  ;;  %v7869_v20 = vstv %s5048_s19  ;;  %s8506_s17 = sld [smem:[#allocation7 + $0x2]]  ;;  %s5089_s19 = sld [smem:[#allocation10 + $0x19]] }
 0x3d1   :  { %2496 = vadd.xlane.f32.xlu0 %v2495_v15 }
 0x3d2   :  { %v1904_v27 = vadd.f32 %v1898_v49, %v1897_v16  ;;  %v1905_v26 = vadd.f32 %v1899_v31, %v1897_v16  ;;  %v1907_v32 = vadd.f32 %v1901_v46, %v1897_v16  ;;  %v1908_v12 = vadd.f32 %v1902_v6, %v1897_v16 }
 0x3d3   :  { %v1906_v39 = vadd.f32 %v1900_v1, %v1897_v16  ;;  %v1909_v13 = vadd.f32 %v1903_v53, %v1897_v16  ;;  %v7889_v31 = vstv %s5053_s21  ;;  %s5082_s21 = sld [smem:[#allocation10 + $0x12]] }
 0x3d4   :  { %v1910_v25 = vmax.f32 %v1904_v27, 0.0  ;;  %v1911_v56 = vmax.f32 %v1905_v26, 0.0  ;;  %v1913_v33 = vmax.f32 %v1907_v32, 0.0  ;;  %v1914_v28 = vmax.f32 %v1908_v12, 0.0 }
 0x3d5   :  { %v1912_v2 = vmax.f32 %v1906_v39, 0.0  ;;  %v1915_v34 = vmax.f32 %v1909_v13, 0.0 }
 0x3d6   :  { %v7835_v63 = vmul.f32 %v10502_v59, %v1910_v25  ;;  %v7838_v7 = vmul.f32 %v10622_v40, %v1911_v56  ;;  %v7841_v36 = vmul.f32 %v10622_v40, %v1914_v28  ;;  %v7848_v18 = vmul.f32 %v10502_v59, %v1913_v33 }
 0x3d7   :  { %v7844_v23 = vmul.f32 %v10646_v5, %v1912_v2  ;;  %v7852_v22 = vmul.f32 %v10646_v5, %v1915_v34 }
 0x3d8   :  { %10671 = vst [vmem:[#allocation71_spill] sm:$0xff] %v7838_v7  ;;  %v1930_v9 = vmul.f32 %v1929_v24, %v7835_v63  ;;  %v7857_v4 = vmul.f32 %v2013_v8, %v7838_v7  ;;  %v7867_v47 = vmul.f32 %v2013_v8, %v7841_v36  ;;  %v1932_v52 = vmul.f32 %v1929_v24, %v7848_v18 }
 0x3d9   :  { %v7864_v42 = vmul.f32 %v2013_v8, %v7844_v23  ;;  %v7875_v54 = vmul.f32 %v2013_v8, %v7852_v22  ;;  %v7878_v11 = vmul.f32 %v2053_v3, %v7838_v7  ;;  %v7881_v41 = vmul.f32 %v2053_v3, %v7841_v36 }
 0x3da   :  { %1938 = vrot.lane.b32.xlu1 %v1930_v9, %s5365_s29  ;;  %v1933_v49 = vmul.f32 %v1929_v24, %v7841_v36  ;;  %v1957_v15 = vmul.f32 %v1955_v44, %v7838_v7  ;;  %v7887_v16 = vmul.f32 %v7859_v57, %v7838_v7  ;;  %v1959_v46 = vmul.f32 %v1955_v44, %v7841_v36 }
 0x3db   :  { %v2027_v6 = vrot.slane %v7857_v4, 1  ;;  %v7895_v1 = vmul.f32 %v2053_v3, %v7844_v23  ;;  %v7899_v53 = vmul.f32 %v7859_v57, %v7841_v36  ;;  %v2029_v27 = vrot.slane %v7864_v42, 1 }
 0x3dc   :  { %v7904_v32 = vmul.f32 %v2053_v3, %v7852_v22  ;;  %v7908_v12 = vmul.f32 %v7861_v35, %v7835_v63  ;;  %v7915_v56 = vmul.f32 %v7861_v35, %v7848_v18  ;;  %v7920_v28 = vmul.f32 %v7869_v20, %v7841_v36 }
 0x3dd   :  { %v1987_v2 = vmul.f32 %v7869_v20, %v7852_v22  ;;  %v7926_v34 = vmul.f32 %v7871_v21, %v7841_v36  ;;  %v2099_v4 = vmul.f32 %v7871_v21, %v7852_v22  ;;  %v7933_v42 = vmul.f32 %v1929_v24, %v7838_v7 }
 0x3de   :  { %1942 = vrot.lane.b32.xlu1 %v1932_v52, %s5365_s29  ;;  %10672 = vst [vmem:[#allocation74_spill] sm:$0xff] %v7908_v12  ;;  %10673 = vst [vmem:[#allocation94_spill] sm:$0xff] %v7915_v56  ;;  %v7936_v52 = vmul.f32 %v1955_v44, %v7835_v63  ;;  %v2000_v39 = vrot.slane %v7920_v28, 1  ;;  %v7941_v13 = vmul.f32 %v1955_v44, %v7848_v18  ;;  %v10674_v56 = vrot.slane %v7867_v47, 1 }
 0x3df   :  { %v2002_v33 = vrot.slane %v1987_v2, 1  ;;  %v10204_v25 = vrot.slane %v7926_v34, 2  ;;  %v2014_v9 = vmul.f32 %v2013_v8, %v7835_v63  ;;  %v2017_v26 = vmul.f32 %v2013_v8, %v7848_v18 }
 0x3e0   :  { %v2054_v0 = vmul.f32 %v2053_v3, %v7835_v63  ;;  %v2057_v38 = vmul.f32 %v2053_v3, %v7848_v18  ;;  %v2126_v28 = vmul.f32 %v7859_v57, %v7835_v63  ;;  %v2167_v2 = vmul.f32 %v7889_v31, %v7838_v7 }
 0x3e1   :  { %v7947_v24 = vsel %vm266_vm0, %v2000_v39, %v2002_v33  ;;  %v2026_v8 = vrot.slane %v2014_v9, 1  ;;  %v2168_v3 = vmul.f32 %v7889_v31, %v7844_v23 }
 0x3e2   :  { %1944 = vrot.lane.b32.xlu1 %v1933_v49, %s5365_s29  ;;  %v2114_v49 = vrot.slane %v2099_v4, 2  ;;  %v2031_v4 = vrot.slane %v2017_v26, 1  ;;  %v2066_v37 = vrot.slane %v2054_v0, 1  ;;  %v2071_v33 = vrot.slane %v2057_v38, 1 }
 0x3e3   :  { %v2138_v19 = vrot.slane %v2126_v28, 2  ;;  %v2179_v62 = vrot.slane %v2167_v2, 2  ;;  %v7963_v51 = vsel %vm266_vm0, %v2026_v8, %v2027_v6  ;;  %v2129_v38 = vmul.f32 %v7859_v57, %v7848_v18 }
 0x3e4   :  { %v7958_v44 = vsel %vm399_vm1, %v10204_v25, %v2114_v49  ;;  %v10675_v49 = vrot.slane %v7878_v11, 1  ;;  %v10676_v0 = vrot.slane %v7881_v41, 1  ;;  %v10677_v28 = vrot.slane %v7887_v16, 2 }
 0x3e5   :  { %v2170_v8 = vmul.f32 %v7889_v31, %v7841_v36  ;;  %v1985_v25 = vmul.f32 %v7869_v20, %v7848_v18 }
 0x3e6   :  { %1966 = vrot.lane.b32.xlu1 %v1957_v15, %s5366_s3  ;;  %v7968_v15 = vsel %vm266_vm0, %v2031_v4, %v10674_v56  ;;  %v7973_v9 = vsel %vm266_vm0, %v2066_v37, %v10675_v49  ;;  %v7980_v26 = vsel %vm266_vm0, %v2071_v33, %v10676_v0  ;;  %v7985_v2 = vsel %vm399_vm1, %v2138_v19, %v10677_v28 }
 0x3e7   :  { %10678 = vst [vmem:[#allocation75_spill] sm:$0xff] %v7985_v2  ;;  %v2181_v56 = vrot.slane %v2168_v3, 2  ;;  %v2030_v37 = vsel %vm266_vm0, %v2027_v6, %v2029_v27  ;;  %v2143_v4 = vrot.slane %v2129_v38, 2  ;;  %v2171_v49 = vmul.f32 %v7889_v31, %v7852_v22 }
 0x3e8   :  { %v1983_v33 = vmul.f32 %v7869_v20, %v7838_v7  ;;  %v2184_v19 = vrot.slane %v2170_v8, 2  ;;  %v1984_v3 = vmul.f32 %v7869_v20, %v7844_v23  ;;  %v1982_v28 = vmul.f32 %v7869_v20, %v7835_v63 }
 0x3e9   :  { %v7996_v0 = vsel %vm399_vm1, %v2179_v62, %v2181_v56  ;;  %v2186_v27 = vrot.slane %v2171_v49, 2  ;;  %v2095_v8 = vmul.f32 %v7871_v21, %v7838_v7  ;;  %v2096_v2 = vmul.f32 %v7871_v21, %v7844_v23 }
 0x3ea   :  { %1970 = vrot.lane.b32.xlu1 %v1959_v46, %s5366_s3  ;;  %10679 = vst [vmem:[#allocation78_spill] sm:$0xff] %v7996_v0  ;;  %v10680_v46 = vrot.slane %v7899_v53, 2  ;;  %v1995_v38 = vrot.slane %v1983_v33, 1  ;;  %v1997_v12 = vrot.slane %v1984_v3, 1  ;;  %v1994_v56 = vrot.slane %v1982_v28, 1 }
 0x3eb   :  { %v8015_v0 = vsel %vm399_vm1, %v2184_v19, %v2186_v27  ;;  %v2094_v49 = vmul.f32 %v7871_v21, %v7835_v63  ;;  %v2097_v20 = vmul.f32 %v7871_v21, %v7848_v18  ;;  %v2107_v28 = vrot.slane %v2095_v8, 2 }
 0x3ec   :  { %v8005_v6 = vsel %vm399_vm1, %v2143_v4, %v10680_v46  ;;  %v1999_v4 = vrot.slane %v1985_v25, 1  ;;  %v8022_v33 = vsel %vm266_vm0, %v1995_v38, %v1997_v12  ;;  %v8025_v3 = vsel %vm266_vm0, %v1994_v56, %v1995_v38 }
 0x3ed   :  { %10681 = vst [vmem:[#allocation90_spill] sm:$0xff] %v8005_v6  ;;  %10682 = vst [vmem:[#allocation121_spill] sm:$0xff] %v8022_v33  ;;  %v2109_v46 = vrot.slane %v2096_v2, 2  ;;  %v2106_v27 = vrot.slane %v2094_v49, 2  ;;  %v2111_v7 = vrot.slane %v2097_v20, 2  ;;  %v2166_v25 = vmul.f32 %v7889_v31, %v7835_v63 }
 0x3ee   :  { %2038 = vrot.lane.b32.xlu1 %v2030_v37, %s5365_s29  ;;  %v8028_v37 = vsel %vm266_vm0, %v1999_v4, %v2000_v39  ;;  %v10683_v6 = vrot.slane %v7875_v54, 1  ;;  %v10684_v21 = vrot.slane %v7867_v47, 1  ;;  %v2069_v33 = vrot.slane %v7895_v1, 1 }
 0x3ef   :  { %v8039_v38 = vsel %vm399_vm1, %v2107_v28, %v2109_v46  ;;  %v2169_v39 = vmul.f32 %v7889_v31, %v7848_v18  ;;  %v8045_v2 = vsel %vm399_vm1, %v2106_v27, %v2107_v28  ;;  %v10687_v63 = vrot.slane %v7926_v34, 2 }
 0x3f0   :  { %v2035_v12 = vsel %vm266_vm0, %v10684_v21, %v10683_v6  ;;  %10685 = vst [vmem:[#allocation35_spill] sm:$0xff] %v8039_v38  ;;  %10686 = vst [vmem:[#allocation68_spill] sm:$0xff] %v8045_v2  ;;  %v2178_v47 = vrot.slane %v2166_v25, 2  ;;  %v10690_v56 = vrot.slane %v7878_v11, 1  ;;  %v2074_v18 = vrot.slane %v7904_v32, 1 }
 0x3f1   :  { %v8050_v54 = vsel %vm399_vm1, %v2111_v7, %v10687_v63  ;;  %v2183_v6 = vrot.slane %v2169_v39, 2  ;;  %v2128_v31 = vmul.f32 %v7859_v57, %v7844_v23  ;;  %v10692_v7 = vrot.slane %v7881_v41, 1  ;;  %v3084_v41 = vpop.xlane.xlu1 %3083 }
 0x3f2   :  { %2042 = vrot.lane.b32.xlu1 %v2035_v12, %s5365_s29  ;;  %10688 = vst [vmem:[#allocation58_spill] sm:$0xff] %v8050_v54  ;;  %v8053_v1 = vsel %vm399_vm1, %v2178_v47, %v2179_v62  ;;  %v2070_v8 = vsel %vm266_vm0, %v10690_v56, %v2069_v33  ;;  %v2131_v11 = vmul.f32 %v7859_v57, %v7852_v22  ;;  %v10693_v32 = vrot.slane %v7887_v16, 2 }
 0x3f3   :  { %10689 = vst [vmem:[#allocation62_spill] sm:$0xff] %v8053_v1  ;;  %v8062_v4 = vsel %vm399_vm1, %v2183_v6, %v2184_v19  ;;  %v2075_v34 = vsel %vm266_vm0, %v10692_v7, %v2074_v18  ;;  %v2141_v62 = vrot.slane %v2128_v31, 2  ;;  %v10694_v19 = vrot.slane %v7899_v53, 2 }
 0x3f4   :  { %10691 = vst [vmem:[#allocation26_spill] sm:$0xff] %v8062_v4  ;;  %v2146_v23 = vrot.slane %v2131_v11, 2  ;;  %v3085_v16 = vrot.slane %v3084_v41, 4  ;;  %v1927_v27 = vmul.f32 %v7861_v35, %v7841_v36 }
 0x3f5   :  { %v2142_v49 = vsel %vm399_vm1, %v10693_v32, %v2141_v62  ;;  %v8079_v33 = vpop.xlane.xlu1 %3710 }
 0x3f6   :  { %2078 = vrot.lane.b32.xlu1 %v2070_v8, %s5366_s3  ;;  %v2147_v20 = vsel %vm399_vm1, %v10694_v19, %v2146_v23  ;;  %v3086_v25 = vadd.f32 %v3085_v16, %v3084_v41 }
 0x3f8   :  { %v3087_v63 = vrot.slane %v3086_v25, 2 }
 0x3fa   :  { %2082 = vrot.lane.b32.xlu1 %v2075_v34, %s5366_s3  ;;  %v3088_v18 = vadd.f32 %v3087_v63, %v3086_v25 }
 0x3fc   :  { %v3089_v62 = vrot.slane %v3088_v18, 1 }
 0x3fe   :  { %2150 = vrot.lane.b32.xlu1 %v2142_v49, %s5365_s29  ;;  %v3090_v49 = vadd.f32 %v3089_v62, %v3088_v18 }
 0x402   :  { %2154 = vrot.lane.b32.xlu1 %v2147_v20, %s5365_s29 }
 0x44c   :  { %v8081_v28 = vpop.permute.xlu1 %1938 }
 0x450   :  { %v8083_v22 = vpop.permute.xlu1 %1942 }
 0x454   :  { %v1945_v57 = vpop.permute.xlu1 %1944 }
 0x455   :  { %v1953_v53 = vadd.f32 %v1945_v57, %v1927_v27 }
 0x458   :  { %v8085_v46 = vpop.permute.xlu1 %1966 }
 0x45c   :  { %v1971_v21 = vpop.permute.xlu1 %1970 }
 0x45d   :  { %v1979_v12 = vadd.f32 %v1971_v21, %v1953_v53 }
 0x45e   :  { %v2497_v39 = vpop.xlane.xlu0 %2496 }
 0x45f   :  { %v2498_v47 = vrot.slane %v2497_v39, 4  ;;  %v2011_v6 = vadd.f32 %v7947_v24, %v1979_v12 }
 0x460   :  { %v8090_v56 = vpop.permute.xlu1 %2038 }
 0x461   :  { %v2499_v8 = vadd.f32 %v2498_v47, %v2497_v39 }
 0x463   :  { %v2500_v31 = vrot.slane %v2499_v8, 2 }
 0x464   :  { %v2043_v7 = vpop.permute.xlu1 %2042 }
 0x465   :  { %v2501_v34 = vadd.f32 %v2500_v31, %v2499_v8  ;;  %v2051_v23 = vadd.f32 %v2043_v7, %v2011_v6 }
 0x467   :  { %v2502_v11 = vrot.slane %v2501_v34, 1 }
 0x468   :  { %v8092_v32 = vpop.permute.xlu1 %2078 }
 0x469   :  { %v2503_v36 = vadd.f32 %v2502_v11, %v2501_v34 }
 0x46b   :  { %5138 = vpush %v2503_v36 }
 0x46c   :  { %5140 = vpush %v3090_v49  ;;  %v2083_v19 = vpop.permute.xlu1 %2082 }
 0x46d   :  { %v2091_v20 = vadd.f32 %v2083_v19, %v2051_v23 }
 0x46f   :  { %v8095_v24 = vadd.f32 %v7958_v44, %v2091_v20 }
 0x471   :  { %10695 = vst [vmem:[#allocation76_spill] sm:$0xff] %v8095_v24 }
 0x49c   :  { %s5139_s22 = spop %5138 }
 0x49d   :  { %v2505_v41 = vstv %s5139_s22  ;;  %s5141_s23 = spop %5140  ;;  %s5085_s22 = sld [smem:[#allocation10 + $0x15]] }
 0x49e   :  { %v2506_v57 = vmul.f32 0.001953125, %v2505_v41  ;;  %v3092_v16 = vstv %s5141_s23  ;;  %s5088_s23 = sld [smem:[#allocation10 + $0x18]] }
 0x49f   :  { %v8097_v27 = vmul.f32 0.001953125, %v3092_v16 }
 0x4a0   :  { %v2508_v25 = vadd.f32 1e-05, %v2506_v57  ;;  %v2510_v57 = vstv %s5061_s24 }
 0x4a1   :  { %10696 = vst [vmem:[#allocation98_spill] sm:$0xff] %v8097_v27  ;;  %v3094_v53 = vsub.f32 %v10666_v48, %v8097_v27  ;;  %v3095_v21 = vsub.f32 %v10665_v58, %v8097_v27  ;;  %v3096_v12 = vsub.f32 %v7649_v50, %v8097_v27  ;;  %v3097_v44 = vsub.f32 %v7697_v43, %v8097_v27 }
 0x4a2   :  { %5205 = vrsqrt.f32 %v2508_v25  ;;  %v3098_v39 = vsub.f32 %v7726_v10, %v8097_v27  ;;  %v3099_v63 = vsub.f32 %v7731_v30, %v8097_v27 }
 0x4a3   :  { %v3100_v47 = vmul.f32 %v10502_v59, %v3094_v53  ;;  %v3101_v6 = vmul.f32 %v10622_v40, %v3095_v21  ;;  %v3102_v8 = vmul.f32 %v10646_v5, %v3096_v12  ;;  %v3103_v18 = vmul.f32 %v10502_v59, %v3097_v44 }
 0x4a4   :  { %v3104_v31 = vmul.f32 %v10622_v40, %v3098_v39  ;;  %v3105_v11 = vmul.f32 %v10646_v5, %v3099_v63  ;;  %v2514_v63 = vstv %s5062_s25  ;;  %s5099_s25 = sld [smem:[#allocation7 + $0x3]] }
 0x4a5   :  { %v3106_v7 = vmul.f32 %v3100_v47, %v3100_v47  ;;  %v3107_v34 = vmul.f32 %v3101_v6, %v3101_v6  ;;  %v3108_v62 = vmul.f32 %v3102_v8, %v3102_v8  ;;  %v3109_v36 = vmul.f32 %v3103_v18, %v3103_v18 }
 0x4a6   :  { %v3110_v20 = vmul.f32 %v3104_v31, %v3104_v31  ;;  %v3111_v25 = vmul.f32 %v3105_v11, %v3105_v11 }
 0x4a7   :  { %v3112_v49 = vsel %vm1825_vm11, %v3106_v7, 0.0  ;;  %v3113_v23 = vsel %vm1825_vm11, %v3107_v34, 0.0  ;;  %v3115_v41 = vsel %vm1829_vm12, %v3108_v62, 0.0  ;;  %v3117_v53 = vsel %vm1825_vm11, %v3109_v36, 0.0 }
 0x4a8   :  { %v3114_v19 = vadd.f32 %v3113_v23, %v3112_v49  ;;  %v3119_v39 = vsel %vm1825_vm11, %v3110_v20, 0.0  ;;  %v3121_v8 = vsel %vm1829_vm12, %v3111_v25, 0.0 }
 0x4aa   :  { %v3116_v16 = vadd.f32 %v3115_v41, %v3114_v19  ;;  %v8128_v41 = vstv %s5064_s6  ;;  %s5100_s6 = sld [smem:[#allocation8 + $0x3]] }
 0x4ac   :  { %v5206_v21 = vpop.eup %5205  ;;  %v3118_v12 = vadd.f32 %v3117_v53, %v3116_v16 }
 0x4ad   :  { %v2511_v44 = vmul.f32 %v5206_v21, %v2510_v57 }
 0x4ae   :  { %v3120_v47 = vadd.f32 %v3119_v39, %v3118_v12  ;;  %v8147_v12 = vstv %s5067_s1  ;;  %s5102_s1 = sld [smem:[#allocation10 + $0x1c]] }
 0x4af   :  { %v2513_v6 = vmul.f32 %v2511_v44, %v7797_v61  ;;  %v2517_v7 = vmul.f32 %v2511_v44, %v10670_v45  ;;  %v2520_v34 = vmul.f32 %v2511_v44, %v7724_v17  ;;  %v2518_v62 = vmul.f32 %v2511_v44, %v7661_v60 }
 0x4b0   :  { %v3122_v18 = vadd.f32 %v3121_v8, %v3120_v47  ;;  %v2521_v11 = vmul.f32 %v2511_v44, %v7743_v14  ;;  %v2516_v16 = vmul.f32 %v2511_v44, %v10669_v55  ;;  %v2519_v25 = vmul.f32 %v2511_v44, %v7703_v29 }
 0x4b1   :  { %v2515_v31 = vsub.f32 %v2514_v63, %v2513_v6  ;;  %v8151_v47 = vstv %s5065_s26  ;;  %v8153_v29 = vstv %s5068_s27  ;;  %s5105_s26 = sld [smem:[#allocation10 + $0x1f]]  ;;  %s5106_s27 = sld [smem:[#allocation10 + $0x20]] }
 0x4b2   :  { %3123 = vadd.xlane.f32.xlu0 %v3122_v18 }
 0x4b3   :  { %v2523_v36 = vadd.f32 %v2517_v7, %v2515_v31  ;;  %v2526_v49 = vadd.f32 %v2520_v34, %v2515_v31  ;;  %v2524_v23 = vadd.f32 %v2518_v62, %v2515_v31  ;;  %v2527_v19 = vadd.f32 %v2521_v11, %v2515_v31 }
 0x4b4   :  { %v2522_v39 = vadd.f32 %v2516_v16, %v2515_v31  ;;  %v2525_v63 = vadd.f32 %v2519_v25, %v2515_v31  ;;  %v8168_v31 = vstv %s5070_s0  ;;  %v8172_v11 = vstv %s5071_s28  ;;  %s5103_s0 = sld [smem:[#allocation10 + $0x1d]]  ;;  %s5108_s28 = sld [smem:[#allocation10 + $0x22]] }
 0x4b5   :  { %v2529_v20 = vmax.f32 %v2523_v36, 0.0  ;;  %v2532_v61 = vmax.f32 %v2526_v49, 0.0  ;;  %v2530_v17 = vmax.f32 %v2524_v23, 0.0  ;;  %v2533_v57 = vmax.f32 %v2527_v19, 0.0 }
 0x4b6   :  { %v2528_v7 = vmax.f32 %v2522_v39, 0.0  ;;  %v2531_v34 = vmax.f32 %v2525_v63, 0.0  ;;  %v2599_v16 = vstv %s5066_s10  ;;  %v2711_v25 = vstv %s5069_s11  ;;  %s5101_s10 = sld [smem:[#allocation10 + $0x1b]]  ;;  %s8990_s11 = sld [smem:[#allocation10 + $0x1e]] }
 0x4b7   :  { %v8131_v45 = vmul.f32 %v10622_v40, %v2529_v20  ;;  %v8134_v60 = vmul.f32 %v10622_v40, %v2532_v61  ;;  %v8142_v53 = vmul.f32 %v10646_v5, %v2530_v17  ;;  %v8145_v21 = vmul.f32 %v10646_v5, %v2533_v57 }
 0x4b9   :  { %v2549_v14 = vmul.f32 %v8128_v41, %v8131_v45  ;;  %v2551_v55 = vmul.f32 %v8128_v41, %v8134_v60  ;;  %v8158_v44 = vmul.f32 %v8147_v12, %v8131_v45  ;;  %v2634_v6 = vmul.f32 %v8147_v12, %v8142_v53 }
 0x4ba   :  { %v8164_v8 = vmul.f32 %v8147_v12, %v8134_v60  ;;  %v2637_v18 = vmul.f32 %v8147_v12, %v8145_v21  ;;  %v2575_v62 = vmul.f32 %v8151_v47, %v8131_v45  ;;  %v8176_v36 = vmul.f32 %v8153_v29, %v8131_v45 }
 0x4bb   :  { %2558 = vrot.lane.b32.xlu1 %v2549_v14, %s5365_s29  ;;  %v8180_v49 = vmul.f32 %v8153_v29, %v8142_v53  ;;  %v8184_v23 = vmul.f32 %v8153_v29, %v8134_v60  ;;  %v8188_v19 = vmul.f32 %v8153_v29, %v8145_v21  ;;  %v2647_v61 = vrot.slane %v2634_v6, 1 }
 0x4bc   :  { %v2652_v57 = vrot.slane %v2637_v18, 1  ;;  %v8193_v14 = vstv %s5063_s30  ;;  %v2577_v39 = vmul.f32 %v8151_v47, %v8134_v60  ;;  %v8199_v63 = vmul.f32 %v8168_v31, %v8134_v60  ;;  %s5109_s30 = sld [smem:[#allocation10 + $0x23]] }
 0x4bd   :  { %v8207_v6 = vmul.f32 %v8172_v11, %v8134_v60  ;;  %v8210_v18 = vmul.f32 %v10502_v59, %v2528_v7  ;;  %v2687_v20 = vrot.slane %v8180_v49, 1  ;;  %v10697_v4 = vrot.slane %v8158_v44, 1 }
 0x4be   :  { %v10698_v30 = vrot.slane %v8164_v8, 1  ;;  %v2692_v10 = vrot.slane %v8188_v19, 1  ;;  %v2601_v49 = vmul.f32 %v2599_v16, %v8131_v45  ;;  %v2605_v17 = vmul.f32 %v2599_v16, %v8145_v21 }
 0x4bf   :  { %2562 = vrot.lane.b32.xlu1 %v2551_v55, %s5365_s29  ;;  %v8203_v55 = vmul.f32 %v8172_v11, %v8131_v45  ;;  %v2648_v1 = vsel %vm266_vm0, %v10697_v4, %v2647_v61  ;;  %v2604_v4 = vmul.f32 %v2599_v16, %v8134_v60  ;;  %v2762_v61 = vrot.slane %v8199_v63, 2 }
 0x4c0   :  { %v2653_v50 = vsel %vm266_vm0, %v10698_v30, %v2652_v57  ;;  %v2746_v30 = vmul.f32 %v8168_v31, %v8142_v53  ;;  %v2713_v58 = vmul.f32 %v2711_v25, %v8131_v45  ;;  %v2714_v48 = vmul.f32 %v2711_v25, %v8142_v53 }
 0x4c1   :  { %v2618_v43 = vrot.slane %v2604_v4, 1  ;;  %v2716_v27 = vmul.f32 %v2711_v25, %v8134_v60  ;;  %v2717_v5 = vmul.f32 %v2711_v25, %v8145_v21 }
 0x4c2   :  { %v2725_v4 = vrot.slane %v2713_v58, 2  ;;  %v2727_v57 = vrot.slane %v2714_v48, 2  ;;  %v2784_v58 = vmul.f32 %v8172_v11, %v8210_v18 }
 0x4c3   :  { %2584 = vrot.lane.b32.xlu1 %v2575_v62, %s5366_s3  ;;  %v8213_v62 = vmul.f32 %v10502_v59, %v2531_v34  ;;  %v8230_v34 = vmul.f32 %v8168_v31, %v8131_v45  ;;  %v2730_v19 = vrot.slane %v2716_v27, 2  ;;  %v2732_v40 = vrot.slane %v2717_v5, 2 }
 0x4c4   :  { %v2796_v54 = vrot.slane %v2784_v58, 2 }
 0x4c5   :  { %v2747_v5 = vmul.f32 %v8168_v31, %v8213_v62  ;;  %v2715_v2 = vmul.f32 %v2711_v25, %v8213_v62 }
 0x4c7   :  { %2588 = vrot.lane.b32.xlu1 %v2577_v39, %s5366_s3  ;;  %v2602_v39 = vmul.f32 %v2599_v16, %v8142_v53 }
 0x4c8   :  { %1940 = vrot.lane.b32.xlu0 %v7933_v42, %s5365_s29  ;;  %v2613_v42 = vrot.slane %v2601_v49, 1  ;;  %v2620_v49 = vrot.slane %v2605_v17, 1  ;;  %v2712_v17 = vmul.f32 %v2711_v25, %v8210_v18  ;;  %v2729_v25 = vrot.slane %v2715_v2, 2 }
 0x4c9   :  { %v2615_v7 = vrot.slane %v2602_v39, 1  ;;  %v8253_v39 = vmul.f32 %v8193_v14, %v8210_v18  ;;  %v2749_v2 = vmul.f32 %v8168_v31, %v8145_v21 }
 0x4ca   :  { %v8260_v59 = vsel %vm266_vm0, %v2618_v43, %v2620_v49  ;;  %v2761_v49 = vrot.slane %v2747_v5, 2  ;;  %v10704_v5 = vrot.slane %v8184_v23, 1 }
 0x4cb   :  { %2656 = vrot.lane.b32.xlu1 %v2648_v1, %s5365_s29  ;;  %v8249_v63 = vsel %vm266_vm0, %v2613_v42, %v2615_v7  ;;  %10699 = vst [vmem:[#allocation88_spill] sm:$0xff] %v8253_v39  ;;  %v8257_v1 = vmul.f32 %v8193_v14, %v8213_v62  ;;  %v2603_v7 = vmul.f32 %v2599_v16, %v8213_v62 }
 0x4cc   :  { %1964 = vrot.lane.b32.xlu0 %v7936_v52, %s5366_s3  ;;  %v2600_v52 = vmul.f32 %v2599_v16, %v8210_v18  ;;  %v8267_v39 = vsel %vm399_vm1, %v2725_v4, %v2727_v57  ;;  %v2724_v16 = vrot.slane %v2712_v17, 2  ;;  %v10701_v57 = vrot.slane %v8176_v36, 1 }
 0x4cd   :  { %10700 = vst [vmem:[#allocation79_spill] sm:$0xff] %v8257_v1  ;;  %v8270_v1 = vsel %vm399_vm1, %v2730_v19, %v2732_v40  ;;  %v2617_v27 = vrot.slane %v2603_v7, 1  ;;  %v8295_v7 = vsel %vm399_vm1, %v2761_v49, %v2762_v61  ;;  %v2693_v58 = vsel %vm266_vm0, %v10704_v5, %v2692_v10 }
 0x4ce   :  { %v2612_v48 = vrot.slane %v2600_v52, 1  ;;  %v2688_v40 = vsel %vm266_vm0, %v10701_v57, %v2687_v20  ;;  %v10702_v20 = vrot.slane %v8203_v55, 2  ;;  %v2574_v55 = vmul.f32 %v8151_v47, %v8210_v18 }
 0x4cf   :  { %2660 = vrot.lane.b32.xlu1 %v2653_v50, %s5365_s29  ;;  %v2787_v50 = vmul.f32 %v8172_v11, %v8213_v62  ;;  %v8288_v38 = vsel %vm266_vm0, %v2617_v27, %v2618_v43  ;;  %v10703_v43 = vrot.slane %v8207_v6, 2  ;;  %v2764_v27 = vrot.slane %v2749_v2, 2 }
 0x4d0   :  { %1968 = vrot.lane.b32.xlu0 %v7941_v13, %s5366_s3  ;;  %v8285_v24 = vsel %vm266_vm0, %v2612_v48, %v2613_v42  ;;  %v8291_v13 = vsel %vm399_vm1, %v2724_v16, %v2725_v4  ;;  %v8300_v17 = vsel %vm399_vm1, %v2796_v54, %v10702_v20  ;;  %v8310_v4 = vsel %vm399_vm1, %v2729_v25, %v2730_v19 }
 0x4d1   :  { %v2801_v52 = vrot.slane %v2787_v50, 2  ;;  %v2757_v48 = vrot.slane %v8230_v34, 2  ;;  %v2759_v54 = vrot.slane %v2746_v30, 2  ;;  %v2765_v10 = vsel %vm399_vm1, %v2762_v61, %v2764_v27  ;;  %v10706_v30 = vld [vmem:[#allocation75_spill] sm:$0xff]  ;;  %v10707_v61 = vld [vmem:[#allocation90_spill] sm:$0xff] }
 0x4d2   :  { %v2786_v34 = vmul.f32 %v8172_v11, %v8142_v53  ;;  %v2548_v16 = vmul.f32 %v8128_v41, %v8210_v18  ;;  %v2632_v57 = vmul.f32 %v8147_v12, %v8210_v18  ;;  %v2576_v6 = vmul.f32 %v8151_v47, %v8213_v62 }
 0x4d3   :  { %2696 = vrot.lane.b32.xlu1 %v2688_v40, %s5366_s3  ;;  %v8307_v42 = vsel %vm399_vm1, %v2801_v52, %v10703_v43  ;;  %v2635_v49 = vmul.f32 %v8147_v12, %v8213_v62  ;;  %v2672_v25 = vmul.f32 %v8153_v29, %v8210_v18  ;;  %v2675_v12 = vmul.f32 %v8153_v29, %v8213_v62 }
 0x4d4   :  { %2036 = vrot.lane.b32.xlu0 %v7963_v51, %s5365_s29  ;;  %v2760_v51 = vsel %vm399_vm1, %v2757_v48, %v2759_v54  ;;  %v2799_v19 = vrot.slane %v2786_v34, 2  ;;  %v2644_v40 = vrot.slane %v2632_v57, 1  ;;  %v2744_v2 = vmul.f32 %v8168_v31, %v8210_v18  ;;  %v10714_v57 = vld [vmem:[#allocation71_spill] sm:$0xff] }
 0x4d5   :  { %v2684_v5 = vrot.slane %v2672_v25, 1  ;;  %v2689_v54 = vrot.slane %v2675_v12, 1  ;;  %v2543_v31 = vmul.f32 %v8193_v14, %v8131_v45  ;;  %v10716_v12 = vld [vmem:[#allocation121_spill] sm:$0xff] }
 0x4d6   :  { %v2756_v27 = vrot.slane %v2744_v2, 2  ;;  %v10717_v2 = vld [vmem:[#allocation94_spill] sm:$0xff] }
 0x4d7   :  { %2700 = vrot.lane.b32.xlu1 %v2693_v58, %s5366_s3 }
 0x4d8   :  { %2040 = vrot.lane.b32.xlu0 %v7968_v15, %s5365_s29  ;;  %v10705_v15 = vld [vmem:[#allocation78_spill] sm:$0xff]  ;;  %v2758_v29 = vsel %vm399_vm1, %v2756_v27, %v2757_v48 }
 0x4db   :  { %2768 = vrot.lane.b32.xlu1 %v2760_v51, %s5365_s29 }
 0x4dc   :  { %2076 = vrot.lane.b32.xlu0 %v7973_v9, %s5366_s3  ;;  %v2789_v9 = vmul.f32 %v8172_v11, %v8145_v21  ;;  %v10709_v21 = vmov %v10703_v43  ;;  %v10711_v43 = vrot.slane %v8164_v8, 1  ;;  %v10713_v8 = vrot.slane %v8184_v23, 1 }
 0x4de   :  { %v2804_v50 = vrot.slane %v2789_v9, 2  ;;  %v2691_v51 = vsel %vm266_vm0, %v2689_v54, %v10713_v8  ;;  %v1952_v8 = vadd.f32 %v8083_v22, %v10717_v2  ;;  %v10718_v22 = vld [vmem:[#allocation35_spill] sm:$0xff] }
 0x4df   :  { %2772 = vrot.lane.b32.xlu1 %v2765_v10, %s5365_s29 }
 0x4e0   :  { %2080 = vrot.lane.b32.xlu0 %v7980_v26, %s5366_s3  ;;  %v10708_v26 = vmov %v10702_v20  ;;  %v2805_v11 = vsel %vm399_vm1, %v10709_v21, %v2804_v50  ;;  %v2649_v20 = vrot.slane %v2635_v49, 1 }
 0x4e1   :  { %v2800_v53 = vsel %vm399_vm1, %v10708_v26, %v2799_v19  ;;  %v3712_v19 = vrot.slane %v8079_v33, 4 }
 0x4e2   :  { %v2651_v47 = vsel %vm266_vm0, %v2649_v20, %v10711_v43 }
 0x4e3   :  { %2190 = vrot.lane.b32.xlu1 %v10705_v15, %s5366_s3  ;;  %v2545_v15 = vmul.f32 %v8193_v14, %v8134_v60  ;;  %v1925_v60 = vmul.f32 %v7861_v35, %v10714_v57 }
 0x4e4   :  { %2148 = vrot.lane.b32.xlu0 %v10706_v30, %s5365_s29 }
 0x4e7   :  { %2194 = vrot.lane.b32.xlu1 %v8015_v0, %s5366_s3  ;;  %v2550_v0 = vmul.f32 %v8128_v41, %v8213_v62  ;;  %v10710_v41 = vrot.slane %v8158_v44, 1  ;;  %v10712_v44 = vrot.slane %v8176_v36, 1  ;;  %v8389_v36 = vpop.permute.xlu1 %2150 }
 0x4e8   :  { %2152 = vrot.lane.b32.xlu0 %v10707_v61, %s5365_s29 }
 0x4e9   :  { %v2646_v52 = vsel %vm266_vm0, %v2644_v40, %v10710_v41  ;;  %v2686_v58 = vsel %vm266_vm0, %v2684_v5, %v10712_v44 }
 0x4eb   :  { %2808 = vrot.lane.b32.xlu1 %v2800_v53, %s5366_s3  ;;  %v8391_v62 = vpop.permute.xlu1 %2154  ;;  %v3713_v53 = vadd.f32 %v3712_v19, %v8079_v33 }
 0x4ec   :  { %2556 = vrot.lane.b32.xlu0 %v2548_v16, %s5365_s29 }
 0x4ed   :  { %v3714_v45 = vrot.slane %v3713_v53, 2 }
 0x4ef   :  { %2812 = vrot.lane.b32.xlu1 %v2805_v11, %s5366_s3 }
 0x4f0   :  { %2560 = vrot.lane.b32.xlu0 %v2550_v0, %s5365_s29 }
 0x4f4   :  { %2582 = vrot.lane.b32.xlu0 %v2574_v55, %s5366_s3 }
 0x4f8   :  { %2586 = vrot.lane.b32.xlu0 %v2576_v6, %s5366_s3  ;;  %v3715_v6 = vadd.f32 %v3714_v45, %v3713_v53 }
 0x4fa   :  { %v3716_v5 = vrot.slane %v3715_v6, 1 }
 0x4fc   :  { %2654 = vrot.lane.b32.xlu0 %v2646_v52, %s5365_s29  ;;  %v10715_v52 = vld [vmem:[#allocation74_spill] sm:$0xff] }
 0x4fd   :  { %v1950_v33 = vadd.f32 %v8081_v28, %v10715_v52 }
 0x500   :  { %2658 = vrot.lane.b32.xlu0 %v2651_v47, %s5365_s29 }
 0x504   :  { %2694 = vrot.lane.b32.xlu0 %v2686_v58, %s5366_s3 }
 0x508   :  { %2698 = vrot.lane.b32.xlu0 %v2691_v51, %s5366_s3 }
 0x50c   :  { %2766 = vrot.lane.b32.xlu0 %v2758_v29, %s5365_s29 }
 0x52d   :  { %v2559_v10 = vpop.permute.xlu1 %2558 }
 0x52e   :  { %v2569_v18 = vadd.f32 %v2559_v10, %v2543_v31 }
 0x531   :  { %v2563_v34 = vpop.permute.xlu1 %2562 }
 0x532   :  { %v2571_v48 = vadd.f32 %v2563_v34, %v2545_v15  ;;  %v3717_v34 = vadd.f32 %v3716_v5, %v3715_v6 }
 0x535   :  { %v2585_v23 = vpop.permute.xlu1 %2584 }
 0x536   :  { %v2595_v30 = vadd.f32 %v2585_v23, %v2569_v18 }
 0x538   :  { %v2627_v9 = vadd.f32 %v8249_v63, %v2595_v30 }
 0x539   :  { %v2589_v61 = vpop.permute.xlu1 %2588 }
 0x53a   :  { %v2597_v26 = vadd.f32 %v2589_v61, %v2571_v48  ;;  %v5369_v61 = vmov 1934713408  }
 0x53c   :  { %v2629_v16 = vadd.f32 %v8260_v59, %v2597_v26 }
 0x53d   :  { %v2657_v50 = vpop.permute.xlu1 %2656 }
 0x53e   :  { %v2667_v40 = vadd.f32 %v2657_v50, %v2627_v9 }
 0x53f   :  { %v3124_v21 = vpop.xlane.xlu0 %3123 }
 0x540   :  { %v3125_v11 = vrot.slane %v3124_v21, 4 }
 0x541   :  { %v2661_v0 = vpop.permute.xlu1 %2660 }
 0x542   :  { %v3126_v55 = vadd.f32 %v3125_v11, %v3124_v21  ;;  %v2669_v43 = vadd.f32 %v2661_v0, %v2629_v16  ;;  %v10719_v11 = vld [vmem:[#allocation118_spill] sm:$0xff] }
 0x543   :  { %v1941_v14 = vpop.permute.xlu0 %1940 }
 0x544   :  { %v1951_v49 = vadd.f32 %v1941_v14, %v1925_v60  ;;  %v3127_v63 = vrot.slane %v3126_v55, 2  ;;  %v10721_v60 = vmov 0.0  }
 0x545   :  { %v2697_v41 = vpop.permute.xlu1 %2696 }
 0x546   :  { %v1977_v59 = vadd.f32 %v8085_v46, %v1951_v49  ;;  %v2707_v20 = vadd.f32 %v2697_v41, %v2667_v40  ;;  %v3128_v25 = vadd.f32 %v3127_v63, %v3126_v55  ;;  %v10722_v63 = vld [vmem:[#allocation68_spill] sm:$0xff] }
 0x547   :  { %v1965_v47 = vpop.permute.xlu0 %1964 }
 0x548   :  { %v2009_v44 = vadd.f32 %v10716_v12, %v1977_v59  ;;  %v1976_v58 = vadd.f32 %v1965_v47, %v1950_v33  ;;  %v3129_v35 = vrot.slane %v3128_v25, 1  ;;  %v2739_v54 = vadd.f32 %v8267_v39, %v2707_v20 }
 0x549   :  { %v2701_v51 = vpop.permute.xlu1 %2700 }
 0x54a   :  { %v2049_v27 = vadd.f32 %v8090_v56, %v2009_v44  ;;  %v2709_v28 = vadd.f32 %v2701_v51, %v2669_v43  ;;  %v3130_v29 = vadd.f32 %v3129_v35, %v3128_v25  ;;  %v2008_v46 = vadd.f32 %v8025_v3, %v1976_v58 }
 0x54b   :  { %v1969_v10 = vpop.permute.xlu0 %1968  ;;  %v5368_v56 = vmov 1983009808   ;;  %v2237_v3 = vunpack.c.l.s4 %v5369_v61 }
 0x54c   :  { %v1978_v31 = vadd.f32 %v1969_v10, %v1952_v8  ;;  %5142 = vpush %v3130_v29  ;;  %v2741_v18 = vadd.f32 %v8270_v1, %v2709_v28  ;;  %v2089_v23 = vadd.f32 %v8092_v32, %v2049_v27  ;;  %v2206_v48 = vunpack.c.l.s4 %v5368_v56 }
 0x54d   :  { %5144 = vpush %v3717_v34  ;;  %v2769_v39 = vpop.permute.xlu1 %2768  ;;  %v2238_v32 = vunpack.c.0.s8 %v2237_v3 }
 0x54e   :  { %v2010_v15 = vadd.f32 %v8028_v37, %v1978_v31  ;;  %v2121_v30 = vadd.f32 %v10718_v22, %v2089_v23  ;;  %v2207_v53 = vunpack.c.0.s8 %v2206_v48  ;;  %v10720_v37 = vld [vmem:[#allocation76_spill] sm:$0xff]  ;;  %v2779_v52 = vadd.f32 %v2769_v39, %v2739_v54  ;;  %v10725_v54 = vld [vmem:[#allocation58_spill] sm:$0xff] }
 0x54f   :  { %v2037_v19 = vpop.permute.xlu0 %2036  ;;  %v2163_v55 = vadd.f32 %v8391_v62, %v10720_v37 }
 0x550   :  { %v2161_v16 = vadd.f32 %v8389_v36, %v2121_v30  ;;  %v2048_v1 = vadd.f32 %v2037_v19, %v2008_v46  ;;  %v8418_v0 = vsub.s32 %v2207_v53, %v10719_v11  ;;  %v8427_v36 = vsub.s32 %v2238_v32, %v10719_v11  ;;  %v10730_v53 = vld [vmem:[#allocation88_spill] sm:$0xff]  ;;  %v10731_v32 = vld [vmem:[#allocation79_spill] sm:$0xff] }
 0x551   :  { %v2773_v9 = vpop.permute.xlu1 %2772 }
 0x552   :  { %v2781_v8 = vadd.f32 %v2773_v9, %v2741_v18 }
 0x553   :  { %v2041_v26 = vpop.permute.xlu0 %2040 }
 0x554   :  { %v2050_v40 = vadd.f32 %v2041_v26, %v2010_v15 }
 0x555   :  { %v2191_v50 = vpop.permute.xlu1 %2190 }
 0x556   :  { %v2201_v21 = vadd.f32 %v2191_v50, %v2161_v16 }
 0x557   :  { %v2077_v45 = vpop.permute.xlu0 %2076 }
 0x558   :  { %v2088_v57 = vadd.f32 %v2077_v45, %v2048_v1  ;;  %v2270_v14 = vcombine.high %v2201_v21, %v10721_v60  ;;  %v2277_v59 = vrot.slane %v2201_v21, %v8418_v0 }
 0x559   :  { %v2195_v6 = vpop.permute.xlu1 %2194 }
 0x55a   :  { %v2203_v49 = vadd.f32 %v2195_v6, %v2163_v55  ;;  %v8424_v41 = vadd.f32 %v10722_v63, %v2088_v57  ;;  %v8433_v43 = vrot.slane %v2270_v14, %v8418_v0 }
 0x55b   :  { %v2081_v33 = vpop.permute.xlu0 %2080 }
 0x55c   :  { %v2285_v20 = vcombine.high %v2203_v49, %v10721_v60  ;;  %v2292_v62 = vrot.slane %v2203_v49, %v8418_v0  ;;  %v2090_v25 = vadd.f32 %v2081_v33, %v2050_v40  ;;  %10723 = vst [vmem:[#allocation82_spill] sm:$0xff] %v8433_v43 }
 0x55d   :  { %v2809_v47 = vpop.permute.xlu1 %2808 }
 0x55e   :  { %v8436_v5 = vrot.slane %v2285_v20, %v8418_v0  ;;  %v2300_v12 = vcombine.low %v2277_v59, %v2292_v62  ;;  %v2301_v44 = vcombine.high %v2277_v59, %v2292_v62  ;;  %v2819_v58 = vadd.f32 %v2809_v47, %v2779_v52 }
 0x55f   :  { %v8438_v35 = vpop.permute.xlu0 %2148  ;;  %v8441_v2 = vadd.f32 %v10725_v54, %v2090_v25 }
 0x560   :  { %10724 = vst [vmem:[#allocation81_spill] sm:$0xff] %v8436_v5  ;;  %v8444_v51 = vrot.slane %v2300_v12, %v8427_v36  ;;  %v2316_v27 = vcombine.low %v8433_v43, %v8436_v5  ;;  %v2888_v46 = vcombine.high %v2819_v58, %v10721_v60  ;;  %v2895_v18 = vrot.slane %v2819_v58, %v8418_v0 }
 0x561   :  { %v2813_v29 = vpop.permute.xlu1 %2812  ;;  %v2315_v50 = vrot.slane %v2301_v44, %v8427_v36 }
 0x562   :  { %10726 = vst [vmem:[#allocation83_spill] sm:$0xff] %v8444_v51  ;;  %v2821_v10 = vadd.f32 %v2813_v29, %v2781_v8  ;;  %v2332_v34 = vcombine.high %v8444_v51, %v10721_v60  ;;  %v8460_v15 = vrot.slane %v2888_v46, %v8418_v0  ;;  %v8488_v59 = vrot.slane %v2316_v27, %v8427_v36  ;;  %v10734_v8 = vld [vmem:[#allocation112_spill] sm:$0xff] }
 0x563   :  { %v8453_v31 = vpop.permute.xlu0 %2152  ;;  %v2333_v6 = vcombine.high %v2315_v50, %v10721_v60  ;;  %v10735_v29 = vld [vmem:[#allocation28_spill] sm:$0xff] }
 0x564   :  { %v2903_v23 = vcombine.high %v2821_v10, %v10721_v60  ;;  %v2910_v39 = vrot.slane %v2821_v10, %v8418_v0  ;;  %2365 = vrot.lane.b32.xlu1 %v2332_v34, %s5370_s12  ;;  %10727 = vst [vmem:[#allocation84_spill] sm:$0xff] %v8460_v15  ;;  %10732 = vst [vmem:[#allocation111_spill] sm:$0xff] %v8488_v59  ;;  %v10736_v10 = vld [vmem:[#allocation23_spill] sm:$0xff] }
 0x566   :  { %v8463_v22 = vrot.slane %v2903_v23, %v8418_v0  ;;  %v2918_v30 = vcombine.low %v2895_v18, %v2910_v39  ;;  %v2919_v19 = vcombine.high %v2895_v18, %v2910_v39  ;;  %v10737_v23 = vld [vmem:[#allocation86_spill] sm:$0xff] }
 0x567   :  { %v2557_v56 = vpop.permute.xlu0 %2556 }
 0x568   :  { %10728 = vst [vmem:[#allocation91_spill] sm:$0xff] %v8463_v22  ;;  %v8466_v48 = vrot.slane %v2918_v30, %v8427_v36  ;;  %v2934_v9 = vcombine.low %v8460_v15, %v8463_v22  ;;  %v2568_v16 = vadd.f32 %v2557_v56, %v10730_v53  ;;  %v2933_v37 = vrot.slane %v2919_v19, %v8427_v36  ;;  %v10738_v30 = vld [vmem:[#allocation95_spill] sm:$0xff]  ;;  %v10739_v19 = vld [vmem:[#allocation29_spill] sm:$0xff] }
 0x569   :  { %v10741_v53 = vld [vmem:[#allocation61_spill] sm:$0xff] }
 0x56a   :  { %10729 = vst [vmem:[#allocation105_spill] sm:$0xff] %v8466_v48  ;;  %v2950_v3 = vcombine.high %v8466_v48, %v10721_v60  ;;  %v2951_v63 = vcombine.high %v2933_v37, %v10721_v60  ;;  %v8495_v58 = vrot.slane %v2934_v9, %v8427_v36 }
 0x56b   :  { %v2561_v26 = vpop.permute.xlu0 %2560 }
 0x56c   :  { %2983 = vrot.lane.b32.xlu1 %v2950_v3, %s5370_s12  ;;  %v2570_v45 = vadd.f32 %v2561_v26, %v10731_v32  ;;  %10733 = vst [vmem:[#allocation117_spill] sm:$0xff] %v8495_v58  ;;  %v10740_v3 = vld [vmem:[#allocation45_spill] sm:$0xff] }
 0x56f   :  { %v2583_v1 = vpop.permute.xlu0 %2582 }
 0x570   :  { %v2594_v21 = vadd.f32 %v2583_v1, %v2568_v16  ;;  %2369 = vrot.lane.b32.xlu1 %v2315_v50, %s5371_s5  ;;  %v10742_v50 = vld [vmem:[#allocation73_spill] sm:$0xff] }
 0x572   :  { %v2626_v55 = vadd.f32 %v8285_v24, %v2594_v21 }
 0x573   :  { %v2587_v57 = vpop.permute.xlu0 %2586 }
 0x574   :  { %v2596_v14 = vadd.f32 %v2587_v57, %v2570_v45  ;;  %2987 = vrot.lane.b32.xlu1 %v2933_v37, %s5371_s5 }
 0x576   :  { %v2628_v40 = vadd.f32 %v8288_v38, %v2596_v14 }
 0x577   :  { %v2655_v49 = vpop.permute.xlu0 %2654 }
 0x578   :  { %2373 = vrot.lane.b32.xlu1 %v2333_v6, %s5372_s13  ;;  %v2666_v33 = vadd.f32 %v2655_v49, %v2626_v55 }
 0x57b   :  { %v2659_v52 = vpop.permute.xlu0 %2658 }
 0x57c   :  { %2991 = vrot.lane.b32.xlu1 %v2951_v63, %s5372_s13  ;;  %v2668_v12 = vadd.f32 %v2659_v52, %v2628_v40 }
 0x57d   :  { %s5143_s14 = spop %5142 }
 0x57e   :  { %v3132_v24 = vstv %s5143_s14  ;;  %s5145_s15 = spop %5144  ;;  %s8992_s14 = sld [smem:[#allocation10 + $0x21]] }
 0x57f   :  { %v3133_v20 = vmul.f32 0.001953125, %v3132_v24  ;;  %v3719_v62 = vstv %s5145_s15  ;;  %v2695_v25 = vpop.permute.xlu0 %2694  ;;  %v3137_v24 = vstv %s8506_s17  ;;  %s5374_s15 = smov 80   ;;  %s5375_s17 = smov 96  }
 0x580   :  { %v8490_v38 = vmul.f32 0.001953125, %v3719_v62  ;;  %v2706_v47 = vadd.f32 %v2695_v25, %v2666_v33  ;;  %2377 = vrot.lane.b32.xlu1 %v8488_v59, %s5373_s16 }
 0x581   :  { %v3135_v44 = vadd.f32 1e-05, %v3133_v20 }
 0x582   :  { %v8498_v54 = vadd.f32 %v8291_v13, %v2706_v47  ;;  %v3721_v27 = vsub.f32 %v10734_v8, %v8490_v38  ;;  %v3722_v46 = vsub.f32 %v10735_v29, %v8490_v38  ;;  %v3723_v34 = vsub.f32 %v10736_v10, %v8490_v38 }
 0x583   :  { %5207 = vrsqrt.f32 %v3135_v44  ;;  %v2699_v18 = vpop.permute.xlu0 %2698  ;;  %v3724_v39 = vsub.f32 %v10737_v23, %v8490_v38  ;;  %v3725_v13 = vsub.f32 %v10738_v30, %v8490_v38  ;;  %v3726_v56 = vsub.f32 %v10739_v19, %v8490_v38 }
 0x584   :  { %v2708_v9 = vadd.f32 %v2699_v18, %v2668_v12  ;;  %2995 = vrot.lane.b32.xlu1 %v8495_v58, %s5373_s16  ;;  %v3727_v26 = vmul.f32 %v10740_v3, %v3721_v27  ;;  %v3728_v16 = vmul.f32 %v10741_v53, %v3722_v46  ;;  %v3729_v1 = vmul.f32 %v10742_v50, %v3723_v34  ;;  %v10743_v34 = vld [vmem:[#allocation98_spill] sm:$0xff] }
 0x585   :  { %v3730_v21 = vmul.f32 %v10740_v3, %v3724_v39  ;;  %v3731_v32 = vmul.f32 %v10741_v53, %v3725_v13  ;;  %v3732_v14 = vmul.f32 %v10742_v50, %v3726_v56  ;;  %v3141_v27 = vstv %s5081_s2  ;;  %v10744_v13 = vld [vmem:[#allocation24_spill] sm:$0xff]  ;;  %s10239_s2 = smov 112  }
 0x586   :  { %v3733_v45 = vmul.f32 %v3727_v26, %v3727_v26  ;;  %v3734_v37 = vmul.f32 %v3728_v16, %v3728_v16  ;;  %v3735_v55 = vmul.f32 %v3729_v1, %v3729_v1  ;;  %v8522_v57 = vadd.f32 %v8310_v4, %v2708_v9  ;;  %v10745_v16 = vld [vmem:[#allocation93_spill] sm:$0xff] }
 0x587   :  { %v3736_v6 = vmul.f32 %v3730_v21, %v3730_v21  ;;  %v3737_v52 = vmul.f32 %v3731_v32, %v3731_v32  ;;  %v3738_v62 = vmul.f32 %v3732_v14, %v3732_v14  ;;  %v10746_v21 = vld [vmem:[#allocation64_spill] sm:$0xff] }
 0x588   :  { %v3739_v40 = vsel %vm1825_vm11, %v3733_v45, 0.0  ;;  %v3740_v49 = vsel %vm1825_vm11, %v3734_v37, 0.0  ;;  %v3742_v33 = vsel %vm1829_vm12, %v3735_v55, 0.0  ;;  %v10747_v45 = vld [vmem:[#allocation67_spill] sm:$0xff] }
 0x589   :  { %v3741_v63 = vadd.f32 %v3740_v49, %v3739_v40  ;;  %v3744_v25 = vsel %vm1825_vm11, %v3736_v6, 0.0  ;;  %v3746_v44 = vsel %vm1825_vm11, %v3737_v52, 0.0  ;;  %v3748_v39 = vsel %vm1829_vm12, %v3738_v62, 0.0  ;;  %v10748_v55 = vld [vmem:[#allocation63_spill] sm:$0xff]  ;;  %v10749_v6 = vld [vmem:[#allocation70_spill] sm:$0xff] }
 0x58b   :  { %v3743_v20 = vadd.f32 %v3742_v33, %v3741_v63 }
 0x58d   :  { %v5208_v47 = vpop.eup %5207  ;;  %v3745_v4 = vadd.f32 %v3744_v25, %v3743_v20 }
 0x58e   :  { %v3138_v12 = vmul.f32 %v5208_v47, %v3137_v24  ;;  %v8539_v47 = vstv %s5083_s4  ;;  %s9412_s4 = sld [smem:[#allocation11 + $0x8]] }
 0x58f   :  { %v3747_v46 = vadd.f32 %v3746_v44, %v3745_v4 }
 0x590   :  { %v3140_v18 = vmul.f32 %v3138_v12, %v10743_v34  ;;  %v3143_v56 = vmul.f32 %v3138_v12, %v10744_v13  ;;  %v3144_v1 = vmul.f32 %v3138_v12, %v10745_v16  ;;  %v3146_v32 = vmul.f32 %v3138_v12, %v10746_v21 }
 0x591   :  { %v3749_v9 = vadd.f32 %v3748_v39, %v3747_v46  ;;  %v3147_v37 = vmul.f32 %v3138_v12, %v10747_v45  ;;  %v3145_v14 = vmul.f32 %v3138_v12, %v10748_v55  ;;  %v3148_v40 = vmul.f32 %v3138_v12, %v10749_v6 }
 0x592   :  { %v3142_v26 = vsub.f32 %v3141_v27, %v3140_v18  ;;  %v8547_v46 = vstv %s5086_s18  ;;  %v3200_v21 = vstv %s5084_s8  ;;  %v8574_v45 = vstv %s5090_s20  ;;  %s9414_s18 = sld [smem:[#allocation11 + $0xc]]  ;;  %s9427_s20 = sld [smem:[#allocation11 + $0x9]] }
 0x593   :  { %3750 = vadd.xlane.f32.xlu0 %v3749_v9  ;;  %v8563_v9 = vstv %s5087_s7  ;;  %v8582_v6 = vstv %s5082_s21  ;;  %s9416_s7 = sld [smem:[#allocation11 + $0x10]]  ;;  %s9418_s8 = sld [smem:[#allocation11 + $0x14]] }
 0x594   :  { %v3149_v49 = vadd.f32 %v3143_v56, %v3142_v26  ;;  %v3150_v63 = vadd.f32 %v3144_v1, %v3142_v26  ;;  %v3152_v52 = vadd.f32 %v3146_v32, %v3142_v26  ;;  %v3153_v33 = vadd.f32 %v3147_v37, %v3142_v26  ;;  %s9429_s21 = sld [smem:[#allocation11 + $0xd]] }
 0x595   :  { %v3151_v24 = vadd.f32 %v3145_v14, %v3142_v26  ;;  %v3154_v20 = vadd.f32 %v3148_v40, %v3142_v26  ;;  %v8572_v32 = vstv %s5089_s19  ;;  %s9425_s19 = sld [smem:[#allocation11 + $0x1c]] }
 0x596   :  { %v3156_v62 = vmax.f32 %v3150_v63, 0.0  ;;  %v3159_v25 = vmax.f32 %v3153_v33, 0.0  ;;  %v3155_v1 = vmax.f32 %v3149_v49, 0.0  ;;  %v3158_v37 = vmax.f32 %v3152_v52, 0.0 }
 0x597   :  { %v3157_v4 = vmax.f32 %v3151_v24, 0.0  ;;  %v3160_v44 = vmax.f32 %v3154_v20, 0.0 }
 0x598   :  { %v8542_v27 = vmul.f32 %v10741_v53, %v3156_v62  ;;  %v8545_v12 = vmul.f32 %v10741_v53, %v3159_v25  ;;  %v8604_v25 = vmul.f32 %v10740_v3, %v3155_v1 }
 0x599   :  { %v8550_v34 = vmul.f32 %v10742_v50, %v3157_v4  ;;  %v8553_v18 = vmul.f32 %v10742_v50, %v3160_v44  ;;  %v8610_v44 = vstv %s5085_s22  ;;  %v10753_v50 = vld [vmem:[#allocation62_spill] sm:$0xff]  ;;  %s9436_s22 = sld [smem:[#allocation11 + $0x11]] }
 0x59a   :  { %v3176_v39 = vmul.f32 %v8539_v47, %v8542_v27  ;;  %v8559_v13 = vmul.f32 %v8547_v46, %v8542_v27  ;;  %v8568_v26 = vmul.f32 %v8547_v46, %v8545_v12  ;;  %v3178_v55 = vmul.f32 %v8539_v47, %v8545_v12 }
 0x59b   :  { %v3261_v56 = vmul.f32 %v8547_v46, %v8550_v34  ;;  %v3264_v16 = vmul.f32 %v8547_v46, %v8553_v18  ;;  %v8580_v14 = vmul.f32 %v8563_v9, %v8542_v27  ;;  %v8587_v49 = vmul.f32 %v8563_v9, %v8550_v34 }
 0x59c   :  { %3185 = vrot.lane.b32.xlu1 %v3176_v39, %s5365_s29  ;;  %v8591_v33 = vmul.f32 %v8563_v9, %v8545_v12  ;;  %v8597_v20 = vmul.f32 %v8572_v32, %v8542_v27  ;;  %v8601_v62 = vmul.f32 %v8572_v32, %v8545_v12  ;;  %v8608_v4 = vmul.f32 %v8574_v45, %v8542_v27 }
 0x59d   :  { %v3274_v63 = vrot.slane %v3261_v56, 1  ;;  %v3279_v24 = vrot.slane %v3264_v16, 1  ;;  %v8612_v39 = vstv %s5088_s23  ;;  %v8615_v56 = vmul.f32 %v10740_v3, %v3158_v37  ;;  %s9438_s23 = sld [smem:[#allocation11 + $0x15]] }
 0x59e   :  { %v3202_v16 = vmul.f32 %v3200_v21, %v8542_v27  ;;  %v8621_v61 = vmul.f32 %v8574_v45, %v8545_v12  ;;  %v8627_v52 = vmul.f32 %v8563_v9, %v8553_v18  ;;  %v10750_v37 = vrot.slane %v8559_v13, 1 }
 0x59f   :  { %v10751_v48 = vrot.slane %v8568_v26, 1  ;;  %v8642_v15 = vmul.f32 %v8610_v44, %v8542_v27  ;;  %v3341_v22 = vmul.f32 %v8612_v39, %v8550_v34  ;;  %v8663_v5 = vmul.f32 %v8612_v39, %v8545_v12 }
 0x5a0   :  { %3189 = vrot.lane.b32.xlu1 %v3178_v55, %s5365_s29  ;;  %v3204_v55 = vmul.f32 %v3200_v21, %v8545_v12  ;;  %v3275_v11 = vsel %vm266_vm0, %v10750_v37, %v3274_v63  ;;  %v8648_v63 = vmul.f32 %v8610_v44, %v8545_v12  ;;  %v3344_v59 = vmul.f32 %v8612_v39, %v8553_v18 }
 0x5a1   :  { %v3280_v51 = vsel %vm266_vm0, %v10751_v48, %v3279_v24  ;;  %v3232_v48 = vmul.f32 %v8610_v44, %v8553_v18  ;;  %v8655_v24 = vmul.f32 %v8612_v39, %v8542_v27  ;;  %v10225_v28 = vrot.slane %v8642_v15, 1 }
 0x5a2   :  { %v3354_v58 = vrot.slane %v3341_v22, 2  ;;  %v3357_v40 = vrot.slane %v8663_v5, 2  ;;  %v8683_v22 = vmul.f32 %v8539_v47, %v8615_v56  ;;  %v8697_v5 = vmul.f32 %v3200_v21, %v8615_v56 }
 0x5a3   :  { %v3247_v37 = vrot.slane %v3232_v48, 1  ;;  %v3352_v43 = vrot.slane %v8655_v24, 2  ;;  %v10752_v48 = vrot.slane %v8648_v63, 1  ;;  %v3259_v3 = vmul.f32 %v8547_v46, %v8604_v25 }
 0x5a4   :  { %3211 = vrot.lane.b32.xlu1 %v3202_v16, %s5366_s3  ;;  %v3229_v16 = vmul.f32 %v8610_v44, %v8550_v34  ;;  %v10754_v23 = vrot.slane %v8559_v13, 1  ;;  %v10755_v8 = vrot.slane %v8568_v26, 1 }
 0x5a5   :  { %v8688_v24 = vsel %vm266_vm0, %v10752_v48, %v3247_v37  ;;  %v3299_v37 = vmul.f32 %v8563_v9, %v8604_v25  ;;  %v3374_v48 = vmul.f32 %v8572_v32, %v8615_v56 }
 0x5a6   :  { %v3242_v1 = vrot.slane %v3229_v16, 1 }
 0x5a7   :  { %v3311_v19 = vrot.slane %v3299_v37, 1  ;;  %v3388_v30 = vrot.slane %v3374_v48, 2 }
 0x5a8   :  { %3215 = vrot.lane.b32.xlu1 %v3204_v55, %s5366_s3  ;;  %v8674_v16 = vsel %vm266_vm0, %v10225_v28, %v3242_v1  ;;  %v8679_v55 = vmul.f32 %v8539_v47, %v8604_v25  ;;  %v3359_v1 = vrot.slane %v3344_v59, 2  ;;  %v8694_v28 = vmul.f32 %v3200_v21, %v8604_v25 }
 0x5a9   :  { %2770 = vrot.lane.b32.xlu0 %v8295_v7, %s5365_s29  ;;  %v8691_v7 = vsel %vm399_vm1, %v3352_v43, %v3354_v58  ;;  %v3262_v47 = vmul.f32 %v8547_v46, %v8615_v56  ;;  %v3302_v59 = vmul.f32 %v8563_v9, %v8615_v56  ;;  %v3371_v21 = vmul.f32 %v8572_v32, %v8604_v25 }
 0x5aa   :  { %v8707_v58 = vsel %vm399_vm1, %v3357_v40, %v3359_v1  ;;  %v3271_v46 = vrot.slane %v3259_v3, 1  ;;  %v3414_v9 = vmul.f32 %v8574_v45, %v8615_v56 }
 0x5ab   :  { %v3276_v53 = vrot.slane %v3262_v47, 1  ;;  %v3316_v1 = vrot.slane %v3302_v59, 1  ;;  %v3383_v10 = vrot.slane %v3371_v21, 2  ;;  %v10757_v59 = vrot.slane %v8591_v33, 1  ;;  %v10760_v21 = vld [vmem:[#allocation26_spill] sm:$0xff] }
 0x5ac   :  { %3283 = vrot.lane.b32.xlu1 %v3275_v11, %s5365_s29  ;;  %v3411_v11 = vmul.f32 %v8574_v45, %v8604_v25  ;;  %v8724_v29 = vsel %vm266_vm0, %v3271_v46, %v10754_v23  ;;  %v10758_v23 = vrot.slane %v8597_v20, 2  ;;  %v8761_v46 = vmul.f32 %v8582_v6, %v8604_v25 }
 0x5ad   :  { %2188 = vrot.lane.b32.xlu0 %v10753_v50, %s5366_s3  ;;  %v8729_v3 = vsel %vm266_vm0, %v3276_v53, %v10755_v8  ;;  %v10756_v50 = vrot.slane %v8580_v14, 1  ;;  %v8740_v13 = vsel %vm266_vm0, %v3316_v1, %v10757_v59  ;;  %v10759_v8 = vrot.slane %v8601_v62, 2 }
 0x5ae   :  { %v3423_v37 = vrot.slane %v3411_v11, 2  ;;  %v8745_v26 = vsel %vm399_vm1, %v3383_v10, %v10758_v23  ;;  %v8765_v10 = vmul.f32 %v8582_v6, %v8615_v56  ;;  %v10762_v11 = vrot.slane %v8621_v61, 2 }
 0x5af   :  { %v8734_v47 = vsel %vm266_vm0, %v3311_v19, %v10756_v50  ;;  %v8750_v53 = vsel %vm399_vm1, %v3388_v30, %v10759_v8  ;;  %v3428_v19 = vrot.slane %v3414_v9, 2  ;;  %v3227_v30 = vmul.f32 %v8610_v44, %v8604_v25 }
 0x5b0   :  { %3287 = vrot.lane.b32.xlu1 %v3280_v51, %s5365_s29  ;;  %v10761_v51 = vrot.slane %v8608_v4, 2  ;;  %v3230_v9 = vmul.f32 %v8610_v44, %v8615_v56  ;;  %v3339_v50 = vmul.f32 %v8612_v39, %v8604_v25  ;;  %v10763_v59 = vrot.slane %v8587_v49, 1 }
 0x5b1   :  { %2192 = vrot.lane.b32.xlu0 %v10760_v21, %s5366_s3  ;;  %v8772_v1 = vsel %vm399_vm1, %v3428_v19, %v10762_v11  ;;  %v10764_v23 = vrot.slane %v8580_v14, 1  ;;  %v3319_v21 = vrot.slane %v8627_v52, 1  ;;  %v3373_v19 = vmul.f32 %v8572_v32, %v8550_v34 }
 0x5b2   :  { %v8757_v48 = vsel %vm399_vm1, %v3423_v37, %v10761_v51  ;;  %v3342_v37 = vmul.f32 %v8612_v39, %v8615_v56  ;;  %v3239_v51 = vrot.slane %v3227_v30, 1  ;;  %v3244_v44 = vrot.slane %v3230_v9, 1 }
 0x5b3   :  { %v3315_v8 = vsel %vm266_vm0, %v10764_v23, %v10763_v59  ;;  %v3351_v11 = vrot.slane %v3339_v50, 2  ;;  %v10765_v49 = vrot.slane %v8642_v15, 1  ;;  %v10766_v39 = vrot.slane %v8648_v63, 1 }
 0x5b4   :  { %3323 = vrot.lane.b32.xlu1 %v3315_v8, %s5366_s3  ;;  %v3356_v25 = vrot.slane %v3342_v37, 2  ;;  %v10767_v9 = vrot.slane %v8591_v33, 1  ;;  %v3386_v50 = vrot.slane %v3373_v19, 2  ;;  %v3376_v15 = vmul.f32 %v8572_v32, %v8553_v18 }
 0x5b5   :  { %2806 = vrot.lane.b32.xlu0 %v8300_v17, %s5366_s3  ;;  %v8794_v14 = vsel %vm266_vm0, %v3239_v51, %v10765_v49  ;;  %v8799_v52 = vsel %vm266_vm0, %v3244_v44, %v10766_v39  ;;  %v8802_v56 = vsel %vm399_vm1, %v3351_v11, %v3352_v43  ;;  %v10768_v63 = vrot.slane %v8597_v20, 2 }
 0x5b6   :  { %v8805_v30 = vsel %vm399_vm1, %v3356_v25, %v3357_v40  ;;  %v3320_v17 = vsel %vm266_vm0, %v10767_v9, %v3319_v21  ;;  %v3391_v37 = vrot.slane %v3376_v15, 2  ;;  %v3413_v40 = vmul.f32 %v8574_v45, %v8550_v34 }
 0x5b7   :  { %v3387_v43 = vsel %vm399_vm1, %v10768_v63, %v3386_v50  ;;  %v10769_v33 = vrot.slane %v8601_v62, 2  ;;  %v3416_v23 = vmul.f32 %v8574_v45, %v8553_v18  ;;  %v10771_v34 = vrot.slane %v8621_v61, 2 }
 0x5b8   :  { %3327 = vrot.lane.b32.xlu1 %v3320_v17, %s5366_s3  ;;  %v3426_v32 = vrot.slane %v3413_v40, 2  ;;  %v3170_v49 = vmul.f32 %v8582_v6, %v8542_v27  ;;  %v3172_v17 = vmul.f32 %v8582_v6, %v8545_v12  ;;  %v2767_v40 = vpop.permute.xlu0 %2766  ;;  %v2160_v12 = vadd.f32 %v8438_v35, %v8424_v41 }
 0x5b9   :  { %2810 = vrot.lane.b32.xlu0 %v8307_v42, %s5366_s3  ;;  %v3392_v59 = vsel %vm399_vm1, %v10769_v33, %v3391_v37  ;;  %v10770_v42 = vrot.slane %v8608_v4, 2  ;;  %v3431_v8 = vrot.slane %v3416_v23, 2 }
 0x5bb   :  { %v3427_v20 = vsel %vm399_vm1, %v10770_v42, %v3426_v32  ;;  %v3432_v21 = vsel %vm399_vm1, %v10771_v34, %v3431_v8 }
 0x5bc   :  { %3395 = vrot.lane.b32.xlu1 %v3387_v43, %s5365_s29 }
 0x5c0   :  { %3399 = vrot.lane.b32.xlu1 %v3392_v59, %s5365_s29 }
 0x5c4   :  { %3435 = vrot.lane.b32.xlu1 %v3427_v20, %s5366_s3 }
 0x5c8   :  { %3439 = vrot.lane.b32.xlu1 %v3432_v21, %s5366_s3 }
 0x5d6   :  { %v8835_v62 = vpop.permute.xlu1 %2365 }
 0x5d7   :  { %10772 = vst [vmem:[#allocation27_spill] sm:$0xff] %v8835_v62 }
 0x5de   :  { %v8837_v19 = vpop.permute.xlu1 %2983 }
 0x5df   :  { %10773 = vst [vmem:[#allocation87_spill] sm:$0xff] %v8837_v19 }
 0x5e2   :  { %v8839_v18 = vpop.permute.xlu1 %2369 }
 0x5e3   :  { %10774 = vst [vmem:[#allocation100_spill] sm:$0xff] %v8839_v18 }
 0x5e6   :  { %v8841_v45 = vpop.permute.xlu1 %2987 }
 0x5e7   :  { %10775 = vst [vmem:[#allocation108_spill] sm:$0xff] %v8841_v45 }
 0x5ea   :  { %v8843_v4 = vpop.permute.xlu1 %2373 }
 0x5eb   :  { %10776 = vst [vmem:[#allocation113_spill] sm:$0xff] %v8843_v4 }
 0x5ee   :  { %v8845_v51 = vpop.permute.xlu1 %2991 }
 0x5ef   :  { %10777 = vst [vmem:[#allocation116_spill] sm:$0xff] %v8845_v51 }
 0x5f2   :  { %v8847_v44 = vpop.permute.xlu1 %2377 }
 0x5f3   :  { %10778 = vst [vmem:[#allocation119_spill] sm:$0xff] %v8847_v44 }
 0x5f6   :  { %v8849_v11 = vpop.permute.xlu1 %2995 }
 0x5f7   :  { %10779 = vst [vmem:[#allocation85_spill] sm:$0xff] %v8849_v11 }
 0x60e   :  { %v3186_v61 = vpop.permute.xlu1 %3185 }
 0x60f   :  { %v3196_v39 = vadd.f32 %v3186_v61, %v3170_v49 }
 0x612   :  { %v3190_v25 = vpop.permute.xlu1 %3189 }
 0x613   :  { %v3198_v15 = vadd.f32 %v3190_v25, %v3172_v17  ;;  %v2162_v17 = vadd.f32 %v8453_v31, %v8441_v2 }
 0x616   :  { %v3212_v9 = vpop.permute.xlu1 %3211 }
 0x617   :  { %v3222_v50 = vadd.f32 %v3212_v9, %v3196_v39 }
 0x619   :  { %v3254_v63 = vadd.f32 %v8674_v16, %v3222_v50 }
 0x61a   :  { %v3216_v43 = vpop.permute.xlu1 %3215 }
 0x61b   :  { %v3224_v37 = vadd.f32 %v3216_v43, %v3198_v15 }
 0x61d   :  { %v3256_v33 = vadd.f32 %v8688_v24, %v3224_v37 }
 0x61e   :  { %v3284_v59 = vpop.permute.xlu1 %3283 }
 0x61f   :  { %v3294_v8 = vadd.f32 %v3284_v59, %v3254_v63 }
 0x620   :  { %v3751_v32 = vpop.xlane.xlu0 %3750 }
 0x621   :  { %v3752_v23 = vrot.slane %v3751_v32, 4 }
 0x622   :  { %v3288_v42 = vpop.permute.xlu1 %3287 }
 0x623   :  { %v3753_v20 = vadd.f32 %v3752_v23, %v3751_v32  ;;  %v3296_v25 = vadd.f32 %v3288_v42, %v3256_v33  ;;  %v2778_v33 = vadd.f32 %v2767_v40, %v8498_v54 }
 0x624   :  { %v2771_v27 = vpop.permute.xlu0 %2770 }
 0x625   :  { %v3754_v34 = vrot.slane %v3753_v20, 2 }
 0x626   :  { %v3324_v21 = vpop.permute.xlu1 %3323 }
 0x627   :  { %v3334_v6 = vadd.f32 %v3324_v21, %v3294_v8  ;;  %v3755_v61 = vadd.f32 %v3754_v34, %v3753_v20  ;;  %v2780_v34 = vadd.f32 %v2771_v27, %v8522_v57 }
 0x628   :  { %v2189_v16 = vpop.permute.xlu0 %2188 }
 0x629   :  { %v2200_v49 = vadd.f32 %v2189_v16, %v2160_v12  ;;  %v3756_v39 = vrot.slane %v3755_v61, 1  ;;  %v3366_v24 = vadd.f32 %v8691_v7, %v3334_v6 }
 0x62a   :  { %v3328_v9 = vpop.permute.xlu1 %3327 }
 0x62b   :  { %v3336_v50 = vadd.f32 %v3328_v9, %v3296_v25  ;;  %v3757_v15 = vadd.f32 %v3756_v39, %v3755_v61  ;;  %v2204_v63 = vcombine.high %v2200_v49, %v10721_v60  ;;  %v2211_v59 = vrot.slane %v2200_v49, %v8418_v0 }
 0x62c   :  { %v2193_v43 = vpop.permute.xlu0 %2192 }
 0x62d   :  { %v2202_v37 = vadd.f32 %v2193_v43, %v2162_v17  ;;  %5146 = vpush %v3757_v15  ;;  %v3368_v41 = vadd.f32 %v8707_v58, %v3336_v50  ;;  %v8869_v2 = vrot.slane %v2204_v63, %v8418_v0 }
 0x62e   :  { %v3396_v35 = vpop.permute.xlu1 %3395 }
 0x62f   :  { %v2219_v7 = vcombine.high %v2202_v37, %v10721_v60  ;;  %v2226_v32 = vrot.slane %v2202_v37, %v8418_v0  ;;  %10780 = vst [vmem:[#allocation30_spill] sm:$0xff] %v8869_v2  ;;  %v3406_v25 = vadd.f32 %v3396_v35, %v3366_v24 }
 0x630   :  { %v2807_v31 = vpop.permute.xlu0 %2806 }
 0x631   :  { %v8872_v23 = vrot.slane %v2219_v7, %v8418_v0  ;;  %v2234_v42 = vcombine.low %v2211_v59, %v2226_v32  ;;  %v2235_v20 = vcombine.high %v2211_v59, %v2226_v32  ;;  %v2818_v8 = vadd.f32 %v2807_v31, %v2778_v33  ;;  %v10797_v33 = vld [vmem:[#allocation45_spill] sm:$0xff] }
 0x632   :  { %v3400_v58 = vpop.permute.xlu1 %3399 }
 0x633   :  { %10781 = vst [vmem:[#allocation46_spill] sm:$0xff] %v8872_v23  ;;  %v8876_v54 = vrot.slane %v2234_v42, %v8427_v36  ;;  %v2250_v40 = vcombine.low %v8869_v2, %v8872_v23  ;;  %v2822_v6 = vcombine.high %v2818_v8, %v10721_v60  ;;  %v2829_v57 = vrot.slane %v2818_v8, %v8418_v0 }
 0x634   :  { %v2811_v12 = vpop.permute.xlu0 %2810  ;;  %v3408_v43 = vadd.f32 %v3400_v58, %v3368_v41 }
 0x635   :  { %10782 = vst [vmem:[#allocation89_spill] sm:$0xff] %v8876_v54  ;;  %v2820_v61 = vadd.f32 %v2811_v12, %v2780_v34  ;;  %v2266_v16 = vcombine.high %v8876_v54, %v10721_v60  ;;  %v8890_v17 = vrot.slane %v2822_v6, %v8418_v0  ;;  %v2249_v6 = vrot.slane %v2235_v20, %v8427_v36 }
 0x636   :  { %v3436_v49 = vpop.permute.xlu1 %3435 }
 0x637   :  { %v2837_v27 = vcombine.high %v2820_v61, %v10721_v60  ;;  %v2844_v39 = vrot.slane %v2820_v61, %v8418_v0  ;;  %2337 = vrot.lane.b32.xlu0 %v2266_v16, %s5370_s12  ;;  %v3446_v9 = vadd.f32 %v3436_v49, %v3406_v25  ;;  %10783 = vst [vmem:[#allocation120_spill] sm:$0xff] %v8890_v17  ;;  %v9058_v16 = vstv %s8990_s11  ;;  %s9635_s11 = sld [smem:[#allocation11 + $0x17]] }
 0x638   :  { %v2267_v20 = vcombine.high %v2249_v6, %v10721_v60 }
 0x639   :  { %v8893_v50 = vrot.slane %v2837_v27, %v8418_v0  ;;  %v2852_v15 = vcombine.low %v2829_v57, %v2844_v39  ;;  %v2853_v63 = vcombine.high %v2829_v57, %v2844_v39  ;;  %v3515_v59 = vcombine.high %v3446_v9, %v10721_v60 }
 0x63a   :  { %v3440_v24 = vpop.permute.xlu1 %3439  ;;  %v8906_v31 = vrot.slane %v3446_v9, %v8418_v0  ;;  %v8942_v39 = vrot.slane %v2250_v40, %v8427_v36 }
 0x63b   :  { %10784 = vst [vmem:[#allocation33_spill] sm:$0xff] %v8893_v50  ;;  %v8896_v37 = vrot.slane %v2852_v15, %v8427_v36  ;;  %v2868_v35 = vcombine.low %v8890_v17, %v8893_v50  ;;  %v3448_v7 = vadd.f32 %v3440_v24, %v3408_v43  ;;  %v8914_v8 = vrot.slane %v3515_v59, %v8418_v0 }
 0x63c   :  { %v2867_v57 = vrot.slane %v2853_v63, %v8427_v36  ;;  %10787 = vst [vmem:[#allocation34_spill] sm:$0xff] %v8942_v39 }
 0x63d   :  { %10785 = vst [vmem:[#allocation25_spill] sm:$0xff] %v8896_v37  ;;  %v2884_v32 = vcombine.high %v8896_v37, %v10721_v60  ;;  %v3530_v41 = vcombine.high %v3448_v7, %v10721_v60  ;;  %v8910_v42 = vrot.slane %v3448_v7, %v8418_v0  ;;  %v8947_v9 = vrot.slane %v2868_v35, %v8427_v36 }
 0x63e   :  { %v2885_v27 = vcombine.high %v2867_v57, %v10721_v60 }
 0x63f   :  { %2955 = vrot.lane.b32.xlu0 %v2884_v32, %s5370_s12  ;;  %v8917_v58 = vrot.slane %v3530_v41, %v8418_v0  ;;  %v3545_v34 = vcombine.low %v8906_v31, %v8910_v42  ;;  %10788 = vst [vmem:[#allocation101_spill] sm:$0xff] %v8947_v9  ;;  %v10790_v32 = vld [vmem:[#allocation28_spill] sm:$0xff]  ;;  %v10791_v41 = vld [vmem:[#allocation86_spill] sm:$0xff] }
 0x641   :  { %v8925_v61 = vrot.slane %v3545_v34, %v8427_v36 }
 0x643   :  { %10786 = vst [vmem:[#allocation56_spill] sm:$0xff] %v8925_v61  ;;  %2341 = vrot.lane.b32.xlu0 %v2249_v6, %s5371_s5  ;;  %v3577_v49 = vcombine.high %v8925_v61, %v10721_v60  ;;  %v10792_v6 = vld [vmem:[#allocation95_spill] sm:$0xff] }
 0x645   :  { %3610 = vrot.lane.b32.xlu1 %v3577_v49, %s5370_s12  ;;  %v10793_v49 = vld [vmem:[#allocation23_spill] sm:$0xff] }
 0x647   :  { %2959 = vrot.lane.b32.xlu0 %v2867_v57, %s5371_s5 }
 0x64b   :  { %2345 = vrot.lane.b32.xlu0 %v2267_v20, %s5372_s13 }
 0x64f   :  { %2963 = vrot.lane.b32.xlu0 %v2885_v27, %s5372_s13 }
 0x653   :  { %2349 = vrot.lane.b32.xlu0 %v8942_v39, %s5373_s16 }
 0x657   :  { %2967 = vrot.lane.b32.xlu0 %v8947_v9, %s5373_s16 }
 0x65b   :  { %3183 = vrot.lane.b32.xlu0 %v8679_v55, %s5365_s29  ;;  %v3764_v55 = vstv %s5099_s25  ;;  %s9509_s25 = sld [smem:[#allocation11 + $0xa]] }
 0x65e   :  { %s5147_s24 = spop %5146 }
 0x65f   :  { %v3759_v15 = vstv %s5147_s24  ;;  %3187 = vrot.lane.b32.xlu0 %v8683_v22, %s5365_s29  ;;  %v3768_v22 = vstv %s5100_s6  ;;  %s9450_s24 = sld [smem:[#allocation11 + $0x1d]]  ;;  %s9514_s6 = sld [smem:[#allocation11 + $0xe]] }
 0x660   :  { %v3760_v63 = vmul.f32 0.001953125, %v3759_v15 }
 0x662   :  { %v3762_v40 = vadd.f32 1e-05, %v3760_v63 }
 0x663   :  { %3209 = vrot.lane.b32.xlu0 %v8694_v28, %s5366_s3  ;;  %v10789_v28 = vld [vmem:[#allocation112_spill] sm:$0xff] }
 0x664   :  { %5209 = vrsqrt.f32 %v3762_v40 }
 0x667   :  { %3213 = vrot.lane.b32.xlu0 %v8697_v5, %s5366_s3 }
 0x66b   :  { %3281 = vrot.lane.b32.xlu0 %v8724_v29, %s5365_s29 }
 0x66e   :  { %v5210_v43 = vpop.eup %5209 }
 0x66f   :  { %v3765_v24 = vmul.f32 %v5210_v43, %v3764_v55  ;;  %3285 = vrot.lane.b32.xlu0 %v8729_v3, %s5365_s29  ;;  %v10794_v3 = vld [vmem:[#allocation29_spill] sm:$0xff] }
 0x671   :  { %v3767_v35 = vmul.f32 %v3765_v24, %v8490_v38  ;;  %v3770_v59 = vmul.f32 %v3765_v24, %v10789_v28  ;;  %v3771_v5 = vmul.f32 %v3765_v24, %v10790_v32  ;;  %v3773_v34 = vmul.f32 %v3765_v24, %v10791_v41  ;;  %v10795_v28 = vld [vmem:[#allocation61_spill] sm:$0xff] }
 0x672   :  { %v3774_v29 = vmul.f32 %v3765_v24, %v10792_v6  ;;  %v3772_v57 = vmul.f32 %v3765_v24, %v10793_v49  ;;  %v3775_v20 = vmul.f32 %v3765_v24, %v10794_v3  ;;  %v9004_v49 = vstv %s5106_s27  ;;  %s9538_s27 = sld [smem:[#allocation11 + $0x1a]] }
 0x673   :  { %v3769_v7 = vsub.f32 %v3768_v22, %v3767_v35  ;;  %3321 = vrot.lane.b32.xlu0 %v8734_v47, %s5366_s3  ;;  %v8974_v47 = vstv %s5102_s1  ;;  %s9525_s1 = sld [smem:[#allocation11 + $0x12]] }
 0x675   :  { %v3776_v27 = vadd.f32 %v3770_v59, %v3769_v7  ;;  %v3777_v38 = vadd.f32 %v3771_v5, %v3769_v7  ;;  %v3779_v15 = vadd.f32 %v3773_v34, %v3769_v7  ;;  %v3780_v63 = vadd.f32 %v3774_v29, %v3769_v7 }
 0x676   :  { %v3778_v40 = vadd.f32 %v3772_v57, %v3769_v7  ;;  %v3781_v55 = vadd.f32 %v3775_v20, %v3769_v7  ;;  %v8982_v5 = vstv %s5105_s26  ;;  %v10796_v7 = vld [vmem:[#allocation73_spill] sm:$0xff]  ;;  %v3827_v57 = vstv %s5103_s0  ;;  %s9530_s26 = sld [smem:[#allocation11 + $0x16]] }
 0x677   :  { %v3783_v43 = vmax.f32 %v3777_v38, 0.0  ;;  %v3786_v22 = vmax.f32 %v3780_v63, 0.0  ;;  %3325 = vrot.lane.b32.xlu0 %v8740_v13, %s5366_s3  ;;  %v3782_v20 = vmax.f32 %v3776_v27, 0.0  ;;  %v9013_v38 = vstv %s5108_s28  ;;  %s9543_s0 = sld [smem:[#allocation11 + $0x1e]]  ;;  %s9626_s28 = sld [smem:[#allocation11 + $0xb]] }
 0x678   :  { %v3784_v35 = vmax.f32 %v3778_v40, 0.0  ;;  %v3787_v24 = vmax.f32 %v3781_v55, 0.0  ;;  %v9015_v63 = vstv %s5109_s30  ;;  %v9017_v40 = vstv %s5101_s10  ;;  %s9630_s30 = sld [smem:[#allocation11 + $0xf]]  ;;  %s9633_s10 = sld [smem:[#allocation11 + $0x13]] }
 0x679   :  { %v8977_v59 = vmul.f32 %v10795_v28, %v3783_v43  ;;  %v8980_v32 = vmul.f32 %v10795_v28, %v3786_v22  ;;  %v3785_v55 = vmax.f32 %v3779_v15, 0.0  ;;  %v9051_v21 = vmul.f32 %v10797_v33, %v3782_v20 }
 0x67a   :  { %v8985_v41 = vmul.f32 %v10796_v7, %v3784_v35  ;;  %v8988_v34 = vmul.f32 %v10796_v7, %v3787_v24 }
 0x67b   :  { %3393 = vrot.lane.b32.xlu0 %v8745_v26, %s5365_s29  ;;  %v3803_v13 = vmul.f32 %v8974_v47, %v8977_v59  ;;  %v9000_v6 = vmul.f32 %v8982_v5, %v8977_v59  ;;  %v9009_v3 = vmul.f32 %v8982_v5, %v8980_v32  ;;  %v3805_v43 = vmul.f32 %v8974_v47, %v8980_v32 }
 0x67c   :  { %v3888_v29 = vmul.f32 %v8982_v5, %v8985_v41  ;;  %v3891_v26 = vmul.f32 %v8982_v5, %v8988_v34  ;;  %v9025_v22 = vmul.f32 %v9004_v49, %v8977_v59  ;;  %v9029_v27 = vmul.f32 %v9004_v49, %v8985_v41 }
 0x67d   :  { %3812 = vrot.lane.b32.xlu1 %v3803_v13, %s5365_s29  ;;  %v9034_v15 = vmul.f32 %v9004_v49, %v8980_v32  ;;  %v9044_v13 = vmul.f32 %v9013_v38, %v8977_v59  ;;  %v9055_v25 = vmul.f32 %v9015_v63, %v8977_v59  ;;  %v3829_v12 = vmul.f32 %v3827_v57, %v8977_v59 }
 0x67e   :  { %v3901_v24 = vrot.slane %v3888_v29, 1  ;;  %v3906_v7 = vrot.slane %v3891_v26, 1  ;;  %v9048_v29 = vmul.f32 %v9013_v38, %v8980_v32  ;;  %v9064_v26 = vmul.f32 %v10797_v33, %v3785_v55 }
 0x67f   :  { %3397 = vrot.lane.b32.xlu0 %v8750_v53, %s5365_s29  ;;  %v9038_v53 = vmul.f32 %v9004_v49, %v8988_v34  ;;  %v3831_v28 = vmul.f32 %v3827_v57, %v8980_v32  ;;  %v9072_v20 = vmul.f32 %v9015_v63, %v8980_v32  ;;  %v10799_v50 = vrot.slane %v9009_v3, 1 }
 0x680   :  { %v9090_v54 = vmul.f32 %v9058_v16, %v8977_v59  ;;  %v9109_v33 = vmul.f32 %v8974_v47, %v9064_v26  ;;  %v9119_v9 = vmul.f32 %v3827_v57, %v9051_v21  ;;  %v9129_v11 = vmul.f32 %v3827_v57, %v9064_v26 }
 0x681   :  { %3816 = vrot.lane.b32.xlu1 %v3805_v43, %s5365_s29  ;;  %v9061_v43 = vstv %s8992_s14  ;;  %v3907_v17 = vsel %vm266_vm0, %v10799_v50, %v3906_v7  ;;  %v3859_v7 = vmul.f32 %v9058_v16, %v8988_v34  ;;  %v3886_v44 = vmul.f32 %v8982_v5, %v9051_v21  ;;  %s9638_s14 = sld [smem:[#allocation11 + $0x1b]] }
 0x682   :  { %v3867_v37 = vrot.slane %v9090_v54, 1  ;;  %v3968_v2 = vmul.f32 %v9061_v43, %v8985_v41  ;;  %v3929_v4 = vmul.f32 %v9004_v49, %v9064_v26  ;;  %v10801_v62 = vrot.slane %v9009_v3, 1 }
 0x683   :  { %3433 = vrot.lane.b32.xlu0 %v8757_v48, %s5366_s3  ;;  %v10798_v48 = vrot.slane %v9000_v6, 1  ;;  %v3874_v50 = vrot.slane %v3859_v7, 1  ;;  %v10804_v3 = vrot.slane %v9044_v13, 2 }
 0x684   :  { %v3981_v7 = vrot.slane %v3968_v2, 2  ;;  %v3898_v2 = vrot.slane %v3886_v44, 1  ;;  %v3943_v18 = vrot.slane %v3929_v4, 1  ;;  %v4038_v44 = vmul.f32 %v9015_v63, %v9051_v21 }
 0x685   :  { %3838 = vrot.lane.b32.xlu1 %v3829_v12, %s5366_s3  ;;  %v3902_v55 = vsel %vm266_vm0, %v10798_v48, %v3901_v24  ;;  %v3856_v12 = vmul.f32 %v9058_v16, %v8985_v41  ;;  %v9096_v24 = vmul.f32 %v9058_v16, %v8980_v32  ;;  %v9105_v48 = vmul.f32 %v8974_v47, %v9051_v21 }
 0x686   :  { %v3970_v47 = vmul.f32 %v9061_v43, %v8980_v32  ;;  %v10803_v4 = vrot.slane %v9034_v15, 1 }
 0x687   :  { %3437 = vrot.lane.b32.xlu0 %v8772_v1, %s5366_s3  ;;  %v3869_v35 = vrot.slane %v3856_v12, 1  ;;  %v3872_v23 = vrot.slane %v9096_v24, 1  ;;  %v3967_v1 = vmul.f32 %v9061_v43, %v8977_v59  ;;  %v3971_v24 = vmul.f32 %v9061_v43, %v8988_v34 }
 0x688   :  { %v3984_v39 = vrot.slane %v3970_v47, 2  ;;  %v4001_v47 = vmul.f32 %v9013_v38, %v9064_v26 }
 0x689   :  { %3842 = vrot.lane.b32.xlu1 %v3831_v28, %s5366_s3  ;;  %v9124_v54 = vsel %vm266_vm0, %v3867_v37, %v3869_v35  ;;  %v3979_v12 = vrot.slane %v3967_v1, 2  ;;  %v9132_v28 = vsel %vm266_vm0, %v3872_v23, %v3874_v50  ;;  %v3986_v51 = vrot.slane %v3971_v24, 2 }
 0x68a   :  { %v3889_v35 = vmul.f32 %v8982_v5, %v9064_v26  ;;  %v3926_v1 = vmul.f32 %v9004_v49, %v9051_v21  ;;  %v3998_v50 = vmul.f32 %v9013_v38, %v9051_v21  ;;  %v10800_v49 = vrot.slane %v9000_v6, 1 }
 0x68b   :  { %v9144_v57 = vsel %vm399_vm1, %v3979_v12, %v3981_v7  ;;  %v9151_v5 = vsel %vm399_vm1, %v3984_v39, %v3986_v51  ;;  %v4015_v19 = vrot.slane %v4001_v47, 2  ;;  %v10802_v51 = vrot.slane %v9025_v22, 1 }
 0x68c   :  { %v3903_v24 = vrot.slane %v3889_v35, 1  ;;  %v3938_v45 = vrot.slane %v3926_v1, 1  ;;  %v4010_v7 = vrot.slane %v3998_v50, 2  ;;  %v9173_v6 = vsel %vm266_vm0, %v3943_v18, %v10803_v4 }
 0x68d   :  { %3910 = vrot.lane.b32.xlu1 %v3902_v55, %s5365_s29  ;;  %v9156_v55 = vsel %vm266_vm0, %v3898_v2, %v10800_v49  ;;  %v4041_v1 = vmul.f32 %v9015_v63, %v9064_v26  ;;  %v10805_v2 = vrot.slane %v9048_v29, 2  ;;  %v4050_v50 = vrot.slane %v4038_v44, 2 }
 0x68e   :  { %v9163_v61 = vsel %vm266_vm0, %v3903_v24, %v10801_v62  ;;  %v9168_v35 = vsel %vm266_vm0, %v3938_v45, %v10802_v51  ;;  %v9181_v62 = vsel %vm399_vm1, %v4010_v7, %v10804_v3  ;;  %v9190_v18 = vmul.f32 %v9017_v40, %v9051_v21 }
 0x68f   :  { %v9186_v45 = vsel %vm399_vm1, %v4015_v19, %v10805_v2  ;;  %v4055_v47 = vrot.slane %v4041_v1, 2  ;;  %v9194_v24 = vmul.f32 %v9017_v40, %v9064_v26  ;;  %v3857_v49 = vmul.f32 %v9058_v16, %v9064_v26 }
 0x690   :  { %10806 = vst [vmem:[#allocation32_spill] sm:$0xff] %v9190_v18  ;;  %v4000_v19 = vmul.f32 %v9013_v38, %v8985_v41  ;;  %v10808_v7 = vrot.slane %v9055_v25, 2  ;;  %v3966_v51 = vmul.f32 %v9061_v43, %v9051_v21  ;;  %v3969_v4 = vmul.f32 %v9061_v43, %v9064_v26 }
 0x691   :  { %3914 = vrot.lane.b32.xlu1 %v3907_v17, %s5365_s29  ;;  %10807 = vst [vmem:[#allocation59_spill] sm:$0xff] %v9194_v24  ;;  %v3854_v17 = vmul.f32 %v9058_v16, %v9051_v21  ;;  %v10810_v1 = vrot.slane %v9029_v27, 1  ;;  %v10811_v3 = vrot.slane %v9025_v22, 1  ;;  %v10812_v2 = vrot.slane %v9072_v20, 2 }
 0x692   :  { %v9205_v44 = vsel %vm399_vm1, %v4050_v50, %v10808_v7  ;;  %v3871_v50 = vrot.slane %v3857_v49, 1  ;;  %v3978_v7 = vrot.slane %v3966_v51, 2  ;;  %v3983_v21 = vrot.slane %v3969_v4, 2 }
 0x693   :  { %10809 = vst [vmem:[#allocation92_spill] sm:$0xff] %v9205_v44  ;;  %v3942_v16 = vsel %vm266_vm0, %v10811_v3, %v10810_v1  ;;  %v9219_v24 = vsel %vm399_vm1, %v4055_v47, %v10812_v2  ;;  %v3866_v18 = vrot.slane %v3854_v17, 1  ;;  %v10813_v26 = vrot.slane %v9038_v53, 1 }
 0x694   :  { %v9226_v27 = vsel %vm266_vm0, %v3871_v50, %v3872_v23  ;;  %v9229_v22 = vsel %vm399_vm1, %v3978_v7, %v3979_v12  ;;  %v9232_v43 = vsel %vm399_vm1, %v3983_v21, %v3984_v39  ;;  %v10814_v47 = vrot.slane %v9034_v15, 1  ;;  %v10822_v7 = vld [vmem:[#allocation82_spill] sm:$0xff]  ;;  %v10823_v21 = vld [vmem:[#allocation81_spill] sm:$0xff] }
 0x695   :  { %3950 = vrot.lane.b32.xlu1 %v3942_v16, %s5366_s3  ;;  %v9223_v44 = vsel %vm266_vm0, %v3866_v18, %v3867_v37  ;;  %v4013_v49 = vrot.slane %v4000_v19, 2  ;;  %v4003_v37 = vmul.f32 %v9013_v38, %v8988_v34  ;;  %v10815_v23 = vrot.slane %v9044_v13, 2  ;;  %v10821_v16 = vld [vmem:[#allocation117_spill] sm:$0xff] }
 0x696   :  { %v3947_v17 = vsel %vm266_vm0, %v10814_v47, %v10813_v26  ;;  %v4040_v39 = vmul.f32 %v9015_v63, %v8985_v41  ;;  %v10816_v15 = vrot.slane %v9048_v29, 2  ;;  %v4043_v38 = vmul.f32 %v9015_v63, %v8988_v34 }
 0x697   :  { %v4014_v12 = vsel %vm399_vm1, %v10815_v23, %v4013_v49  ;;  %v4018_v18 = vrot.slane %v4003_v37, 2  ;;  %v10817_v13 = vrot.slane %v9055_v25, 2  ;;  %v10818_v41 = vmov %v10812_v2  ;;  %v10820_v25 = vld [vmem:[#allocation111_spill] sm:$0xff]  ;;  %v10825_v49 = vld [vmem:[#allocation84_spill] sm:$0xff] }
 0x698   :  { %v4053_v19 = vrot.slane %v4040_v39, 2  ;;  %v4058_v4 = vrot.slane %v4043_v38, 2  ;;  %v10819_v29 = vcombine.high %v8906_v31, %v8910_v42  ;;  %v2334_v3 = vcombine.high %v10820_v25, %v10721_v60  ;;  %v10826_v37 = vld [vmem:[#allocation91_spill] sm:$0xff] }
 0x699   :  { %3954 = vrot.lane.b32.xlu1 %v3947_v17, %s5366_s3  ;;  %v4019_v53 = vsel %vm399_vm1, %v10816_v15, %v4018_v18  ;;  %v2952_v2 = vcombine.high %v10821_v16, %v10721_v60  ;;  %v10824_v26 = vcombine.high %v10822_v7, %v10823_v21  ;;  %v10827_v23 = vcombine.high %v10825_v49, %v10826_v37 }
 0x69a   :  { %v4054_v51 = vsel %vm399_vm1, %v10817_v13, %v4053_v19  ;;  %v4059_v1 = vsel %vm399_vm1, %v10818_v41, %v4058_v4  ;;  %v3560_v34 = vrot.slane %v10819_v29, %v8427_v36  ;;  %v10828_v39 = vcombine.low %v8914_v8, %v8917_v58 }
 0x69b   :  { %v2331_v47 = vrot.slane %v10824_v26, %v8427_v36  ;;  %vm2398_vm0 = vcmask 523264   ;;  %vm2400_vm1 = vcmask 654336  }
 0x69c   :  { %v3578_v31 = vcombine.high %v3560_v34, %v10721_v60  ;;  %v3569_v15 = vrot.slane %v10828_v39, %v8427_v36 }
 0x69d   :  { %4022 = vrot.lane.b32.xlu1 %v4014_v12, %s5365_s29  ;;  %v2949_v12 = vrot.slane %v10827_v23, %v8427_v36  ;;  %v2335_v19 = vcombine.high %v2331_v47, %v10721_v60 }
 0x69e   :  { %v3579_v4 = vcombine.high %v3569_v15, %v10721_v60 }
 0x69f   :  { %v2953_v13 = vcombine.high %v2949_v12, %v10721_v60 }
 0x6a1   :  { %4026 = vrot.lane.b32.xlu1 %v4019_v53, %s5365_s29 }
 0x6a5   :  { %4062 = vrot.lane.b32.xlu1 %v4054_v51, %s5366_s3 }
 0x6a9   :  { %4066 = vrot.lane.b32.xlu1 %v4059_v1, %s5366_s3  ;;  %v9266_v63 = vpop.permute.xlu0 %2337  ;;  %v10829_v1 = vcombine.high %v8914_v8, %v8917_v58 }
 0x6ab   :  { %v3576_v29 = vrot.slane %v10829_v1, %v8427_v36 }
 0x6ad   :  { %3614 = vrot.lane.b32.xlu1 %v3560_v34, %s5371_s5  ;;  %v3580_v16 = vcombine.high %v3576_v29, %v10721_v60 }
 0x6b1   :  { %2381 = vrot.lane.b32.xlu1 %v2334_v3, %s5374_s15  ;;  %v9272_v20 = vpop.permute.xlu0 %2955 }
 0x6b5   :  { %2999 = vrot.lane.b32.xlu1 %v2952_v2, %s5374_s15  ;;  %v9277_v50 = vpop.permute.xlu0 %2341 }
 0x6b9   :  { %3618 = vrot.lane.b32.xlu1 %v3578_v31, %s5372_s13  ;;  %v9281_v42 = vpop.permute.xlu0 %2959 }
 0x6bd   :  { %2385 = vrot.lane.b32.xlu1 %v2331_v47, %s5375_s17  ;;  %v9288_v17 = vpop.permute.xlu0 %2345 }
 0x6c1   :  { %3003 = vrot.lane.b32.xlu1 %v2949_v12, %s5375_s17  ;;  %v9295_v18 = vpop.permute.xlu0 %2963 }
 0x6c5   :  { %3622 = vrot.lane.b32.xlu1 %v3569_v15, %s5373_s16  ;;  %v9302_v53 = vpop.permute.xlu0 %2349  ;;  %v9324_v15 = vpop.permute.xlu1 %3610 }
 0x6c9   :  { %2389 = vrot.lane.b32.xlu1 %v2335_v19, %s10239_s2  ;;  %v9306_v38 = vpop.permute.xlu0 %2967 }
 0x6cd   :  { %3007 = vrot.lane.b32.xlu1 %v2953_v13, %s10239_s2  ;;  %v3184_v51 = vpop.permute.xlu0 %3183 }
 0x6ce   :  { %v3195_v34 = vadd.f32 %v3184_v51, %v8761_v46 }
 0x6d1   :  { %3626 = vrot.lane.b32.xlu1 %v3579_v4, %s5374_s15  ;;  %v3188_v41 = vpop.permute.xlu0 %3187 }
 0x6d2   :  { %v3197_v2 = vadd.f32 %v3188_v41, %v8765_v10 }
 0x6d5   :  { %3630 = vrot.lane.b32.xlu1 %v3576_v29, %s5375_s17  ;;  %v3210_v25 = vpop.permute.xlu0 %3209 }
 0x6d6   :  { %v3221_v3 = vadd.f32 %v3210_v25, %v3195_v34 }
 0x6d8   :  { %v3253_v31 = vadd.f32 %v8794_v14, %v3221_v3 }
 0x6d9   :  { %3634 = vrot.lane.b32.xlu1 %v3580_v16, %s10239_s2  ;;  %v3214_v7 = vpop.permute.xlu0 %3213 }
 0x6da   :  { %v3223_v21 = vadd.f32 %v3214_v7, %v3197_v2 }
 0x6dc   :  { %v3255_v26 = vadd.f32 %v8799_v52, %v3223_v21  ;;  %v3797_v52 = vmul.f32 %v9017_v40, %v8977_v59 }
 0x6dd   :  { %v3282_v8 = vpop.permute.xlu0 %3281 }
 0x6de   :  { %v3293_v47 = vadd.f32 %v3282_v8, %v3253_v31 }
 0x6e1   :  { %v3286_v58 = vpop.permute.xlu0 %3285 }
 0x6e2   :  { %v3295_v37 = vadd.f32 %v3286_v58, %v3255_v26 }
 0x6e5   :  { %v3322_v46 = vpop.permute.xlu0 %3321 }
 0x6e6   :  { %v3333_v49 = vadd.f32 %v3322_v46, %v3293_v47 }
 0x6e8   :  { %v3365_v23 = vadd.f32 %v8802_v56, %v3333_v49  ;;  %v3799_v56 = vmul.f32 %v9017_v40, %v8980_v32 }
 0x6e9   :  { %v3326_v12 = vpop.permute.xlu0 %3325 }
 0x6ea   :  { %v3335_v39 = vadd.f32 %v3326_v12, %v3295_v37 }
 0x6ec   :  { %v3367_v10 = vadd.f32 %v8805_v30, %v3335_v39 }
 0x6ed   :  { %v3394_v14 = vpop.permute.xlu0 %3393 }
 0x6ee   :  { %v3405_v4 = vadd.f32 %v3394_v14, %v3365_v23 }
 0x6ef   :  { %v3813_v19 = vpop.permute.xlu1 %3812 }
 0x6f0   :  { %v3823_v1 = vadd.f32 %v3813_v19, %v3797_v52 }
 0x6f1   :  { %v3398_v13 = vpop.permute.xlu0 %3397 }
 0x6f2   :  { %v3407_v25 = vadd.f32 %v3398_v13, %v3367_v10 }
 0x6f3   :  { %v3817_v51 = vpop.permute.xlu1 %3816 }
 0x6f4   :  { %v3825_v2 = vadd.f32 %v3817_v51, %v3799_v56 }
 0x6f5   :  { %v3434_v41 = vpop.permute.xlu0 %3433 }
 0x6f6   :  { %v3445_v29 = vadd.f32 %v3434_v41, %v3405_v4 }
 0x6f7   :  { %v3839_v34 = vpop.permute.xlu1 %3838 }
 0x6f8   :  { %v3849_v3 = vadd.f32 %v3839_v34, %v3823_v1  ;;  %v3449_v16 = vcombine.high %v3445_v29, %v10721_v60  ;;  %v9334_v26 = vrot.slane %v3445_v29, %v8418_v0 }
 0x6f9   :  { %v3438_v30 = vpop.permute.xlu0 %3437 }
 0x6fa   :  { %v3447_v31 = vadd.f32 %v3438_v30, %v3407_v25  ;;  %v3881_v7 = vadd.f32 %v9124_v54, %v3849_v3  ;;  %v9341_v32 = vrot.slane %v3449_v16, %v8418_v0  ;;  %v10830_v16 = vld [vmem:[#allocation56_spill] sm:$0xff] }
 0x6fb   :  { %v3843_v21 = vpop.permute.xlu1 %3842 }
 0x6fc   :  { %v3464_v59 = vcombine.high %v3447_v31, %v10721_v60  ;;  %v9338_v8 = vrot.slane %v3447_v31, %v8418_v0  ;;  %v3851_v58 = vadd.f32 %v3843_v21, %v3825_v2 }
 0x6fe   :  { %v9344_v40 = vrot.slane %v3464_v59, %v8418_v0  ;;  %v3479_v47 = vcombine.low %v9334_v26, %v9338_v8  ;;  %v3480_v54 = vcombine.high %v9334_v26, %v9338_v8  ;;  %v3883_v46 = vadd.f32 %v9132_v28, %v3851_v58  ;;  %v10836_v26 = vld [vmem:[#allocation100_spill] sm:$0xff] }
 0x6ff   :  { %v3911_v49 = vpop.permute.xlu1 %3910 }
 0x700   :  { %v9352_v37 = vrot.slane %v3479_v47, %v8427_v36  ;;  %v3495_v23 = vcombine.low %v9341_v32, %v9344_v40  ;;  %v3496_v12 = vcombine.high %v9341_v32, %v9344_v40  ;;  %v3921_v14 = vadd.f32 %v3911_v49, %v3881_v7 }
 0x702   :  { %v3511_v39 = vcombine.high %v9352_v37, %v10721_v60 }
 0x703   :  { %v3915_v10 = vpop.permute.xlu1 %3914 }
 0x704   :  { %3582 = vrot.lane.b32.xlu0 %v3511_v39, %s5370_s12  ;;  %v3923_v28 = vadd.f32 %v3915_v10, %v3883_v46 }
 0x707   :  { %v3951_v19 = vpop.permute.xlu1 %3950 }
 0x708   :  { %v3961_v13 = vadd.f32 %v3951_v19, %v3921_v14  ;;  %3810 = vrot.lane.b32.xlu0 %v9105_v48, %s5365_s29  ;;  %v10831_v19 = vld [vmem:[#allocation92_spill] sm:$0xff] }
 0x70a   :  { %v3993_v51 = vadd.f32 %v9144_v57, %v3961_v13 }
 0x70b   :  { %v3955_v4 = vpop.permute.xlu1 %3954 }
 0x70c   :  { %v3963_v52 = vadd.f32 %v3955_v4, %v3923_v28  ;;  %3814 = vrot.lane.b32.xlu0 %v9109_v33, %s5365_s29 }
 0x70e   :  { %v3995_v41 = vadd.f32 %v9151_v5, %v3963_v52  ;;  %v10834_v52 = vld [vmem:[#allocation87_spill] sm:$0xff] }
 0x70f   :  { %v4023_v1 = vpop.permute.xlu1 %4022 }
 0x710   :  { %3836 = vrot.lane.b32.xlu0 %v9119_v9, %s5366_s3  ;;  %v4033_v34 = vadd.f32 %v4023_v1, %v3993_v51  ;;  %v10833_v51 = vld [vmem:[#allocation83_spill] sm:$0xff] }
 0x713   :  { %v4027_v29 = vpop.permute.xlu1 %4026 }
 0x714   :  { %3840 = vrot.lane.b32.xlu0 %v9129_v11, %s5366_s3  ;;  %v4035_v57 = vadd.f32 %v4027_v29, %v3995_v41  ;;  %v10835_v41 = vld [vmem:[#allocation105_spill] sm:$0xff] }
 0x715   :  { %v3017_v1 = vsel %vm2392_vm13, %v10835_v41, %v10834_v52 }
 0x717   :  { %v4063_v48 = vpop.permute.xlu1 %4062 }
 0x718   :  { %v4073_v25 = vadd.f32 %v4063_v48, %v4033_v34  ;;  %3908 = vrot.lane.b32.xlu0 %v9156_v55, %s5365_s29  ;;  %v3644_v55 = vsel %vm2392_vm13, %v10830_v16, %v9324_v15  ;;  %v10838_v48 = vld [vmem:[#allocation113_spill] sm:$0xff] }
 0x719   :  { %v10842_v16 = vld [vmem:[#allocation85_spill] sm:$0xff] }
 0x71a   :  { %v4142_v56 = vcombine.high %v4073_v25, %v10721_v60  ;;  %v4149_v9 = vrot.slane %v4073_v25, %v8418_v0 }
 0x71b   :  { %v4067_v33 = vpop.permute.xlu1 %4066 }
 0x71c   :  { %v4075_v3 = vadd.f32 %v4067_v33, %v4035_v57  ;;  %3912 = vrot.lane.b32.xlu0 %v9163_v61, %s5365_s29  ;;  %v4156_v30 = vrot.slane %v4142_v56, %v8418_v0  ;;  %v10839_v57 = vld [vmem:[#allocation116_spill] sm:$0xff]  ;;  %v10840_v33 = vld [vmem:[#allocation119_spill] sm:$0xff] }
 0x71e   :  { %v4157_v5 = vcombine.high %v4075_v3, %v10721_v60  ;;  %v4164_v11 = vrot.slane %v4075_v3, %v8418_v0 }
 0x71f   :  { %v3615_v2 = vpop.permute.xlu1 %3614 }
 0x720   :  { %v4171_v31 = vrot.slane %v4157_v5, %v8418_v0  ;;  %v4172_v7 = vcombine.low %v4149_v9, %v4164_v11  ;;  %v4173_v21 = vcombine.high %v4149_v9, %v4164_v11  ;;  %v9385_v61 = vsel %vm2394_vm14, %v3644_v55, %v3615_v2  ;;  %3948 = vrot.lane.b32.xlu0 %v9168_v35, %s5366_s3  ;;  %v10841_v5 = vld [vmem:[#allocation34_spill] sm:$0xff] }
 0x721   :  { %v2268_v11 = vcombine.high %v10841_v5, %v10721_v60 }
 0x722   :  { %v9390_v59 = vrot.slane %v4172_v7, %v8427_v36  ;;  %v4187_v58 = vrot.slane %v4173_v21, %v8427_v36  ;;  %v4188_v47 = vcombine.low %v4156_v30, %v4171_v31  ;;  %v4189_v15 = vcombine.high %v4156_v30, %v4171_v31 }
 0x723   :  { %v2382_v46 = vpop.permute.xlu1 %2381  ;;  %v2422_v31 = vstv %s9412_s4  ;;  %v2426_v7 = vstv %s9414_s18  ;;  %s9817_s4 = sld [smem:[#allocation11 + $0x2]]  ;;  %s9819_s18 = sld [smem:[#allocation11 + $0x3]] }
 0x724   :  { %4241 = vrot.lane.b32.xlu1 %v4187_v58, %s5371_s5  ;;  %3952 = vrot.lane.b32.xlu0 %v9173_v6, %s5366_s3  ;;  %v4204_v49 = vcombine.high %v9390_v59, %v10721_v60  ;;  %v4205_v35 = vcombine.high %v4187_v58, %v10721_v60  ;;  %v4196_v6 = vrot.slane %v4188_v47, %v8427_v36  ;;  %v10843_v58 = vld [vmem:[#allocation101_spill] sm:$0xff] }
 0x725   :  { %v4203_v13 = vrot.slane %v4189_v15, %v8427_v36  ;;  %v2886_v47 = vcombine.high %v10843_v58, %v10721_v60  ;;  %v2430_v15 = vstv %s9416_s7  ;;  %v10845_v58 = vld [vmem:[#allocation46_spill] sm:$0xff]  ;;  %s9821_s7 = sld [smem:[#allocation11 + $0x6]] }
 0x726   :  { %v4206_v28 = vcombine.high %v4196_v6, %v10721_v60 }
 0x727   :  { %v3000_v39 = vpop.permute.xlu1 %2999  ;;  %v4207_v9 = vcombine.high %v4203_v13, %v10721_v60 }
 0x728   :  { %4237 = vrot.lane.b32.xlu1 %v4204_v49, %s5370_s12  ;;  %4020 = vrot.lane.b32.xlu0 %v9181_v62, %s5365_s29  ;;  %v2434_v49 = vstv %s9418_s8  ;;  %s9823_s8 = sld [smem:[#allocation11 + $0x7]] }
 0x72b   :  { %v9402_v10 = vpop.permute.xlu1 %3618 }
 0x72c   :  { %4245 = vrot.lane.b32.xlu1 %v4205_v35, %s5372_s13  ;;  %4024 = vrot.lane.b32.xlu0 %v9186_v45, %s5365_s29  ;;  %s9423_s29 = sld [smem:[#allocation11 + $0x18]]  ;;  %v3494_v45 = vrot.slane %v3480_v54, %v8427_v36  ;;  %v10837_v54 = vld [vmem:[#allocation108_spill] sm:$0xff]  ;;  %v3037_v35 = vstv %s9427_s20 }
 0x72d   :  { %v3018_v34 = vsel %vm2394_vm14, %v3017_v1, %v10837_v54  ;;  %v3067_v1 = vstv %s9450_s24  ;;  %s4359_s20 = sld [smem:[#allocation13]]  ;;  %s5119_s24 = sld [smem:[#allocation14 + $0x1]] }
 0x72e   :  { %v3019_v56 = vsel %vm2396_vm15, %v3018_v34, %v10839_v57  ;;  %v3512_v52 = vcombine.high %v3494_v45, %v10721_v60 }
 0x72f   :  { %v2386_v14 = vpop.permute.xlu1 %2385  ;;  %v3020_v55 = vsel %vm2398_vm0, %v3019_v56, %v10842_v16 }
 0x730   :  { %4249 = vrot.lane.b32.xlu1 %v4196_v6, %s5373_s16  ;;  %4060 = vrot.lane.b32.xlu0 %v10831_v19, %s5366_s3  ;;  %v3021_v19 = vsel %vm2400_vm1, %v3020_v55, %v3000_v39 }
 0x732   :  { %v2438_v6 = vstv %s9423_s29 }
 0x733   :  { %v3004_v62 = vpop.permute.xlu1 %3003 }
 0x734   :  { %4257 = vrot.lane.b32.xlu1 %v4203_v13, %s5375_s17  ;;  %4064 = vrot.lane.b32.xlu0 %v9219_v24, %s5366_s3  ;;  %v10832_v24 = vld [vmem:[#allocation27_spill] sm:$0xff]  ;;  %s9448_s3 = sld [smem:[#allocation11 + $0x19]]  ;;  %v3043_v13 = vstv %s9429_s21  ;;  %s4364_s21 = sld [smem:[#allocation14]] }
 0x735   :  { %v2406_v4 = vsel %vm2392_vm13, %v10833_v51, %v10832_v24  ;;  %v3055_v24 = vstv %s9438_s23  ;;  %v3022_v51 = vsel %vm2402_vm2, %v3021_v19, %v3004_v62 }
 0x736   :  { %v2407_v8 = vsel %vm2394_vm14, %v2406_v4, %v10836_v26 }
 0x737   :  { %v9446_v29 = vpop.permute.xlu1 %3622  ;;  %v2408_v25 = vsel %vm2396_vm15, %v2407_v8, %v10838_v48 }
 0x738   :  { %4253 = vrot.lane.b32.xlu1 %v4206_v28, %s5374_s15  ;;  %3586 = vrot.lane.b32.xlu0 %v3494_v45, %s5371_s5  ;;  %v2409_v3 = vsel %vm2398_vm0, %v2408_v25, %v10840_v33  ;;  %v3049_v28 = vstv %s9436_s22 }
 0x739   :  { %v2410_v30 = vsel %vm2400_vm1, %v2409_v3, %v2382_v46 }
 0x73a   :  { %v2411_v21 = vsel %vm2402_vm2, %v2410_v30, %v2386_v14  ;;  %v2442_v14 = vstv %s9425_s19  ;;  %v3061_v41 = vstv %s9448_s3  ;;  %s5118_s3 = sld [smem:[#allocation13 + $0x1]] }
 0x73b   :  { %v2390_v2 = vpop.permute.xlu1 %2389 }
 0x73c   :  { %4261 = vrot.lane.b32.xlu1 %v4207_v9, %s10239_s2  ;;  %2353 = vrot.lane.b32.xlu0 %v2268_v11, %s5374_s15  ;;  %v9480_v46 = vsel %vm2404_vm3, %v2411_v21, %v2390_v2  ;;  %v10844_v21 = vld [vmem:[#allocation30_spill] sm:$0xff] }
 0x73d   :  { %v2424_v39 = vmul.f32 %v2422_v31, %v9480_v46  ;;  %v2428_v62 = vmul.f32 %v2426_v7, %v9480_v46  ;;  %v2432_v8 = vmul.f32 %v2430_v15, %v9480_v46  ;;  %v2436_v34 = vmul.f32 %v2434_v49, %v9480_v46 }
 0x73e   :  { %v2440_v48 = vmul.f32 %v2438_v6, %v9480_v46  ;;  %v2444_v11 = vmul.f32 %v2442_v14, %v9480_v46 }
 0x73f   :  { %v3008_v4 = vpop.permute.xlu1 %3007 }
 0x740   :  { %v9494_v26 = vsel %vm2404_vm3, %v3022_v51, %v3008_v4  ;;  %2971 = vrot.lane.b32.xlu0 %v2886_v47, %s5374_s15  ;;  %v10846_v47 = vcombine.high %v10844_v21, %v10845_v58  ;;  %v3646_v4 = vsel %vm2396_vm15, %v9385_v61, %v9402_v10  ;;  %v3670_v61 = vstv %s9514_s6 }
 0x741   :  { %v3039_v45 = vmul.f32 %v3037_v35, %v9494_v26  ;;  %v3045_v54 = vmul.f32 %v3043_v13, %v9494_v26  ;;  %v3051_v25 = vmul.f32 %v3049_v28, %v9494_v26  ;;  %v3057_v57 = vmul.f32 %v3055_v24, %v9494_v26 }
 0x742   :  { %v3063_v56 = vmul.f32 %v3061_v41, %v9494_v26  ;;  %v3069_v33 = vmul.f32 %v3067_v1, %v9494_v26  ;;  %v2265_v19 = vrot.slane %v10846_v47, %v8427_v36  ;;  %v3676_v10 = vstv %s9525_s1  ;;  %s5120_s1 = sld [smem:[#allocation13 + $0x2]] }
 0x743   :  { %v3627_v3 = vpop.permute.xlu1 %3626  ;;  %v3041_v9 = vadd.f32 %v3039_v45, %v2424_v39  ;;  %v3047_v5 = vadd.f32 %v3045_v54, %v2428_v62  ;;  %v3053_v16 = vadd.f32 %v3051_v25, %v2432_v8  ;;  %v3059_v55 = vadd.f32 %v3057_v57, %v2436_v34  ;;  %v10847_v39 = vld [vmem:[#allocation120_spill] sm:$0xff]  ;;  %v10848_v62 = vld [vmem:[#allocation33_spill] sm:$0xff] }
 0x744   :  { %3590 = vrot.lane.b32.xlu0 %v3512_v52, %s5372_s13  ;;  %v3065_v30 = vadd.f32 %v3063_v56, %v2440_v48  ;;  %v3071_v2 = vadd.f32 %v3069_v33, %v2444_v11  ;;  %v3647_v52 = vsel %vm2398_vm0, %v3646_v4, %v9446_v29  ;;  %v10849_v8 = vcombine.high %v10847_v39, %v10848_v62 }
 0x745   :  { %v3648_v54 = vsel %vm2400_vm1, %v3647_v52, %v3627_v3  ;;  %v3664_v34 = vstv %s9509_s25  ;;  %v3682_v57 = vstv %s9530_s26  ;;  %v3688_v56 = vstv %s9538_s27  ;;  %s5121_s26 = sld [smem:[#allocation14 + $0x2]] }
 0x746   :  { %v2883_v45 = vrot.slane %v10849_v8, %v8427_v36  ;;  %v10238_v29 = vstv %s9543_s0  ;;  %v3503_v3 = vrot.slane %v3495_v23, %v8427_v36 }
 0x747   :  { %v3631_v51 = vpop.permute.xlu1 %3630 }
 0x748   :  { %2357 = vrot.lane.b32.xlu0 %v2265_v19, %s5375_s17  ;;  %v3649_v48 = vsel %vm2402_vm2, %v3648_v54, %v3631_v51 }
 0x74b   :  { %v3635_v25 = vpop.permute.xlu1 %3634 }
 0x74c   :  { %v9569_v33 = vsel %vm2404_vm3, %v3649_v48, %v3635_v25  ;;  %2975 = vrot.lane.b32.xlu0 %v2883_v45, %s5375_s17  ;;  %v2269_v48 = vcombine.high %v2265_v19, %v10721_v60  ;;  %v2887_v25 = vcombine.high %v2883_v45, %v10721_v60  ;;  %v10850_v19 = vld [vmem:[#allocation32_spill] sm:$0xff] }
 0x74d   :  { %v3666_v11 = vmul.f32 %v3664_v34, %v9569_v33  ;;  %v3672_v21 = vmul.f32 %v3670_v61, %v9569_v33  ;;  %v3678_v58 = vmul.f32 %v3676_v10, %v9569_v33  ;;  %v3684_v47 = vmul.f32 %v3682_v57, %v9569_v33 }
 0x74e   :  { %v3690_v51 = vmul.f32 %v3688_v56, %v9569_v33  ;;  %v3696_v4 = vmul.f32 %v10238_v29, %v9569_v33 }
 0x74f   :  { %v9594_v52 = vadd.f32 %v3666_v11, %v3041_v9  ;;  %v9596_v23 = vadd.f32 %v3672_v21, %v3047_v5  ;;  %v9599_v39 = vadd.f32 %v3678_v58, %v3053_v16  ;;  %v9601_v62 = vadd.f32 %v3684_v47, %v3059_v55  ;;  %v10851_v21 = vld [vmem:[#allocation59_spill] sm:$0xff] }
 0x750   :  { %3594 = vrot.lane.b32.xlu0 %v3503_v3, %s5373_s16  ;;  %v9603_v8 = vadd.f32 %v3690_v51, %v3065_v30  ;;  %v9605_v54 = vadd.f32 %v3696_v4, %v3071_v2  ;;  %v3513_v9 = vcombine.high %v3503_v3, %v10721_v60  ;;  %v3510_v5 = vrot.slane %v3496_v12, %v8427_v36 }
 0x752   :  { %v3514_v16 = vcombine.high %v3510_v5, %v10721_v60 }
 0x754   :  { %2361 = vrot.lane.b32.xlu0 %v2269_v48, %s10239_s2 }
 0x758   :  { %2979 = vrot.lane.b32.xlu0 %v2887_v25, %s10239_s2 }
 0x75c   :  { %3598 = vrot.lane.b32.xlu0 %v3513_v9, %s5374_s15 }
 0x760   :  { %3602 = vrot.lane.b32.xlu0 %v3510_v5, %s5375_s17 }
 0x764   :  { %3606 = vrot.lane.b32.xlu0 %v3514_v16, %s10239_s2  ;;  %s9648_s2 = sld [smem:[#allocation11 + $0x1f]] }
 0x776   :  { %v3583_v55 = vpop.permute.xlu0 %3582 }
 0x77a   :  { %v3811_v30 = vpop.permute.xlu0 %3810 }
 0x77b   :  { %v3822_v45 = vadd.f32 %v3811_v30, %v10850_v19 }
 0x77e   :  { %v3815_v2 = vpop.permute.xlu0 %3814 }
 0x77f   :  { %v3824_v58 = vadd.f32 %v3815_v2, %v10851_v21 }
 0x782   :  { %v3837_v11 = vpop.permute.xlu0 %3836 }
 0x783   :  { %v3848_v3 = vadd.f32 %v3837_v11, %v3822_v45 }
 0x785   :  { %v3880_v47 = vadd.f32 %v9223_v44, %v3848_v3 }
 0x786   :  { %v3841_v51 = vpop.permute.xlu0 %3840 }
 0x787   :  { %v3850_v32 = vadd.f32 %v3841_v51, %v3824_v58 }
 0x789   :  { %v3882_v40 = vadd.f32 %v9226_v27, %v3850_v32 }
 0x78a   :  { %v3909_v12 = vpop.permute.xlu0 %3908 }
 0x78b   :  { %v3920_v48 = vadd.f32 %v3909_v12, %v3880_v47 }
 0x78e   :  { %v3913_v4 = vpop.permute.xlu0 %3912 }
 0x78f   :  { %v3922_v5 = vadd.f32 %v3913_v4, %v3882_v40 }
 0x792   :  { %v3949_v25 = vpop.permute.xlu0 %3948 }
 0x793   :  { %v3960_v9 = vadd.f32 %v3949_v25, %v3920_v48 }
 0x795   :  { %v3992_v16 = vadd.f32 %v9229_v22, %v3960_v9 }
 0x796   :  { %v4242_v29 = vpop.permute.xlu1 %4241  ;;  %v3953_v30 = vpop.permute.xlu0 %3952 }
 0x797   :  { %v3962_v19 = vadd.f32 %v3953_v30, %v3922_v5  ;;  %v3637_v5 = vsel %vm2392_vm13, %v9352_v37, %v3583_v55  ;;  %v4291_v55 = vstv %s9626_s28  ;;  %s5122_s28 = sld [smem:[#allocation13 + $0x3]] }
 0x799   :  { %v3994_v45 = vadd.f32 %v9232_v43, %v3962_v19 }
 0x79a   :  { %v4238_v2 = vpop.permute.xlu1 %4237  ;;  %v4021_v11 = vpop.permute.xlu0 %4020 }
 0x79b   :  { %v4032_v21 = vadd.f32 %v4021_v11, %v3992_v16  ;;  %v4271_v47 = vsel %vm2392_vm13, %v9390_v59, %v4238_v2 }
 0x79c   :  { %v4272_v4 = vsel %vm2394_vm14, %v4271_v47, %v4242_v29 }
 0x79e   :  { %v4246_v44 = vpop.permute.xlu1 %4245  ;;  %v4025_v3 = vpop.permute.xlu0 %4024 }
 0x79f   :  { %v4034_v32 = vadd.f32 %v4025_v3, %v3994_v45  ;;  %v4273_v48 = vsel %vm2396_vm15, %v4272_v4, %v4246_v44 }
 0x7a2   :  { %v4250_v58 = vpop.permute.xlu1 %4249  ;;  %v4061_v27 = vpop.permute.xlu0 %4060 }
 0x7a3   :  { %v4072_v51 = vadd.f32 %v4061_v27, %v4032_v21  ;;  %v4274_v16 = vsel %vm2398_vm0, %v4273_v48, %v4250_v58  ;;  %v4315_v48 = vstv %s9638_s14  ;;  %s5124_s14 = sld [smem:[#allocation13 + $0x4]] }
 0x7a5   :  { %v4076_v22 = vcombine.high %v4072_v51, %v10721_v60  ;;  %v4083_v59 = vrot.slane %v4072_v51, %v8418_v0 }
 0x7a6   :  { %v4258_v40 = vpop.permute.xlu1 %4257  ;;  %v4065_v43 = vpop.permute.xlu0 %4064 }
 0x7a7   :  { %v4074_v12 = vadd.f32 %v4065_v43, %v4034_v32  ;;  %v4090_v30 = vrot.slane %v4076_v22, %v8418_v0  ;;  %v4297_v32 = vstv %s9630_s30  ;;  %v4303_v22 = vstv %s9633_s10  ;;  %s5123_s30 = sld [smem:[#allocation14 + $0x3]] }
 0x7a8   :  { %v4309_v43 = vstv %s9635_s11 }
 0x7a9   :  { %v4091_v25 = vcombine.high %v4074_v12, %v10721_v60  ;;  %v4098_v9 = vrot.slane %v4074_v12, %v8418_v0 }
 0x7aa   :  { %v4254_v19 = vpop.permute.xlu1 %4253  ;;  %v3587_v29 = vpop.permute.xlu0 %3586 }
 0x7ab   :  { %v4105_v45 = vrot.slane %v4091_v25, %v8418_v0  ;;  %v4106_v2 = vcombine.low %v4083_v59, %v4098_v9  ;;  %v4107_v11 = vcombine.high %v4083_v59, %v4098_v9  ;;  %v4275_v44 = vsel %vm2400_vm1, %v4274_v16, %v4254_v19 }
 0x7ac   :  { %v9653_v37 = vsel %vm2394_vm14, %v3637_v5, %v3587_v29  ;;  %v4276_v27 = vsel %vm2402_vm2, %v4275_v44, %v4258_v40  ;;  %v4321_v16 = vstv %s9648_s2 }
 0x7ad   :  { %v9657_v3 = vrot.slane %v4106_v2, %v8427_v36  ;;  %v4121_v21 = vrot.slane %v4107_v11, %v8427_v36  ;;  %v4122_v58 = vcombine.low %v4090_v30, %v4105_v45  ;;  %v4123_v0 = vcombine.high %v4090_v30, %v4105_v45 }
 0x7ae   :  { %v4262_v51 = vpop.permute.xlu1 %4261  ;;  %v2354_v47 = vpop.permute.xlu0 %2353 }
 0x7af   :  { %v9665_v12 = vsel %vm2404_vm3, %v4276_v27, %v4262_v51  ;;  %4213 = vrot.lane.b32.xlu0 %v4121_v21, %s5371_s5  ;;  %v4138_v4 = vcombine.high %v9657_v3, %v10721_v60  ;;  %v4139_v11 = vcombine.high %v4121_v21, %v10721_v60  ;;  %v4137_v51 = vrot.slane %v4123_v0, %v8427_v36  ;;  %s10854_s5 = smov 112  }
 0x7b0   :  { %v4293_v59 = vmul.f32 %v4291_v55, %v9665_v12  ;;  %v4299_v40 = vmul.f32 %v4297_v32, %v9665_v12  ;;  %v4305_v25 = vmul.f32 %v4303_v22, %v9665_v12  ;;  %v4311_v9 = vmul.f32 %v4309_v43, %v9665_v12 }
 0x7b1   :  { %v4317_v2 = vmul.f32 %v4315_v48, %v9665_v12  ;;  %v4323_v44 = vmul.f32 %v4321_v16, %v9665_v12 }
 0x7b2   :  { %v2972_v5 = vpop.permute.xlu0 %2971  ;;  %v9686_v30 = vadd.f32 %v4293_v59, %v9594_v52  ;;  %v9689_v19 = vadd.f32 %v4299_v40, %v9596_v23  ;;  %v9692_v29 = vadd.f32 %v4305_v25, %v9599_v39  ;;  %v9695_v45 = vadd.f32 %v4311_v9, %v9601_v62 }
 0x7b3   :  { %4209 = vrot.lane.b32.xlu0 %v4138_v4, %s5370_s12  ;;  %v9705_v52 = vadd.f32 %v4317_v2, %v9603_v8  ;;  %v9709_v23 = vadd.f32 %v4323_v44, %v9605_v54  ;;  %v4130_v39 = vrot.slane %v4122_v58, %v8427_v36  ;;  %v10852_v8 = vld [vmem:[#allocation89_spill] sm:$0xff] }
 0x7b4   :  { %v2393_v59 = vsel %vm2392_vm13, %v10852_v8, %v9266_v63  ;;  %v10853_v36 = vld [vmem:[#allocation25_spill] sm:$0xff]  ;;  %v4141_v63 = vcombine.high %v4137_v51, %v10721_v60 }
 0x7b5   :  { %v4140_v4 = vcombine.high %v4130_v39, %v10721_v60  ;;  %v2395_v54 = vsel %vm2394_vm14, %v2393_v59, %v9277_v50  ;;  %v3010_v0 = vsel %vm2392_vm13, %v10853_v36, %v9272_v20 }
 0x7b6   :  { %v3591_v27 = vpop.permute.xlu0 %3590  ;;  %v2397_v58 = vsel %vm2396_vm15, %v2395_v54, %v9288_v17  ;;  %v3011_v50 = vsel %vm2394_vm14, %v3010_v0, %v9281_v42 }
 0x7b7   :  { %4217 = vrot.lane.b32.xlu0 %v4139_v11, %s5372_s13  ;;  %v2399_v25 = vsel %vm2398_vm0, %v2397_v58, %v9302_v53  ;;  %v3012_v20 = vsel %vm2396_vm15, %v3011_v50, %v9295_v18  ;;  %s5072_s13 = sld [smem:[#allocation11 + $0x1]] }
 0x7b8   :  { %v2401_v9 = vsel %vm2400_vm1, %v2399_v25, %v2354_v47  ;;  %v3013_v60 = vsel %vm2398_vm0, %v3012_v20, %v9306_v38 }
 0x7b9   :  { %v3014_v53 = vsel %vm2400_vm1, %v3013_v60, %v2972_v5 }
 0x7ba   :  { %v2358_v62 = vpop.permute.xlu0 %2357 }
 0x7bb   :  { %4221 = vrot.lane.b32.xlu0 %v4130_v39, %s5373_s16  ;;  %v2403_v2 = vsel %vm2402_vm2, %v2401_v9, %v2358_v62  ;;  %s9813_s16 = sld [smem:[#allocation11]] }
 0x7be   :  { %v2976_v21 = vpop.permute.xlu0 %2975 }
 0x7bf   :  { %4229 = vrot.lane.b32.xlu0 %v4137_v51, %s5375_s17  ;;  %v3015_v47 = vsel %vm2402_vm2, %v3014_v53, %v2976_v21  ;;  %s5073_s17 = sld [smem:[#allocation11 + $0x5]] }
 0x7c2   :  { %v3595_v40 = vpop.permute.xlu0 %3594 }
 0x7c3   :  { %4225 = vrot.lane.b32.xlu0 %v4140_v4, %s5374_s15  ;;  %s9815_s15 = sld [smem:[#allocation11 + $0x4]] }
 0x7c6   :  { %v2362_v17 = vpop.permute.xlu0 %2361 }
 0x7c7   :  { %4233 = vrot.lane.b32.xlu0 %v4141_v63, %s10854_s5  ;;  %v9740_v42 = vsel %vm2404_vm3, %v2403_v2, %v2362_v17  ;;  %s5125_s5 = sld [smem:[#allocation14 + $0x4]] }
 0x7c8   :  { %v2423_v44 = vmul.f32 %v2422_v31, %v9740_v42  ;;  %v2427_v39 = vmul.f32 %v2426_v7, %v9740_v42  ;;  %v2431_v38 = vmul.f32 %v2430_v15, %v9740_v42  ;;  %v2435_v51 = vmul.f32 %v2434_v49, %v9740_v42 }
 0x7c9   :  { %v2439_v21 = vmul.f32 %v2438_v6, %v9740_v42  ;;  %v2443_v6 = vmul.f32 %v2442_v14, %v9740_v42 }
 0x7ca   :  { %v2980_v11 = vpop.permute.xlu0 %2979 }
 0x7cb   :  { %v9745_v18 = vsel %vm2404_vm3, %v3015_v47, %v2980_v11  ;;  %v2414_v11 = vstv %s9813_s16 }
 0x7cc   :  { %v3038_v62 = vmul.f32 %v3037_v35, %v9745_v18  ;;  %v3044_v5 = vmul.f32 %v3043_v13, %v9745_v18  ;;  %v3050_v31 = vmul.f32 %v3049_v28, %v9745_v18  ;;  %v3056_v7 = vmul.f32 %v3055_v24, %v9745_v18 }
 0x7cd   :  { %v3062_v15 = vmul.f32 %v3061_v41, %v9745_v18  ;;  %v3068_v35 = vmul.f32 %v3067_v1, %v9745_v18  ;;  %v3639_v1 = vsel %vm2396_vm15, %v9653_v37, %v3591_v27  ;;  %v10855_v37 = vstv %s9543_s0 }
 0x7ce   :  { %v3599_v13 = vpop.permute.xlu0 %3598  ;;  %v3040_v4 = vadd.f32 %v3038_v62, %v2423_v44  ;;  %v3046_v49 = vadd.f32 %v3044_v5, %v2427_v39  ;;  %v3052_v28 = vadd.f32 %v3050_v31, %v2431_v38  ;;  %v3058_v24 = vadd.f32 %v3056_v7, %v2435_v51 }
 0x7cf   :  { %v3064_v8 = vadd.f32 %v3062_v15, %v2439_v21  ;;  %v3070_v59 = vadd.f32 %v3068_v35, %v2443_v6  ;;  %v3640_v54 = vsel %vm2398_vm0, %v3639_v1, %v3595_v40  ;;  %v2418_v39 = vstv %s9815_s15  ;;  %s5126_s15 = sld [smem:[#allocation13 + $0x5]] }
 0x7d0   :  { %v3641_v58 = vsel %vm2400_vm1, %v3640_v54, %v3599_v13  ;;  %v3031_v62 = vstv %s5073_s17  ;;  %v2416_v51 = vmul.f32 %v2414_v11, %v9480_v46  ;;  %v3652_v21 = vstv %s9817_s4  ;;  %s5127_s17 = sld [smem:[#allocation14 + $0x5]] }
 0x7d1   :  { %v4279_v31 = vstv %s9819_s18  ;;  %v2420_v7 = vmul.f32 %v2418_v39, %v9480_v46  ;;  %v3658_v15 = vstv %s9821_s7  ;;  %v2415_v46 = vmul.f32 %v2414_v11, %v9740_v42  ;;  %s5128_s7 = sld [smem:[#allocation13 + $0x6]] }
 0x7d2   :  { %v3603_v41 = vpop.permute.xlu0 %3602  ;;  %v3660_v1 = vmul.f32 %v3658_v15, %v9569_v33 }
 0x7d3   :  { %v3642_v36 = vsel %vm2402_vm2, %v3641_v58, %v3603_v41  ;;  %v4281_v41 = vmul.f32 %v4279_v31, %v9665_v12  ;;  %v2419_v58 = vmul.f32 %v2418_v39, %v9740_v42 }
 0x7d6   :  { %v3607_v0 = vpop.permute.xlu0 %3606 }
 0x7d7   :  { %v3643_v25 = vsel %vm2404_vm3, %v3642_v36, %v3607_v0 }
 0x7d8   :  { %v3665_v14 = vmul.f32 %v3664_v34, %v3643_v25  ;;  %v3671_v63 = vmul.f32 %v3670_v61, %v3643_v25  ;;  %v3677_v50 = vmul.f32 %v3676_v10, %v3643_v25  ;;  %v3683_v9 = vmul.f32 %v3682_v57, %v3643_v25 }
 0x7d9   :  { %v3689_v17 = vmul.f32 %v3688_v56, %v3643_v25  ;;  %v3695_v27 = vmul.f32 %v10855_v37, %v3643_v25  ;;  %v3025_v56 = vstv %s5072_s13  ;;  %v3653_v54 = vmul.f32 %v3652_v21, %v3643_v25 }
 0x7da   :  { %v9801_v40 = vadd.f32 %v3665_v14, %v3040_v4  ;;  %v9803_v20 = vadd.f32 %v3671_v63, %v3046_v49  ;;  %v9805_v2 = vadd.f32 %v3677_v50, %v3052_v28  ;;  %v9807_v60 = vadd.f32 %v3683_v9, %v3058_v24 }
 0x7db   :  { %v9809_v53 = vadd.f32 %v3689_v17, %v3064_v8  ;;  %v9811_v34 = vadd.f32 %v3695_v27, %v3070_v59  ;;  %v3027_v44 = vmul.f32 %v3025_v56, %v9494_v26  ;;  %v3033_v4 = vmul.f32 %v3031_v62, %v9494_v26 }
 0x7dc   :  { %v4285_v49 = vstv %s9823_s8  ;;  %v3026_v28 = vmul.f32 %v3025_v56, %v9745_v18  ;;  %v3032_v24 = vmul.f32 %v3031_v62, %v9745_v18  ;;  %v3659_v36 = vmul.f32 %v3658_v15, %v3643_v25  ;;  %s5129_s8 = sld [smem:[#allocation14 + $0x6]] }
 0x7dd   :  { %v3029_v13 = vadd.f32 %v3027_v44, %v2416_v51  ;;  %v3035_v0 = vadd.f32 %v3033_v4, %v2420_v7  ;;  %v4287_v17 = vmul.f32 %v4285_v49, %v9665_v12 }
 0x7de   :  { %v3028_v14 = vadd.f32 %v3026_v28, %v2415_v46  ;;  %v3034_v63 = vadd.f32 %v3032_v24, %v2419_v58 }
 0x7e0   :  { %v3655_v25 = vadd.f32 %v3653_v54, %v3028_v14  ;;  %v3661_v27 = vadd.f32 %v3659_v36, %v3034_v63  ;;  %v4565_v54 = vsel %vm4326_vm4, %v9689_v19, 0.0  ;;  %v4721_v63 = vsel %vm4326_vm4, %v9695_v45, 0.0 }
 0x821   :  { %v4214_v61 = vpop.permute.xlu0 %4213 }
 0x825   :  { %v4210_v10 = vpop.permute.xlu0 %4209 }
 0x826   :  { %v4264_v38 = vsel %vm2392_vm13, %v9657_v3, %v4210_v10  ;;  %v3654_v3 = vmul.f32 %v3652_v21, %v9569_v33  ;;  %v3662_v33 = vadd.f32 %v3660_v1, %v3035_v0  ;;  %v4643_v0 = vsel %vm4326_vm4, %v9692_v29, 0.0 }
 0x827   :  { %v4265_v35 = vsel %vm2394_vm14, %v4264_v38, %v4214_v61 }
 0x828   :  { %v3656_v18 = vadd.f32 %v3654_v3, %v3029_v13 }
 0x829   :  { %v4218_v57 = vpop.permute.xlu0 %4217 }
 0x82a   :  { %v4266_v6 = vsel %vm2396_vm15, %v4265_v35, %v4218_v57  ;;  %v9851_v37 = vadd.f32 %v4281_v41, %v3656_v18  ;;  %v4487_v41 = vsel %vm4326_vm4, %v9686_v30, 0.0 }
 0x82d   :  { %v4222_v47 = vpop.permute.xlu0 %4221 }
 0x82e   :  { %v4267_v8 = vsel %vm2398_vm0, %v4266_v6, %v4222_v47 }
 0x831   :  { %v4230_v5 = vpop.permute.xlu0 %4229 }
 0x835   :  { %v4226_v59 = vpop.permute.xlu0 %4225 }
 0x836   :  { %v4268_v26 = vsel %vm2400_vm1, %v4267_v8, %v4226_v59 }
 0x837   :  { %v4269_v50 = vsel %vm2402_vm2, %v4268_v26, %v4230_v5 }
 0x839   :  { %v4234_v9 = vpop.permute.xlu0 %4233 }
 0x83a   :  { %v4270_v42 = vsel %vm2404_vm3, %v4269_v50, %v4234_v9 }
 0x83b   :  { %v4280_v61 = vmul.f32 %v4279_v31, %v4270_v42  ;;  %v4286_v10 = vmul.f32 %v4285_v49, %v4270_v42  ;;  %v4292_v57 = vmul.f32 %v4291_v55, %v4270_v42  ;;  %v4298_v56 = vmul.f32 %v4297_v32, %v4270_v42 }
 0x83c   :  { %v4304_v47 = vmul.f32 %v4303_v22, %v4270_v42  ;;  %v4310_v11 = vmul.f32 %v4309_v43, %v4270_v42  ;;  %v4316_v44 = vmul.f32 %v4315_v48, %v4270_v42  ;;  %v4322_v12 = vmul.f32 %v4321_v16, %v4270_v42 }
 0x83d   :  { %v9865_v39 = vadd.f32 %v4280_v61, %v3655_v25  ;;  %v9867_v38 = vadd.f32 %v4286_v10, %v3661_v27  ;;  %v9870_v62 = vadd.f32 %v4292_v57, %v9801_v40  ;;  %v9873_v5 = vadd.f32 %v4298_v56, %v9803_v20 }
 0x83e   :  { %v9876_v55 = vadd.f32 %v4304_v47, %v9805_v2  ;;  %v9879_v32 = vadd.f32 %v4310_v11, %v9807_v60  ;;  %v9882_v22 = vadd.f32 %v4316_v44, %v9809_v53  ;;  %v9885_v43 = vadd.f32 %v4322_v12, %v9811_v34 }
 0x83f   :  { %v4327_v48 = vsel %vm4326_vm4, %v9865_v39, 0.0  ;;  %v4328_v16 = vsel %vm4326_vm4, %v9851_v37, 0.0  ;;  %v9891_v40 = vadd.f32 %v4287_v17, %v3662_v33  ;;  %v4408_v2 = vsel %vm4326_vm4, %v9867_v38, 0.0 }
 0x840   :  { %v4329_v20 = vadd.f32 %v4328_v16, %v4327_v48  ;;  %v4486_v46 = vsel %vm4326_vm4, %v9870_v62, 0.0  ;;  %v4564_v26 = vsel %vm4326_vm4, %v9873_v5, 0.0  ;;  %v4642_v36 = vsel %vm4326_vm4, %v9876_v55, 0.0 }
 0x841   :  { %v4409_v60 = vsel %vm4326_vm4, %v9891_v40, 0.0  ;;  %v4488_v1 = vadd.f32 %v4487_v41, %v4486_v46  ;;  %v4566_v58 = vadd.f32 %v4565_v54, %v4564_v26  ;;  %v4644_v14 = vadd.f32 %v4643_v0, %v4642_v36 }
 0x842   :  { %4330 = vadd.xlane.f32.xlu0 %v4329_v20  ;;  %v4410_v53 = vadd.f32 %v4409_v60, %v4408_v2  ;;  %v4720_v18 = vsel %vm4326_vm4, %v9879_v32, 0.0  ;;  %v4798_v9 = vsel %vm4326_vm4, %v9882_v22, 0.0  ;;  %v4799_v33 = vsel %vm4326_vm4, %v9705_v52, 0.0 }
 0x843   :  { %v4722_v50 = vadd.f32 %v4721_v63, %v4720_v18  ;;  %v4800_v17 = vadd.f32 %v4799_v33, %v4798_v9  ;;  %v4876_v42 = vsel %vm4326_vm4, %v9885_v43, 0.0  ;;  %v4877_v25 = vsel %vm4326_vm4, %v9709_v23, 0.0 }
 0x844   :  { %v4878_v27 = vadd.f32 %v4877_v25, %v4876_v42 }
 0x846   :  { %4411 = vadd.xlane.f32.xlu0 %v4410_v53 }
 0x8cf   :  { %v4331_v34 = vpop.xlane.xlu0 %4330 }
 0x8d0   :  { %v4332_v51 = vrot.slane %v4331_v34, 4 }
 0x8d2   :  { %v4333_v21 = vadd.f32 %v4332_v51, %v4331_v34 }
 0x8d3   :  { %v4412_v61 = vpop.xlane.xlu0 %4411 }
 0x8d4   :  { %v4334_v31 = vrot.slane %v4333_v21, 2  ;;  %v4413_v10 = vrot.slane %v4412_v61, 4 }
 0x8d6   :  { %v4335_v7 = vadd.f32 %v4334_v31, %v4333_v21  ;;  %v4414_v57 = vadd.f32 %v4413_v10, %v4412_v61 }
 0x8d8   :  { %v4336_v15 = vrot.slane %v4335_v7, 1  ;;  %v4415_v56 = vrot.slane %v4414_v57, 2 }
 0x8da   :  { %v4337_v35 = vadd.f32 %v4336_v15, %v4335_v7  ;;  %v4416_v12 = vadd.f32 %v4415_v56, %v4414_v57 }
 0x8dc   :  { %5148 = vpush %v4337_v35  ;;  %v4417_v20 = vrot.slane %v4416_v12, 1 }
 0x8de   :  { %v4418_v53 = vadd.f32 %v4417_v20, %v4416_v12 }
 0x90d   :  { %s5149_s2 = spop %5148 }
 0x90e   :  { %v4339_v13 = vstv %s5149_s2 }
 0x90f   :  { %v9897_v4 = vmul.f32 0.001953125, %v4339_v13 }
 0x911   :  { %v4341_v49 = vsub.f32 %v9865_v39, %v9897_v4  ;;  %v4342_v6 = vsub.f32 %v9851_v37, %v9897_v4 }
 0x913   :  { %v4343_v28 = vmul.f32 %v4341_v49, %v4341_v49  ;;  %v4344_v3 = vmul.f32 %v4342_v6, %v4342_v6 }
 0x915   :  { %v4345_v24 = vsel %vm4326_vm4, %v4343_v28, 0.0  ;;  %v4346_v8 = vsel %vm4326_vm4, %v4344_v3, 0.0 }
 0x916   :  { %v4347_v59 = vadd.f32 %v4346_v8, %v4345_v24  ;;  %v4362_v24 = vstv %s4359_s20  ;;  %v5377_v8 = vmov 1966171168   ;;  %s5378_s20 = smov [#allocation16]  }
 0x918   :  { %4348 = vadd.xlane.f32.xlu1 %v4347_v59  ;;  %v4376_v59 = vunpack.c.l.s4 %v5377_v8 }
 0x91a   :  { %v4377_v26 = vunpack.c.0.s8 %v4376_v59  ;;  %v4447_v59 = vstv %s5119_s24 }
 0x91c   :  { %4489 = vadd.xlane.f32.xlu1 %v4488_v1  ;;  %v4366_v1 = vstv %s4364_s21  ;;  %s4959_s21 = sshll.u32 %s5378_s20, 4  ;;  %s4960_s21 = int_to_ptr.vmem [resolvable:$true] %s4959_s21 }
 0x91d   :  { %p5328_p13 = scmp.lt.s32.totalorder %s4960_s21, %s4960_s21 }
 0x920   :  { %4567 = vadd.xlane.f32.xlu1 %v4566_v58 }
 0x924   :  { %4645 = vadd.xlane.f32.xlu1 %v4644_v14  ;;  %v10856_v14 = vld [vmem:[#allocation118_spill] sm:$0xff] }
 0x925   :  { %v9941_v18 = vsub.s32 %v4377_v26, %v10856_v14 }
 0x928   :  { %4723 = vadd.xlane.f32.xlu1 %v4722_v50 }
 0x92c   :  { %4801 = vadd.xlane.f32.xlu1 %v4800_v17  ;;  %v10857_v17 = vlaneseq }
 0x92e   :  { %vm9945_vm5 = vcmp.lt.s32.totalorder %v10857_v17, 256 }
 0x930   :  { %4879 = vadd.xlane.f32.xlu1 %v4878_v27 }
 0x9a5   :  { %v4349_v47 = vpop.xlane.xlu1 %4348 }
 0x9a6   :  { %v4350_v11 = vrot.slane %v4349_v47, 4 }
 0x9a8   :  { %v4351_v44 = vadd.f32 %v4350_v11, %v4349_v47 }
 0x9aa   :  { %v4352_v48 = vrot.slane %v4351_v44, 2 }
 0x9ac   :  { %v4353_v16 = vadd.f32 %v4352_v48, %v4351_v44 }
 0x9ae   :  { %v4354_v2 = vrot.slane %v4353_v16, 1 }
 0x9b0   :  { %v4355_v60 = vadd.f32 %v4354_v2, %v4353_v16 }
 0x9b2   :  { %5150 = vpush %v4355_v60 }
 0x9b3   :  { %5152 = vpush %v4418_v53 }
 0x9e3   :  { %s5151_s29 = spop %5150 }
 0x9e4   :  { %v4357_v34 = vstv %s5151_s29  ;;  %s5153_s19 = spop %5152  ;;  %s5130_s29 = sld [smem:[#allocation13 + $0x7]] }
 0x9e5   :  { %v4358_v51 = vmul.f32 0.001953125, %v4357_v34  ;;  %v4420_v21 = vstv %s5153_s19  ;;  %s5131_s19 = sld [smem:[#allocation14 + $0x7]] }
 0x9e6   :  { %v9929_v31 = vmul.f32 0.001953125, %v4420_v21 }
 0x9e7   :  { %v4360_v7 = vadd.f32 1e-05, %v4358_v51 }
 0x9e8   :  { %v4422_v15 = vsub.f32 %v9867_v38, %v9929_v31  ;;  %v4423_v35 = vsub.f32 %v9891_v40, %v9929_v31 }
 0x9e9   :  { %5211 = vrsqrt.f32 %v4360_v7 }
 0x9ea   :  { %v4424_v13 = vmul.f32 %v4422_v15, %v4422_v15  ;;  %v4425_v49 = vmul.f32 %v4423_v35, %v4423_v35 }
 0x9ec   :  { %v4426_v6 = vsel %vm4326_vm4, %v4424_v13, 0.0  ;;  %v4427_v28 = vsel %vm4326_vm4, %v4425_v49, 0.0 }
 0x9ed   :  { %v4428_v3 = vadd.f32 %v4427_v28, %v4426_v6 }
 0x9ef   :  { %4429 = vadd.xlane.f32.xlu0 %v4428_v3  ;;  %v4443_v3 = vstv %s5118_s3 }
 0x9f3   :  { %v5212_v46 = vpop.eup %5211 }
 0x9f4   :  { %v4363_v41 = vmul.f32 %v5212_v46, %v4362_v24 }
 0x9f6   :  { %v4365_v54 = vmul.f32 %v4363_v41, %v9897_v4  ;;  %v4368_v36 = vmul.f32 %v4363_v41, %v9865_v39  ;;  %v4369_v0 = vmul.f32 %v4363_v41, %v9851_v37  ;;  %v4490_v37 = vpop.xlane.xlu1 %4489 }
 0x9f7   :  { %v4491_v27 = vrot.slane %v4490_v37, 4 }
 0x9f8   :  { %v4367_v58 = vsub.f32 %v4366_v1, %v4365_v54 }
 0x9f9   :  { %v4492_v61 = vadd.f32 %v4491_v27, %v4490_v37 }
 0x9fa   :  { %v4370_v63 = vadd.f32 %v4368_v36, %v4367_v58  ;;  %v4371_v50 = vadd.f32 %v4369_v0, %v4367_v58 }
 0x9fb   :  { %v4493_v10 = vrot.slane %v4492_v61, 2 }
 0x9fc   :  { %v4374_v9 = vcombine.low %v4370_v63, %v4371_v50 }
 0x9fd   :  { %v4494_v11 = vadd.f32 %v4493_v10, %v4492_v61 }
 0x9fe   :  { %v4381_v33 = vrot.slane %v4374_v9, %v9941_v18 }
 0x9ff   :  { %v4495_v48 = vrot.slane %v4494_v11, 1 }
 0xa00   :  { %v4382_v25 = vcombine.high %v4381_v33, %v4381_v33  ;;  %v4389_v4 = vrot.slane %v4381_v33, %v9941_v18 }
 0xa01   :  { %v4496_v2 = vadd.f32 %v4495_v48, %v4494_v11 }
 0xa02   :  { %v4396_v39 = vrot.slane %v4382_v25, %v9941_v18  ;;  %4403 = vst.msk [vmem:[#allocation16] ss:$8 sm:$0x3] %vm9945_vm5, %v4389_v4 }
 0xa04   :  { %4406 = vst.msk [vmem:[#allocation16 + $0x10] ss:$8 sm:$0x3] %vm9945_vm5, %v4396_v39 }
 0xa7c   :  { %v4430_v57 = vpop.xlane.xlu0 %4429 }
 0xa7d   :  { %v4431_v56 = vrot.slane %v4430_v57, 4 }
 0xa7f   :  { %v4432_v47 = vadd.f32 %v4431_v56, %v4430_v57 }
 0xa81   :  { %v4433_v44 = vrot.slane %v4432_v47, 2 }
 0xa83   :  { %v4434_v12 = vadd.f32 %v4433_v44, %v4432_v47 }
 0xa85   :  { %v4435_v16 = vrot.slane %v4434_v12, 1 }
 0xa87   :  { %v4436_v20 = vadd.f32 %v4435_v16, %v4434_v12 }
 0xa89   :  { %5154 = vpush %v4436_v20 }
 0xa8a   :  { %5156 = vpush %v4496_v2 }
 0xaba   :  { %s5155_s22 = spop %5154 }
 0xabb   :  { %v4438_v60 = vstv %s5155_s22  ;;  %s5157_s23 = spop %5156  ;;  %s5323_s22 = scalar_lea.vmem %s4960_s21, 512 }
 0xabc   :  { %v4439_v53 = vmul.f32 0.001953125, %v4438_v60  ;;  %v4498_v34 = vstv %s5157_s23  ;;  %p5324_p12 = scmp.ne.s32.totalorder %s4960_s21, %s5323_s22  ;;  %p5329_p0 = scmp.lt.s32.totalorder %s5323_s22, %s5323_s22 }
 0xabd   :  { %v9955_v51 = vmul.f32 0.001953125, %v4498_v34 }
 0xabe   :  { %v4441_v21 = vadd.f32 1e-05, %v4439_v53  ;;  %p5330_p1 = por %p5329_p0, %p5328_p13 }
 0xabf   :  { %v4500_v7 = vsub.f32 %v9870_v62, %v9955_v51  ;;  %v4501_v15 = vsub.f32 %v9686_v30, %v9955_v51 }
 0xac0   :  { %5213 = vrsqrt.f32 %v4441_v21  ;;  %v4521_v21 = vstv %s5120_s1  ;;  %p5331_p2 = pnand %p5330_p1, %p5324_p12 }
 0xac1   :  { %v4502_v35 = vmul.f32 %v4500_v7, %v4500_v7  ;;  %v4503_v13 = vmul.f32 %v4501_v15, %v4501_v15 }
 0xac3   :  { %v4504_v49 = vsel %vm4326_vm4, %v4502_v35, 0.0  ;;  %v4505_v6 = vsel %vm4326_vm4, %v4503_v13, 0.0  ;;  %v4525_v35 = vstv %s5121_s26 }
 0xac4   :  { %v4506_v28 = vadd.f32 %v4505_v6, %v4504_v49 }
 0xac6   :  { %4507 = vadd.xlane.f32.xlu0 %v4506_v28 }
 0xaca   :  { %v5214_v24 = vpop.eup %5213 }
 0xacb   :  { %v4444_v8 = vmul.f32 %v5214_v24, %v4443_v3 }
 0xacd   :  { %v4446_v46 = vmul.f32 %v4444_v8, %v9929_v31  ;;  %v4449_v1 = vmul.f32 %v4444_v8, %v9867_v38  ;;  %v4450_v26 = vmul.f32 %v4444_v8, %v9891_v40  ;;  %v4568_v31 = vpop.xlane.xlu1 %4567 }
 0xace   :  { %v4569_v38 = vrot.slane %v4568_v31, 4 }
 0xacf   :  { %v4448_v41 = vsub.f32 %v4447_v59, %v4446_v46 }
 0xad0   :  { %v4570_v9 = vadd.f32 %v4569_v38, %v4568_v31 }
 0xad1   :  { %v4451_v54 = vadd.f32 %v4449_v1, %v4448_v41  ;;  %v4452_v58 = vadd.f32 %v4450_v26, %v4448_v41 }
 0xad2   :  { %v4571_v40 = vrot.slane %v4570_v9, 2 }
 0xad3   :  { %v4455_v36 = vcombine.low %v4451_v54, %v4452_v58 }
 0xad4   :  { %v4572_v4 = vadd.f32 %v4571_v40, %v4570_v9 }
 0xad5   :  { %v4462_v0 = vrot.slane %v4455_v36, %v9941_v18 }
 0xad6   :  { %v4573_v27 = vrot.slane %v4572_v4, 1 }
 0xad7   :  { %v4463_v14 = vcombine.high %v4462_v0, %v4462_v0  ;;  %v4470_v63 = vrot.slane %v4462_v0, %v9941_v18 }
 0xad8   :  { %v4574_v57 = vadd.f32 %v4573_v27, %v4572_v4 }
 0xad9   :  { %v4477_v50 = vrot.slane %v4463_v14, %v9941_v18  ;;  %4481 = vst.msk [vmem:[#allocation16 + $0x1] ss:$8 sm:$0x3] %vm9945_vm5, %v4470_v63 }
 0xadb   :  { %4484 = vst.msk [vmem:[#allocation16 + $0x11] ss:$8 sm:$0x3] %vm9945_vm5, %v4477_v50 }
 0xb53   :  { %v4508_v33 = vpop.xlane.xlu0 %4507 }
 0xb54   :  { %v4509_v17 = vrot.slane %v4508_v33, 4 }
 0xb56   :  { %v4510_v25 = vadd.f32 %v4509_v17, %v4508_v33 }
 0xb58   :  { %v4511_v39 = vrot.slane %v4510_v25, 2 }
 0xb5a   :  { %v4512_v37 = vadd.f32 %v4511_v39, %v4510_v25 }
 0xb5c   :  { %v4513_v61 = vrot.slane %v4512_v37, 1 }
 0xb5e   :  { %v4514_v10 = vadd.f32 %v4513_v61, %v4512_v37 }
 0xb60   :  { %5158 = vpush %v4514_v10 }
 0xb61   :  { %5160 = vpush %v4574_v57 }
 0xb91   :  { %s5159_s25 = spop %5158 }
 0xb92   :  { %v4516_v56 = vstv %s5159_s25  ;;  %s5161_s6 = spop %5160 }
 0xb93   :  { %v4517_v47 = vmul.f32 0.001953125, %v4516_v56  ;;  %v4576_v11 = vstv %s5161_s6 }
 0xb94   :  { %v9973_v44 = vmul.f32 0.001953125, %v4576_v11 }
 0xb95   :  { %v4519_v12 = vadd.f32 1e-05, %v4517_v47  ;;  %v4599_v47 = vstv %s5122_s28 }
 0xb96   :  { %v4578_v48 = vsub.f32 %v9873_v5, %v9973_v44  ;;  %v4579_v16 = vsub.f32 %v9689_v19, %v9973_v44 }
 0xb97   :  { %5215 = vrsqrt.f32 %v4519_v12 }
 0xb98   :  { %v4580_v20 = vmul.f32 %v4578_v48, %v4578_v48  ;;  %v4581_v2 = vmul.f32 %v4579_v16, %v4579_v16  ;;  %v4603_v48 = vstv %s5123_s30 }
 0xb9a   :  { %v4582_v60 = vsel %vm4326_vm4, %v4580_v20, 0.0  ;;  %v4583_v53 = vsel %vm4326_vm4, %v4581_v2, 0.0 }
 0xb9b   :  { %v4584_v34 = vadd.f32 %v4583_v53, %v4582_v60 }
 0xb9d   :  { %4585 = vadd.xlane.f32.xlu0 %v4584_v34 }
 0xba1   :  { %v5216_v7 = vpop.eup %5215 }
 0xba2   :  { %v4522_v15 = vmul.f32 %v5216_v7, %v4521_v21 }
 0xba4   :  { %v4524_v13 = vmul.f32 %v4522_v15, %v9955_v51  ;;  %v4527_v6 = vmul.f32 %v4522_v15, %v9870_v62  ;;  %v4528_v28 = vmul.f32 %v4522_v15, %v9686_v30  ;;  %v4646_v51 = vpop.xlane.xlu1 %4645 }
 0xba5   :  { %v4647_v62 = vrot.slane %v4646_v51, 4 }
 0xba6   :  { %v4526_v49 = vsub.f32 %v4525_v35, %v4524_v13 }
 0xba7   :  { %v4648_v26 = vadd.f32 %v4647_v62, %v4646_v51 }
 0xba8   :  { %v4529_v3 = vadd.f32 %v4527_v6, %v4526_v49  ;;  %v4530_v24 = vadd.f32 %v4528_v28, %v4526_v49 }
 0xba9   :  { %v4649_v30 = vrot.slane %v4648_v26, 2 }
 0xbaa   :  { %v4533_v8 = vcombine.low %v4529_v3, %v4530_v24 }
 0xbab   :  { %v4650_v0 = vadd.f32 %v4649_v30, %v4648_v26 }
 0xbac   :  { %v4540_v59 = vrot.slane %v4533_v8, %v9941_v18 }
 0xbad   :  { %v4651_v50 = vrot.slane %v4650_v0, 1 }
 0xbae   :  { %v4541_v46 = vcombine.high %v4540_v59, %v4540_v59  ;;  %v4548_v41 = vrot.slane %v4540_v59, %v9941_v18 }
 0xbaf   :  { %v4652_v9 = vadd.f32 %v4651_v50, %v4650_v0 }
 0xbb0   :  { %v4555_v1 = vrot.slane %v4541_v46, %v9941_v18  ;;  %4559 = vst.msk [vmem:[#allocation16 + $0x2] ss:$8 sm:$0x3] %vm9945_vm5, %v4548_v41 }
 0xbb2   :  { %4562 = vst.msk [vmem:[#allocation16 + $0x12] ss:$8 sm:$0x3] %vm9945_vm5, %v4555_v1 }
 0xc2a   :  { %v4586_v54 = vpop.xlane.xlu0 %4585 }
 0xc2b   :  { %v4587_v58 = vrot.slane %v4586_v54, 4 }
 0xc2d   :  { %v4588_v36 = vadd.f32 %v4587_v58, %v4586_v54 }
 0xc2f   :  { %v4589_v14 = vrot.slane %v4588_v36, 2 }
 0xc31   :  { %v4590_v63 = vadd.f32 %v4589_v14, %v4588_v36 }
 0xc33   :  { %v4591_v31 = vrot.slane %v4590_v63, 1 }
 0xc35   :  { %v4592_v38 = vadd.f32 %v4591_v31, %v4590_v63 }
 0xc37   :  { %5162 = vpush %v4592_v38 }
 0xc38   :  { %5164 = vpush %v4652_v9  ;;  %v4677_v9 = vstv %s5124_s14 }
 0xc68   :  { %s5163_s27 = spop %5162 }
 0xc69   :  { %v4594_v40 = vstv %s5163_s27  ;;  %s5165_s0 = spop %5164 }
 0xc6a   :  { %v4595_v33 = vmul.f32 0.001953125, %v4594_v40  ;;  %v4654_v17 = vstv %s5165_s0 }
 0xc6b   :  { %v9991_v25 = vmul.f32 0.001953125, %v4654_v17  ;;  %v4681_v17 = vstv %s5125_s5 }
 0xc6c   :  { %v4597_v4 = vadd.f32 1e-05, %v4595_v33 }
 0xc6d   :  { %v4656_v39 = vsub.f32 %v9876_v55, %v9991_v25  ;;  %v4657_v37 = vsub.f32 %v9692_v29, %v9991_v25 }
 0xc6e   :  { %5217 = vrsqrt.f32 %v4597_v4 }
 0xc6f   :  { %v4658_v27 = vmul.f32 %v4656_v39, %v4656_v39  ;;  %v4659_v61 = vmul.f32 %v4657_v37, %v4657_v37 }
 0xc71   :  { %v4660_v10 = vsel %vm4326_vm4, %v4658_v27, 0.0  ;;  %v4661_v57 = vsel %vm4326_vm4, %v4659_v61, 0.0 }
 0xc72   :  { %v4662_v56 = vadd.f32 %v4661_v57, %v4660_v10 }
 0xc74   :  { %4663 = vadd.xlane.f32.xlu0 %v4662_v56 }
 0xc78   :  { %v5218_v11 = vpop.eup %5217 }
 0xc79   :  { %v4600_v12 = vmul.f32 %v5218_v11, %v4599_v47 }
 0xc7b   :  { %v4602_v16 = vmul.f32 %v4600_v12, %v9973_v44  ;;  %v4605_v2 = vmul.f32 %v4600_v12, %v9873_v5  ;;  %v4606_v60 = vmul.f32 %v4600_v12, %v9689_v19  ;;  %v4724_v44 = vpop.xlane.xlu1 %4723 }
 0xc7c   :  { %v4725_v5 = vrot.slane %v4724_v44, 4 }
 0xc7d   :  { %v4604_v20 = vsub.f32 %v4603_v48, %v4602_v16 }
 0xc7e   :  { %v4726_v49 = vadd.f32 %v4725_v5, %v4724_v44 }
 0xc7f   :  { %v4607_v53 = vadd.f32 %v4605_v2, %v4604_v20  ;;  %v4608_v34 = vadd.f32 %v4606_v60, %v4604_v20 }
 0xc80   :  { %v4727_v19 = vrot.slane %v4726_v49, 2 }
 0xc81   :  { %v4611_v21 = vcombine.low %v4607_v53, %v4608_v34 }
 0xc82   :  { %v4728_v24 = vadd.f32 %v4727_v19, %v4726_v49 }
 0xc83   :  { %v4618_v7 = vrot.slane %v4611_v21, %v9941_v18 }
 0xc84   :  { %v4729_v46 = vrot.slane %v4728_v24, 1 }
 0xc85   :  { %v4619_v15 = vcombine.high %v4618_v7, %v4618_v7  ;;  %v4626_v35 = vrot.slane %v4618_v7, %v9941_v18 }
 0xc86   :  { %v4730_v51 = vadd.f32 %v4729_v46, %v4728_v24 }
 0xc87   :  { %v4633_v13 = vrot.slane %v4619_v15, %v9941_v18  ;;  %4637 = vst.msk [vmem:[#allocation16 + $0x3] ss:$8 sm:$0x3] %vm9945_vm5, %v4626_v35 }
 0xc89   :  { %4640 = vst.msk [vmem:[#allocation16 + $0x13] ss:$8 sm:$0x3] %vm9945_vm5, %v4633_v13 }
 0xd01   :  { %v4664_v6 = vpop.xlane.xlu0 %4663 }
 0xd02   :  { %v4665_v28 = vrot.slane %v4664_v6, 4 }
 0xd04   :  { %v4666_v3 = vadd.f32 %v4665_v28, %v4664_v6 }
 0xd06   :  { %v4667_v8 = vrot.slane %v4666_v3, 2 }
 0xd08   :  { %v4668_v59 = vadd.f32 %v4667_v8, %v4666_v3 }
 0xd0a   :  { %v4669_v41 = vrot.slane %v4668_v59, 1 }
 0xd0c   :  { %v4670_v1 = vadd.f32 %v4669_v41, %v4668_v59  ;;  %v4755_v41 = vstv %s5126_s15 }
 0xd0e   :  { %5166 = vpush %v4670_v1 }
 0xd0f   :  { %5168 = vpush %v4730_v51 }
 0xd3f   :  { %s5167_s10 = spop %5166 }
 0xd40   :  { %v4672_v62 = vstv %s5167_s10  ;;  %s5169_s11 = spop %5168 }
 0xd41   :  { %v4673_v26 = vmul.f32 0.001953125, %v4672_v62  ;;  %v4732_v30 = vstv %s5169_s11  ;;  %v4759_v62 = vstv %s5127_s17 }
 0xd42   :  { %v10009_v54 = vmul.f32 0.001953125, %v4732_v30 }
 0xd43   :  { %v4675_v58 = vadd.f32 1e-05, %v4673_v26 }
 0xd44   :  { %v4734_v36 = vsub.f32 %v9879_v32, %v10009_v54  ;;  %v4735_v0 = vsub.f32 %v9695_v45, %v10009_v54 }
 0xd45   :  { %5219 = vrsqrt.f32 %v4675_v58 }
 0xd46   :  { %v4736_v14 = vmul.f32 %v4734_v36, %v4734_v36  ;;  %v4737_v63 = vmul.f32 %v4735_v0, %v4735_v0 }
 0xd48   :  { %v4738_v50 = vsel %vm4326_vm4, %v4736_v14, 0.0  ;;  %v4739_v31 = vsel %vm4326_vm4, %v4737_v63, 0.0 }
 0xd49   :  { %v4740_v38 = vadd.f32 %v4739_v31, %v4738_v50 }
 0xd4b   :  { %4741 = vadd.xlane.f32.xlu0 %v4740_v38 }
 0xd4f   :  { %v5220_v40 = vpop.eup %5219 }
 0xd50   :  { %v4678_v33 = vmul.f32 %v5220_v40, %v4677_v9 }
 0xd52   :  { %v4680_v4 = vmul.f32 %v4678_v33, %v9991_v25  ;;  %v4683_v37 = vmul.f32 %v4678_v33, %v9876_v55  ;;  %v4684_v27 = vmul.f32 %v4678_v33, %v9692_v29  ;;  %v4802_v25 = vpop.xlane.xlu1 %4801 }
 0xd53   :  { %v4803_v55 = vrot.slane %v4802_v25, 4 }
 0xd54   :  { %v4682_v39 = vsub.f32 %v4681_v17, %v4680_v4 }
 0xd55   :  { %v4804_v48 = vadd.f32 %v4803_v55, %v4802_v25 }
 0xd56   :  { %v4685_v61 = vadd.f32 %v4683_v37, %v4682_v39  ;;  %v4686_v10 = vadd.f32 %v4684_v27, %v4682_v39 }
 0xd57   :  { %v4805_v29 = vrot.slane %v4804_v48, 2 }
 0xd58   :  { %v4689_v57 = vcombine.low %v4685_v61, %v4686_v10 }
 0xd59   :  { %v4806_v60 = vadd.f32 %v4805_v29, %v4804_v48 }
 0xd5a   :  { %v4696_v56 = vrot.slane %v4689_v57, %v9941_v18 }
 0xd5b   :  { %v4807_v21 = vrot.slane %v4806_v60, 1 }
 0xd5c   :  { %v4697_v47 = vcombine.high %v4696_v56, %v4696_v56  ;;  %v4704_v11 = vrot.slane %v4696_v56, %v9941_v18 }
 0xd5d   :  { %v4808_v35 = vadd.f32 %v4807_v21, %v4806_v60 }
 0xd5e   :  { %v4711_v12 = vrot.slane %v4697_v47, %v9941_v18  ;;  %4715 = vst.msk [vmem:[#allocation16 + $0x4] ss:$8 sm:$0x3] %vm9945_vm5, %v4704_v11 }
 0xd60   :  { %4718 = vst.msk [vmem:[#allocation16 + $0x14] ss:$8 sm:$0x3] %vm9945_vm5, %v4711_v12 }
 0xdd8   :  { %v4742_v16 = vpop.xlane.xlu0 %4741 }
 0xdd9   :  { %v4743_v20 = vrot.slane %v4742_v16, 4 }
 0xddb   :  { %v4744_v2 = vadd.f32 %v4743_v20, %v4742_v16 }
 0xddd   :  { %v4745_v53 = vrot.slane %v4744_v2, 2 }
 0xddf   :  { %v4746_v34 = vadd.f32 %v4745_v53, %v4744_v2 }
 0xde1   :  { %v4747_v7 = vrot.slane %v4746_v34, 1 }
 0xde3   :  { %v4748_v15 = vadd.f32 %v4747_v7, %v4746_v34  ;;  %v4833_v34 = vstv %s5128_s7 }
 0xde5   :  { %5170 = vpush %v4748_v15  ;;  %v4837_v15 = vstv %s5129_s8 }
 0xde6   :  { %5172 = vpush %v4808_v35 }
 0xe16   :  { %s5171_s13 = spop %5170 }
 0xe17   :  { %v4750_v13 = vstv %s5171_s13  ;;  %s5173_s16 = spop %5172 }
 0xe18   :  { %v4751_v44 = vmul.f32 0.001953125, %v4750_v13  ;;  %v4810_v5 = vstv %s5173_s16 }
 0xe19   :  { %v10027_v49 = vmul.f32 0.001953125, %v4810_v5 }
 0xe1a   :  { %v4753_v19 = vadd.f32 1e-05, %v4751_v44 }
 0xe1b   :  { %v4812_v6 = vsub.f32 %v9882_v22, %v10027_v49  ;;  %v4813_v28 = vsub.f32 %v9705_v52, %v10027_v49 }
 0xe1c   :  { %5221 = vrsqrt.f32 %v4753_v19 }
 0xe1d   :  { %v4814_v3 = vmul.f32 %v4812_v6, %v4812_v6  ;;  %v4815_v24 = vmul.f32 %v4813_v28, %v4813_v28 }
 0xe1f   :  { %v4816_v8 = vsel %vm4326_vm4, %v4814_v3, 0.0  ;;  %v4817_v59 = vsel %vm4326_vm4, %v4815_v24, 0.0 }
 0xe20   :  { %v4818_v46 = vadd.f32 %v4817_v59, %v4816_v8 }
 0xe22   :  { %4819 = vadd.xlane.f32.xlu0 %v4818_v46 }
 0xe26   :  { %v5222_v1 = vpop.eup %5221 }
 0xe27   :  { %v4756_v51 = vmul.f32 %v5222_v1, %v4755_v41 }
 0xe29   :  { %v4758_v26 = vmul.f32 %v4756_v51, %v10009_v54  ;;  %v4761_v58 = vmul.f32 %v4756_v51, %v9879_v32  ;;  %v4762_v36 = vmul.f32 %v4756_v51, %v9695_v45  ;;  %v4880_v54 = vpop.xlane.xlu1 %4879 }
 0xe2a   :  { %v4881_v32 = vrot.slane %v4880_v54, 4 }
 0xe2b   :  { %v4760_v30 = vsub.f32 %v4759_v62, %v4758_v26 }
 0xe2c   :  { %v4882_v40 = vadd.f32 %v4881_v32, %v4880_v54 }
 0xe2d   :  { %v4763_v0 = vadd.f32 %v4761_v58, %v4760_v30  ;;  %v4764_v14 = vadd.f32 %v4762_v36, %v4760_v30  ;;  %v4911_v58 = vstv %s5130_s29 }
 0xe2e   :  { %v4883_v45 = vrot.slane %v4882_v40, 2 }
 0xe2f   :  { %v4767_v63 = vcombine.low %v4763_v0, %v4764_v14  ;;  %v4915_v14 = vstv %s5131_s19 }
 0xe30   :  { %v4884_v39 = vadd.f32 %v4883_v45, %v4882_v40 }
 0xe31   :  { %v4774_v50 = vrot.slane %v4767_v63, %v9941_v18 }
 0xe32   :  { %v4885_v61 = vrot.slane %v4884_v39, 1 }
 0xe33   :  { %v4775_v31 = vcombine.high %v4774_v50, %v4774_v50  ;;  %v4782_v38 = vrot.slane %v4774_v50, %v9941_v18 }
 0xe34   :  { %v4886_v56 = vadd.f32 %v4885_v61, %v4884_v39 }
 0xe35   :  { %v4789_v9 = vrot.slane %v4775_v31, %v9941_v18  ;;  %4793 = vst.msk [vmem:[#allocation16 + $0x5] ss:$8 sm:$0x3] %vm9945_vm5, %v4782_v38 }
 0xe37   :  { %4796 = vst.msk [vmem:[#allocation16 + $0x15] ss:$8 sm:$0x3] %vm9945_vm5, %v4789_v9 }
 0xeaf   :  { %v4820_v33 = vpop.xlane.xlu0 %4819 }
 0xeb0   :  { %v4821_v17 = vrot.slane %v4820_v33, 4 }
 0xeb2   :  { %v4822_v4 = vadd.f32 %v4821_v17, %v4820_v33 }
 0xeb4   :  { %v4823_v37 = vrot.slane %v4822_v4, 2 }
 0xeb6   :  { %v4824_v27 = vadd.f32 %v4823_v37, %v4822_v4 }
 0xeb8   :  { %v4825_v10 = vrot.slane %v4824_v27, 1 }
 0xeba   :  { %v4826_v57 = vadd.f32 %v4825_v10, %v4824_v27 }
 0xebc   :  { %5174 = vpush %v4826_v57 }
 0xebd   :  { %5176 = vpush %v4886_v56 }
 0xeed   :  { %s5175_s4 = spop %5174 }
 0xeee   :  { %v4828_v47 = vstv %s5175_s4  ;;  %s5177_s18 = spop %5176 }
 0xeef   :  { %v4829_v11 = vmul.f32 0.001953125, %v4828_v47  ;;  %v4888_v12 = vstv %s5177_s18 }
 0xef0   :  { %v4889_v25 = vmul.f32 0.001953125, %v4888_v12 }
 0xef1   :  { %v4831_v55 = vadd.f32 1e-05, %v4829_v11 }
 0xef2   :  { %v4890_v48 = vsub.f32 %v9885_v43, %v4889_v25  ;;  %v4891_v29 = vsub.f32 %v9709_v23, %v4889_v25 }
 0xef3   :  { %5223 = vrsqrt.f32 %v4831_v55 }
 0xef4   :  { %v4892_v16 = vmul.f32 %v4890_v48, %v4890_v48  ;;  %v4893_v20 = vmul.f32 %v4891_v29, %v4891_v29 }
 0xef6   :  { %v4894_v2 = vsel %vm4326_vm4, %v4892_v16, 0.0  ;;  %v4895_v60 = vsel %vm4326_vm4, %v4893_v20, 0.0 }
 0xef7   :  { %v4896_v53 = vadd.f32 %v4895_v60, %v4894_v2 }
 0xef9   :  { %4897 = vadd.xlane.f32.xlu0 %v4896_v53 }
 0xefd   :  { %v5224_v21 = vpop.eup %5223 }
 0xefe   :  { %v4834_v7 = vmul.f32 %v5224_v21, %v4833_v34 }
 0xf00   :  { %v4836_v35 = vmul.f32 %v4834_v7, %v10027_v49  ;;  %v4839_v44 = vmul.f32 %v4834_v7, %v9882_v22  ;;  %v4840_v5 = vmul.f32 %v4834_v7, %v9705_v52 }
 0xf02   :  { %v4838_v13 = vsub.f32 %v4837_v15, %v4836_v35 }
 0xf04   :  { %v4841_v19 = vadd.f32 %v4839_v44, %v4838_v13  ;;  %v4842_v6 = vadd.f32 %v4840_v5, %v4838_v13 }
 0xf06   :  { %v4845_v28 = vcombine.low %v4841_v19, %v4842_v6 }
 0xf08   :  { %v4852_v3 = vrot.slane %v4845_v28, %v9941_v18 }
 0xf0a   :  { %v4853_v24 = vcombine.high %v4852_v3, %v4852_v3  ;;  %v4860_v8 = vrot.slane %v4852_v3, %v9941_v18 }
 0xf0c   :  { %v4867_v59 = vrot.slane %v4853_v24, %v9941_v18  ;;  %4871 = vst.msk [vmem:[#allocation16 + $0x6] ss:$8 sm:$0x3] %vm9945_vm5, %v4860_v8 }
 0xf0e   :  { %4874 = vst.msk [vmem:[#allocation16 + $0x16] ss:$8 sm:$0x3] %vm9945_vm5, %v4867_v59 }
 0xf86   :  { %v4898_v49 = vpop.xlane.xlu0 %4897 }
 0xf87   :  { %v4899_v22 = vrot.slane %v4898_v49, 4 }
 0xf89   :  { %v4900_v46 = vadd.f32 %v4899_v22, %v4898_v49 }
 0xf8b   :  { %v4901_v52 = vrot.slane %v4900_v46, 2 }
 0xf8d   :  { %v4902_v41 = vadd.f32 %v4901_v52, %v4900_v46 }
 0xf8f   :  { %v4903_v1 = vrot.slane %v4902_v41, 1 }
 0xf91   :  { %v4904_v51 = vadd.f32 %v4903_v1, %v4902_v41 }
 0xf93   :  { %5178 = vpush %v4904_v51 }
 0xfc4   :  { %s5179_s2 = spop %5178 }
 0xfc5   :  { %v4906_v62 = vstv %s5179_s2 }
 0xfc6   :  { %v4907_v26 = vmul.f32 0.001953125, %v4906_v62 }
 0xfc8   :  { %v4909_v30 = vadd.f32 1e-05, %v4907_v26 }
 0xfca   :  { %5225 = vrsqrt.f32 %v4909_v30 }
 0xfd4   :  { %v5226_v36 = vpop.eup %5225 }
 0xfd5   :  { %v4912_v0 = vmul.f32 %v5226_v36, %v4911_v58 }
 0xfd7   :  { %v4914_v63 = vmul.f32 %v4912_v0, %v4889_v25  ;;  %v4917_v31 = vmul.f32 %v4912_v0, %v9885_v43  ;;  %v4918_v38 = vmul.f32 %v4912_v0, %v9709_v23 }
 0xfd9   :  { %v4916_v50 = vsub.f32 %v4915_v14, %v4914_v63 }
 0xfdb   :  { %v4919_v9 = vadd.f32 %v4917_v31, %v4916_v50  ;;  %v4920_v54 = vadd.f32 %v4918_v38, %v4916_v50 }
 0xfdd   :  { %v4923_v32 = vcombine.low %v4919_v9, %v4920_v54 }
 0xfdf   :  { %v4930_v40 = vrot.slane %v4923_v32, %v9941_v18 }
 0xfe1   :  { %v4931_v45 = vcombine.high %v4930_v40, %v4930_v40  ;;  %v4938_v33 = vrot.slane %v4930_v40, %v9941_v18 }
 0xfe3   :  { %v4945_v17 = vrot.slane %v4931_v45, %v9941_v18  ;;  %4949 = vst.msk [vmem:[#allocation16 + $0x7] ss:$8 sm:$0x3] %vm9945_vm5, %v4938_v33 }
 0xfe5   :  { %4952 = vst.msk [vmem:[#allocation16 + $0x17] ss:$8 sm:$0x3] %vm9945_vm5, %v4945_v17 }
 0xfe6   :  { %5334 = shalt.err (!%p5331_p2)
}
 0xfe7   :  { %s5335_s24 = scalar_lea.hbm %s10090_s9, 512 }
 0xfe8   :  { %p5336_p3 = scmp.ne.s32.totalorder %s10090_s9, %s5335_s24  ;;  %p5339_p4 = scmp.lt.u32.totalorder %s5335_s24, %s10090_s9 }
 0xfea   :  { %p5341_p5 = pnand %p5339_p4, %p5336_p3 }
 0xfec   :  { %5344 = shalt.err (!%p5341_p5)
}
 0xfed   :  { %s5379_s27 = smov 256  }
 0xfee   :  { %4965 = dma.vmem_to_hbm [thread:$0]  %s4960_s21, 512, %s10090_s9, [#allocation3], %s5379_s27, %s5379_s27, %s5370_s12  }
 0xfef   :  { %5355 = dma.done.wait [#allocation3], 512  }
 0xff0   :  { %5356 = vsyncadd [#allocation3], 4294966784 }
 0xff1   :  { %4969 = vsyncpa [#allocation3], 1 }
 0xff2   :  { %4970 = vsyncpa [#allocation4], 1 }
 0xff3   :  { %4971 = vsyncpa [#allocation6], 1 }
 0xff4   :  { %4972 = vsyncpa [#allocation9], 1 }
 0xff5   :  { %4973 = vsyncpa [#allocation12], 1 }
 0xff6   :  { %4974 = vsyncpa [#allocation15], 1 }

</bundles_post_ra>
